<compile_context>
chip_gen: v7x
topology: tpu7x:2x2x1
jax: 0.10.0
libtpu: 0.0.40
codegen_flags: <defaults>
</compile_context>

<pallas_src>
import functools

import jax
import jax.numpy as jnp
import numpy as np
from jax.experimental import pallas as pl
from jax.experimental.pallas import tpu as pltpu

LANE = 128


def _round_up(x, m):
    return (x + m - 1) // m * m


# -----------------------------------------------------------------------------
# Kernel 1: fused conv stack (all conv blocks in one pallas_call, grid = batch)
# -----------------------------------------------------------------------------
def _conv_stack_kernel(x_ref, w_ref, b_ref, m_ref, o_ref,
                       buf_a, buf_b, acc_ref, *, H, W, n_layers, c_out_true):
    # x_ref : (1, H*W, Cpad)       channel-padded, NHWC-flattened input (f32)
    # w_ref : (L, 9, Cpad, Cpad)   bf16 conv weights, tap index = kh*3 + kw
    # b_ref : (L, 1, Cpad)         f32 biases (zero in padded channels)
    # m_ref : (9, H*W, 1)          f32 per-tap row-validity masks (1.0 / 0.0)
    # o_ref : (1, H*W, c_out_true) last conv layer output, rows in (h, w) order
    # buf_a/b : (H*W, Cpad)        ping-pong activation scratch (f32)
    # acc_ref : (H*W, Cpad)        f32 accumulator
    bufs = (buf_a, buf_b)
    for l in range(n_layers):
        src = x_ref[0] if l == 0 else bufs[(l - 1) % 2][...]   # (H*W, Cpad) f32
        acc_ref[...] = jnp.zeros_like(acc_ref)
        for kh in range(3):
            for kw in range(3):
                dh, dw = kh - 1, kw - 1
                s = dh * W + dw            # flattened-row shift of this tap
                kidx = kh * 3 + kw
                if s == 0:
                    tap = src
                else:
                    # tap[p, :] = src[p + s, :] where (h+dh, w+dw) is in-bounds,
                    # 0 otherwise (roll's wrap-around rows are killed by mask).
                    tap = jnp.roll(src, -s, axis=0) * m_ref[kidx]
                acc_ref[...] += jnp.dot(tap.astype(jnp.bfloat16), w_ref[l, kidx],
                                        preferred_element_type=jnp.float32)
        act = jnp.maximum(acc_ref[...] + b_ref[l], 0.0)        # (H*W, Cpad) f32
        if l < n_layers - 1:
            bufs[l % 2][...] = act
        else:
            o_ref[0] = act[:, :c_out_true]


def conv_stack(x_nchw, conv_w, conv_b, tap_masks, *, c_out_true):
    n, cin, H, W = x_nchw.shape
    L, _, cpad, _ = conv_w.shape
    HW = H * W
    # NCHW -> (n, H*W, C) NHWC-flattened, pad channels once (tiny input).
    xh = jnp.transpose(x_nchw, (0, 2, 3, 1)).reshape(n, HW, cin)
    xp = jnp.pad(xh, ((0, 0), (0, 0), (0, cpad - cin)))
    kern = functools.partial(_conv_stack_kernel, H=H, W=W, n_layers=L,
                             c_out_true=c_out_true)
    return pl.pallas_call(
        kern,
        grid=(n,),
        out_shape=jax.ShapeDtypeStruct((n, HW, c_out_true), jnp.float32),
        in_specs=[
            pl.BlockSpec((1, HW, cpad), lambda i: (i, 0, 0)),
            pl.BlockSpec((L, 9, cpad, cpad), lambda i: (0, 0, 0, 0)),  # resident
            pl.BlockSpec((L, 1, cpad), lambda i: (0, 0, 0)),           # resident
            pl.BlockSpec((9, HW, 1), lambda i: (0, 0, 0)),             # resident
        ],
        out_specs=pl.BlockSpec((1, HW, c_out_true), lambda i: (i, 0, 0)),
        scratch_shapes=[
            pltpu.VMEM((HW, cpad), jnp.float32),
            pltpu.VMEM((HW, cpad), jnp.float32),
            pltpu.VMEM((HW, cpad), jnp.float32),
        ],
        compiler_params=pltpu.CompilerParams(dimension_semantics=("parallel",)),
    )(xp, conv_w, conv_b, tap_masks)


# -----------------------------------------------------------------------------
# Kernel 2: fused linear stack + fc + SMoE activations (one pallas_call)
# -----------------------------------------------------------------------------
def _mlp_kernel(*refs, n_hidden, sigmoid_dims):
    x_ref, out_ref = refs[0], refs[-1]
    wb = refs[1:-1]                       # w0, b0, w1, b1, ..., w_fc, b_fc
    h = x_ref[...]                        # (M, K0) f32, stays on-chip throughout
    for l in range(n_hidden):
        w = wb[2 * l][...]                # bf16, lane-dense (padded to 128)
        b = wb[2 * l + 1][...]            # (1, Dpad) f32
        y = jnp.dot(h.astype(jnp.bfloat16), w,
                    preferred_element_type=jnp.float32) + b
        h = jnp.maximum(y, 0.0)
    y = jnp.dot(h.astype(jnp.bfloat16), wb[-2][...],
                preferred_element_type=jnp.float32) + wb[-1][...]
    # SMoE: sigmoid on the first 3K columns (centers + nus), identity on the rest.
    col = jax.lax.broadcasted_iota(jnp.int32, y.shape, 1)
    y = jnp.where(col < sigmoid_dims, jax.nn.sigmoid(y), y)
    out_ref[...] = y.astype(out_ref.dtype)


def mlp_stack(feat, mlp_params, *, n_hidden, sigmoid_dims, out_width):
    m = feat.shape[0]
    kern = functools.partial(_mlp_kernel, n_hidden=n_hidden,
                             sigmoid_dims=sigmoid_dims)
    return pl.pallas_call(
        kern,
        out_shape=jax.ShapeDtypeStruct((m, out_width), jnp.float32),
        in_specs=[pl.BlockSpec(memory_space=pltpu.MemorySpace.VMEM)]
                 * (1 + len(mlp_params)),
        out_specs=pl.BlockSpec(memory_space=pltpu.MemorySpace.VMEM),
    )(feat, *mlp_params)


# -----------------------------------------------------------------------------
# Full CAE forward
# -----------------------------------------------------------------------------
def cae_forward(x, prep, n_kernels):
    if x.ndim == 3:
        x = x[:, None, :, :]
    n = x.shape[0]
    conv_out = conv_stack(x, prep["conv_w"], prep["conv_b"], prep["tap_masks"],
                          c_out_true=prep["c_last"])      # (n, H*W, C_last)
    feat = conv_out.reshape(n, -1)       # (h, w, c) ordering; free reshape
    y = mlp_stack(feat, prep["mlp"], n_hidden=prep["n_hidden"],
                  sigmoid_dims=3 * n_kernels, out_width=prep["lat_pad"])
    k = n_kernels
    return y[:, :2 * k], y[:, 2 * k:3 * k], y[:, 3 * k:7 * k]


# -----------------------------------------------------------------------------
# Parameters: torch-equivalent "raw" params + a zero-cost prep step that packs,
# pads (lane-dense), permutes the first linear weight and casts weights to bf16.
# -----------------------------------------------------------------------------
def init_raw_params(key, in_channels, hidden_dims_conv, hidden_dims_lin,
                    block_size, n_kernels):
    # Layouts:  conv w (3,3,cin,cout)  == torch (cout,cin,3,3).transpose(2,3,1,0)
    #           lin  w (din,dout)      == torch (dout,din).T
    raw = {"conv": [], "lin": []}
    c = in_channels
    for hdim in hidden_dims_conv:
        key, kw, kb = jax.random.split(key, 3)
        w = jax.random.normal(kw, (3, 3, c, hdim), jnp.float32) / jnp.sqrt(9.0 * c)
        b = jax.random.normal(kb, (hdim,), jnp.float32) * 0.01
        raw["conv"].append((w, b))
        c = hdim
    d = c * block_size ** 2
    for hdim in hidden_dims_lin:
        key, kw, kb = jax.random.split(key, 3)
        w = jax.random.normal(kw, (d, hdim), jnp.float32) / jnp.sqrt(float(d))
        b = jax.random.normal(kb, (hdim,), jnp.float32) * 0.01
        raw["lin"].append((w, b))
        d = hdim
    key, kw, kb = jax.random.split(key, 3)
    latent = 7 * n_kernels
    w = jax.random.normal(kw, (d, latent), jnp.float32) / jnp.sqrt(float(d))
    b = jax.random.normal(kb, (latent,), jnp.float32) * 0.01
    raw["fc"] = (w, b)
    return raw


def prepare_params(raw, in_channels, block_size, n_kernels):
    H = W = block_size
    conv_dims = [in_channels] + [w.shape[-1] for (w, _) in raw["conv"]]
    cpad = _round_up(max(conv_dims), LANE)

    ws, bs = [], []
    for (w, b) in raw["conv"]:
        cin, cout = w.shape[2], w.shape[3]
        ws.append(jnp.pad(w.reshape(9, cin, cout),
                          ((0, 0), (0, cpad - cin), (0, cpad - cout))))
        bs.append(jnp.pad(b, (0, cpad - cout))[None, :])
    conv_w = jnp.stack(ws).astype(jnp.bfloat16)          # (L, 9, cpad, cpad)
    conv_b = jnp.stack(bs)                               # (L, 1, cpad) f32

    c_last = conv_dims[-1]
    mlp = []
    din_true = c_last * H * W
    din_pad = din_true
    for i, (w, b) in enumerate(raw["lin"]):
        dout_true = w.shape[1]
        dout_pad = _round_up(dout_true, LANE)
        if i == 0:
            # Fold torch's NCHW-Flatten ordering into the weight rows:
            # (c,h,w) -> (h,w,c), so the NHWC conv output is consumed directly.
            w = (w.reshape(c_last, H, W, dout_true)
                  .transpose(1, 2, 0, 3).reshape(din_true, dout_true))
        wp = jnp.pad(w, ((0, din_pad - w.shape[0]), (0, dout_pad - dout_true)))
        bp = jnp.pad(b, (0, dout_pad - dout_true))[None, :]
        mlp += [wp.astype(jnp.bfloat16), bp]
        din_true, din_pad = dout_true, dout_pad

    wfc, bfc = raw["fc"]
    latent = 7 * n_kernels
    lat_pad = _round_up(latent, LANE)
    wp = jnp.pad(wfc, ((0, din_pad - din_true), (0, lat_pad - latent)))
    bp = jnp.pad(bfc, (0, lat_pad - latent))[None, :]
    mlp += [wp.astype(jnp.bfloat16), bp]

    # Precomputed per-tap row-validity masks for the fused conv kernel.
    hh, ww = np.meshgrid(np.arange(H), np.arange(W), indexing="ij")
    masks = np.zeros((9, H * W, 1), np.float32)
    for kh in range(3):
        for kw in range(3):
            dh, dw = kh - 1, kw - 1
            ok = ((hh + dh >= 0) & (hh + dh < H) &
                  (ww + dw >= 0) & (ww + dw < W))
            masks[kh * 3 + kw, :, 0] = ok.reshape(-1).astype(np.float32)

    return dict(conv_w=conv_w, conv_b=conv_b, tap_masks=jnp.asarray(masks),
                mlp=tuple(mlp), c_last=c_last, lat_pad=lat_pad,
                n_hidden=len(raw["lin"]))


# -----------------------------------------------------------------------------
# Pure-JAX reference (matches the kernel's bf16-operand / f32-accumulate precision)
# -----------------------------------------------------------------------------
def cae_reference(x, raw, n_kernels):
    if x.ndim == 3:
        x = x[:, None, :, :]
    h = jnp.transpose(x, (0, 2, 3, 1)).astype(jnp.float32)      # NHWC
    for (w, b) in raw["conv"]:
        H, W = h.shape[1], h.shape[2]
        hp = jnp.pad(h, ((0, 0), (1, 1), (1, 1), (0, 0)))
        acc = jnp.zeros(h.shape[:3] + (w.shape[-1],), jnp.float32)
        for kh in range(3):
            for kw in range(3):
                acc = acc + jnp.einsum(
                    "nhwc,cd->nhwd",
                    hp[:, kh:kh + H, kw:kw + W, :].astype(jnp.bfloat16),
                    w[kh, kw].astype(jnp.bfloat16),
                    preferred_element_type=jnp.float32)
        h = jnp.maximum(acc + b, 0.0)
    n = h.shape[0]
    h = jnp.transpose(h, (0, 3, 1, 2)).reshape(n, -1)           # torch Flatten (NCHW)
    for (w, b) in raw["lin"]:
        h = jnp.maximum(
            jnp.dot(h.astype(jnp.bfloat16), w.astype(jnp.bfloat16),
                    preferred_element_type=jnp.float32) + b, 0.0)
    w, b = raw["fc"]
    y = jnp.dot(h.astype(jnp.bfloat16), w.astype(jnp.bfloat16),
                preferred_element_type=jnp.float32) + b
    k = n_kernels
    return jax.nn.sigmoid(y[:, :2 * k]), jax.nn.sigmoid(y[:, 2 * k:3 * k]), y[:, 3 * k:]


if __name__ == "__main__":
    in_channels = 1
    n_kernels = 4               # latent_dim = 7 * 4 = 28
    block_size = 16             # spatial 16x16
    hidden_dims_conv = [8, 16]  # small stand-ins for the default conv widths
    hidden_dims_lin = [64, 32]  # small stand-ins for the default linear widths

    key = jax.random.PRNGKey(0)
    key, kx = jax.random.split(key)
    x = jax.random.normal(kx, (2, in_channels, block_size, block_size), jnp.float32)

    raw = init_raw_params(key, in_channels, hidden_dims_conv, hidden_dims_lin,
                          block_size, n_kernels)
    prep = prepare_params(raw, in_channels, block_size, n_kernels)

    fwd = jax.jit(lambda inp: cae_forward(inp, prep, n_kernels))
    centers, nus, covs = jax.block_until_ready(fwd(x))

    assert centers.shape == (2, 2 * n_kernels)
    assert nus.shape == (2, n_kernels)
    assert covs.shape == (2, 4 * n_kernels)
    assert bool(jnp.all((centers >= 0) & (centers <= 1)))
    assert bool(jnp.all((nus >= 0) & (nus <= 1)))

    # numerical check against the pure-JAX reference
    rc, rn, rv = cae_reference(x, raw, n_kernels)
    for got, ref in ((centers, rc), (nus, rn), (covs, rv)):
        assert bool(jnp.allclose(got, ref, atol=2e-2, rtol=2e-2)), \
            float(jnp.max(jnp.abs(got - ref)))

    print("KERNEL_OK")
</pallas_src>

<mosaic_0001>
module attributes {stable_mosaic.version = 11 : i64} {
  func.func @_conv_stack_kernel(%arg0: i32, %arg1: memref<1x256x128xf32, #tpu.memory_space<vmem>>, %arg2: memref<2x9x128x128xbf16, #tpu.memory_space<vmem>>, %arg3: memref<2x1x128xf32, #tpu.memory_space<vmem>>, %arg4: memref<9x256x1xf32, #tpu.memory_space<vmem>>, %arg5: memref<1x256x16xf32, #tpu.memory_space<vmem>>, %arg6: memref<256x128xf32, #tpu.memory_space<vmem>>, %arg7: memref<256x128xf32, #tpu.memory_space<vmem>>, %arg8: memref<256x128xf32, #tpu.memory_space<vmem>>) attributes {dimension_semantics = [#tpu.dimension_semantics<parallel>], iteration_bounds = array<i64: 2>, scalar_prefetch = 0 : i64, scratch_operands = 3 : i64, tpu.core_type = #tpu.core_type<tc>, window_params = [{transform_indices = @transform_0, window_bounds = array<i64: 1, 256, 128>}, {pipeline_mode = #tpu.pipeline_mode<synchronous>, transform_indices = @transform_1, window_bounds = array<i64: 2, 9, 128, 128>}, {pipeline_mode = #tpu.pipeline_mode<synchronous>, transform_indices = @transform_2, window_bounds = array<i64: 2, 1, 128>}, {pipeline_mode = #tpu.pipeline_mode<synchronous>, transform_indices = @transform_3, window_bounds = array<i64: 9, 256, 1>}, {transform_indices = @transform_4, window_bounds = array<i64: 1, 256, 16>}]} {
    %c0 = arith.constant 0 : index
    %c0_0 = arith.constant 0 : index
    %c0_1 = arith.constant 0 : index
    %0 = vector.load %arg1[%c0, %c0_0, %c0_1] : memref<1x256x128xf32, #tpu.memory_space<vmem>>, vector<1x256x128xf32>
    %1 = vector.shape_cast %0 : vector<1x256x128xf32> to vector<256x128xf32>
    %cst = arith.constant 0.000000e+00 : f32
    %2 = vector.broadcast %cst : f32 to vector<256x128xf32>
    %c0_2 = arith.constant 0 : index
    %c0_3 = arith.constant 0 : index
    %3 = vector.load %arg8[%c0_2, %c0_3] : memref<256x128xf32, #tpu.memory_space<vmem>>, vector<256x128xf32>
    tpu.vector_store %arg8[%c0_2, %c0_3], %2 {strides = array<i32>} : memref<256x128xf32, #tpu.memory_space<vmem>>, vector<256x128xf32>,
    %4 = vector.extract_strided_slice %1 {offsets = [239, 0], sizes = [17, 128], strides = [1, 1]} : vector<256x128xf32> to vector<17x128xf32>
    %5 = vector.extract_strided_slice %1 {offsets = [0, 0], sizes = [239, 128], strides = [1, 1]} : vector<256x128xf32> to vector<239x128xf32>
    %6 = tpu.concatenate %4, %5 in 0 : vector<17x128xf32>, vector<239x128xf32> -> vector<256x128xf32>
    %c0_4 = arith.constant 0 : index
    %c0_5 = arith.constant 0 : index
    %c0_6 = arith.constant 0 : index
    %7 = vector.load %arg4[%c0_4, %c0_5, %c0_6] : memref<9x256x1xf32, #tpu.memory_space<vmem>>, vector<1x256x1xf32>
    %8 = vector.shape_cast %7 : vector<1x256x1xf32> to vector<256x1xf32>
    %9 = vector.broadcast %8 : vector<256x1xf32> to vector<256x128xf32>
    %10 = arith.mulf %6, %9 : vector<256x128xf32>
    %c0_7 = arith.constant 0 : index
    %c0_8 = arith.constant 0 : index
    %11 = vector.load %arg8[%c0_7, %c0_8] : memref<256x128xf32, #tpu.memory_space<vmem>>, vector<256x128xf32>
    %12 = arith.truncf %10 : vector<256x128xf32> to vector<256x128xbf16>
    %c0_9 = arith.constant 0 : index
    %c0_10 = arith.constant 0 : index
    %c0_11 = arith.constant 0 : index
    %c0_12 = arith.constant 0 : index
    %13 = vector.load %arg2[%c0_9, %c0_10, %c0_11, %c0_12] : memref<2x9x128x128xbf16, #tpu.memory_space<vmem>>, vector<1x1x128x128xbf16>
    %14 = vector.shape_cast %13 : vector<1x1x128x128xbf16> to vector<128x128xbf16>
    %cst_13 = arith.constant dense<0.000000e+00> : vector<256x128xf32>
    %15 = tpu.matmul %12, %14, %cst_13 {dimension_numbers = #tpu.dot_dimension_numbers<[1], [0], [0], [1], [0, 0, 1, 1], [], []>} : vector<256x128xbf16>, vector<128x128xbf16>, vector<256x128xf32> -> vector<256x128xf32>
    %16 = arith.addf %11, %15 : vector<256x128xf32>
    %c0_14 = arith.constant 0 : index
    %c0_15 = arith.constant 0 : index
    %17 = vector.load %arg8[%c0_14, %c0_15] : memref<256x128xf32, #tpu.memory_space<vmem>>, vector<256x128xf32>
    tpu.vector_store %arg8[%c0_14, %c0_15], %16 {strides = array<i32>} : memref<256x128xf32, #tpu.memory_space<vmem>>, vector<256x128xf32>,
    %18 = vector.extract_strided_slice %1 {offsets = [240, 0], sizes = [16, 128], strides = [1, 1]} : vector<256x128xf32> to vector<16x128xf32>
    %19 = vector.extract_strided_slice %1 {offsets = [0, 0], sizes = [240, 128], strides = [1, 1]} : vector<256x128xf32> to vector<240x128xf32>
    %20 = tpu.concatenate %18, %19 in 0 : vector<16x128xf32>, vector<240x128xf32> -> vector<256x128xf32>
    %c1 = arith.constant 1 : index
    %c0_16 = arith.constant 0 : index
    %c0_17 = arith.constant 0 : index
    %21 = vector.load %arg4[%c1, %c0_16, %c0_17] : memref<9x256x1xf32, #tpu.memory_space<vmem>>, vector<1x256x1xf32>
    %22 = vector.shape_cast %21 : vector<1x256x1xf32> to vector<256x1xf32>
    %23 = vector.broadcast %22 : vector<256x1xf32> to vector<256x128xf32>
    %24 = arith.mulf %20, %23 : vector<256x128xf32>
    %c0_18 = arith.constant 0 : index
    %c0_19 = arith.constant 0 : index
    %25 = vector.load %arg8[%c0_18, %c0_19] : memref<256x128xf32, #tpu.memory_space<vmem>>, vector<256x128xf32>
    %26 = arith.truncf %24 : vector<256x128xf32> to vector<256x128xbf16>
    %c0_20 = arith.constant 0 : index
    %c1_21 = arith.constant 1 : index
    %c0_22 = arith.constant 0 : index
    %c0_23 = arith.constant 0 : index
    %27 = vector.load %arg2[%c0_20, %c1_21, %c0_22, %c0_23] : memref<2x9x128x128xbf16, #tpu.memory_space<vmem>>, vector<1x1x128x128xbf16>
    %28 = vector.shape_cast %27 : vector<1x1x128x128xbf16> to vector<128x128xbf16>
    %cst_24 = arith.constant dense<0.000000e+00> : vector<256x128xf32>
    %29 = tpu.matmul %26, %28, %cst_24 {dimension_numbers = #tpu.dot_dimension_numbers<[1], [0], [0], [1], [0, 0, 1, 1], [], []>} : vector<256x128xbf16>, vector<128x128xbf16>, vector<256x128xf32> -> vector<256x128xf32>
    %30 = arith.addf %25, %29 : vector<256x128xf32>
    %c0_25 = arith.constant 0 : index
    %c0_26 = arith.constant 0 : index
    %31 = vector.load %arg8[%c0_25, %c0_26] : memref<256x128xf32, #tpu.memory_space<vmem>>, vector<256x128xf32>
    tpu.vector_store %arg8[%c0_25, %c0_26], %30 {strides = array<i32>} : memref<256x128xf32, #tpu.memory_space<vmem>>, vector<256x128xf32>,
    %32 = vector.extract_strided_slice %1 {offsets = [241, 0], sizes = [15, 128], strides = [1, 1]} : vector<256x128xf32> to vector<15x128xf32>
    %33 = vector.extract_strided_slice %1 {offsets = [0, 0], sizes = [241, 128], strides = [1, 1]} : vector<256x128xf32> to vector<241x128xf32>
    %34 = tpu.concatenate %32, %33 in 0 : vector<15x128xf32>, vector<241x128xf32> -> vector<256x128xf32>
    %c2 = arith.constant 2 : index
    %c0_27 = arith.constant 0 : index
    %c0_28 = arith.constant 0 : index
    %35 = vector.load %arg4[%c2, %c0_27, %c0_28] : memref<9x256x1xf32, #tpu.memory_space<vmem>>, vector<1x256x1xf32>
    %36 = vector.shape_cast %35 : vector<1x256x1xf32> to vector<256x1xf32>
    %37 = vector.broadcast %36 : vector<256x1xf32> to vector<256x128xf32>
    %38 = arith.mulf %34, %37 : vector<256x128xf32>
    %c0_29 = arith.constant 0 : index
    %c0_30 = arith.constant 0 : index
    %39 = vector.load %arg8[%c0_29, %c0_30] : memref<256x128xf32, #tpu.memory_space<vmem>>, vector<256x128xf32>
    %40 = arith.truncf %38 : vector<256x128xf32> to vector<256x128xbf16>
    %c0_31 = arith.constant 0 : index
    %c2_32 = arith.constant 2 : index
    %c0_33 = arith.constant 0 : index
    %c0_34 = arith.constant 0 : index
    %41 = vector.load %arg2[%c0_31, %c2_32, %c0_33, %c0_34] : memref<2x9x128x128xbf16, #tpu.memory_space<vmem>>, vector<1x1x128x128xbf16>
    %42 = vector.shape_cast %41 : vector<1x1x128x128xbf16> to vector<128x128xbf16>
    %cst_35 = arith.constant dense<0.000000e+00> : vector<256x128xf32>
    %43 = tpu.matmul %40, %42, %cst_35 {dimension_numbers = #tpu.dot_dimension_numbers<[1], [0], [0], [1], [0, 0, 1, 1], [], []>} : vector<256x128xbf16>, vector<128x128xbf16>, vector<256x128xf32> -> vector<256x128xf32>
    %44 = arith.addf %39, %43 : vector<256x128xf32>
    %c0_36 = arith.constant 0 : index
    %c0_37 = arith.constant 0 : index
    %45 = vector.load %arg8[%c0_36, %c0_37] : memref<256x128xf32, #tpu.memory_space<vmem>>, vector<256x128xf32>
    tpu.vector_store %arg8[%c0_36, %c0_37], %44 {strides = array<i32>} : memref<256x128xf32, #tpu.memory_space<vmem>>, vector<256x128xf32>,
    %46 = vector.extract_strided_slice %1 {offsets = [255, 0], sizes = [1, 128], strides = [1, 1]} : vector<256x128xf32> to vector<1x128xf32>
    %47 = vector.extract_strided_slice %1 {offsets = [0, 0], sizes = [255, 128], strides = [1, 1]} : vector<256x128xf32> to vector<255x128xf32>
    %48 = tpu.concatenate %46, %47 in 0 : vector<1x128xf32>, vector<255x128xf32> -> vector<256x128xf32>
    %c3 = arith.constant 3 : index
    %c0_38 = arith.constant 0 : index
    %c0_39 = arith.constant 0 : index
    %49 = vector.load %arg4[%c3, %c0_38, %c0_39] : memref<9x256x1xf32, #tpu.memory_space<vmem>>, vector<1x256x1xf32>
    %50 = vector.shape_cast %49 : vector<1x256x1xf32> to vector<256x1xf32>
    %51 = vector.broadcast %50 : vector<256x1xf32> to vector<256x128xf32>
    %52 = arith.mulf %48, %51 : vector<256x128xf32>
    %c0_40 = arith.constant 0 : index
    %c0_41 = arith.constant 0 : index
    %53 = vector.load %arg8[%c0_40, %c0_41] : memref<256x128xf32, #tpu.memory_space<vmem>>, vector<256x128xf32>
    %54 = arith.truncf %52 : vector<256x128xf32> to vector<256x128xbf16>
    %c0_42 = arith.constant 0 : index
    %c3_43 = arith.constant 3 : index
    %c0_44 = arith.constant 0 : index
    %c0_45 = arith.constant 0 : index
    %55 = vector.load %arg2[%c0_42, %c3_43, %c0_44, %c0_45] : memref<2x9x128x128xbf16, #tpu.memory_space<vmem>>, vector<1x1x128x128xbf16>
    %56 = vector.shape_cast %55 : vector<1x1x128x128xbf16> to vector<128x128xbf16>
    %cst_46 = arith.constant dense<0.000000e+00> : vector<256x128xf32>
    %57 = tpu.matmul %54, %56, %cst_46 {dimension_numbers = #tpu.dot_dimension_numbers<[1], [0], [0], [1], [0, 0, 1, 1], [], []>} : vector<256x128xbf16>, vector<128x128xbf16>, vector<256x128xf32> -> vector<256x128xf32>
    %58 = arith.addf %53, %57 : vector<256x128xf32>
    %c0_47 = arith.constant 0 : index
    %c0_48 = arith.constant 0 : index
    %59 = vector.load %arg8[%c0_47, %c0_48] : memref<256x128xf32, #tpu.memory_space<vmem>>, vector<256x128xf32>
    tpu.vector_store %arg8[%c0_47, %c0_48], %58 {strides = array<i32>} : memref<256x128xf32, #tpu.memory_space<vmem>>, vector<256x128xf32>,
    %c0_49 = arith.constant 0 : index
    %c0_50 = arith.constant 0 : index
    %60 = vector.load %arg8[%c0_49, %c0_50] : memref<256x128xf32, #tpu.memory_space<vmem>>, vector<256x128xf32>
    %61 = arith.truncf %1 : vector<256x128xf32> to vector<256x128xbf16>
    %c0_51 = arith.constant 0 : index
    %c4 = arith.constant 4 : index
    %c0_52 = arith.constant 0 : index
    %c0_53 = arith.constant 0 : index
    %62 = vector.load %arg2[%c0_51, %c4, %c0_52, %c0_53] : memref<2x9x128x128xbf16, #tpu.memory_space<vmem>>, vector<1x1x128x128xbf16>
    %63 = vector.shape_cast %62 : vector<1x1x128x128xbf16> to vector<128x128xbf16>
    %cst_54 = arith.constant dense<0.000000e+00> : vector<256x128xf32>
    %64 = tpu.matmul %61, %63, %cst_54 {dimension_numbers = #tpu.dot_dimension_numbers<[1], [0], [0], [1], [0, 0, 1, 1], [], []>} : vector<256x128xbf16>, vector<128x128xbf16>, vector<256x128xf32> -> vector<256x128xf32>
    %65 = arith.addf %60, %64 : vector<256x128xf32>
    %c0_55 = arith.constant 0 : index
    %c0_56 = arith.constant 0 : index
    %66 = vector.load %arg8[%c0_55, %c0_56] : memref<256x128xf32, #tpu.memory_space<vmem>>, vector<256x128xf32>
    tpu.vector_store %arg8[%c0_55, %c0_56], %65 {strides = array<i32>} : memref<256x128xf32, #tpu.memory_space<vmem>>, vector<256x128xf32>,
    %67 = vector.extract_strided_slice %1 {offsets = [1, 0], sizes = [255, 128], strides = [1, 1]} : vector<256x128xf32> to vector<255x128xf32>
    %68 = vector.extract_strided_slice %1 {offsets = [0, 0], sizes = [1, 128], strides = [1, 1]} : vector<256x128xf32> to vector<1x128xf32>
    %69 = tpu.concatenate %67, %68 in 0 : vector<255x128xf32>, vector<1x128xf32> -> vector<256x128xf32>
    %c5 = arith.constant 5 : index
    %c0_57 = arith.constant 0 : index
    %c0_58 = arith.constant 0 : index
    %70 = vector.load %arg4[%c5, %c0_57, %c0_58] : memref<9x256x1xf32, #tpu.memory_space<vmem>>, vector<1x256x1xf32>
    %71 = vector.shape_cast %70 : vector<1x256x1xf32> to vector<256x1xf32>
    %72 = vector.broadcast %71 : vector<256x1xf32> to vector<256x128xf32>
    %73 = arith.mulf %69, %72 : vector<256x128xf32>
    %c0_59 = arith.constant 0 : index
    %c0_60 = arith.constant 0 : index
    %74 = vector.load %arg8[%c0_59, %c0_60] : memref<256x128xf32, #tpu.memory_space<vmem>>, vector<256x128xf32>
    %75 = arith.truncf %73 : vector<256x128xf32> to vector<256x128xbf16>
    %c0_61 = arith.constant 0 : index
    %c5_62 = arith.constant 5 : index
    %c0_63 = arith.constant 0 : index
    %c0_64 = arith.constant 0 : index
    %76 = vector.load %arg2[%c0_61, %c5_62, %c0_63, %c0_64] : memref<2x9x128x128xbf16, #tpu.memory_space<vmem>>, vector<1x1x128x128xbf16>
    %77 = vector.shape_cast %76 : vector<1x1x128x128xbf16> to vector<128x128xbf16>
    %cst_65 = arith.constant dense<0.000000e+00> : vector<256x128xf32>
    %78 = tpu.matmul %75, %77, %cst_65 {dimension_numbers = #tpu.dot_dimension_numbers<[1], [0], [0], [1], [0, 0, 1, 1], [], []>} : vector<256x128xbf16>, vector<128x128xbf16>, vector<256x128xf32> -> vector<256x128xf32>
    %79 = arith.addf %74, %78 : vector<256x128xf32>
    %c0_66 = arith.constant 0 : index
    %c0_67 = arith.constant 0 : index
    %80 = vector.load %arg8[%c0_66, %c0_67] : memref<256x128xf32, #tpu.memory_space<vmem>>, vector<256x128xf32>
    tpu.vector_store %arg8[%c0_66, %c0_67], %79 {strides = array<i32>} : memref<256x128xf32, #tpu.memory_space<vmem>>, vector<256x128xf32>,
    %81 = vector.extract_strided_slice %1 {offsets = [15, 0], sizes = [241, 128], strides = [1, 1]} : vector<256x128xf32> to vector<241x128xf32>
    %82 = vector.extract_strided_slice %1 {offsets = [0, 0], sizes = [15, 128], strides = [1, 1]} : vector<256x128xf32> to vector<15x128xf32>
    %83 = tpu.concatenate %81, %82 in 0 : vector<241x128xf32>, vector<15x128xf32> -> vector<256x128xf32>
    %c6 = arith.constant 6 : index
    %c0_68 = arith.constant 0 : index
    %c0_69 = arith.constant 0 : index
    %84 = vector.load %arg4[%c6, %c0_68, %c0_69] : memref<9x256x1xf32, #tpu.memory_space<vmem>>, vector<1x256x1xf32>
    %85 = vector.shape_cast %84 : vector<1x256x1xf32> to vector<256x1xf32>
    %86 = vector.broadcast %85 : vector<256x1xf32> to vector<256x128xf32>
    %87 = arith.mulf %83, %86 : vector<256x128xf32>
    %c0_70 = arith.constant 0 : index
    %c0_71 = arith.constant 0 : index
    %88 = vector.load %arg8[%c0_70, %c0_71] : memref<256x128xf32, #tpu.memory_space<vmem>>, vector<256x128xf32>
    %89 = arith.truncf %87 : vector<256x128xf32> to vector<256x128xbf16>
    %c0_72 = arith.constant 0 : index
    %c6_73 = arith.constant 6 : index
    %c0_74 = arith.constant 0 : index
    %c0_75 = arith.constant 0 : index
    %90 = vector.load %arg2[%c0_72, %c6_73, %c0_74, %c0_75] : memref<2x9x128x128xbf16, #tpu.memory_space<vmem>>, vector<1x1x128x128xbf16>
    %91 = vector.shape_cast %90 : vector<1x1x128x128xbf16> to vector<128x128xbf16>
    %cst_76 = arith.constant dense<0.000000e+00> : vector<256x128xf32>
    %92 = tpu.matmul %89, %91, %cst_76 {dimension_numbers = #tpu.dot_dimension_numbers<[1], [0], [0], [1], [0, 0, 1, 1], [], []>} : vector<256x128xbf16>, vector<128x128xbf16>, vector<256x128xf32> -> vector<256x128xf32>
    %93 = arith.addf %88, %92 : vector<256x128xf32>
    %c0_77 = arith.constant 0 : index
    %c0_78 = arith.constant 0 : index
    %94 = vector.load %arg8[%c0_77, %c0_78] : memref<256x128xf32, #tpu.memory_space<vmem>>, vector<256x128xf32>
    tpu.vector_store %arg8[%c0_77, %c0_78], %93 {strides = array<i32>} : memref<256x128xf32, #tpu.memory_space<vmem>>, vector<256x128xf32>,
    %95 = vector.extract_strided_slice %1 {offsets = [16, 0], sizes = [240, 128], strides = [1, 1]} : vector<256x128xf32> to vector<240x128xf32>
    %96 = vector.extract_strided_slice %1 {offsets = [0, 0], sizes = [16, 128], strides = [1, 1]} : vector<256x128xf32> to vector<16x128xf32>
    %97 = tpu.concatenate %95, %96 in 0 : vector<240x128xf32>, vector<16x128xf32> -> vector<256x128xf32>
    %c7 = arith.constant 7 : index
    %c0_79 = arith.constant 0 : index
    %c0_80 = arith.constant 0 : index
    %98 = vector.load %arg4[%c7, %c0_79, %c0_80] : memref<9x256x1xf32, #tpu.memory_space<vmem>>, vector<1x256x1xf32>
    %99 = vector.shape_cast %98 : vector<1x256x1xf32> to vector<256x1xf32>
    %100 = vector.broadcast %99 : vector<256x1xf32> to vector<256x128xf32>
    %101 = arith.mulf %97, %100 : vector<256x128xf32>
    %c0_81 = arith.constant 0 : index
    %c0_82 = arith.constant 0 : index
    %102 = vector.load %arg8[%c0_81, %c0_82] : memref<256x128xf32, #tpu.memory_space<vmem>>, vector<256x128xf32>
    %103 = arith.truncf %101 : vector<256x128xf32> to vector<256x128xbf16>
    %c0_83 = arith.constant 0 : index
    %c7_84 = arith.constant 7 : index
    %c0_85 = arith.constant 0 : index
    %c0_86 = arith.constant 0 : index
    %104 = vector.load %arg2[%c0_83, %c7_84, %c0_85, %c0_86] : memref<2x9x128x128xbf16, #tpu.memory_space<vmem>>, vector<1x1x128x128xbf16>
    %105 = vector.shape_cast %104 : vector<1x1x128x128xbf16> to vector<128x128xbf16>
    %cst_87 = arith.constant dense<0.000000e+00> : vector<256x128xf32>
    %106 = tpu.matmul %103, %105, %cst_87 {dimension_numbers = #tpu.dot_dimension_numbers<[1], [0], [0], [1], [0, 0, 1, 1], [], []>} : vector<256x128xbf16>, vector<128x128xbf16>, vector<256x128xf32> -> vector<256x128xf32>
    %107 = arith.addf %102, %106 : vector<256x128xf32>
    %c0_88 = arith.constant 0 : index
    %c0_89 = arith.constant 0 : index
    %108 = vector.load %arg8[%c0_88, %c0_89] : memref<256x128xf32, #tpu.memory_space<vmem>>, vector<256x128xf32>
    tpu.vector_store %arg8[%c0_88, %c0_89], %107 {strides = array<i32>} : memref<256x128xf32, #tpu.memory_space<vmem>>, vector<256x128xf32>,
    %109 = vector.extract_strided_slice %1 {offsets = [17, 0], sizes = [239, 128], strides = [1, 1]} : vector<256x128xf32> to vector<239x128xf32>
    %110 = vector.extract_strided_slice %1 {offsets = [0, 0], sizes = [17, 128], strides = [1, 1]} : vector<256x128xf32> to vector<17x128xf32>
    %111 = tpu.concatenate %109, %110 in 0 : vector<239x128xf32>, vector<17x128xf32> -> vector<256x128xf32>
    %c8 = arith.constant 8 : index
    %c0_90 = arith.constant 0 : index
    %c0_91 = arith.constant 0 : index
    %112 = vector.load %arg4[%c8, %c0_90, %c0_91] : memref<9x256x1xf32, #tpu.memory_space<vmem>>, vector<1x256x1xf32>
    %113 = vector.shape_cast %112 : vector<1x256x1xf32> to vector<256x1xf32>
    %114 = vector.broadcast %113 : vector<256x1xf32> to vector<256x128xf32>
    %115 = arith.mulf %111, %114 : vector<256x128xf32>
    %c0_92 = arith.constant 0 : index
    %c0_93 = arith.constant 0 : index
    %116 = vector.load %arg8[%c0_92, %c0_93] : memref<256x128xf32, #tpu.memory_space<vmem>>, vector<256x128xf32>
    %117 = arith.truncf %115 : vector<256x128xf32> to vector<256x128xbf16>
    %c0_94 = arith.constant 0 : index
    %c8_95 = arith.constant 8 : index
    %c0_96 = arith.constant 0 : index
    %c0_97 = arith.constant 0 : index
    %118 = vector.load %arg2[%c0_94, %c8_95, %c0_96, %c0_97] : memref<2x9x128x128xbf16, #tpu.memory_space<vmem>>, vector<1x1x128x128xbf16>
    %119 = vector.shape_cast %118 : vector<1x1x128x128xbf16> to vector<128x128xbf16>
    %cst_98 = arith.constant dense<0.000000e+00> : vector<256x128xf32>
    %120 = tpu.matmul %117, %119, %cst_98 {dimension_numbers = #tpu.dot_dimension_numbers<[1], [0], [0], [1], [0, 0, 1, 1], [], []>} : vector<256x128xbf16>, vector<128x128xbf16>, vector<256x128xf32> -> vector<256x128xf32>
    %121 = arith.addf %116, %120 : vector<256x128xf32>
    %c0_99 = arith.constant 0 : index
    %c0_100 = arith.constant 0 : index
    %122 = vector.load %arg8[%c0_99, %c0_100] : memref<256x128xf32, #tpu.memory_space<vmem>>, vector<256x128xf32>
    tpu.vector_store %arg8[%c0_99, %c0_100], %121 {strides = array<i32>} : memref<256x128xf32, #tpu.memory_space<vmem>>, vector<256x128xf32>,
    %c0_101 = arith.constant 0 : index
    %c0_102 = arith.constant 0 : index
    %123 = vector.load %arg8[%c0_101, %c0_102] : memref<256x128xf32, #tpu.memory_space<vmem>>, vector<256x128xf32>
    %c0_103 = arith.constant 0 : index
    %c0_104 = arith.constant 0 : index
    %c0_105 = arith.constant 0 : index
    %124 = vector.load %arg3[%c0_103, %c0_104, %c0_105] : memref<2x1x128xf32, #tpu.memory_space<vmem>>, vector<1x1x128xf32>
    %125 = vector.shape_cast %124 : vector<1x1x128xf32> to vector<1x128xf32>
    %126 = vector.broadcast %125 : vector<1x128xf32> to vector<256x128xf32>
    %127 = arith.addf %123, %126 : vector<256x128xf32>
    %cst_106 = arith.constant 0.000000e+00 : f32
    %128 = vector.broadcast %cst_106 : f32 to vector<256x128xf32>
    %129 = arith.maximumf %127, %128 : vector<256x128xf32>
    %c0_107 = arith.constant 0 : index
    %c0_108 = arith.constant 0 : index
    %130 = vector.load %arg6[%c0_107, %c0_108] : memref<256x128xf32, #tpu.memory_space<vmem>>, vector<256x128xf32>
    tpu.vector_store %arg6[%c0_107, %c0_108], %129 {strides = array<i32>} : memref<256x128xf32, #tpu.memory_space<vmem>>, vector<256x128xf32>,
    %c0_109 = arith.constant 0 : index
    %c0_110 = arith.constant 0 : index
    %131 = vector.load %arg6[%c0_109, %c0_110] : memref<256x128xf32, #tpu.memory_space<vmem>>, vector<256x128xf32>
    %cst_111 = arith.constant 0.000000e+00 : f32
    %132 = vector.broadcast %cst_111 : f32 to vector<256x128xf32>
    %c0_112 = arith.constant 0 : index
    %c0_113 = arith.constant 0 : index
    %133 = vector.load %arg8[%c0_112, %c0_113] : memref<256x128xf32, #tpu.memory_space<vmem>>, vector<256x128xf32>
    tpu.vector_store %arg8[%c0_112, %c0_113], %132 {strides = array<i32>} : memref<256x128xf32, #tpu.memory_space<vmem>>, vector<256x128xf32>,
    %134 = vector.extract_strided_slice %131 {offsets = [239, 0], sizes = [17, 128], strides = [1, 1]} : vector<256x128xf32> to vector<17x128xf32>
    %135 = vector.extract_strided_slice %131 {offsets = [0, 0], sizes = [239, 128], strides = [1, 1]} : vector<256x128xf32> to vector<239x128xf32>
    %136 = tpu.concatenate %134, %135 in 0 : vector<17x128xf32>, vector<239x128xf32> -> vector<256x128xf32>
    %c0_114 = arith.constant 0 : index
    %c0_115 = arith.constant 0 : index
    %c0_116 = arith.constant 0 : index
    %137 = vector.load %arg4[%c0_114, %c0_115, %c0_116] : memref<9x256x1xf32, #tpu.memory_space<vmem>>, vector<1x256x1xf32>
    %138 = vector.shape_cast %137 : vector<1x256x1xf32> to vector<256x1xf32>
    %139 = vector.broadcast %138 : vector<256x1xf32> to vector<256x128xf32>
    %140 = arith.mulf %136, %139 : vector<256x128xf32>
    %c0_117 = arith.constant 0 : index
    %c0_118 = arith.constant 0 : index
    %141 = vector.load %arg8[%c0_117, %c0_118] : memref<256x128xf32, #tpu.memory_space<vmem>>, vector<256x128xf32>
    %142 = arith.truncf %140 : vector<256x128xf32> to vector<256x128xbf16>
    %c1_119 = arith.constant 1 : index
    %c0_120 = arith.constant 0 : index
    %c0_121 = arith.constant 0 : index
    %c0_122 = arith.constant 0 : index
    %143 = vector.load %arg2[%c1_119, %c0_120, %c0_121, %c0_122] : memref<2x9x128x128xbf16, #tpu.memory_space<vmem>>, vector<1x1x128x128xbf16>
    %144 = vector.shape_cast %143 : vector<1x1x128x128xbf16> to vector<128x128xbf16>
    %cst_123 = arith.constant dense<0.000000e+00> : vector<256x128xf32>
    %145 = tpu.matmul %142, %144, %cst_123 {dimension_numbers = #tpu.dot_dimension_numbers<[1], [0], [0], [1], [0, 0, 1, 1], [], []>} : vector<256x128xbf16>, vector<128x128xbf16>, vector<256x128xf32> -> vector<256x128xf32>
    %146 = arith.addf %141, %145 : vector<256x128xf32>
    %c0_124 = arith.constant 0 : index
    %c0_125 = arith.constant 0 : index
    %147 = vector.load %arg8[%c0_124, %c0_125] : memref<256x128xf32, #tpu.memory_space<vmem>>, vector<256x128xf32>
    tpu.vector_store %arg8[%c0_124, %c0_125], %146 {strides = array<i32>} : memref<256x128xf32, #tpu.memory_space<vmem>>, vector<256x128xf32>,
    %148 = vector.extract_strided_slice %131 {offsets = [240, 0], sizes = [16, 128], strides = [1, 1]} : vector<256x128xf32> to vector<16x128xf32>
    %149 = vector.extract_strided_slice %131 {offsets = [0, 0], sizes = [240, 128], strides = [1, 1]} : vector<256x128xf32> to vector<240x128xf32>
    %150 = tpu.concatenate %148, %149 in 0 : vector<16x128xf32>, vector<240x128xf32> -> vector<256x128xf32>
    %c1_126 = arith.constant 1 : index
    %c0_127 = arith.constant 0 : index
    %c0_128 = arith.constant 0 : index
    %151 = vector.load %arg4[%c1_126, %c0_127, %c0_128] : memref<9x256x1xf32, #tpu.memory_space<vmem>>, vector<1x256x1xf32>
    %152 = vector.shape_cast %151 : vector<1x256x1xf32> to vector<256x1xf32>
    %153 = vector.broadcast %152 : vector<256x1xf32> to vector<256x128xf32>
    %154 = arith.mulf %150, %153 : vector<256x128xf32>
    %c0_129 = arith.constant 0 : index
    %c0_130 = arith.constant 0 : index
    %155 = vector.load %arg8[%c0_129, %c0_130] : memref<256x128xf32, #tpu.memory_space<vmem>>, vector<256x128xf32>
    %156 = arith.truncf %154 : vector<256x128xf32> to vector<256x128xbf16>
    %c1_131 = arith.constant 1 : index
    %c1_132 = arith.constant 1 : index
    %c0_133 = arith.constant 0 : index
    %c0_134 = arith.constant 0 : index
    %157 = vector.load %arg2[%c1_131, %c1_132, %c0_133, %c0_134] : memref<2x9x128x128xbf16, #tpu.memory_space<vmem>>, vector<1x1x128x128xbf16>
    %158 = vector.shape_cast %157 : vector<1x1x128x128xbf16> to vector<128x128xbf16>
    %cst_135 = arith.constant dense<0.000000e+00> : vector<256x128xf32>
    %159 = tpu.matmul %156, %158, %cst_135 {dimension_numbers = #tpu.dot_dimension_numbers<[1], [0], [0], [1], [0, 0, 1, 1], [], []>} : vector<256x128xbf16>, vector<128x128xbf16>, vector<256x128xf32> -> vector<256x128xf32>
    %160 = arith.addf %155, %159 : vector<256x128xf32>
    %c0_136 = arith.constant 0 : index
    %c0_137 = arith.constant 0 : index
    %161 = vector.load %arg8[%c0_136, %c0_137] : memref<256x128xf32, #tpu.memory_space<vmem>>, vector<256x128xf32>
    tpu.vector_store %arg8[%c0_136, %c0_137], %160 {strides = array<i32>} : memref<256x128xf32, #tpu.memory_space<vmem>>, vector<256x128xf32>,
    %162 = vector.extract_strided_slice %131 {offsets = [241, 0], sizes = [15, 128], strides = [1, 1]} : vector<256x128xf32> to vector<15x128xf32>
    %163 = vector.extract_strided_slice %131 {offsets = [0, 0], sizes = [241, 128], strides = [1, 1]} : vector<256x128xf32> to vector<241x128xf32>
    %164 = tpu.concatenate %162, %163 in 0 : vector<15x128xf32>, vector<241x128xf32> -> vector<256x128xf32>
    %c2_138 = arith.constant 2 : index
    %c0_139 = arith.constant 0 : index
    %c0_140 = arith.constant 0 : index
    %165 = vector.load %arg4[%c2_138, %c0_139, %c0_140] : memref<9x256x1xf32, #tpu.memory_space<vmem>>, vector<1x256x1xf32>
    %166 = vector.shape_cast %165 : vector<1x256x1xf32> to vector<256x1xf32>
    %167 = vector.broadcast %166 : vector<256x1xf32> to vector<256x128xf32>
    %168 = arith.mulf %164, %167 : vector<256x128xf32>
    %c0_141 = arith.constant 0 : index
    %c0_142 = arith.constant 0 : index
    %169 = vector.load %arg8[%c0_141, %c0_142] : memref<256x128xf32, #tpu.memory_space<vmem>>, vector<256x128xf32>
    %170 = arith.truncf %168 : vector<256x128xf32> to vector<256x128xbf16>
    %c1_143 = arith.constant 1 : index
    %c2_144 = arith.constant 2 : index
    %c0_145 = arith.constant 0 : index
    %c0_146 = arith.constant 0 : index
    %171 = vector.load %arg2[%c1_143, %c2_144, %c0_145, %c0_146] : memref<2x9x128x128xbf16, #tpu.memory_space<vmem>>, vector<1x1x128x128xbf16>
    %172 = vector.shape_cast %171 : vector<1x1x128x128xbf16> to vector<128x128xbf16>
    %cst_147 = arith.constant dense<0.000000e+00> : vector<256x128xf32>
    %173 = tpu.matmul %170, %172, %cst_147 {dimension_numbers = #tpu.dot_dimension_numbers<[1], [0], [0], [1], [0, 0, 1, 1], [], []>} : vector<256x128xbf16>, vector<128x128xbf16>, vector<256x128xf32> -> vector<256x128xf32>
    %174 = arith.addf %169, %173 : vector<256x128xf32>
    %c0_148 = arith.constant 0 : index
    %c0_149 = arith.constant 0 : index
    %175 = vector.load %arg8[%c0_148, %c0_149] : memref<256x128xf32, #tpu.memory_space<vmem>>, vector<256x128xf32>
    tpu.vector_store %arg8[%c0_148, %c0_149], %174 {strides = array<i32>} : memref<256x128xf32, #tpu.memory_space<vmem>>, vector<256x128xf32>,
    %176 = vector.extract_strided_slice %131 {offsets = [255, 0], sizes = [1, 128], strides = [1, 1]} : vector<256x128xf32> to vector<1x128xf32>
    %177 = vector.extract_strided_slice %131 {offsets = [0, 0], sizes = [255, 128], strides = [1, 1]} : vector<256x128xf32> to vector<255x128xf32>
    %178 = tpu.concatenate %176, %177 in 0 : vector<1x128xf32>, vector<255x128xf32> -> vector<256x128xf32>
    %c3_150 = arith.constant 3 : index
    %c0_151 = arith.constant 0 : index
    %c0_152 = arith.constant 0 : index
    %179 = vector.load %arg4[%c3_150, %c0_151, %c0_152] : memref<9x256x1xf32, #tpu.memory_space<vmem>>, vector<1x256x1xf32>
    %180 = vector.shape_cast %179 : vector<1x256x1xf32> to vector<256x1xf32>
    %181 = vector.broadcast %180 : vector<256x1xf32> to vector<256x128xf32>
    %182 = arith.mulf %178, %181 : vector<256x128xf32>
    %c0_153 = arith.constant 0 : index
    %c0_154 = arith.constant 0 : index
    %183 = vector.load %arg8[%c0_153, %c0_154] : memref<256x128xf32, #tpu.memory_space<vmem>>, vector<256x128xf32>
    %184 = arith.truncf %182 : vector<256x128xf32> to vector<256x128xbf16>
    %c1_155 = arith.constant 1 : index
    %c3_156 = arith.constant 3 : index
    %c0_157 = arith.constant 0 : index
    %c0_158 = arith.constant 0 : index
    %185 = vector.load %arg2[%c1_155, %c3_156, %c0_157, %c0_158] : memref<2x9x128x128xbf16, #tpu.memory_space<vmem>>, vector<1x1x128x128xbf16>
    %186 = vector.shape_cast %185 : vector<1x1x128x128xbf16> to vector<128x128xbf16>
    %cst_159 = arith.constant dense<0.000000e+00> : vector<256x128xf32>
    %187 = tpu.matmul %184, %186, %cst_159 {dimension_numbers = #tpu.dot_dimension_numbers<[1], [0], [0], [1], [0, 0, 1, 1], [], []>} : vector<256x128xbf16>, vector<128x128xbf16>, vector<256x128xf32> -> vector<256x128xf32>
    %188 = arith.addf %183, %187 : vector<256x128xf32>
    %c0_160 = arith.constant 0 : index
    %c0_161 = arith.constant 0 : index
    %189 = vector.load %arg8[%c0_160, %c0_161] : memref<256x128xf32, #tpu.memory_space<vmem>>, vector<256x128xf32>
    tpu.vector_store %arg8[%c0_160, %c0_161], %188 {strides = array<i32>} : memref<256x128xf32, #tpu.memory_space<vmem>>, vector<256x128xf32>,
    %c0_162 = arith.constant 0 : index
    %c0_163 = arith.constant 0 : index
    %190 = vector.load %arg8[%c0_162, %c0_163] : memref<256x128xf32, #tpu.memory_space<vmem>>, vector<256x128xf32>
    %191 = arith.truncf %131 : vector<256x128xf32> to vector<256x128xbf16>
    %c1_164 = arith.constant 1 : index
    %c4_165 = arith.constant 4 : index
    %c0_166 = arith.constant 0 : index
    %c0_167 = arith.constant 0 : index
    %192 = vector.load %arg2[%c1_164, %c4_165, %c0_166, %c0_167] : memref<2x9x128x128xbf16, #tpu.memory_space<vmem>>, vector<1x1x128x128xbf16>
    %193 = vector.shape_cast %192 : vector<1x1x128x128xbf16> to vector<128x128xbf16>
    %cst_168 = arith.constant dense<0.000000e+00> : vector<256x128xf32>
    %194 = tpu.matmul %191, %193, %cst_168 {dimension_numbers = #tpu.dot_dimension_numbers<[1], [0], [0], [1], [0, 0, 1, 1], [], []>} : vector<256x128xbf16>, vector<128x128xbf16>, vector<256x128xf32> -> vector<256x128xf32>
    %195 = arith.addf %190, %194 : vector<256x128xf32>
    %c0_169 = arith.constant 0 : index
    %c0_170 = arith.constant 0 : index
    %196 = vector.load %arg8[%c0_169, %c0_170] : memref<256x128xf32, #tpu.memory_space<vmem>>, vector<256x128xf32>
    tpu.vector_store %arg8[%c0_169, %c0_170], %195 {strides = array<i32>} : memref<256x128xf32, #tpu.memory_space<vmem>>, vector<256x128xf32>,
    %197 = vector.extract_strided_slice %131 {offsets = [1, 0], sizes = [255, 128], strides = [1, 1]} : vector<256x128xf32> to vector<255x128xf32>
    %198 = vector.extract_strided_slice %131 {offsets = [0, 0], sizes = [1, 128], strides = [1, 1]} : vector<256x128xf32> to vector<1x128xf32>
    %199 = tpu.concatenate %197, %198 in 0 : vector<255x128xf32>, vector<1x128xf32> -> vector<256x128xf32>
    %c5_171 = arith.constant 5 : index
    %c0_172 = arith.constant 0 : index
    %c0_173 = arith.constant 0 : index
    %200 = vector.load %arg4[%c5_171, %c0_172, %c0_173] : memref<9x256x1xf32, #tpu.memory_space<vmem>>, vector<1x256x1xf32>
    %201 = vector.shape_cast %200 : vector<1x256x1xf32> to vector<256x1xf32>
    %202 = vector.broadcast %201 : vector<256x1xf32> to vector<256x128xf32>
    %203 = arith.mulf %199, %202 : vector<256x128xf32>
    %c0_174 = arith.constant 0 : index
    %c0_175 = arith.constant 0 : index
    %204 = vector.load %arg8[%c0_174, %c0_175] : memref<256x128xf32, #tpu.memory_space<vmem>>, vector<256x128xf32>
    %205 = arith.truncf %203 : vector<256x128xf32> to vector<256x128xbf16>
    %c1_176 = arith.constant 1 : index
    %c5_177 = arith.constant 5 : index
    %c0_178 = arith.constant 0 : index
    %c0_179 = arith.constant 0 : index
    %206 = vector.load %arg2[%c1_176, %c5_177, %c0_178, %c0_179] : memref<2x9x128x128xbf16, #tpu.memory_space<vmem>>, vector<1x1x128x128xbf16>
    %207 = vector.shape_cast %206 : vector<1x1x128x128xbf16> to vector<128x128xbf16>
    %cst_180 = arith.constant dense<0.000000e+00> : vector<256x128xf32>
    %208 = tpu.matmul %205, %207, %cst_180 {dimension_numbers = #tpu.dot_dimension_numbers<[1], [0], [0], [1], [0, 0, 1, 1], [], []>} : vector<256x128xbf16>, vector<128x128xbf16>, vector<256x128xf32> -> vector<256x128xf32>
    %209 = arith.addf %204, %208 : vector<256x128xf32>
    %c0_181 = arith.constant 0 : index
    %c0_182 = arith.constant 0 : index
    %210 = vector.load %arg8[%c0_181, %c0_182] : memref<256x128xf32, #tpu.memory_space<vmem>>, vector<256x128xf32>
    tpu.vector_store %arg8[%c0_181, %c0_182], %209 {strides = array<i32>} : memref<256x128xf32, #tpu.memory_space<vmem>>, vector<256x128xf32>,
    %211 = vector.extract_strided_slice %131 {offsets = [15, 0], sizes = [241, 128], strides = [1, 1]} : vector<256x128xf32> to vector<241x128xf32>
    %212 = vector.extract_strided_slice %131 {offsets = [0, 0], sizes = [15, 128], strides = [1, 1]} : vector<256x128xf32> to vector<15x128xf32>
    %213 = tpu.concatenate %211, %212 in 0 : vector<241x128xf32>, vector<15x128xf32> -> vector<256x128xf32>
    %c6_183 = arith.constant 6 : index
    %c0_184 = arith.constant 0 : index
    %c0_185 = arith.constant 0 : index
    %214 = vector.load %arg4[%c6_183, %c0_184, %c0_185] : memref<9x256x1xf32, #tpu.memory_space<vmem>>, vector<1x256x1xf32>
    %215 = vector.shape_cast %214 : vector<1x256x1xf32> to vector<256x1xf32>
    %216 = vector.broadcast %215 : vector<256x1xf32> to vector<256x128xf32>
    %217 = arith.mulf %213, %216 : vector<256x128xf32>
    %c0_186 = arith.constant 0 : index
    %c0_187 = arith.constant 0 : index
    %218 = vector.load %arg8[%c0_186, %c0_187] : memref<256x128xf32, #tpu.memory_space<vmem>>, vector<256x128xf32>
    %219 = arith.truncf %217 : vector<256x128xf32> to vector<256x128xbf16>
    %c1_188 = arith.constant 1 : index
    %c6_189 = arith.constant 6 : index
    %c0_190 = arith.constant 0 : index
    %c0_191 = arith.constant 0 : index
    %220 = vector.load %arg2[%c1_188, %c6_189, %c0_190, %c0_191] : memref<2x9x128x128xbf16, #tpu.memory_space<vmem>>, vector<1x1x128x128xbf16>
    %221 = vector.shape_cast %220 : vector<1x1x128x128xbf16> to vector<128x128xbf16>
    %cst_192 = arith.constant dense<0.000000e+00> : vector<256x128xf32>
    %222 = tpu.matmul %219, %221, %cst_192 {dimension_numbers = #tpu.dot_dimension_numbers<[1], [0], [0], [1], [0, 0, 1, 1], [], []>} : vector<256x128xbf16>, vector<128x128xbf16>, vector<256x128xf32> -> vector<256x128xf32>
    %223 = arith.addf %218, %222 : vector<256x128xf32>
    %c0_193 = arith.constant 0 : index
    %c0_194 = arith.constant 0 : index
    %224 = vector.load %arg8[%c0_193, %c0_194] : memref<256x128xf32, #tpu.memory_space<vmem>>, vector<256x128xf32>
    tpu.vector_store %arg8[%c0_193, %c0_194], %223 {strides = array<i32>} : memref<256x128xf32, #tpu.memory_space<vmem>>, vector<256x128xf32>,
    %225 = vector.extract_strided_slice %131 {offsets = [16, 0], sizes = [240, 128], strides = [1, 1]} : vector<256x128xf32> to vector<240x128xf32>
    %226 = vector.extract_strided_slice %131 {offsets = [0, 0], sizes = [16, 128], strides = [1, 1]} : vector<256x128xf32> to vector<16x128xf32>
    %227 = tpu.concatenate %225, %226 in 0 : vector<240x128xf32>, vector<16x128xf32> -> vector<256x128xf32>
    %c7_195 = arith.constant 7 : index
    %c0_196 = arith.constant 0 : index
    %c0_197 = arith.constant 0 : index
    %228 = vector.load %arg4[%c7_195, %c0_196, %c0_197] : memref<9x256x1xf32, #tpu.memory_space<vmem>>, vector<1x256x1xf32>
    %229 = vector.shape_cast %228 : vector<1x256x1xf32> to vector<256x1xf32>
    %230 = vector.broadcast %229 : vector<256x1xf32> to vector<256x128xf32>
    %231 = arith.mulf %227, %230 : vector<256x128xf32>
    %c0_198 = arith.constant 0 : index
    %c0_199 = arith.constant 0 : index
    %232 = vector.load %arg8[%c0_198, %c0_199] : memref<256x128xf32, #tpu.memory_space<vmem>>, vector<256x128xf32>
    %233 = arith.truncf %231 : vector<256x128xf32> to vector<256x128xbf16>
    %c1_200 = arith.constant 1 : index
    %c7_201 = arith.constant 7 : index
    %c0_202 = arith.constant 0 : index
    %c0_203 = arith.constant 0 : index
    %234 = vector.load %arg2[%c1_200, %c7_201, %c0_202, %c0_203] : memref<2x9x128x128xbf16, #tpu.memory_space<vmem>>, vector<1x1x128x128xbf16>
    %235 = vector.shape_cast %234 : vector<1x1x128x128xbf16> to vector<128x128xbf16>
    %cst_204 = arith.constant dense<0.000000e+00> : vector<256x128xf32>
    %236 = tpu.matmul %233, %235, %cst_204 {dimension_numbers = #tpu.dot_dimension_numbers<[1], [0], [0], [1], [0, 0, 1, 1], [], []>} : vector<256x128xbf16>, vector<128x128xbf16>, vector<256x128xf32> -> vector<256x128xf32>
    %237 = arith.addf %232, %236 : vector<256x128xf32>
    %c0_205 = arith.constant 0 : index
    %c0_206 = arith.constant 0 : index
    %238 = vector.load %arg8[%c0_205, %c0_206] : memref<256x128xf32, #tpu.memory_space<vmem>>, vector<256x128xf32>
    tpu.vector_store %arg8[%c0_205, %c0_206], %237 {strides = array<i32>} : memref<256x128xf32, #tpu.memory_space<vmem>>, vector<256x128xf32>,
    %239 = vector.extract_strided_slice %131 {offsets = [17, 0], sizes = [239, 128], strides = [1, 1]} : vector<256x128xf32> to vector<239x128xf32>
    %240 = vector.extract_strided_slice %131 {offsets = [0, 0], sizes = [17, 128], strides = [1, 1]} : vector<256x128xf32> to vector<17x128xf32>
    %241 = tpu.concatenate %239, %240 in 0 : vector<239x128xf32>, vector<17x128xf32> -> vector<256x128xf32>
    %c8_207 = arith.constant 8 : index
    %c0_208 = arith.constant 0 : index
    %c0_209 = arith.constant 0 : index
    %242 = vector.load %arg4[%c8_207, %c0_208, %c0_209] : memref<9x256x1xf32, #tpu.memory_space<vmem>>, vector<1x256x1xf32>
    %243 = vector.shape_cast %242 : vector<1x256x1xf32> to vector<256x1xf32>
    %244 = vector.broadcast %243 : vector<256x1xf32> to vector<256x128xf32>
    %245 = arith.mulf %241, %244 : vector<256x128xf32>
    %c0_210 = arith.constant 0 : index
    %c0_211 = arith.constant 0 : index
    %246 = vector.load %arg8[%c0_210, %c0_211] : memref<256x128xf32, #tpu.memory_space<vmem>>, vector<256x128xf32>
    %247 = arith.truncf %245 : vector<256x128xf32> to vector<256x128xbf16>
    %c1_212 = arith.constant 1 : index
    %c8_213 = arith.constant 8 : index
    %c0_214 = arith.constant 0 : index
    %c0_215 = arith.constant 0 : index
    %248 = vector.load %arg2[%c1_212, %c8_213, %c0_214, %c0_215] : memref<2x9x128x128xbf16, #tpu.memory_space<vmem>>, vector<1x1x128x128xbf16>
    %249 = vector.shape_cast %248 : vector<1x1x128x128xbf16> to vector<128x128xbf16>
    %cst_216 = arith.constant dense<0.000000e+00> : vector<256x128xf32>
    %250 = tpu.matmul %247, %249, %cst_216 {dimension_numbers = #tpu.dot_dimension_numbers<[1], [0], [0], [1], [0, 0, 1, 1], [], []>} : vector<256x128xbf16>, vector<128x128xbf16>, vector<256x128xf32> -> vector<256x128xf32>
    %251 = arith.addf %246, %250 : vector<256x128xf32>
    %c0_217 = arith.constant 0 : index
    %c0_218 = arith.constant 0 : index
    %252 = vector.load %arg8[%c0_217, %c0_218] : memref<256x128xf32, #tpu.memory_space<vmem>>, vector<256x128xf32>
    tpu.vector_store %arg8[%c0_217, %c0_218], %251 {strides = array<i32>} : memref<256x128xf32, #tpu.memory_space<vmem>>, vector<256x128xf32>,
    %c0_219 = arith.constant 0 : index
    %c0_220 = arith.constant 0 : index
    %253 = vector.load %arg8[%c0_219, %c0_220] : memref<256x128xf32, #tpu.memory_space<vmem>>, vector<256x128xf32>
    %c1_221 = arith.constant 1 : index
    %c0_222 = arith.constant 0 : index
    %c0_223 = arith.constant 0 : index
    %254 = vector.load %arg3[%c1_221, %c0_222, %c0_223] : memref<2x1x128xf32, #tpu.memory_space<vmem>>, vector<1x1x128xf32>
    %255 = vector.shape_cast %254 : vector<1x1x128xf32> to vector<1x128xf32>
    %256 = vector.broadcast %255 : vector<1x128xf32> to vector<256x128xf32>
    %257 = arith.addf %253, %256 : vector<256x128xf32>
    %cst_224 = arith.constant 0.000000e+00 : f32
    %258 = vector.broadcast %cst_224 : f32 to vector<256x128xf32>
    %259 = arith.maximumf %257, %258 : vector<256x128xf32>
    %260 = vector.extract_strided_slice %259 {offsets = [0, 0], sizes = [256, 16], strides = [1, 1]} : vector<256x128xf32> to vector<256x16xf32>
    %c0_225 = arith.constant 0 : index
    %c0_226 = arith.constant 0 : index
    %c0_227 = arith.constant 0 : index
    %261 = vector.load %arg5[%c0_225, %c0_226, %c0_227] : memref<1x256x16xf32, #tpu.memory_space<vmem>>, vector<1x256x16xf32>
    %262 = vector.shape_cast %261 : vector<1x256x16xf32> to vector<256x16xf32>
    %263 = vector.shape_cast %260 : vector<256x16xf32> to vector<1x256x16xf32>
    tpu.vector_store %arg5[%c0_225, %c0_226, %c0_227], %263 {strides = array<i32>} : memref<1x256x16xf32, #tpu.memory_space<vmem>>, vector<1x256x16xf32>,
    return
  }
  func.func @transform_0(%arg0: i32) -> (i32, i32, i32) {
    %c0_i32 = arith.constant 0 : i32
    %c0_i32_0 = arith.constant 0 : i32
    %c0_i32_1 = arith.constant 0 : i32
    return %arg0, %c0_i32, %c0_i32_0 : i32, i32, i32
  }
  func.func @transform_1(%arg0: i32) -> (i32, i32, i32, i32) {
    %c0_i32 = arith.constant 0 : i32
    %c0_i32_0 = arith.constant 0 : i32
    %c0_i32_1 = arith.constant 0 : i32
    %c0_i32_2 = arith.constant 0 : i32
    %c0_i32_3 = arith.constant 0 : i32
    return %c0_i32, %c0_i32_0, %c0_i32_1, %c0_i32_2 : i32, i32, i32, i32
  }
  func.func @transform_2(%arg0: i32) -> (i32, i32, i32) {
    %c0_i32 = arith.constant 0 : i32
    %c0_i32_0 = arith.constant 0 : i32
    %c0_i32_1 = arith.constant 0 : i32
    %c0_i32_2 = arith.constant 0 : i32
    return %c0_i32, %c0_i32_0, %c0_i32_1 : i32, i32, i32
  }
  func.func @transform_3(%arg0: i32) -> (i32, i32, i32) {
    %c0_i32 = arith.constant 0 : i32
    %c0_i32_0 = arith.constant 0 : i32
    %c0_i32_1 = arith.constant 0 : i32
    %c0_i32_2 = arith.constant 0 : i32
    return %c0_i32, %c0_i32_0, %c0_i32_1 : i32, i32, i32
  }
  func.func @transform_4(%arg0: i32) -> (i32, i32, i32) {
    %c0_i32 = arith.constant 0 : i32
    %c0_i32_0 = arith.constant 0 : i32
    %c0_i32_1 = arith.constant 0 : i32
    return %arg0, %c0_i32, %c0_i32_0 : i32, i32, i32
  }
}

module attributes {stable_mosaic.version = 11 : i64} {
  func.func @_mlp_kernel(%arg0: memref<2x4096xf32, #tpu.memory_space<vmem>>, %arg1: memref<4096x128xbf16, #tpu.memory_space<vmem>>, %arg2: memref<1x128xf32, #tpu.memory_space<vmem>>, %arg3: memref<128x128xbf16, #tpu.memory_space<vmem>>, %arg4: memref<1x128xf32, #tpu.memory_space<vmem>>, %arg5: memref<128x128xbf16, #tpu.memory_space<vmem>>, %arg6: memref<1x128xf32, #tpu.memory_space<vmem>>, %arg7: memref<2x128xf32, #tpu.memory_space<vmem>>) attributes {dimension_semantics = [], scalar_prefetch = 0 : i64, scratch_operands = 0 : i64, tpu.core_type = #tpu.core_type<tc>} {
    %c0 = arith.constant 0 : index
    %c0_0 = arith.constant 0 : index
    %0 = vector.load %arg0[%c0, %c0_0] : memref<2x4096xf32, #tpu.memory_space<vmem>>, vector<2x4096xf32>
    %c0_1 = arith.constant 0 : index
    %c0_2 = arith.constant 0 : index
    %1 = vector.load %arg1[%c0_1, %c0_2] : memref<4096x128xbf16, #tpu.memory_space<vmem>>, vector<4096x128xbf16>
    %c0_3 = arith.constant 0 : index
    %c0_4 = arith.constant 0 : index
    %2 = vector.load %arg2[%c0_3, %c0_4] : memref<1x128xf32, #tpu.memory_space<vmem>>, vector<1x128xf32>
    %3 = arith.truncf %0 : vector<2x4096xf32> to vector<2x4096xbf16>
    %cst = arith.constant dense<0.000000e+00> : vector<2x128xf32>
    %4 = tpu.matmul %3, %1, %cst {dimension_numbers = #tpu.dot_dimension_numbers<[1], [0], [0], [1], [0, 0, 1, 1], [], []>} : vector<2x4096xbf16>, vector<4096x128xbf16>, vector<2x128xf32> -> vector<2x128xf32>
    %5 = vector.broadcast %2 : vector<1x128xf32> to vector<2x128xf32>
    %6 = arith.addf %4, %5 : vector<2x128xf32>
    %cst_5 = arith.constant 0.000000e+00 : f32
    %7 = vector.broadcast %cst_5 : f32 to vector<2x128xf32>
    %8 = arith.maximumf %6, %7 : vector<2x128xf32>
    %c0_6 = arith.constant 0 : index
    %c0_7 = arith.constant 0 : index
    %9 = vector.load %arg3[%c0_6, %c0_7] : memref<128x128xbf16, #tpu.memory_space<vmem>>, vector<128x128xbf16>
    %c0_8 = arith.constant 0 : index
    %c0_9 = arith.constant 0 : index
    %10 = vector.load %arg4[%c0_8, %c0_9] : memref<1x128xf32, #tpu.memory_space<vmem>>, vector<1x128xf32>
    %11 = arith.truncf %8 : vector<2x128xf32> to vector<2x128xbf16>
    %cst_10 = arith.constant dense<0.000000e+00> : vector<2x128xf32>
    %12 = tpu.matmul %11, %9, %cst_10 {dimension_numbers = #tpu.dot_dimension_numbers<[1], [0], [0], [1], [0, 0, 1, 1], [], []>} : vector<2x128xbf16>, vector<128x128xbf16>, vector<2x128xf32> -> vector<2x128xf32>
    %13 = vector.broadcast %10 : vector<1x128xf32> to vector<2x128xf32>
    %14 = arith.addf %12, %13 : vector<2x128xf32>
    %cst_11 = arith.constant 0.000000e+00 : f32
    %15 = vector.broadcast %cst_11 : f32 to vector<2x128xf32>
    %16 = arith.maximumf %14, %15 : vector<2x128xf32>
    %17 = arith.truncf %16 : vector<2x128xf32> to vector<2x128xbf16>
    %c0_12 = arith.constant 0 : index
    %c0_13 = arith.constant 0 : index
    %18 = vector.load %arg5[%c0_12, %c0_13] : memref<128x128xbf16, #tpu.memory_space<vmem>>, vector<128x128xbf16>
    %cst_14 = arith.constant dense<0.000000e+00> : vector<2x128xf32>
    %19 = tpu.matmul %17, %18, %cst_14 {dimension_numbers = #tpu.dot_dimension_numbers<[1], [0], [0], [1], [0, 0, 1, 1], [], []>} : vector<2x128xbf16>, vector<128x128xbf16>, vector<2x128xf32> -> vector<2x128xf32>
    %c0_15 = arith.constant 0 : index
    %c0_16 = arith.constant 0 : index
    %20 = vector.load %arg6[%c0_15, %c0_16] : memref<1x128xf32, #tpu.memory_space<vmem>>, vector<1x128xf32>
    %21 = vector.broadcast %20 : vector<1x128xf32> to vector<2x128xf32>
    %22 = arith.addf %19, %21 : vector<2x128xf32>
    %23 = tpu.iota {dimensions = array<i32: 1>} : vector<2x128xi32>
    %c12_i32 = arith.constant 12 : i32
    %24 = vector.broadcast %c12_i32 : i32 to vector<2x128xi32>
    %25 = arith.cmpi slt, %23, %24 : vector<2x128xi32>
    %26 = arith.negf %22 : vector<2x128xf32>
    %27 = math.exp %26 : vector<2x128xf32>
    %cst_17 = arith.constant 1.000000e+00 : f32
    %28 = vector.broadcast %cst_17 : f32 to vector<2x128xf32>
    %29 = arith.addf %28, %27 : vector<2x128xf32>
    %30 = arith.divf %28, %29 : vector<2x128xf32>
    %31 = arith.select %25, %30, %22 : vector<2x128xi1>, vector<2x128xf32>
    %c0_18 = arith.constant 0 : index
    %c0_19 = arith.constant 0 : index
    %32 = vector.load %arg7[%c0_18, %c0_19] : memref<2x128xf32, #tpu.memory_space<vmem>>, vector<2x128xf32>
    tpu.vector_store %arg7[%c0_18, %c0_19], %31 {strides = array<i32>} : memref<2x128xf32, #tpu.memory_space<vmem>>, vector<2x128xf32>,
    return
  }
}

</mosaic_0001>

<bundles_post_ra>
// kernel: _lambda_.3
= control target key start
LH: loop header
LB: loop body
LE: loop exit
PB: predicated region body
PF: predicated region fallthrough
CT: control target
= control target key end

     0   :  { %v4152_v22 = vmov 1983009808   ;;  %v560_v24 = vlaneseq  ;;  %vm4154_vm0 = vmmov 0   ;;  %s5085_s1 = inlined_call_operand.vmem [shape: bf16[4096,128], index: 1, kind: input, shape index: {}]   ;;  %s5086_s0 = inlined_call_operand.vmem [shape: f32[2,4096], index: 0, kind: input, shape index: {}]   ;;  %s5087_s2 = inlined_call_operand.vmem [shape: f32[1,128], index: 2, kind: input, shape index: {}]   ;;  %s5088_s3 = inlined_call_operand.vmem [shape: bf16[128,128], index: 3, kind: input, shape index: {}]   ;;  %s5089_s5 = inlined_call_operand.vmem [shape: bf16[128,128], index: 5, kind: input, shape index: {}]   ;;  %s5090_s4 = inlined_call_operand.vmem [shape: f32[1,128], index: 4, kind: input, shape index: {}]   ;;  %s5091_s6 = inlined_call_operand.vmem [shape: f32[1,128], index: 6, kind: input, shape index: {}]   ;;  %s5092_s7 = inlined_call_operand.vmem [shape: f32[2,128], index: 7, kind: output, shape index: {}]  }
   0x1   :  { %v3868_v0 = vld [vmem:[%s5085_s1 + $0x40] sm:$0xff]   ;;  %v3872_v4 = vld [vmem:[%s5085_s1 + $0x48] sm:$0xff]   ;;  %v3876_v8 = vld [vmem:[%s5085_s1 + $0x50] sm:$0xff]   ;;  %v558_v23 = vunpack.c.l.s4 %v4152_v22 }
   0x2   :  { %v3869_v1 = vld [vmem:[%s5085_s1 + $0xc0] sm:$0xff]   ;;  %3455 = vmatprep.subr.bf16.mxu0 %v3868_v0  ;;  %v3873_v5 = vld [vmem:[%s5085_s1 + $0xc8] sm:$0xff]   ;;  %v3877_v9 = vld [vmem:[%s5085_s1 + $0xd0] sm:$0xff]   ;;  %v561_v30 = vshrl.u32 %v560_v24, 7 }
   0x3   :  { %v3870_v2 = vld [vmem:[%s5085_s1] sm:$0xff]   ;;  %3477 = vmatprep.subr.bf16.mxu1 %v3869_v1  ;;  %v3874_v6 = vld [vmem:[%s5085_s1 + $0x8] sm:$0xff]   ;;  %v3878_v10 = vld [vmem:[%s5085_s1 + $0x10] sm:$0xff]   ;;  %v559_v29 = vunpack.c.0.s8 %v558_v23 }
   0x4   :  { %v3871_v3 = vld [vmem:[%s5085_s1 + $0x80] sm:$0xff]   ;;  %3456 = vmatpush3.bf16.msra.mxu0 %v3870_v2  ;;  %v3875_v7 = vld [vmem:[%s5085_s1 + $0x88] sm:$0xff]   ;;  %v3879_v11 = vld [vmem:[%s5085_s1 + $0x90] sm:$0xff]  }
   0x5   :  { %3478 = vmatpush3.bf16.msra.mxu1 %v3871_v3  ;;  %3457 = vmatprep.subr.bf16.mxu0 %v3872_v4  ;;  %v3880_v12 = vld [vmem:[%s5085_s1 + $0x58] sm:$0xff]   ;;  %v3884_v16 = vld [vmem:[%s5085_s1 + $0x60] sm:$0xff]   ;;  %v3888_v20 = vld [vmem:[%s5085_s1 + $0x68] sm:$0xff]   ;;  %v4286_v35 = vsub.s32 %v559_v29, %v561_v30 }
   0x6   :  { %3479 = vmatprep.subr.bf16.mxu1 %v3873_v5  ;;  %v3881_v13 = vld [vmem:[%s5085_s1 + $0xd8] sm:$0xff]   ;;  %v3885_v17 = vld [vmem:[%s5085_s1 + $0xe0] sm:$0xff]   ;;  %v3889_v21 = vld [vmem:[%s5085_s1 + $0xe8] sm:$0xff]  }
   0x7   :  { %v3882_v14 = vld [vmem:[%s5085_s1 + $0x18] sm:$0xff]   ;;  %v3886_v18 = vld [vmem:[%s5085_s1 + $0x20] sm:$0xff]   ;;  %v3890_v25 = vld [vmem:[%s5085_s1 + $0x28] sm:$0xff]  }
   0x8   :  { %3458 = vmatpush3.bf16.msra.mxu0 %v3874_v6  ;;  %v3883_v15 = vld [vmem:[%s5085_s1 + $0x98] sm:$0xff]   ;;  %v3887_v19 = vld [vmem:[%s5085_s1 + $0xa0] sm:$0xff]   ;;  %v3891_v26 = vld [vmem:[%s5085_s1 + $0xa8] sm:$0xff]  }
   0x9   :  { %3480 = vmatpush3.bf16.msra.mxu1 %v3875_v7  ;;  %3459 = vmatprep.subr.bf16.mxu0 %v3876_v8  ;;  %v3892_v27 = vld [vmem:[%s5085_s1 + $0x70] sm:$0xff]   ;;  %v3896_v33 = vld [vmem:[%s5085_s1 + $0x78] sm:$0xff]   ;;  %v27_v38 = vld [vmem:[%s5086_s0] sm:$0xff] }
   0xa   :  { %3481 = vmatprep.subr.bf16.mxu1 %v3877_v9  ;;  %v3893_v28 = vld [vmem:[%s5085_s1 + $0xf0] sm:$0xff]   ;;  %v3897_v34 = vld [vmem:[%s5085_s1 + $0xf8] sm:$0xff]   ;;  %v563_v39 = vrot.slane %v27_v38, %v4286_v35  ;;  %v556_v40 = vcombine.high %v27_v38, %v27_v38  ;;  %v3901_v41 = vld [vmem:[%s5085_s1 + $0x140] sm:$0xff]  }
   0xb   :  { %v3894_v31 = vld [vmem:[%s5085_s1 + $0x30] sm:$0xff]   ;;  %v3898_v36 = vld [vmem:[%s5085_s1 + $0x38] sm:$0xff]   ;;  %v3902_v42 = vld [vmem:[%s5085_s1 + $0x1c0] sm:$0xff]  }
   0xc   :  { %3460 = vmatpush3.bf16.msra.mxu0 %v3878_v10  ;;  %v3895_v32 = vld [vmem:[%s5085_s1 + $0xb0] sm:$0xff]   ;;  %v3899_v37 = vld [vmem:[%s5085_s1 + $0xb8] sm:$0xff]   ;;  %v571_v43 = vcombine.high %v563_v39, %v563_v39  ;;  %v570_v44 = vrot.slane %v556_v40, %v4286_v35  ;;  %v724_v45 = vpack.c.bf16 %v563_v39, %v563_v39  ;;  %v3903_v46 = vld [vmem:[%s5085_s1 + $0x100] sm:$0xff]  }
   0xd   :  { %3482 = vmatpush3.bf16.msra.mxu1 %v3879_v11  ;;  %3461 = vmatprep.subr.bf16.mxu0 %v3880_v12  ;;  %v3904_v49 = vld [vmem:[%s5085_s1 + $0x180] sm:$0xff]   ;;  %v3905_v51 = vld [vmem:[%s5085_s1 + $0x148] sm:$0xff]   ;;  %v3909_v56 = vld [vmem:[%s5085_s1 + $0x150] sm:$0xff]  }
   0xe   :  { %3483 = vmatprep.subr.bf16.mxu1 %v3881_v13  ;;  %v725_v47 = vpack.c.bf16 %v571_v43, %v571_v43  ;;  %v572_v48 = vcombine.high %v570_v44, %v570_v44  ;;  %v726_v50 = vpack.c.bf16 %v570_v44, %v570_v44  ;;  %v3906_v53 = vld [vmem:[%s5085_s1 + $0x1c8] sm:$0xff]   ;;  %v3910_v57 = vld [vmem:[%s5085_s1 + $0x1d0] sm:$0xff]   ;;  %v3913_v60 = vld [vmem:[%s5085_s1 + $0x158] sm:$0xff]  }
   0xf   :  { %v3907_v54 = vld [vmem:[%s5085_s1 + $0x108] sm:$0xff]   ;;  %v3911_v58 = vld [vmem:[%s5085_s1 + $0x110] sm:$0xff]   ;;  %v3914_v61 = vld [vmem:[%s5085_s1 + $0x1d8] sm:$0xff]  }
  0x10   :  { %3462 = vmatpush3.bf16.msra.mxu0 %v3882_v14  ;;  %2330 = vmatprep.mubr.bf16.mxu0 %v725_v47  ;;  %v727_v52 = vpack.c.bf16 %v572_v48, %v572_v48  ;;  %v3908_v55 = vld [vmem:[%s5085_s1 + $0x188] sm:$0xff]   ;;  %v3912_v59 = vld [vmem:[%s5085_s1 + $0x190] sm:$0xff]   ;;  %v3915_v62 = vld [vmem:[%s5085_s1 + $0x118] sm:$0xff]  }
  0x11   :  { %3484 = vmatpush3.bf16.msra.mxu1 %v3883_v15  ;;  %3463 = vmatprep.subr.bf16.mxu0 %v3884_v16  ;;  %v3916_v63 = vld [vmem:[%s5085_s1 + $0x198] sm:$0xff]   ;;  %v3917_v0 = vld [vmem:[%s5085_s1 + $0x160] sm:$0xff]   ;;  %v3921_v4 = vld [vmem:[%s5085_s1 + $0x168] sm:$0xff]  }
  0x12   :  { %3485 = vmatprep.subr.bf16.mxu1 %v3885_v17  ;;  %2370 = vmatprep.mubr.bf16.mxu1 %v727_v52  ;;  %v3918_v1 = vld [vmem:[%s5085_s1 + $0x1e0] sm:$0xff]   ;;  %v3922_v5 = vld [vmem:[%s5085_s1 + $0x1e8] sm:$0xff]   ;;  %v3925_v8 = vld [vmem:[%s5085_s1 + $0x170] sm:$0xff]  }
  0x13   :  { %v3919_v2 = vld [vmem:[%s5085_s1 + $0x120] sm:$0xff]   ;;  %v3923_v6 = vld [vmem:[%s5085_s1 + $0x128] sm:$0xff]   ;;  %v3926_v9 = vld [vmem:[%s5085_s1 + $0x1f0] sm:$0xff]  }
  0x14   :  { %3464 = vmatpush3.bf16.msra.mxu0 %v3886_v18  ;;  %v3920_v3 = vld [vmem:[%s5085_s1 + $0x1a0] sm:$0xff]   ;;  %v3924_v7 = vld [vmem:[%s5085_s1 + $0x1a8] sm:$0xff]   ;;  %v3927_v10 = vld [vmem:[%s5085_s1 + $0x130] sm:$0xff]  }
  0x15   :  { %3486 = vmatpush3.bf16.msra.mxu1 %v3887_v19  ;;  %3465 = vmatprep.subr.bf16.mxu0 %v3888_v20  ;;  %v3928_v11 = vld [vmem:[%s5085_s1 + $0x1b0] sm:$0xff]   ;;  %v3929_v12 = vld [vmem:[%s5085_s1 + $0x178] sm:$0xff]   ;;  %v28_v15 = vld [vmem:[%s5086_s0 + $0x8] sm:$0xff] }
  0x16   :  { %3487 = vmatprep.subr.bf16.mxu1 %v3889_v21  ;;  %v3930_v13 = vld [vmem:[%s5085_s1 + $0x1f8] sm:$0xff]   ;;  %v580_v17 = vrot.slane %v28_v15, %v4286_v35  ;;  %v573_v18 = vcombine.high %v28_v15, %v28_v15  ;;  %v3934_v19 = vld [vmem:[%s5085_s1 + $0x240] sm:$0xff]   ;;  %v3938_v30 = vld [vmem:[%s5085_s1 + $0x248] sm:$0xff]  }
  0x17   :  { %v3931_v14 = vld [vmem:[%s5085_s1 + $0x138] sm:$0xff]   ;;  %v3935_v22 = vld [vmem:[%s5085_s1 + $0x2c0] sm:$0xff]   ;;  %v3944_v38 = vld [vmem:[%s5085_s1 + $0x210] sm:$0xff]  }
  0x18   :  { %3466 = vmatpush3.bf16.msra.mxu0 %v3890_v25  ;;  %v3932_v16 = vld [vmem:[%s5085_s1 + $0x1b8] sm:$0xff]   ;;  %v588_v20 = vcombine.high %v580_v17, %v580_v17  ;;  %v587_v21 = vrot.slane %v573_v18, %v4286_v35  ;;  %v728_v23 = vpack.c.bf16 %v580_v17, %v580_v17  ;;  %v3936_v25 = vld [vmem:[%s5085_s1 + $0x200] sm:$0xff]   ;;  %v3945_v39 = vld [vmem:[%s5085_s1 + $0x290] sm:$0xff]  }
  0x19   :  { %3488 = vmatpush3.bf16.msra.mxu1 %v3891_v26  ;;  %3467 = vmatprep.subr.bf16.mxu0 %v3892_v27  ;;  %v3946_v40 = vld [vmem:[%s5085_s1 + $0x258] sm:$0xff]   ;;  %v3950_v44 = vld [vmem:[%s5085_s1 + $0x260] sm:$0xff]   ;;  %v3954_v48 = vld [vmem:[%s5085_s1 + $0x268] sm:$0xff]  }
  0x1a   :  { %3489 = vmatprep.subr.bf16.mxu1 %v3893_v28  ;;  %v729_v26 = vpack.c.bf16 %v588_v20, %v588_v20  ;;  %v589_v27 = vcombine.high %v587_v21, %v587_v21  ;;  %v3937_v28 = vld [vmem:[%s5085_s1 + $0x280] sm:$0xff]   ;;  %v730_v29 = vpack.c.bf16 %v587_v21, %v587_v21  ;;  %v3949_v43 = vld [vmem:[%s5085_s1 + $0x298] sm:$0xff]   ;;  %v3958_v52 = vld [vmem:[%s5085_s1 + $0x270] sm:$0xff]  }
  0x1b   :  { %v3953_v47 = vld [vmem:[%s5085_s1 + $0x2a0] sm:$0xff]   ;;  %v3976_v15 = vld [vmem:[%s5085_s1 + $0x3d0] sm:$0xff]   ;;  %v3979_v18 = vld [vmem:[%s5085_s1 + $0x358] sm:$0xff]  }
  0x1c   :  { %3468 = vmatpush3.bf16.msra.mxu0 %v3894_v31  ;;  %v731_v31 = vpack.c.bf16 %v589_v27, %v589_v27  ;;  %v3978_v17 = vld [vmem:[%s5085_s1 + $0x390] sm:$0xff]   ;;  %v3981_v20 = vld [vmem:[%s5085_s1 + $0x318] sm:$0xff]   ;;  %v3987_v27 = vld [vmem:[%s5085_s1 + $0x368] sm:$0xff]  }
  0x1d   :  { %3490 = vmatpush3.bf16.msra.mxu1 %v3895_v32  ;;  %3469 = vmatprep.subr.bf16.mxu0 %v3896_v33  ;;  %v3939_v32 = vld [vmem:[%s5085_s1 + $0x2c8] sm:$0xff]   ;;  %v3982_v21 = vld [vmem:[%s5085_s1 + $0x398] sm:$0xff]  }
  0x1e   :  { %3491 = vmatprep.subr.bf16.mxu1 %v3897_v34  ;;  %v3940_v33 = vld [vmem:[%s5085_s1 + $0x208] sm:$0xff]  }
  0x1f   :  { %v3941_v34 = vld [vmem:[%s5085_s1 + $0x288] sm:$0xff]  }
  0x20   :  { %3470 = vmatpush3.bf16.msra.mxu0 %v3898_v36  ;;  %v3942_v36 = vld [vmem:[%s5085_s1 + $0x250] sm:$0xff]  }
  0x21   :  { %3492 = vmatpush3.bf16.msra.mxu1 %v3899_v37  ;;  %3499 = vmatprep.subr.bf16.mxu0 %v3901_v41  ;;  %v3943_v37 = vld [vmem:[%s5085_s1 + $0x2d0] sm:$0xff]   ;;  %v3947_v41 = vld [vmem:[%s5085_s1 + $0x2d8] sm:$0xff]  }
  0x22   :  { %3521 = vmatprep.subr.bf16.mxu1 %v3902_v42  ;;  %v3948_v42 = vld [vmem:[%s5085_s1 + $0x218] sm:$0xff]  }
  0x23   :  { %2331 = vmatmul.mubr.bf16.vlgmr.msra.gmra.mrb[0].mxu0 %v724_v45  ;;  %v3951_v45 = vld [vmem:[%s5085_s1 + $0x2e0] sm:$0xff]  }
  0x24   :  { %3500 = vmatpush3.bf16.msra.mxu0 %v3903_v46  ;;  %2371 = vmatmul.mubr.bf16.vlgmr.msra.gmra.mrb[0].mxu1 %v726_v50  ;;  %v3952_v46 = vld [vmem:[%s5085_s1 + $0x220] sm:$0xff]   ;;  %v3956_v50 = vld [vmem:[%s5085_s1 + $0x228] sm:$0xff]  }
  0x25   :  { %3501 = vmatprep.subr.bf16.mxu0 %v3905_v51  ;;  %3522 = vmatpush3.bf16.msra.mxu1 %v3904_v49  ;;  %v3955_v49 = vld [vmem:[%s5085_s1 + $0x2e8] sm:$0xff]  }
  0x26   :  { %3523 = vmatprep.subr.bf16.mxu1 %v3906_v53  ;;  %2410 = vmatprep.mubr.bf16.mxu0 %v729_v26  ;;  %v3957_v51 = vld [vmem:[%s5085_s1 + $0x2a8] sm:$0xff]   ;;  %v3959_v53 = vld [vmem:[%s5085_s1 + $0x2f0] sm:$0xff]   ;;  %v3986_v26 = vld [vmem:[%s5085_s1 + $0x3a0] sm:$0xff]  }
  0x27   :  { %2450 = vmatprep.mubr.bf16.mxu1 %v731_v31  ;;  %v3991_v31 = vld [vmem:[%s5085_s1 + $0x370] sm:$0xff]  }
  0x28   :  { %3502 = vmatpush3.bf16.msra.mxu0 %v3907_v54  ;;  %v3960_v54 = vld [vmem:[%s5085_s1 + $0x230] sm:$0xff]  }
  0x29   :  { %3503 = vmatprep.subr.bf16.mxu0 %v3909_v56  ;;  %3524 = vmatpush3.bf16.msra.mxu1 %v3908_v55  ;;  %v3961_v55 = vld [vmem:[%s5085_s1 + $0x2b0] sm:$0xff]   ;;  %v3962_v56 = vld [vmem:[%s5085_s1 + $0x278] sm:$0xff]  }
  0x2a   :  { %3525 = vmatprep.subr.bf16.mxu1 %v3910_v57  ;;  %v3963_v57 = vld [vmem:[%s5085_s1 + $0x2f8] sm:$0xff]  }
  0x2c   :  { %3504 = vmatpush3.bf16.msra.mxu0 %v3911_v58  ;;  %v3964_v58 = vld [vmem:[%s5085_s1 + $0x238] sm:$0xff]  }
  0x2d   :  { %3505 = vmatprep.subr.bf16.mxu0 %v3913_v60  ;;  %3526 = vmatpush3.bf16.msra.mxu1 %v3912_v59  ;;  %v29_v59 = vld [vmem:[%s5086_s0 + $0x10] sm:$0xff]  ;;  %v3965_v60 = vld [vmem:[%s5085_s1 + $0x2b8] sm:$0xff]  }
  0x2e   :  { %3527 = vmatprep.subr.bf16.mxu1 %v3914_v61  ;;  %v597_v61 = vrot.slane %v29_v59, %v4286_v35 }
  0x30   :  { %3506 = vmatpush3.bf16.msra.mxu0 %v3915_v62  ;;  %v590_v62 = vcombine.high %v29_v59, %v29_v59  ;;  %v4009_v59 = vld [vmem:[%s5085_s1 + $0x4d0] sm:$0xff]  }
  0x31   :  { %3507 = vmatprep.subr.bf16.mxu0 %v3917_v0  ;;  %3528 = vmatpush3.bf16.msra.mxu1 %v3916_v63  ;;  %v3967_v63 = vld [vmem:[%s5085_s1 + $0x340] sm:$0xff]   ;;  %v605_v0 = vcombine.high %v597_v61, %v597_v61 }
  0x32   :  { %3529 = vmatprep.subr.bf16.mxu1 %v3918_v1  ;;  %v604_v1 = vrot.slane %v590_v62, %v4286_v35  ;;  %v4012_v62 = vld [vmem:[%s5085_s1 + $0x458] sm:$0xff]  }
  0x34   :  { %3508 = vmatpush3.bf16.msra.mxu0 %v3919_v2  ;;  %v3968_v2 = vld [vmem:[%s5085_s1 + $0x3c0] sm:$0xff]  }
  0x35   :  { %3509 = vmatprep.subr.bf16.mxu0 %v3921_v4  ;;  %3530 = vmatpush3.bf16.msra.mxu1 %v3920_v3  ;;  %v732_v3 = vpack.c.bf16 %v597_v61, %v597_v61  ;;  %v3969_v4 = vld [vmem:[%s5085_s1 + $0x300] sm:$0xff]   ;;  %v4011_v61 = vld [vmem:[%s5085_s1 + $0x490] sm:$0xff]  }
  0x36   :  { %3531 = vmatprep.subr.bf16.mxu1 %v3922_v5  ;;  %v733_v5 = vpack.c.bf16 %v605_v0, %v605_v0  ;;  %v4014_v0 = vld [vmem:[%s5085_s1 + $0x418] sm:$0xff]  }
  0x38   :  { %3510 = vmatpush3.bf16.msra.mxu0 %v3923_v6  ;;  %v606_v6 = vcombine.high %v604_v1, %v604_v1 }
  0x39   :  { %3511 = vmatprep.subr.bf16.mxu0 %v3925_v8  ;;  %3532 = vmatpush3.bf16.msra.mxu1 %v3924_v7  ;;  %v3970_v7 = vld [vmem:[%s5085_s1 + $0x380] sm:$0xff]   ;;  %v734_v8 = vpack.c.bf16 %v604_v1, %v604_v1  ;;  %v4015_v1 = vld [vmem:[%s5085_s1 + $0x498] sm:$0xff]  }
  0x3a   :  { %3533 = vmatprep.subr.bf16.mxu1 %v3926_v9  ;;  %v3971_v9 = vld [vmem:[%s5085_s1 + $0x348] sm:$0xff]  }
  0x3c   :  { %3512 = vmatpush3.bf16.msra.mxu0 %v3927_v10  ;;  %v735_v10 = vpack.c.bf16 %v606_v6, %v606_v6  ;;  %v4020_v6 = vld [vmem:[%s5085_s1 + $0x468] sm:$0xff]  }
  0x3d   :  { %3513 = vmatprep.subr.bf16.mxu0 %v3929_v12  ;;  %3534 = vmatpush3.bf16.msra.mxu1 %v3928_v11  ;;  %v3972_v11 = vld [vmem:[%s5085_s1 + $0x3c8] sm:$0xff]  }
  0x3e   :  { %3535 = vmatprep.subr.bf16.mxu1 %v3930_v13  ;;  %v3973_v12 = vld [vmem:[%s5085_s1 + $0x308] sm:$0xff]  }
  0x3f   :  { %v3974_v13 = vld [vmem:[%s5085_s1 + $0x388] sm:$0xff]  }
  0x40   :  { %3514 = vmatpush3.bf16.msra.mxu0 %v3931_v14  ;;  %v3975_v14 = vld [vmem:[%s5085_s1 + $0x350] sm:$0xff]  }
  0x41   :  { %3543 = vmatprep.subr.bf16.mxu0 %v3934_v19  ;;  %3536 = vmatpush3.bf16.msra.mxu1 %v3932_v16  ;;  %v3977_v16 = vld [vmem:[%s5085_s1 + $0x310] sm:$0xff]   ;;  %v3980_v19 = vld [vmem:[%s5085_s1 + $0x3d8] sm:$0xff]  }
  0x42   :  { %3565 = vmatprep.subr.bf16.mxu1 %v3935_v22  ;;  %v3983_v22 = vld [vmem:[%s5085_s1 + $0x360] sm:$0xff]  }
  0x43   :  { %2411 = vmatmul.mubr.bf16.vlgmr.msra.gmra.mrb[4].mxu0 %v728_v23  ;;  %v3984_v23 = vld [vmem:[%s5085_s1 + $0x3e0] sm:$0xff]  }
  0x44   :  { %3544 = vmatpush3.bf16.msra.mxu0 %v3936_v25  ;;  %2451 = vmatmul.mubr.bf16.vlgmr.msra.gmra.mrb[4].mxu1 %v730_v29  ;;  %v3985_v25 = vld [vmem:[%s5085_s1 + $0x320] sm:$0xff]   ;;  %v3989_v29 = vld [vmem:[%s5085_s1 + $0x328] sm:$0xff]  }
  0x45   :  { %3545 = vmatprep.subr.bf16.mxu0 %v3938_v30  ;;  %3566 = vmatpush3.bf16.msra.mxu1 %v3937_v28  ;;  %v3988_v28 = vld [vmem:[%s5085_s1 + $0x3e8] sm:$0xff]  }
  0x46   :  { %3567 = vmatprep.subr.bf16.mxu1 %v3939_v32  ;;  %2490 = vmatprep.mubr.bf16.mxu0 %v733_v5  ;;  %v3990_v30 = vld [vmem:[%s5085_s1 + $0x3a8] sm:$0xff]   ;;  %v3992_v32 = vld [vmem:[%s5085_s1 + $0x3f0] sm:$0xff]   ;;  %v4019_v5 = vld [vmem:[%s5085_s1 + $0x4a0] sm:$0xff]  }
  0x47   :  { %2530 = vmatprep.mubr.bf16.mxu1 %v735_v10  ;;  %v4024_v10 = vld [vmem:[%s5085_s1 + $0x470] sm:$0xff]  }
  0x48   :  { %3546 = vmatpush3.bf16.msra.mxu0 %v3940_v33  ;;  %v3993_v33 = vld [vmem:[%s5085_s1 + $0x330] sm:$0xff]  }
  0x49   :  { %3547 = vmatprep.subr.bf16.mxu0 %v3942_v36  ;;  %3568 = vmatpush3.bf16.msra.mxu1 %v3941_v34  ;;  %v3994_v34 = vld [vmem:[%s5085_s1 + $0x3b0] sm:$0xff]   ;;  %v3995_v36 = vld [vmem:[%s5085_s1 + $0x378] sm:$0xff]  }
  0x4a   :  { %3569 = vmatprep.subr.bf16.mxu1 %v3943_v37  ;;  %v3996_v37 = vld [vmem:[%s5085_s1 + $0x3f8] sm:$0xff]  }
  0x4c   :  { %3548 = vmatpush3.bf16.msra.mxu0 %v3944_v38  ;;  %v3997_v38 = vld [vmem:[%s5085_s1 + $0x338] sm:$0xff]  }
  0x4d   :  { %3549 = vmatprep.subr.bf16.mxu0 %v3946_v40  ;;  %3570 = vmatpush3.bf16.msra.mxu1 %v3945_v39  ;;  %v30_v39 = vld [vmem:[%s5086_s0 + $0x18] sm:$0xff] }
  0x4e   :  { %3571 = vmatprep.subr.bf16.mxu1 %v3947_v41  ;;  %v614_v40 = vrot.slane %v30_v39, %v4286_v35  ;;  %v607_v41 = vcombine.high %v30_v39, %v30_v39  ;;  %v4042_v39 = vld [vmem:[%s5085_s1 + $0x5d0] sm:$0xff]  }
  0x50   :  { %3550 = vmatpush3.bf16.msra.mxu0 %v3948_v42  ;;  %v4000_v42 = vld [vmem:[%s5085_s1 + $0x440] sm:$0xff]  }
  0x51   :  { %3551 = vmatprep.subr.bf16.mxu0 %v3950_v44  ;;  %3572 = vmatpush3.bf16.msra.mxu1 %v3949_v43  ;;  %v3998_v43 = vld [vmem:[%s5085_s1 + $0x3b8] sm:$0xff]   ;;  %v622_v44 = vcombine.high %v614_v40, %v614_v40 }
  0x52   :  { %3573 = vmatprep.subr.bf16.mxu1 %v3951_v45  ;;  %v621_v45 = vrot.slane %v607_v41, %v4286_v35  ;;  %v4044_v41 = vld [vmem:[%s5085_s1 + $0x590] sm:$0xff]  }
  0x54   :  { %3552 = vmatpush3.bf16.msra.mxu0 %v3952_v46  ;;  %v4001_v46 = vld [vmem:[%s5085_s1 + $0x4c0] sm:$0xff]  }
  0x55   :  { %3553 = vmatprep.subr.bf16.mxu0 %v3954_v48  ;;  %3574 = vmatpush3.bf16.msra.mxu1 %v3953_v47  ;;  %v736_v47 = vpack.c.bf16 %v614_v40, %v614_v40  ;;  %v4002_v48 = vld [vmem:[%s5085_s1 + $0x400] sm:$0xff]   ;;  %v4043_v40 = vld [vmem:[%s5085_s1 + $0x510] sm:$0xff]  }
  0x56   :  { %3575 = vmatprep.subr.bf16.mxu1 %v3955_v49  ;;  %v737_v49 = vpack.c.bf16 %v622_v44, %v622_v44  ;;  %v4047_v44 = vld [vmem:[%s5085_s1 + $0x518] sm:$0xff]  }
  0x58   :  { %3554 = vmatpush3.bf16.msra.mxu0 %v3956_v50  ;;  %v623_v50 = vcombine.high %v621_v45, %v621_v45 }
  0x59   :  { %3555 = vmatprep.subr.bf16.mxu0 %v3958_v52  ;;  %3576 = vmatpush3.bf16.msra.mxu1 %v3957_v51  ;;  %v4003_v51 = vld [vmem:[%s5085_s1 + $0x480] sm:$0xff]   ;;  %v738_v52 = vpack.c.bf16 %v621_v45, %v621_v45  ;;  %v4048_v45 = vld [vmem:[%s5085_s1 + $0x598] sm:$0xff]  }
  0x5a   :  { %3577 = vmatprep.subr.bf16.mxu1 %v3959_v53  ;;  %v4004_v53 = vld [vmem:[%s5085_s1 + $0x448] sm:$0xff]  }
  0x5c   :  { %3556 = vmatpush3.bf16.msra.mxu0 %v3960_v54  ;;  %v739_v54 = vpack.c.bf16 %v623_v50, %v623_v50  ;;  %v4053_v50 = vld [vmem:[%s5085_s1 + $0x568] sm:$0xff]  }
  0x5d   :  { %3557 = vmatprep.subr.bf16.mxu0 %v3962_v56  ;;  %3578 = vmatpush3.bf16.msra.mxu1 %v3961_v55  ;;  %v4005_v55 = vld [vmem:[%s5085_s1 + $0x4c8] sm:$0xff]  }
  0x5e   :  { %3579 = vmatprep.subr.bf16.mxu1 %v3963_v57  ;;  %v4006_v56 = vld [vmem:[%s5085_s1 + $0x408] sm:$0xff]  }
  0x5f   :  { %v4007_v57 = vld [vmem:[%s5085_s1 + $0x488] sm:$0xff]  }
  0x60   :  { %3558 = vmatpush3.bf16.msra.mxu0 %v3964_v58  ;;  %v4008_v58 = vld [vmem:[%s5085_s1 + $0x450] sm:$0xff]  }
  0x61   :  { %3587 = vmatprep.subr.bf16.mxu0 %v3967_v63  ;;  %3580 = vmatpush3.bf16.msra.mxu1 %v3965_v60  ;;  %v4010_v60 = vld [vmem:[%s5085_s1 + $0x410] sm:$0xff]   ;;  %v4013_v63 = vld [vmem:[%s5085_s1 + $0x4d8] sm:$0xff]  }
  0x62   :  { %3609 = vmatprep.subr.bf16.mxu1 %v3968_v2  ;;  %v4016_v2 = vld [vmem:[%s5085_s1 + $0x460] sm:$0xff]  }
  0x63   :  { %2491 = vmatmul.mubr.bf16.vlgmr.msra.gmra.mrb[8].mxu0 %v732_v3  ;;  %v4017_v3 = vld [vmem:[%s5085_s1 + $0x4e0] sm:$0xff]  }
  0x64   :  { %3588 = vmatpush3.bf16.msra.mxu0 %v3969_v4  ;;  %2531 = vmatmul.mubr.bf16.vlgmr.msra.gmra.mrb[8].mxu1 %v734_v8  ;;  %v4018_v4 = vld [vmem:[%s5085_s1 + $0x420] sm:$0xff]   ;;  %v4022_v8 = vld [vmem:[%s5085_s1 + $0x428] sm:$0xff]  }
  0x65   :  { %3589 = vmatprep.subr.bf16.mxu0 %v3971_v9  ;;  %3610 = vmatpush3.bf16.msra.mxu1 %v3970_v7  ;;  %v4021_v7 = vld [vmem:[%s5085_s1 + $0x4e8] sm:$0xff]  }
  0x66   :  { %3611 = vmatprep.subr.bf16.mxu1 %v3972_v11  ;;  %2570 = vmatprep.mubr.bf16.mxu0 %v737_v49  ;;  %v4023_v9 = vld [vmem:[%s5085_s1 + $0x4a8] sm:$0xff]   ;;  %v4025_v11 = vld [vmem:[%s5085_s1 + $0x4f0] sm:$0xff]   ;;  %v4052_v49 = vld [vmem:[%s5085_s1 + $0x5a0] sm:$0xff]  }
  0x67   :  { %2610 = vmatprep.mubr.bf16.mxu1 %v739_v54  ;;  %v4057_v54 = vld [vmem:[%s5085_s1 + $0x570] sm:$0xff]  }
  0x68   :  { %3590 = vmatpush3.bf16.msra.mxu0 %v3973_v12  ;;  %v4026_v12 = vld [vmem:[%s5085_s1 + $0x430] sm:$0xff]  }
  0x69   :  { %3591 = vmatprep.subr.bf16.mxu0 %v3975_v14  ;;  %3612 = vmatpush3.bf16.msra.mxu1 %v3974_v13  ;;  %v4027_v13 = vld [vmem:[%s5085_s1 + $0x4b0] sm:$0xff]   ;;  %v4028_v14 = vld [vmem:[%s5085_s1 + $0x478] sm:$0xff]  }
  0x6a   :  { %3613 = vmatprep.subr.bf16.mxu1 %v3976_v15  ;;  %v4029_v15 = vld [vmem:[%s5085_s1 + $0x4f8] sm:$0xff]  }
  0x6c   :  { %3592 = vmatpush3.bf16.msra.mxu0 %v3977_v16  ;;  %v4030_v16 = vld [vmem:[%s5085_s1 + $0x438] sm:$0xff]  }
  0x6d   :  { %3593 = vmatprep.subr.bf16.mxu0 %v3979_v18  ;;  %3614 = vmatpush3.bf16.msra.mxu1 %v3978_v17  ;;  %v31_v17 = vld [vmem:[%s5086_s0 + $0x20] sm:$0xff]  ;;  %v4031_v18 = vld [vmem:[%s5085_s1 + $0x4b8] sm:$0xff]  }
  0x6e   :  { %3615 = vmatprep.subr.bf16.mxu1 %v3980_v19  ;;  %v631_v19 = vrot.slane %v31_v17, %v4286_v35 }
  0x70   :  { %3594 = vmatpush3.bf16.msra.mxu0 %v3981_v20  ;;  %v624_v20 = vcombine.high %v31_v17, %v31_v17  ;;  %v4075_v17 = vld [vmem:[%s5085_s1 + $0x6d0] sm:$0xff]  }
  0x71   :  { %3595 = vmatprep.subr.bf16.mxu0 %v3983_v22  ;;  %3616 = vmatpush3.bf16.msra.mxu1 %v3982_v21  ;;  %v4033_v21 = vld [vmem:[%s5085_s1 + $0x540] sm:$0xff]   ;;  %v639_v22 = vcombine.high %v631_v19, %v631_v19 }
  0x72   :  { %3617 = vmatprep.subr.bf16.mxu1 %v3984_v23  ;;  %v638_v23 = vrot.slane %v624_v20, %v4286_v35  ;;  %v4078_v20 = vld [vmem:[%s5085_s1 + $0x658] sm:$0xff]  }
  0x74   :  { %3596 = vmatpush3.bf16.msra.mxu0 %v3985_v25  ;;  %v4034_v25 = vld [vmem:[%s5085_s1 + $0x5c0] sm:$0xff]  }
  0x75   :  { %3597 = vmatprep.subr.bf16.mxu0 %v3987_v27  ;;  %3618 = vmatpush3.bf16.msra.mxu1 %v3986_v26  ;;  %v740_v26 = vpack.c.bf16 %v631_v19, %v631_v19  ;;  %v4035_v27 = vld [vmem:[%s5085_s1 + $0x500] sm:$0xff]   ;;  %v4077_v19 = vld [vmem:[%s5085_s1 + $0x690] sm:$0xff]  }
  0x76   :  { %3619 = vmatprep.subr.bf16.mxu1 %v3988_v28  ;;  %v741_v28 = vpack.c.bf16 %v639_v22, %v639_v22  ;;  %v4080_v22 = vld [vmem:[%s5085_s1 + $0x618] sm:$0xff]  }
  0x78   :  { %3598 = vmatpush3.bf16.msra.mxu0 %v3989_v29  ;;  %v640_v29 = vcombine.high %v638_v23, %v638_v23 }
  0x79   :  { %3599 = vmatprep.subr.bf16.mxu0 %v3991_v31  ;;  %3620 = vmatpush3.bf16.msra.mxu1 %v3990_v30  ;;  %v4036_v30 = vld [vmem:[%s5085_s1 + $0x580] sm:$0xff]   ;;  %v742_v31 = vpack.c.bf16 %v638_v23, %v638_v23  ;;  %v4081_v23 = vld [vmem:[%s5085_s1 + $0x698] sm:$0xff]  }
  0x7a   :  { %3621 = vmatprep.subr.bf16.mxu1 %v3992_v32  ;;  %v4037_v32 = vld [vmem:[%s5085_s1 + $0x548] sm:$0xff]  }
  0x7c   :  { %3600 = vmatpush3.bf16.msra.mxu0 %v3993_v33  ;;  %v743_v33 = vpack.c.bf16 %v640_v29, %v640_v29  ;;  %v4086_v29 = vld [vmem:[%s5085_s1 + $0x668] sm:$0xff]  }
  0x7d   :  { %3601 = vmatprep.subr.bf16.mxu0 %v3995_v36  ;;  %3622 = vmatpush3.bf16.msra.mxu1 %v3994_v34  ;;  %v4038_v34 = vld [vmem:[%s5085_s1 + $0x5c8] sm:$0xff]  }
  0x7e   :  { %3623 = vmatprep.subr.bf16.mxu1 %v3996_v37  ;;  %v4039_v36 = vld [vmem:[%s5085_s1 + $0x508] sm:$0xff]  }
  0x7f   :  { %v4040_v37 = vld [vmem:[%s5085_s1 + $0x588] sm:$0xff]  }
  0x80   :  { %3602 = vmatpush3.bf16.msra.mxu0 %v3997_v38  ;;  %v4041_v38 = vld [vmem:[%s5085_s1 + $0x550] sm:$0xff]  }
  0x81   :  { %3631 = vmatprep.subr.bf16.mxu0 %v4000_v42  ;;  %3624 = vmatpush3.bf16.msra.mxu1 %v3998_v43  ;;  %v4045_v42 = vld [vmem:[%s5085_s1 + $0x558] sm:$0xff]  }
  0x82   :  { %3653 = vmatprep.subr.bf16.mxu1 %v4001_v46  ;;  %v4046_v43 = vld [vmem:[%s5085_s1 + $0x5d8] sm:$0xff]   ;;  %v4049_v46 = vld [vmem:[%s5085_s1 + $0x560] sm:$0xff]  }
  0x83   :  { %2571 = vmatmul.mubr.bf16.vlgmr.msra.gmra.mrb[12].mxu0 %v736_v47  ;;  %v4050_v47 = vld [vmem:[%s5085_s1 + $0x5e0] sm:$0xff]  }
  0x84   :  { %3632 = vmatpush3.bf16.msra.mxu0 %v4002_v48  ;;  %2611 = vmatmul.mubr.bf16.vlgmr.msra.gmra.mrb[12].mxu1 %v738_v52  ;;  %v4051_v48 = vld [vmem:[%s5085_s1 + $0x520] sm:$0xff]   ;;  %v4055_v52 = vld [vmem:[%s5085_s1 + $0x528] sm:$0xff]  }
  0x85   :  { %3633 = vmatprep.subr.bf16.mxu0 %v4004_v53  ;;  %3654 = vmatpush3.bf16.msra.mxu1 %v4003_v51  ;;  %v4054_v51 = vld [vmem:[%s5085_s1 + $0x5e8] sm:$0xff]  }
  0x86   :  { %3655 = vmatprep.subr.bf16.mxu1 %v4005_v55  ;;  %2650 = vmatprep.mubr.bf16.mxu0 %v741_v28  ;;  %v4056_v53 = vld [vmem:[%s5085_s1 + $0x5a8] sm:$0xff]   ;;  %v4058_v55 = vld [vmem:[%s5085_s1 + $0x5f0] sm:$0xff]   ;;  %v4085_v28 = vld [vmem:[%s5085_s1 + $0x6a0] sm:$0xff]  }
  0x87   :  { %2690 = vmatprep.mubr.bf16.mxu1 %v743_v33  ;;  %v4090_v33 = vld [vmem:[%s5085_s1 + $0x670] sm:$0xff]  }
  0x88   :  { %3634 = vmatpush3.bf16.msra.mxu0 %v4006_v56  ;;  %v4059_v56 = vld [vmem:[%s5085_s1 + $0x530] sm:$0xff]  }
  0x89   :  { %3635 = vmatprep.subr.bf16.mxu0 %v4008_v58  ;;  %3656 = vmatpush3.bf16.msra.mxu1 %v4007_v57  ;;  %v4060_v57 = vld [vmem:[%s5085_s1 + $0x5b0] sm:$0xff]   ;;  %v4061_v58 = vld [vmem:[%s5085_s1 + $0x578] sm:$0xff]  }
  0x8a   :  { %3657 = vmatprep.subr.bf16.mxu1 %v4009_v59  ;;  %v4062_v59 = vld [vmem:[%s5085_s1 + $0x5f8] sm:$0xff]  }
  0x8c   :  { %3636 = vmatpush3.bf16.msra.mxu0 %v4010_v60  ;;  %v4063_v60 = vld [vmem:[%s5085_s1 + $0x538] sm:$0xff]  }
  0x8d   :  { %3637 = vmatprep.subr.bf16.mxu0 %v4012_v62  ;;  %3658 = vmatpush3.bf16.msra.mxu1 %v4011_v61  ;;  %v32_v61 = vld [vmem:[%s5086_s0 + $0x28] sm:$0xff]  ;;  %v4064_v62 = vld [vmem:[%s5085_s1 + $0x5b8] sm:$0xff]  }
  0x8e   :  { %3659 = vmatprep.subr.bf16.mxu1 %v4013_v63  ;;  %v648_v63 = vrot.slane %v32_v61, %v4286_v35 }
  0x90   :  { %3638 = vmatpush3.bf16.msra.mxu0 %v4014_v0  ;;  %v641_v0 = vcombine.high %v32_v61, %v32_v61  ;;  %v4108_v61 = vld [vmem:[%s5085_s1 + $0x7d0] sm:$0xff]  }
  0x91   :  { %3639 = vmatprep.subr.bf16.mxu0 %v4016_v2  ;;  %3660 = vmatpush3.bf16.msra.mxu1 %v4015_v1  ;;  %v4066_v1 = vld [vmem:[%s5085_s1 + $0x640] sm:$0xff]   ;;  %v656_v2 = vcombine.high %v648_v63, %v648_v63 }
  0x92   :  { %3661 = vmatprep.subr.bf16.mxu1 %v4017_v3  ;;  %v655_v3 = vrot.slane %v641_v0, %v4286_v35  ;;  %v4110_v0 = vld [vmem:[%s5085_s1 + $0x790] sm:$0xff]  }
  0x94   :  { %3640 = vmatpush3.bf16.msra.mxu0 %v4018_v4  ;;  %v4067_v4 = vld [vmem:[%s5085_s1 + $0x6c0] sm:$0xff]  }
  0x95   :  { %3641 = vmatprep.subr.bf16.mxu0 %v4020_v6  ;;  %3662 = vmatpush3.bf16.msra.mxu1 %v4019_v5  ;;  %v744_v5 = vpack.c.bf16 %v648_v63, %v648_v63  ;;  %v4068_v6 = vld [vmem:[%s5085_s1 + $0x600] sm:$0xff]   ;;  %v4111_v63 = vld [vmem:[%s5085_s1 + $0x758] sm:$0xff]  }
  0x96   :  { %3663 = vmatprep.subr.bf16.mxu1 %v4021_v7  ;;  %v745_v7 = vpack.c.bf16 %v656_v2, %v656_v2  ;;  %v4113_v2 = vld [vmem:[%s5085_s1 + $0x718] sm:$0xff]  }
  0x98   :  { %3642 = vmatpush3.bf16.msra.mxu0 %v4022_v8  ;;  %v657_v8 = vcombine.high %v655_v3, %v655_v3 }
  0x99   :  { %3643 = vmatprep.subr.bf16.mxu0 %v4024_v10  ;;  %3664 = vmatpush3.bf16.msra.mxu1 %v4023_v9  ;;  %v4069_v9 = vld [vmem:[%s5085_s1 + $0x680] sm:$0xff]   ;;  %v746_v10 = vpack.c.bf16 %v655_v3, %v655_v3 }
  0x9a   :  { %3665 = vmatprep.subr.bf16.mxu1 %v4025_v11  ;;  %v4070_v11 = vld [vmem:[%s5085_s1 + $0x648] sm:$0xff]   ;;  %v4115_v3 = vld [vmem:[%s5085_s1 + $0x760] sm:$0xff]  }
  0x9c   :  { %3644 = vmatpush3.bf16.msra.mxu0 %v4026_v12  ;;  %v747_v12 = vpack.c.bf16 %v657_v8, %v657_v8  ;;  %v4118_v8 = vld [vmem:[%s5085_s1 + $0x7a0] sm:$0xff]  }
  0x9d   :  { %3645 = vmatprep.subr.bf16.mxu0 %v4028_v14  ;;  %3666 = vmatpush3.bf16.msra.mxu1 %v4027_v13  ;;  %v4071_v13 = vld [vmem:[%s5085_s1 + $0x6c8] sm:$0xff]  }
  0x9e   :  { %3667 = vmatprep.subr.bf16.mxu1 %v4029_v15  ;;  %v4072_v14 = vld [vmem:[%s5085_s1 + $0x608] sm:$0xff]  }
  0x9f   :  { %v4073_v15 = vld [vmem:[%s5085_s1 + $0x688] sm:$0xff]  }
  0xa0   :  { %3646 = vmatpush3.bf16.msra.mxu0 %v4030_v16  ;;  %v4074_v16 = vld [vmem:[%s5085_s1 + $0x650] sm:$0xff]  }
  0xa1   :  { %3675 = vmatprep.subr.bf16.mxu0 %v4033_v21  ;;  %3668 = vmatpush3.bf16.msra.mxu1 %v4031_v18  ;;  %v4076_v18 = vld [vmem:[%s5085_s1 + $0x610] sm:$0xff]   ;;  %v4079_v21 = vld [vmem:[%s5085_s1 + $0x6d8] sm:$0xff]  }
  0xa2   :  { %3697 = vmatprep.subr.bf16.mxu1 %v4034_v25  ;;  %v4082_v25 = vld [vmem:[%s5085_s1 + $0x660] sm:$0xff]  }
  0xa3   :  { %2651 = vmatmul.mubr.bf16.vlgmr.msra.gmra.mrb[16].mxu0 %v740_v26  ;;  %v4083_v26 = vld [vmem:[%s5085_s1 + $0x6e0] sm:$0xff]  }
  0xa4   :  { %3676 = vmatpush3.bf16.msra.mxu0 %v4035_v27  ;;  %2691 = vmatmul.mubr.bf16.vlgmr.msra.gmra.mrb[16].mxu1 %v742_v31  ;;  %v4084_v27 = vld [vmem:[%s5085_s1 + $0x620] sm:$0xff]   ;;  %v4088_v31 = vld [vmem:[%s5085_s1 + $0x628] sm:$0xff]  }
  0xa5   :  { %3677 = vmatprep.subr.bf16.mxu0 %v4037_v32  ;;  %3698 = vmatpush3.bf16.msra.mxu1 %v4036_v30  ;;  %v4087_v30 = vld [vmem:[%s5085_s1 + $0x6e8] sm:$0xff]  }
  0xa6   :  { %3699 = vmatprep.subr.bf16.mxu1 %v4038_v34  ;;  %2730 = vmatprep.mubr.bf16.mxu0 %v745_v7  ;;  %v4089_v32 = vld [vmem:[%s5085_s1 + $0x6a8] sm:$0xff]   ;;  %v4091_v34 = vld [vmem:[%s5085_s1 + $0x6f0] sm:$0xff]  }
  0xa7   :  { %2770 = vmatprep.mubr.bf16.mxu1 %v747_v12  ;;  %v4119_v7 = vld [vmem:[%s5085_s1 + $0x768] sm:$0xff]  }
  0xa8   :  { %3678 = vmatpush3.bf16.msra.mxu0 %v4039_v36  ;;  %v4092_v36 = vld [vmem:[%s5085_s1 + $0x630] sm:$0xff]   ;;  %v4121_v12 = vld [vmem:[%s5085_s1 + $0x728] sm:$0xff]  }
  0xa9   :  { %3679 = vmatprep.subr.bf16.mxu0 %v4041_v38  ;;  %3700 = vmatpush3.bf16.msra.mxu1 %v4040_v37  ;;  %v4093_v37 = vld [vmem:[%s5085_s1 + $0x6b0] sm:$0xff]   ;;  %v4094_v38 = vld [vmem:[%s5085_s1 + $0x678] sm:$0xff]  }
  0xaa   :  { %3701 = vmatprep.subr.bf16.mxu1 %v4042_v39  ;;  %v4095_v39 = vld [vmem:[%s5085_s1 + $0x6f8] sm:$0xff]  }
  0xac   :  { %3680 = vmatpush3.bf16.msra.mxu0 %v4043_v40  ;;  %v4096_v40 = vld [vmem:[%s5085_s1 + $0x638] sm:$0xff]  }
  0xad   :  { %3681 = vmatprep.subr.bf16.mxu0 %v4045_v42  ;;  %3702 = vmatpush3.bf16.msra.mxu1 %v4044_v41  ;;  %v33_v41 = vld [vmem:[%s5086_s0 + $0x30] sm:$0xff] }
  0xae   :  { %3703 = vmatprep.subr.bf16.mxu1 %v4046_v43  ;;  %v665_v42 = vrot.slane %v33_v41, %v4286_v35  ;;  %v658_v43 = vcombine.high %v33_v41, %v33_v41 }
  0xb0   :  { %3682 = vmatpush3.bf16.msra.mxu0 %v4047_v44  ;;  %v4099_v44 = vld [vmem:[%s5085_s1 + $0x740] sm:$0xff]  }
  0xb1   :  { %3683 = vmatprep.subr.bf16.mxu0 %v4049_v46  ;;  %3704 = vmatpush3.bf16.msra.mxu1 %v4048_v45  ;;  %v4097_v45 = vld [vmem:[%s5085_s1 + $0x6b8] sm:$0xff]   ;;  %v673_v46 = vcombine.high %v665_v42, %v665_v42 }
  0xb2   :  { %3705 = vmatprep.subr.bf16.mxu1 %v4050_v47  ;;  %v672_v47 = vrot.slane %v658_v43, %v4286_v35 }
  0xb4   :  { %3684 = vmatpush3.bf16.msra.mxu0 %v4051_v48  ;;  %v4100_v48 = vld [vmem:[%s5085_s1 + $0x7c0] sm:$0xff]  }
  0xb5   :  { %3685 = vmatprep.subr.bf16.mxu0 %v4053_v50  ;;  %3706 = vmatpush3.bf16.msra.mxu1 %v4052_v49  ;;  %v748_v49 = vpack.c.bf16 %v665_v42, %v665_v42  ;;  %v749_v50 = vpack.c.bf16 %v673_v46, %v673_v46 }
  0xb6   :  { %3707 = vmatprep.subr.bf16.mxu1 %v4054_v51  ;;  %v674_v51 = vcombine.high %v672_v47, %v672_v47 }
  0xb8   :  { %3686 = vmatpush3.bf16.msra.mxu0 %v4055_v52  ;;  %v4101_v52 = vld [vmem:[%s5085_s1 + $0x700] sm:$0xff]  }
  0xb9   :  { %3687 = vmatprep.subr.bf16.mxu0 %v4057_v54  ;;  %3708 = vmatpush3.bf16.msra.mxu1 %v4056_v53  ;;  %v750_v53 = vpack.c.bf16 %v672_v47, %v672_v47  ;;  %v4103_v54 = vld [vmem:[%s5085_s1 + $0x748] sm:$0xff]  }
  0xba   :  { %3709 = vmatprep.subr.bf16.mxu1 %v4058_v55  ;;  %v751_v55 = vpack.c.bf16 %v674_v51, %v674_v51 }
  0xbc   :  { %3688 = vmatpush3.bf16.msra.mxu0 %v4059_v56  ;;  %v4102_v56 = vld [vmem:[%s5085_s1 + $0x780] sm:$0xff]  }
  0xbd   :  { %3689 = vmatprep.subr.bf16.mxu0 %v4061_v58  ;;  %3710 = vmatpush3.bf16.msra.mxu1 %v4060_v57  ;;  %v4104_v57 = vld [vmem:[%s5085_s1 + $0x7c8] sm:$0xff]  }
  0xbe   :  { %3711 = vmatprep.subr.bf16.mxu1 %v4062_v59  ;;  %v4105_v58 = vld [vmem:[%s5085_s1 + $0x708] sm:$0xff]   ;;  %v4107_v59 = vld [vmem:[%s5085_s1 + $0x750] sm:$0xff]  }
  0xc0   :  { %3690 = vmatpush3.bf16.msra.mxu0 %v4063_v60  ;;  %v4106_v60 = vld [vmem:[%s5085_s1 + $0x788] sm:$0xff]  }
  0xc1   :  { %3719 = vmatprep.subr.bf16.mxu0 %v4066_v1  ;;  %3712 = vmatpush3.bf16.msra.mxu1 %v4064_v62  ;;  %v4109_v62 = vld [vmem:[%s5085_s1 + $0x710] sm:$0xff]   ;;  %v4112_v1 = vld [vmem:[%s5085_s1 + $0x7d8] sm:$0xff]  }
  0xc2   :  { %3741 = vmatprep.subr.bf16.mxu1 %v4067_v4  ;;  %v4114_v4 = vld [vmem:[%s5085_s1 + $0x798] sm:$0xff]  }
  0xc3   :  { %2731 = vmatmul.mubr.bf16.vlgmr.msra.gmra.mrb[20].mxu0 %v744_v5  ;;  %v4116_v5 = vld [vmem:[%s5085_s1 + $0x7e0] sm:$0xff]  }
  0xc4   :  { %3720 = vmatpush3.bf16.msra.mxu0 %v4068_v6  ;;  %2771 = vmatmul.mubr.bf16.vlgmr.msra.gmra.mrb[20].mxu1 %v746_v10  ;;  %v4117_v6 = vld [vmem:[%s5085_s1 + $0x720] sm:$0xff]   ;;  %v4120_v10 = vld [vmem:[%s5085_s1 + $0x7e8] sm:$0xff]  }
  0xc5   :  { %3721 = vmatprep.subr.bf16.mxu0 %v4070_v11  ;;  %3742 = vmatpush3.bf16.msra.mxu1 %v4069_v9  ;;  %v3179_v9 = vld [vmem:[%s5087_s2] ss:$0 sm:$0xff] }
  0xc6   :  { %3743 = vmatprep.subr.bf16.mxu1 %v4071_v13  ;;  %2810 = vmatprep.mubr.bf16.mxu0 %v749_v50 }
  0xc7   :  { %2850 = vmatprep.mubr.bf16.mxu1 %v751_v55 }
  0xc8   :  { %3722 = vmatpush3.bf16.msra.mxu0 %v4072_v14  ;;  %v4123_v14 = vld [vmem:[%s5085_s1 + $0x770] sm:$0xff]  }
  0xc9   :  { %3723 = vmatprep.subr.bf16.mxu0 %v4074_v16  ;;  %3744 = vmatpush3.bf16.msra.mxu1 %v4073_v15 }
  0xca   :  { %3745 = vmatprep.subr.bf16.mxu1 %v4075_v17 }
  0xcc   :  { %3724 = vmatpush3.bf16.msra.mxu0 %v4076_v18  ;;  %v4122_v18 = vld [vmem:[%s5085_s1 + $0x7a8] sm:$0xff]  }
  0xcd   :  { %3725 = vmatprep.subr.bf16.mxu0 %v4078_v20  ;;  %3746 = vmatpush3.bf16.msra.mxu1 %v4077_v19  ;;  %v4124_v19 = vld [vmem:[%s5085_s1 + $0x7f0] sm:$0xff]  }
  0xce   :  { %3747 = vmatprep.subr.bf16.mxu1 %v4079_v21 }
  0xd0   :  { %3726 = vmatpush3.bf16.msra.mxu0 %v4080_v22 }
  0xd1   :  { %3727 = vmatprep.subr.bf16.mxu0 %v4082_v25  ;;  %3748 = vmatpush3.bf16.msra.mxu1 %v4081_v23 }
  0xd2   :  { %3749 = vmatprep.subr.bf16.mxu1 %v4083_v26  ;;  %v4125_v26 = vld [vmem:[%s5085_s1 + $0x730] sm:$0xff]  }
  0xd4   :  { %3728 = vmatpush3.bf16.msra.mxu0 %v4084_v27 }
  0xd5   :  { %3729 = vmatprep.subr.bf16.mxu0 %v4086_v29  ;;  %3750 = vmatpush3.bf16.msra.mxu1 %v4085_v28  ;;  %v4127_v28 = vld [vmem:[%s5085_s1 + $0x778] sm:$0xff]  }
  0xd6   :  { %3751 = vmatprep.subr.bf16.mxu1 %v4087_v30  ;;  %v4126_v30 = vld [vmem:[%s5085_s1 + $0x7b0] sm:$0xff]  }
  0xd8   :  { %3730 = vmatpush3.bf16.msra.mxu0 %v4088_v31  ;;  %v4128_v31 = vld [vmem:[%s5085_s1 + $0x7f8] sm:$0xff]  }
  0xd9   :  { %3731 = vmatprep.subr.bf16.mxu0 %v4090_v33  ;;  %3752 = vmatpush3.bf16.msra.mxu1 %v4089_v32  ;;  %v4129_v32 = vld [vmem:[%s5085_s1 + $0x738] sm:$0xff]  }
  0xda   :  { %3753 = vmatprep.subr.bf16.mxu1 %v4091_v34  ;;  %v34_v33 = vld [vmem:[%s5086_s0 + $0x38] sm:$0xff] }
  0xdb   :  { %v682_v34 = vrot.slane %v34_v33, %v4286_v35 }
  0xdc   :  { %3732 = vmatpush3.bf16.msra.mxu0 %v4092_v36  ;;  %v675_v36 = vcombine.high %v34_v33, %v34_v33  ;;  %v4145_v33 = vld [vmem:[%s5089_s5 + $0x28] sm:$0xff]  }
  0xdd   :  { %3733 = vmatprep.subr.bf16.mxu0 %v4094_v38  ;;  %3754 = vmatpush3.bf16.msra.mxu1 %v4093_v37  ;;  %v4130_v37 = vld [vmem:[%s5085_s1 + $0x7b8] sm:$0xff]   ;;  %v690_v38 = vcombine.high %v682_v34, %v682_v34 }
  0xde   :  { %3755 = vmatprep.subr.bf16.mxu1 %v4095_v39  ;;  %v689_v39 = vrot.slane %v675_v36, %v4286_v35 }
  0xdf   :  { %v753_v41 = vpack.c.bf16 %v690_v38, %v690_v38 }
  0xe0   :  { %3734 = vmatpush3.bf16.msra.mxu0 %v4096_v40  ;;  %v752_v40 = vpack.c.bf16 %v682_v34, %v682_v34  ;;  %v691_v42 = vcombine.high %v689_v39, %v689_v39  ;;  %v754_v43 = vpack.c.bf16 %v689_v39, %v689_v39 }
  0xe1   :  { %3763 = vmatprep.subr.bf16.mxu0 %v4099_v44  ;;  %3756 = vmatpush3.bf16.msra.mxu1 %v4097_v45 }
  0xe2   :  { %3785 = vmatprep.subr.bf16.mxu1 %v4100_v48  ;;  %v755_v44 = vpack.c.bf16 %v691_v42, %v691_v42 }
  0xe3   :  { %2811 = vmatmul.mubr.bf16.vlgmr.msra.gmra.mrb[24].mxu0 %v748_v49 }
  0xe4   :  { %3764 = vmatpush3.bf16.msra.mxu0 %v4101_v52  ;;  %2851 = vmatmul.mubr.bf16.vlgmr.msra.gmra.mrb[24].mxu1 %v750_v53 }
  0xe5   :  { %3765 = vmatprep.subr.bf16.mxu0 %v4103_v54  ;;  %3786 = vmatpush3.bf16.msra.mxu1 %v4102_v56 }
  0xe6   :  { %3787 = vmatprep.subr.bf16.mxu1 %v4104_v57  ;;  %2890 = vmatprep.mubr.bf16.mxu0 %v753_v41 }
  0xe7   :  { %2930 = vmatprep.mubr.bf16.mxu1 %v755_v44 }
  0xe8   :  { %3766 = vmatpush3.bf16.msra.mxu0 %v4105_v58 }
  0xe9   :  { %3767 = vmatprep.subr.bf16.mxu0 %v4107_v59  ;;  %3788 = vmatpush3.bf16.msra.mxu1 %v4106_v60 }
  0xea   :  { %3789 = vmatprep.subr.bf16.mxu1 %v4108_v61 }
  0xec   :  { %3768 = vmatpush3.bf16.msra.mxu0 %v4109_v62 }
  0xed   :  { %3769 = vmatprep.subr.bf16.mxu0 %v4111_v63  ;;  %3790 = vmatpush3.bf16.msra.mxu1 %v4110_v0 }
  0xee   :  { %3791 = vmatprep.subr.bf16.mxu1 %v4112_v1 }
  0xf0   :  { %3770 = vmatpush3.bf16.msra.mxu0 %v4113_v2 }
  0xf1   :  { %3771 = vmatprep.subr.bf16.mxu0 %v4115_v3  ;;  %3792 = vmatpush3.bf16.msra.mxu1 %v4114_v4  ;;  %v4153_v4 = vmov 0.0  }
  0xf2   :  { %3793 = vmatprep.subr.bf16.mxu1 %v4116_v5  ;;  %v4132_v5 = vld [vmem:[%s5088_s3] sm:$0xff]  }
  0xf4   :  { %3772 = vmatpush3.bf16.msra.mxu0 %v4117_v6  ;;  %v4133_v6 = vld [vmem:[%s5088_s3 + $0x8] sm:$0xff]  }
  0xf5   :  { %3773 = vmatprep.subr.bf16.mxu0 %v4119_v7  ;;  %3794 = vmatpush3.bf16.msra.mxu1 %v4118_v8  ;;  %v4134_v7 = vld [vmem:[%s5088_s3 + $0x10] sm:$0xff]   ;;  %v4135_v8 = vld [vmem:[%s5088_s3 + $0x18] sm:$0xff]  }
  0xf6   :  { %v3471_v11 = vpop.f32.mrb[0].mxu0  ;;  %3795 = vmatprep.subr.bf16.mxu1 %v4120_v10 }
  0xf7   :  { %v3472_v13 = vpop.f32.mrb[1].mxu0  ;;  %v3493_v15 = vpop.f32.mrb[0].mxu1 }
  0xf8   :  { %v3473_v16 = vadd.f32 %v3472_v13, %v3471_v11  ;;  %v3474_v17 = vpop.f32.mrb[2].mxu0  ;;  %v3494_v20 = vpop.f32.mrb[1].mxu1  ;;  %3774 = vmatpush3.bf16.msra.mxu0 %v4121_v12 }
  0xf9   :  { %v3475_v21 = vpop.f32.mrb[3].mxu0  ;;  %v3495_v23 = vadd.f32 %v3494_v20, %v3493_v15  ;;  %v3496_v25 = vpop.f32.mrb[2].mxu1  ;;  %3775 = vmatprep.subr.bf16.mxu0 %v4123_v14  ;;  %3796 = vmatpush3.bf16.msra.mxu1 %v4122_v18  ;;  %v4137_v17 = vld [vmem:[%s5088_s3 + $0x28] sm:$0xff]  }
  0xfa   :  { %v2333_v22 = vadd.f32 %v3473_v16, %v3179_v9  ;;  %v3497_v27 = vpop.f32.mrb[3].mxu1  ;;  %3797 = vmatprep.subr.bf16.mxu1 %v4124_v19  ;;  %v4136_v9 = vld [vmem:[%s5088_s3 + $0x20] sm:$0xff]   ;;  %v4139_v25 = vld [vmem:[%s5088_s3 + $0x38] sm:$0xff]  }
  0xfb   :  { %v4141_v27 = vld [vmem:[%s5089_s5 + $0x8] sm:$0xff]  }
  0xfc   :  { %v2373_v29 = vadd.f32 %v3495_v23, %v2333_v22  ;;  %3776 = vmatpush3.bf16.msra.mxu0 %v4125_v26  ;;  %v4138_v23 = vld [vmem:[%s5088_s3 + $0x30] sm:$0xff]   ;;  %v4140_v26 = vld [vmem:[%s5089_s5] sm:$0xff]  }
  0xfd   :  { %3777 = vmatprep.subr.bf16.mxu0 %v4127_v28  ;;  %3798 = vmatpush3.bf16.msra.mxu1 %v4126_v30  ;;  %v4142_v28 = vld [vmem:[%s5089_s5 + $0x10] sm:$0xff]   ;;  %v4144_v30 = vld [vmem:[%s5089_s5 + $0x20] sm:$0xff]  }
  0xfe   :  { %3799 = vmatprep.subr.bf16.mxu1 %v4128_v31 }
 0x100   :  { %3778 = vmatpush3.bf16.msra.mxu0 %v4129_v32 }
 0x101   :  { %3800 = vmatpush3.bf16.msra.mxu1 %v4130_v37  ;;  %3825 = vmatprep.subr.bf16.mxu0 %v4153_v4 }
 0x102   :  { %3845 = vmatprep.subr.bf16.mxu1 %v4153_v4 }
 0x103   :  { %2891 = vmatmul.mubr.bf16.vlgmr.msra.gmra.mrb[28].mxu0 %v752_v40 }
 0x104   :  { %2931 = vmatmul.mubr.bf16.vlgmr.msra.gmra.mrb[28].mxu1 %v754_v43  ;;  %3826 = vmatpush3.bf16.msra.mxu0 %v4132_v5 }
 0x105   :  { %3827 = vmatprep.subr.bf16.mxu0 %v4153_v4  ;;  %3841 = vmatprep.mubr.msk.bf16.mxu0 %vm4154_vm0, %v4153_v4 }
 0x106   :  { %3861 = vmatprep.mubr.msk.bf16.mxu1 %vm4154_vm0, %v4153_v4  ;;  %3846 = vmatpush3.bf16.msra.mxu1 %v4140_v26 }
 0x107   :  { %3847 = vmatprep.subr.bf16.mxu1 %v4153_v4 }
 0x108   :  { %3828 = vmatpush3.bf16.msra.mxu0 %v4133_v6 }
 0x109   :  { %3829 = vmatprep.subr.bf16.mxu0 %v4153_v4 }
 0x10a   :  { %3848 = vmatpush3.bf16.msra.mxu1 %v4141_v27 }
 0x10b   :  { %3849 = vmatprep.subr.bf16.mxu1 %v4153_v4 }
 0x10c   :  { %3830 = vmatpush3.bf16.msra.mxu0 %v4134_v7 }
 0x10d   :  { %3831 = vmatprep.subr.bf16.mxu0 %v4153_v4 }
 0x10e   :  { %3850 = vmatpush3.bf16.msra.mxu1 %v4142_v28 }
 0x10f   :  { %3851 = vmatprep.subr.bf16.mxu1 %v4153_v4 }
 0x110   :  { %3832 = vmatpush3.bf16.msra.mxu0 %v4135_v8 }
 0x111   :  { %3833 = vmatprep.subr.bf16.mxu0 %v4153_v4 }
 0x114   :  { %3834 = vmatpush3.bf16.msra.mxu0 %v4136_v9 }
 0x115   :  { %3835 = vmatprep.subr.bf16.mxu0 %v4153_v4 }
 0x116   :  { %v3515_v45 = vpop.f32.mrb[4].mxu0 }
 0x117   :  { %v3516_v46 = vpop.f32.mrb[5].mxu0  ;;  %v3537_v47 = vpop.f32.mrb[4].mxu1 }
 0x118   :  { %v3517_v48 = vadd.f32 %v3516_v46, %v3515_v45  ;;  %v3518_v49 = vpop.f32.mrb[6].mxu0  ;;  %v3538_v50 = vpop.f32.mrb[5].mxu1  ;;  %3836 = vmatpush3.bf16.msra.mxu0 %v4137_v17 }
 0x119   :  { %v3519_v51 = vpop.f32.mrb[7].mxu0  ;;  %v3539_v35 = vadd.f32 %v3538_v50, %v3537_v47  ;;  %v3540_v53 = vpop.f32.mrb[6].mxu1  ;;  %3837 = vmatprep.subr.bf16.mxu0 %v4153_v4 }
 0x11a   :  { %v2413_v52 = vadd.f32 %v3517_v48, %v2373_v29  ;;  %v3541_v54 = vpop.f32.mrb[7].mxu1  ;;  %v4143_v29 = vld [vmem:[%s5089_s5 + $0x18] sm:$0xff]  }
 0x11b   :  { %3852 = vmatpush3.bf16.msra.mxu1 %v4143_v29 }
 0x11c   :  { %v2453_v55 = vadd.f32 %v3539_v35, %v2413_v52  ;;  %3838 = vmatpush3.bf16.msra.mxu0 %v4138_v23  ;;  %3853 = vmatprep.subr.bf16.mxu1 %v4153_v4 }
 0x11d   :  { %3839 = vmatprep.subr.bf16.mxu0 %v4153_v4 }
 0x11f   :  { %3854 = vmatpush3.bf16.msra.mxu1 %v4144_v30 }
 0x120   :  { %3840 = vmatpush3.bf16.msra.mxu0 %v4139_v25  ;;  %3855 = vmatprep.subr.bf16.mxu1 %v4153_v4 }
 0x123   :  { %3856 = vmatpush3.bf16.msra.mxu1 %v4145_v33 }
 0x124   :  { %3857 = vmatprep.subr.bf16.mxu1 %v4153_v4 }
 0x136   :  { %v3559_v56 = vpop.f32.mrb[8].mxu0 }
 0x137   :  { %v3560_v57 = vpop.f32.mrb[9].mxu0  ;;  %v3581_v58 = vpop.f32.mrb[8].mxu1 }
 0x138   :  { %v3561_v59 = vadd.f32 %v3560_v57, %v3559_v56  ;;  %v3562_v60 = vpop.f32.mrb[10].mxu0  ;;  %v3582_v61 = vpop.f32.mrb[9].mxu1 }
 0x139   :  { %v3563_v62 = vpop.f32.mrb[11].mxu0  ;;  %v3583_v0 = vadd.f32 %v3582_v61, %v3581_v58  ;;  %v3584_v1 = vpop.f32.mrb[10].mxu1 }
 0x13a   :  { %v2493_v63 = vadd.f32 %v3561_v59, %v2453_v55  ;;  %v3585_v2 = vpop.f32.mrb[11].mxu1 }
 0x13c   :  { %v2533_v3 = vadd.f32 %v3583_v0, %v2493_v63 }
 0x156   :  { %v3603_v10 = vpop.f32.mrb[12].mxu0 }
 0x157   :  { %v3604_v11 = vpop.f32.mrb[13].mxu0  ;;  %v3625_v12 = vpop.f32.mrb[12].mxu1 }
 0x158   :  { %v3605_v13 = vadd.f32 %v3604_v11, %v3603_v10  ;;  %v3606_v14 = vpop.f32.mrb[14].mxu0  ;;  %v3626_v15 = vpop.f32.mrb[13].mxu1 }
 0x159   :  { %v3607_v16 = vpop.f32.mrb[15].mxu0  ;;  %v3627_v19 = vadd.f32 %v3626_v15, %v3625_v12  ;;  %v3628_v20 = vpop.f32.mrb[14].mxu1 }
 0x15a   :  { %v2573_v18 = vadd.f32 %v3605_v13, %v2533_v3  ;;  %v3629_v21 = vpop.f32.mrb[15].mxu1  ;;  %v4147_v20 = vld [vmem:[%s5089_s5 + $0x38] sm:$0xff]  }
 0x15b   :  { %v3436_v21 = vld [vmem:[%s5090_s4] ss:$0 sm:$0xff] }
 0x15c   :  { %v2613_v22 = vadd.f32 %v3627_v19, %v2573_v18  ;;  %v4146_v19 = vld [vmem:[%s5089_s5 + $0x30] sm:$0xff]  }
 0x15d   :  { %3858 = vmatpush3.bf16.msra.mxu1 %v4146_v19 }
 0x15e   :  { %3859 = vmatprep.subr.bf16.mxu1 %v4153_v4  ;;  %v3445_v4 = vld [vmem:[%s5091_s6] ss:$0 sm:$0xff] }
 0x161   :  { %3860 = vmatpush3.bf16.msra.mxu1 %v4147_v20 }
 0x176   :  { %v3647_v31 = vpop.f32.mrb[16].mxu0 }
 0x177   :  { %v3648_v32 = vpop.f32.mrb[17].mxu0  ;;  %v3669_v34 = vpop.f32.mrb[16].mxu1 }
 0x178   :  { %v3649_v36 = vadd.f32 %v3648_v32, %v3647_v31  ;;  %v3650_v37 = vpop.f32.mrb[18].mxu0  ;;  %v3670_v38 = vpop.f32.mrb[17].mxu1 }
 0x179   :  { %v3651_v39 = vpop.f32.mrb[19].mxu0  ;;  %v3671_v41 = vadd.f32 %v3670_v38, %v3669_v34  ;;  %v3672_v42 = vpop.f32.mrb[18].mxu1 }
 0x17a   :  { %v2653_v40 = vadd.f32 %v3649_v36, %v2613_v22  ;;  %v3673_v43 = vpop.f32.mrb[19].mxu1  ;;  %v3165_v39 = vand.u32 127, %v560_v24 }
 0x17c   :  { %v2693_v44 = vadd.f32 %v3671_v41, %v2653_v40  ;;  %vm3166_vm1 = vcmp.lt.s32.totalorder %v3165_v39, 12 }
 0x196   :  { %v3691_v45 = vpop.f32.mrb[20].mxu0 }
 0x197   :  { %v3692_v46 = vpop.f32.mrb[21].mxu0  ;;  %v3713_v47 = vpop.f32.mrb[20].mxu1 }
 0x198   :  { %v3693_v48 = vadd.f32 %v3692_v46, %v3691_v45  ;;  %v3694_v49 = vpop.f32.mrb[22].mxu0  ;;  %v3714_v50 = vpop.f32.mrb[21].mxu1 }
 0x199   :  { %v3695_v51 = vpop.f32.mrb[23].mxu0  ;;  %v3715_v35 = vadd.f32 %v3714_v50, %v3713_v47  ;;  %v3716_v53 = vpop.f32.mrb[22].mxu1 }
 0x19a   :  { %v2733_v52 = vadd.f32 %v3693_v48, %v2693_v44  ;;  %v3717_v54 = vpop.f32.mrb[23].mxu1 }
 0x19c   :  { %v2773_v55 = vadd.f32 %v3715_v35, %v2733_v52 }
 0x1b6   :  { %v3735_v56 = vpop.f32.mrb[24].mxu0 }
 0x1b7   :  { %v3736_v57 = vpop.f32.mrb[25].mxu0  ;;  %v3757_v58 = vpop.f32.mrb[24].mxu1 }
 0x1b8   :  { %v3737_v59 = vadd.f32 %v3736_v57, %v3735_v56  ;;  %v3738_v60 = vpop.f32.mrb[26].mxu0  ;;  %v3758_v61 = vpop.f32.mrb[25].mxu1 }
 0x1b9   :  { %v3739_v62 = vpop.f32.mrb[27].mxu0  ;;  %v3759_v0 = vadd.f32 %v3758_v61, %v3757_v58  ;;  %v3760_v1 = vpop.f32.mrb[26].mxu1 }
 0x1ba   :  { %v2813_v63 = vadd.f32 %v3737_v59, %v2773_v55  ;;  %v3761_v2 = vpop.f32.mrb[27].mxu1 }
 0x1bc   :  { %v2853_v3 = vadd.f32 %v3759_v0, %v2813_v63 }
 0x1d6   :  { %v3779_v5 = vpop.f32.mrb[28].mxu0 }
 0x1d7   :  { %v3780_v6 = vpop.f32.mrb[29].mxu0  ;;  %v3801_v7 = vpop.f32.mrb[28].mxu1 }
 0x1d8   :  { %v3781_v8 = vadd.f32 %v3780_v6, %v3779_v5  ;;  %v3782_v9 = vpop.f32.mrb[30].mxu0  ;;  %v3802_v10 = vpop.f32.mrb[29].mxu1 }
 0x1d9   :  { %v3783_v11 = vpop.f32.mrb[31].mxu0  ;;  %v3803_v13 = vadd.f32 %v3802_v10, %v3801_v7  ;;  %v3804_v14 = vpop.f32.mrb[30].mxu1 }
 0x1da   :  { %v2893_v12 = vadd.f32 %v3781_v8, %v2853_v3  ;;  %v3805_v15 = vpop.f32.mrb[31].mxu1 }
 0x1dc   :  { %v2933_v16 = vadd.f32 %v3803_v13, %v2893_v12 }
 0x1de   :  { %v2938_v17 = vmax.f32 %v2933_v16, 0.0 }
 0x1e0   :  { %v2956_v18 = vpack.c.bf16 %v2938_v17, %v2938_v17 }
 0x1e2   :  { %3842 = vmatmul.mubr.bf16.vlgmr.msra.gmra.mrb[32].mxu0 %v2956_v18 }
 0x2b5   :  { %v3045_v22 = vpop.f32.mrb[32].mxu0 }
 0x2b6   :  { %v3046_v23 = vadd.f32 %v3436_v21, %v3045_v22  ;;  %v3843_v25 = vpop.f32.mrb[33].mxu0 }
 0x2b7   :  { %v3048_v26 = vpop.f32.mrb[34].mxu0 }
 0x2b8   :  { %v3051_v27 = vmax.f32 %v3046_v23, 0.0  ;;  %v3844_v28 = vpop.f32.mrb[35].mxu0 }
 0x2ba   :  { %v3052_v29 = vpack.c.bf16 %v3051_v27, %v3051_v27 }
 0x2bc   :  { %3862 = vmatmul.mubr.bf16.vlgmr.msra.gmra.mrb[32].mxu1 %v3052_v29 }
 0x38f   :  { %v3158_v30 = vpop.f32.mrb[32].mxu1 }
 0x390   :  { %v3159_v31 = vadd.f32 %v3445_v4, %v3158_v30  ;;  %v3863_v32 = vpop.f32.mrb[33].mxu1 }
 0x391   :  { %v3161_v33 = vpop.f32.mrb[34].mxu1 }
 0x392   :  { %v3454_v34 = vmul.f32 -1.442695, %v3159_v31  ;;  %v3864_v36 = vpop.f32.mrb[35].mxu1 }
 0x394   :  { %4148 = vpow2.f32 %v3454_v34 }
 0x39e   :  { %v4149_v37 = vpop.eup %4148 }
 0x39f   :  { %v3170_v38 = vadd.f32 1.0, %v4149_v37 }
 0x3a1   :  { %4150 = vrcp.f32 %v3170_v38 }
 0x3ab   :  { %v4151_v40 = vpop.eup %4150 }
 0x3ac   :  { %v3173_v41 = vsel %vm3166_vm1, %v4151_v40, %v3159_v31 }
 0x3ad   :  { %3174 = vst [vmem:[%s5092_s7] sm:$0x3] %v3173_v41 }

// kernel: _lambda_.2
= control target key start
LH: loop header
LB: loop body
LE: loop exit
PB: predicated region body
PF: predicated region fallthrough
CT: control target
= control target key end

     0   :  { %9 = vsyncpa [#allocation6], 0  ;;  %s16613_s0 = inlined_call_operand.vmem [shape: f32[2,256,128], index: 0, kind: input, shape index: {}]   ;;  %s16614_s1 = inlined_call_operand.vmem [shape: bf16[2,9,128,128], index: 1, kind: input, shape index: {}]   ;;  %s16615_s2 = inlined_call_operand.hbm [shape: f32[2,1,128], index: 2, kind: input, shape index: {}]   ;;  %s16616_s3 = inlined_call_operand.hbm [shape: f32[9,256,1], index: 3, kind: input, shape index: {}]   ;;  %s16617_s4 = inlined_call_operand.vmem [shape: f32[2,256,16], index: 4, kind: output, shape index: {}]  }
   0x1   :  { %10 = vsyncpa [#allocation8], 0  ;;  %s13424_s15 = smov 0  }
   0x2 LB: > { %s13392_s16 = smov [#allocation5]   ;;  %s13430_s18 = sadd.s32 4294967295, %s13390_s15   ;;  %s13390_s15 = sphi %s13424_s15, %s16_s15  }
   0x3   : > { %s151_s17 = sshll.u32 %s13392_s16, 4  ;;  %p10836_p0 = scmp.ge.s32.totalorder %s13390_s15, 1  ;;  %s152_s17 = int_to_ptr.vmem [resolvable:$true] %s151_s17 }
   0x4   : > { %p136_p1 = scmp.lt.s32.totalorder %s13390_s15, 3  ;;  %p16618_p3 = scmp.eq.s32.totalorder %s13430_s18, 0 }
   0x5   : > { %s13393_s20 = smov [#allocation7]   ;;  %s13320_s25 = scalar_lea.hbm %s16615_s2, 32 }
   0x6   : > { %p13434_p2 = pnand %p10836_p0, %p136_p1  ;;  %s164_s21 = sshll.u32 %s13393_s20, 4  ;;  %s13447_s21 = int_to_ptr.vmem [resolvable:$true] %s164_s21 }
   0x7   : > { %p13321_p6 = scmp.ne.s32.totalorder %s16615_s2, %s13320_s25  ;;  %p13327_p10 = scmp.lt.u32.totalorder %s13320_s25, %s16615_s2 }
   0x8   : > { %s16859_s19 = scalar_select %p13434_p2, 1, 0 }
   0x9   : > { %p13085_p4 = pneg %p13434_p2 }
   0xb   : > { %p13443_p5 = pnand %p16618_p3, %p13085_p4 }
   0xd   : > { %p13322_p7 = pneg %p13443_p5 }
   0xf   : > { %p13323_p8 = pnand %p13322_p7, %p13321_p6 }
  0x11   : > { %p13324_p9 = pneg %p13323_p8 }
  0x13   : > { %p13329_p11 = pnand %p13327_p10, %p13324_p9 }
  0x15   : > { %13332 = shalt.err (!%p13329_p11)
}
  0x16   : > { %s13333_s30 = scalar_lea.vmem %s152_s17, 32  ;;  %p13341_p1 = scmp.lt.s32.totalorder %s152_s17, %s152_s17 }
  0x17   : > { %p13334_p12 = scmp.ne.s32.totalorder %s152_s17, %s13333_s30  ;;  %p13342_p4 = scmp.lt.s32.totalorder %s13333_s30, %s13333_s30 }
  0x19   : > { %p13336_p13 = pnand %p13334_p12, %p13322_p7  ;;  %p13343_p3 = por %p13342_p4, %p13341_p1 }
  0x1b   : > { %p13337_p0 = pneg %p13336_p13 }
  0x1d   : > { %p13344_p2 = pnand %p13343_p3, %p13337_p0 }
  0x1f   : > { %13347 = shalt.err (!%p13344_p2)
}
  0x20   : > { %s13394_s5 = smov 16   ;;  %s13395_s6 = smov 1  }
  0x21   : > { %13088 = dma.hbm_to_vmem [thread:$0]  (!%p13443_p5), %s16615_s2, 32, %s152_s17, [#allocation6], %s13394_s5, %s13394_s5, %s13395_s6  }
  0x22   : > { %s13348_s11 = scalar_lea.hbm %s16616_s3, 36864 }
  0x23   : > { %p13349_p6 = scmp.ne.s32.totalorder %s16616_s3, %s13348_s11  ;;  %p13355_p8 = scmp.lt.u32.totalorder %s13348_s11, %s16616_s3 }
  0x25   : > { %p13351_p2 = pnand %p13349_p6, %p13322_p7 }
  0x27   : > { %p13352_p3 = pneg %p13351_p2 }
  0x29   : > { %p13357_p9 = pnand %p13355_p8, %p13352_p3 }
  0x2b   : > { %13360 = shalt.err (!%p13357_p9)
}
  0x2c   : > { %s13361_s17 = scalar_lea.vmem %s13447_s21, 36864  ;;  %p13369_p13 = scmp.lt.s32.totalorder %s13447_s21, %s13447_s21 }
  0x2d   : > { %p13362_p10 = scmp.ne.s32.totalorder %s13447_s21, %s13361_s17  ;;  %p13370_p0 = scmp.lt.s32.totalorder %s13361_s17, %s13361_s17 }
  0x2f   : > { %p13364_p11 = pnand %p13362_p10, %p13322_p7  ;;  %p13371_p1 = por %p13370_p0, %p13369_p13 }
  0x31   : > { %p13365_p12 = pneg %p13364_p11 }
  0x33   : > { %p13372_p4 = pnand %p13371_p1, %p13365_p12 }
  0x35   : > { %13375 = shalt.err (!%p13372_p4)
}
  0x36   : > { %s13396_s20 = smov 128   ;;  %s13397_s23 = smov 8  }
  0x37   : > { %13091 = dma.hbm_to_vmem [thread:$0]  (!%p13443_p5), %s16616_s3, 36864, %s13447_s21, [#allocation8], %s13396_s20, %s13396_s20, %s13397_s23  }
  0x38   : > { %p16861_p6 = scmp.ne.s32.totalorder %s16859_s19, 0 }
  0x3a   : > { %188 = sbr.rel (%p16861_p6) target bundleno = 1795 (0x703), region = 36 }
  0x41   : > { %p16862_p7 = scmp.eq.s32.totalorder %s13430_s18, 0 }
  0x43   : > { %13381 = dma.done.wait (%p16862_p7), [#allocation6], 32   ;;  %p16863_p2 = pmov %p16862_p7 }
  0x45   : > { %13383 = vsyncadd (%p16863_p2), [#allocation6], 4294967264  ;;  %p16864_p3 = pmov %p16863_p2 }
  0x46   : > { %p16865_p8 = pmov %p16863_p2 }
  0x47   : > { %13385 = dma.done.wait (%p16864_p3), [#allocation8], 36864  }
  0x48   : > { %13387 = vsyncadd (%p16865_p8), [#allocation8], 4294930432  ;;  %v13398_v0 = vmov 0   ;;  %v425_v1 = vld [vmem:[#allocation7 + $0x10] sm:$0xff]  ;;  %v423_v2 = vld [vmem:[#allocation7] sm:$0xff]  ;;  %p218_p5 = scmp.lt.s32.totalorder %s13430_s18, 1 }
  0x49   : > { %13112 = vset.pattern.permute.xlu1 %v13398_v0  ;;  %13111 = vset.pattern.permute.xlu0 %v13398_v0  ;;  %v426_v3 = vld [vmem:[#allocation7 + $0x18] sm:$0xff]  ;;  %v424_v4 = vld [vmem:[#allocation7 + $0x8] sm:$0xff]  ;;  %v427_v6 = vld [vmem:[#allocation7 + $0x20] sm:$0xff]  ;;  %vm296_vm0 = vcmask 1040384   ;;  %vm1547_vm1 = vcmask 1046528   ;;  %vm10724_vm2 = vcmask 130048  }
  0x4a   : > { %467 = vperm.xlu1 %13112, %v425_v1   ;;  %457 = vperm.xlu0 %13111, %v423_v2   ;;  %v428_v5 = vld [vmem:[#allocation7 + $0x28] sm:$0xff]  ;;  %v430_v7 = vld [vmem:[#allocation7 + $0x38] sm:$0xff]  ;;  %v429_v8 = vld [vmem:[#allocation7 + $0x30] sm:$0xff]  ;;  %s17535_s18 = smov (!%p218_p5, %s13430_s18), 1 }
  0x4b   : > { %v432_v9 = vld [vmem:[#allocation7 + $0x48] sm:$0xff]  ;;  %v431_v10 = vld [vmem:[#allocation7 + $0x40] sm:$0xff]  ;;  %v434_v11 = vld [vmem:[#allocation7 + $0x58] sm:$0xff]  ;;  %s11267_s16 = sshll.u32 %s17535_s18, 8 }
  0x4c   : > { %v433_v12 = vld [vmem:[#allocation7 + $0x50] sm:$0xff]  ;;  %v13113_v13 = vld [vmem:[%s16614_s1] sm:$0xff]   ;;  %v13114_v14 = vld [vmem:[%s16614_s1 + $0x8] sm:$0xff]   ;;  %s13546_s23 = scalar_lea.vmem %s16613_s0, %s11267_s16  ;;  %s16513_s25 = scalar_lea.vmem %s16617_s4, %s11267_s16 }
  0x4d   : > { %11701 = vmatprep.subr.bf16.mxu0 %v13113_v13  ;;  %v436_v15 = vld [vmem:[#allocation7 + $0x68] sm:$0xff]  ;;  %v435_v16 = vld [vmem:[#allocation7 + $0x60] sm:$0xff]  ;;  %v438_v18 = vld [vmem:[#allocation7 + $0x78] sm:$0xff] }
  0x4e   : > { %472 = vperm.xlu1 %13112, %v426_v3   ;;  %462 = vperm.xlu0 %13111, %v424_v4   ;;  %v13115_v17 = vld [vmem:[%s16614_s1 + $0x10] sm:$0xff]   ;;  %v13116_v20 = vld [vmem:[%s16614_s1 + $0x18] sm:$0xff]   ;;  %v439_v22 = vld [vmem:[#allocation7 + $0x80] sm:$0xff] }
  0x4f   : > { %11702 = vmatpush3.bf16.msra.mxu0 %v13113_v13  ;;  %v437_v19 = vld [vmem:[#allocation7 + $0x70] sm:$0xff]  ;;  %v440_v21 = vld [vmem:[#allocation7 + $0x88] sm:$0xff]  ;;  %v13117_v23 = vld [vmem:[%s16614_s1 + $0x20] sm:$0xff]  }
  0x50   : > { %11703 = vmatprep.subr.bf16.mxu0 %v13114_v14  ;;  %v442_v24 = vld [vmem:[#allocation7 + $0x98] sm:$0xff]  ;;  %v441_v25 = vld [vmem:[#allocation7 + $0x90] sm:$0xff]  ;;  %v13118_v26 = vld [vmem:[%s16614_s1 + $0x28] sm:$0xff]  }
  0x51   : > { %v444_v27 = vld [vmem:[#allocation7 + $0xa8] sm:$0xff]  ;;  %v443_v28 = vld [vmem:[#allocation7 + $0xa0] sm:$0xff]  ;;  %v446_v30 = vld [vmem:[#allocation7 + $0xb8] sm:$0xff] }
  0x52   : > { %482 = vperm.xlu1 %13112, %v428_v5   ;;  %477 = vperm.xlu0 %13111, %v427_v6   ;;  %v13119_v29 = vld [vmem:[%s16614_s1 + $0x30] sm:$0xff]   ;;  %v13120_v32 = vld [vmem:[%s16614_s1 + $0x38] sm:$0xff]   ;;  %v447_v34 = vld [vmem:[#allocation7 + $0xc0] sm:$0xff] }
  0x53   : > { %11704 = vmatpush3.bf16.msra.mxu0 %v13114_v14  ;;  %v445_v31 = vld [vmem:[#allocation7 + $0xb0] sm:$0xff]  ;;  %v448_v33 = vld [vmem:[#allocation7 + $0xc8] sm:$0xff]  ;;  %v13533_v35 = vld [vmem:[%s16614_s1 + $0x40] sm:$0xff]  }
  0x54   : > { %11705 = vmatprep.subr.bf16.mxu0 %v13115_v17  ;;  %v450_v36 = vld [vmem:[#allocation7 + $0xd8] sm:$0xff]  ;;  %v449_v37 = vld [vmem:[#allocation7 + $0xd0] sm:$0xff]  ;;  %v452_v38 = vld [vmem:[#allocation7 + $0xe8] sm:$0xff] }
  0x55   : > { %v451_v39 = vld [vmem:[#allocation7 + $0xe0] sm:$0xff]  ;;  %v454_v40 = vld [vmem:[#allocation7 + $0xf8] sm:$0xff]  ;;  %v453_v41 = vld [vmem:[#allocation7 + $0xf0] sm:$0xff] }
  0x56   : > { %492 = vperm.xlu1 %13112, %v430_v7   ;;  %487 = vperm.xlu0 %13111, %v429_v8   ;;  %v986_v42 = vld [vmem:[#allocation7 + $0x108] sm:$0xff]  ;;  %v985_v43 = vld [vmem:[#allocation7 + $0x100] sm:$0xff]  ;;  %v988_v44 = vld [vmem:[#allocation7 + $0x118] sm:$0xff] }
  0x57   : > { %11706 = vmatpush3.bf16.msra.mxu0 %v13115_v17  ;;  %v987_v45 = vld [vmem:[#allocation7 + $0x110] sm:$0xff]  ;;  %v990_v46 = vld [vmem:[#allocation7 + $0x128] sm:$0xff]  ;;  %v989_v47 = vld [vmem:[#allocation7 + $0x120] sm:$0xff] }
  0x58   : > { %11707 = vmatprep.subr.bf16.mxu0 %v13116_v20  ;;  %v992_v48 = vld [vmem:[#allocation7 + $0x138] sm:$0xff]  ;;  %v991_v49 = vld [vmem:[#allocation7 + $0x130] sm:$0xff]  ;;  %v994_v50 = vld [vmem:[#allocation7 + $0x148] sm:$0xff] }
  0x59   : > { %v993_v51 = vld [vmem:[#allocation7 + $0x140] sm:$0xff]  ;;  %v996_v52 = vld [vmem:[#allocation7 + $0x158] sm:$0xff]  ;;  %v995_v53 = vld [vmem:[#allocation7 + $0x150] sm:$0xff] }
  0x5a   : > { %502 = vperm.xlu1 %13112, %v432_v9   ;;  %497 = vperm.xlu0 %13111, %v431_v10   ;;  %v998_v54 = vld [vmem:[#allocation7 + $0x168] sm:$0xff]  ;;  %v997_v55 = vld [vmem:[#allocation7 + $0x160] sm:$0xff]  ;;  %v1000_v56 = vld [vmem:[#allocation7 + $0x178] sm:$0xff] }
  0x5b   : > { %11708 = vmatpush3.bf16.msra.mxu0 %v13116_v20  ;;  %v999_v57 = vld [vmem:[#allocation7 + $0x170] sm:$0xff]  ;;  %v1002_v58 = vld [vmem:[#allocation7 + $0x188] sm:$0xff]  ;;  %v1001_v59 = vld [vmem:[#allocation7 + $0x180] sm:$0xff] }
  0x5c   : > { %11709 = vmatprep.subr.bf16.mxu0 %v13117_v23  ;;  %v1004_v60 = vld [vmem:[#allocation7 + $0x198] sm:$0xff]  ;;  %v1003_v61 = vld [vmem:[#allocation7 + $0x190] sm:$0xff]  ;;  %v1006_v62 = vld [vmem:[#allocation7 + $0x1a8] sm:$0xff] }
  0x5d   : > { %v1005_v63 = vld [vmem:[#allocation7 + $0x1a0] sm:$0xff]  ;;  %v1008_v0 = vld [vmem:[#allocation7 + $0x1b8] sm:$0xff]  ;;  %v1007_v1 = vld [vmem:[#allocation7 + $0x1b0] sm:$0xff] }
  0x5e   : > { %512 = vperm.xlu1 %13112, %v434_v11   ;;  %507 = vperm.xlu0 %13111, %v433_v12   ;;  %v1010_v2 = vld [vmem:[#allocation7 + $0x1c8] sm:$0xff]  ;;  %v1009_v3 = vld [vmem:[#allocation7 + $0x1c0] sm:$0xff]  ;;  %v1012_v4 = vld [vmem:[#allocation7 + $0x1d8] sm:$0xff] }
  0x5f   : > { %11710 = vmatpush3.bf16.msra.mxu0 %v13117_v23  ;;  %v1011_v5 = vld [vmem:[#allocation7 + $0x1d0] sm:$0xff]  ;;  %v1014_v6 = vld [vmem:[#allocation7 + $0x1e8] sm:$0xff]  ;;  %v1013_v7 = vld [vmem:[#allocation7 + $0x1e0] sm:$0xff] }
  0x60   : > { %11711 = vmatprep.subr.bf16.mxu0 %v13118_v26  ;;  %v13549_v8 = vld [vmem:[%s13546_s23 + $0xf8] sm:$0xff]  ;;  %v13552_v9 = vld [vmem:[%s13546_s23] sm:$0xff]  ;;  %v13555_v10 = vld [vmem:[%s13546_s23 + $0xe8] sm:$0xff] }
  0x61   : > { %v1016_v11 = vld [vmem:[#allocation7 + $0x1f8] sm:$0xff]  ;;  %v1015_v12 = vld [vmem:[#allocation7 + $0x1f0] sm:$0xff]  ;;  %v300_v13 = vrot.slane %v13549_v8, 7  ;;  %v16620_v17 = vrot.slane %v13555_v10, 7 }
  0x62   : > { %522 = vperm.xlu1 %13112, %v436_v15   ;;  %517 = vperm.xlu0 %13111, %v435_v16   ;;  %v13559_v14 = vld [vmem:[%s13546_s23 + $0xf0] sm:$0xff]  ;;  %v13562_v15 = vld [vmem:[%s13546_s23 + $0x8] sm:$0xff]  ;;  %v334_v16 = vrot.slane %v13552_v9, 7  ;;  %v13572_v23 = vld [vmem:[%s13546_s23 + $0x18] sm:$0xff] }
  0x63   : > { %11712 = vmatpush3.bf16.msra.mxu0 %v13118_v26  ;;  %v298_v20 = vrot.slane %v13559_v14, 7 }
  0x64   : > { %11713 = vmatprep.subr.bf16.mxu0 %v13119_v29 }
  0x66   : > { %532 = vperm.xlu1 %13112, %v438_v18   ;;  %527 = vperm.xlu0 %13111, %v437_v19   ;;  %v1647_v18 = vld [vmem:[#allocation7 + $0x208] sm:$0xff]  ;;  %v1646_v19 = vld [vmem:[#allocation7 + $0x200] sm:$0xff] }
  0x67   : > { %11714 = vmatpush3.bf16.msra.mxu0 %v13119_v29  ;;  %v1648_v29 = vld [vmem:[#allocation7 + $0x210] sm:$0xff] }
  0x68   : > { %11715 = vmatprep.subr.bf16.mxu0 %v13120_v32 }
  0x6a   : > { %542 = vperm.xlu1 %13112, %v440_v21   ;;  %537 = vperm.xlu0 %13111, %v439_v22   ;;  %v335_v21 = vrot.slane %v13562_v15, 7  ;;  %v13569_v22 = vld [vmem:[%s13546_s23 + $0x10] sm:$0xff] }
  0x6b   : > { %11716 = vmatpush3.bf16.msra.mxu0 %v13120_v32  ;;  %v13583_v32 = vld [vmem:[%s13546_s23 + $0x28] sm:$0xff] }
  0x6c   : > { %11749 = vmatprep.subr.bf16.mxu0 %v13533_v35 }
  0x6e   : > { %552 = vperm.xlu1 %13112, %v442_v24   ;;  %547 = vperm.xlu0 %13111, %v441_v25   ;;  %v13575_v24 = vld [vmem:[%s13546_s23 + $0x20] sm:$0xff] }
  0x72   : > { %562 = vperm.xlu1 %13112, %v444_v27   ;;  %557 = vperm.xlu0 %13111, %v443_v28   ;;  %v1649_v27 = vld [vmem:[#allocation7 + $0x218] sm:$0xff]  ;;  %v13578_v28 = vsel %vm296_vm0, %v300_v13, %v334_v16 }
  0x73   : > { %16866 = vst [vmem:[#allocation11_spill] sm:$0xff] %v13578_v28 }
  0x76   : > { %572 = vperm.xlu1 %13112, %v446_v30   ;;  %567 = vperm.xlu0 %13111, %v445_v31   ;;  %v337_v30 = vrot.slane %v13569_v22, 7  ;;  %v339_v31 = vrot.slane %v13572_v23, 7 }
  0x7a   : > { %582 = vperm.xlu1 %13112, %v448_v33   ;;  %577 = vperm.xlu0 %13111, %v447_v34   ;;  %v13588_v33 = vsel %vm296_vm0, %v16620_v17, %v298_v20  ;;  %v13591_v34 = vsel %vm296_vm0, %v334_v16, %v335_v21 }
  0x7b   : > { %16867 = vst [vmem:[#allocation12_spill] sm:$0xff] %v13588_v33  ;;  %16868 = vst [vmem:[#allocation13_spill] sm:$0xff] %v13591_v34 }
  0x7e   : > { %592 = vperm.xlu1 %13112, %v450_v36   ;;  %587 = vperm.xlu0 %13111, %v449_v37   ;;  %v13594_v36 = vsel %vm296_vm0, %v298_v20, %v300_v13  ;;  %v341_v37 = vrot.slane %v13575_v24, 7 }
  0x7f   : > { %16869 = vst [vmem:[#allocation14_spill] sm:$0xff] %v13594_v36 }
  0x82   : > { %602 = vperm.xlu1 %13112, %v452_v38   ;;  %597 = vperm.xlu0 %13111, %v451_v39  }
  0x86   : > { %612 = vperm.xlu1 %13112, %v454_v40   ;;  %607 = vperm.xlu0 %13111, %v453_v41   ;;  %v1651_v41 = vld [vmem:[#allocation7 + $0x228] sm:$0xff] }
  0x8a   : > { %1024 = vperm.xlu1 %13112, %v986_v42   ;;  %1019 = vperm.xlu0 %13111, %v985_v43   ;;  %v1650_v42 = vld [vmem:[#allocation7 + $0x220] sm:$0xff] }
  0x8e   : > { %1034 = vperm.xlu1 %13112, %v988_v44   ;;  %1029 = vperm.xlu0 %13111, %v987_v45  }
  0x92   : > { %1044 = vperm.xlu1 %13112, %v990_v46   ;;  %1039 = vperm.xlu0 %13111, %v989_v47   ;;  %v343_v46 = vrot.slane %v13583_v32, 7  ;;  %v13603_v47 = vld [vmem:[%s13546_s23 + $0x30] sm:$0xff] }
  0x96   : > { %1054 = vperm.xlu1 %13112, %v992_v48   ;;  %1049 = vperm.xlu0 %13111, %v991_v49   ;;  %v13606_v48 = vld [vmem:[%s13546_s23 + $0x38] sm:$0xff]  ;;  %v13609_v49 = vsel %vm296_vm0, %v337_v30, %v339_v31 }
  0x97   : > { %16870 = vst [vmem:[#allocation15_spill] sm:$0xff] %v13609_v49 }
  0x9a   : > { %1064 = vperm.xlu1 %13112, %v994_v50   ;;  %1059 = vperm.xlu0 %13111, %v993_v51   ;;  %v13612_v50 = vsel %vm296_vm0, %v335_v21, %v337_v30  ;;  %v13654_v30 = vld [vmem:[%s13546_s23 + $0x60] sm:$0xff] }
  0x9b   : > { %16871 = vst [vmem:[#allocation16_spill] sm:$0xff] %v13612_v50 }
  0x9e   : > { %1074 = vperm.xlu1 %13112, %v996_v52   ;;  %1069 = vperm.xlu0 %13111, %v995_v53  }
  0xa2   : > { %1084 = vperm.xlu1 %13112, %v998_v54   ;;  %1079 = vperm.xlu0 %13111, %v997_v55   ;;  %v1653_v55 = vld [vmem:[#allocation7 + $0x238] sm:$0xff] }
  0xa6   : > { %1094 = vperm.xlu1 %13112, %v1000_v56   ;;  %1089 = vperm.xlu0 %13111, %v999_v57   ;;  %v1652_v56 = vld [vmem:[#allocation7 + $0x230] sm:$0xff]  ;;  %v13122_v57 = vld [vmem:[%s16614_s1 + $0x48] sm:$0xff]  }
  0xaa   : > { %1104 = vperm.xlu1 %13112, %v1002_v58   ;;  %1099 = vperm.xlu0 %13111, %v1001_v59  }
  0xae   : > { %1114 = vperm.xlu1 %13112, %v1004_v60   ;;  %1109 = vperm.xlu0 %13111, %v1003_v61   ;;  %v345_v60 = vrot.slane %v13603_v47, 7  ;;  %v347_v61 = vrot.slane %v13606_v48, 7 }
  0xb0   : > { %v13651_v20 = vsel %vm296_vm0, %v343_v46, %v345_v60 }
  0xb1   : > { %16875 = vst [vmem:[#allocation20_spill] sm:$0xff] %v13651_v20 }
  0xb2   : > { %1124 = vperm.xlu1 %13112, %v1006_v62   ;;  %1119 = vperm.xlu0 %13111, %v1005_v63   ;;  %v13622_v62 = vld [vmem:[%s13546_s23 + $0x40] sm:$0xff]  ;;  %v13625_v63 = vld [vmem:[%s13546_s23 + $0x48] sm:$0xff] }
  0xb3   : > { %v349_v13 = vrot.slane %v13622_v62, 7  ;;  %v351_v16 = vrot.slane %v13625_v63, 7 }
  0xb6   : > { %1134 = vperm.xlu1 %13112, %v1008_v0   ;;  %1129 = vperm.xlu0 %13111, %v1007_v1   ;;  %v13628_v0 = vsel %vm296_vm0, %v341_v37, %v343_v46  ;;  %v13631_v1 = vsel %vm296_vm0, %v339_v31, %v341_v37 }
  0xb7   : > { %16872 = vst [vmem:[#allocation17_spill] sm:$0xff] %v13628_v0  ;;  %16873 = vst [vmem:[#allocation18_spill] sm:$0xff] %v13631_v1 }
  0xba   : > { %1144 = vperm.xlu1 %13112, %v1010_v2   ;;  %1139 = vperm.xlu0 %13111, %v1009_v3  }
  0xbe   : > { %1154 = vperm.xlu1 %13112, %v1012_v4   ;;  %1149 = vperm.xlu0 %13111, %v1011_v5   ;;  %v1655_v5 = vld [vmem:[#allocation7 + $0x248] sm:$0xff] }
  0xc2   : > { %1164 = vperm.xlu1 %13112, %v1014_v6   ;;  %1159 = vperm.xlu0 %13111, %v1013_v7   ;;  %v1654_v6 = vld [vmem:[#allocation7 + $0x240] sm:$0xff]  ;;  %v13635_v7 = vld [vmem:[%s13546_s23 + $0x50] sm:$0xff] }
  0xc6   : > { %1174 = vperm.xlu1 %13112, %v1016_v11   ;;  %1169 = vperm.xlu0 %13111, %v1015_v12  }
  0xc9   : > { %v468_v25 = vpop.permute.xlu1 %467  ;;  %v458_v26 = vpop.permute.xlu0 %457 }
  0xca   : > { %1685 = vperm.xlu1 %13112, %v1647_v18   ;;  %1680 = vperm.xlu0 %13111, %v1646_v19   ;;  %v617_v38 = vmul.f32 %v468_v25, %v13578_v28  ;;  %v615_v43 = vmul.f32 %v458_v26, %v13588_v33  ;;  %v13642_v18 = vld [vmem:[%s13546_s23 + $0x58] sm:$0xff]  ;;  %v13648_v19 = vsel %vm296_vm0, %v345_v60, %v347_v61 }
  0xcb   : > { %16874 = vst [vmem:[#allocation19_spill] sm:$0xff] %v13648_v19 }
  0xcd   : > { %v473_v39 = vpop.permute.xlu1 %472  ;;  %v463_v40 = vpop.permute.xlu0 %462 }
  0xce   : > { %v618_v44 = vmul.f32 %v473_v39, %v13591_v34  ;;  %v616_v45 = vmul.f32 %v463_v40, %v13594_v36  ;;  %1695 = vperm.xlu1 %13112, %v1649_v27   ;;  %1690 = vperm.xlu0 %13111, %v1648_v29   ;;  %v1657_v27 = vld [vmem:[#allocation7 + $0x258] sm:$0xff]  ;;  %v1656_v29 = vld [vmem:[#allocation7 + $0x250] sm:$0xff]  ;;  %v355_v39 = vrot.slane %v13642_v18, 7  ;;  %v13661_v40 = vld [vmem:[%s13546_s23 + $0x68] sm:$0xff] }
  0xd0   : > { %v680_v51 = vpack.c.bf16 %v618_v44, %v617_v38  ;;  %v679_v52 = vpack.c.bf16 %v616_v45, %v615_v43  ;;  %v353_v38 = vrot.slane %v13635_v7, 7  ;;  %v13670_v43 = vsel %vm296_vm0, %v347_v61, %v349_v13 }
  0xd1   : > { %v483_v53 = vpop.permute.xlu1 %482  ;;  %v478_v54 = vpop.permute.xlu0 %477  ;;  %16877 = vst [vmem:[#allocation22_spill] sm:$0xff] %v13670_v43 }
  0xd2   : > { %v620_v58 = vmul.f32 %v483_v53, %v13609_v49  ;;  %v619_v59 = vmul.f32 %v478_v54, %v13612_v50  ;;  %1705 = vperm.xlu1 %13112, %v1651_v41   ;;  %1700 = vperm.xlu0 %13111, %v1650_v42   ;;  %v13124_v41 = vld [vmem:[%s16614_s1 + $0x58] sm:$0xff]   ;;  %v13667_v42 = vsel %vm296_vm0, %v349_v13, %v351_v16  ;;  %v13673_v53 = vld [vmem:[%s13546_s23 + $0x70] sm:$0xff] }
  0xd3   : > { %11717 = vmatprep.mubr.bf16.mxu0 %v679_v52  ;;  %16876 = vst [vmem:[#allocation21_spill] sm:$0xff] %v13667_v42  ;;  %v1658_v52 = vld [vmem:[#allocation7 + $0x260] sm:$0xff]  ;;  %v13686_v60 = vsel %vm296_vm0, %v353_v38, %v355_v39  ;;  %v13689_v61 = vsel %vm296_vm0, %v351_v16, %v353_v38  ;;  %v1663_v38 = vld [vmem:[#allocation7 + $0x288] sm:$0xff] }
  0xd4   : > { %v681_v2 = vpack.c.bf16 %v620_v58, %v619_v59  ;;  %11718 = vmatmul.mubr.bf16.vlgmr.msra.gmra.mrb[0].mxu0 %v680_v51  ;;  %v1659_v51 = vld [vmem:[#allocation7 + $0x268] sm:$0xff]  ;;  %v13680_v58 = vld [vmem:[%s13546_s23 + $0x78] sm:$0xff]  ;;  %v13125_v59 = vld [vmem:[%s16614_s1 + $0x60] sm:$0xff]   ;;  %16878 = vst [vmem:[#allocation23_spill] sm:$0xff] %v13686_v60 }
  0xd5   : > { %11750 = vmatpush3.bf16.msra.mxu0 %v13533_v35  ;;  %v493_v3 = vpop.permute.xlu1 %492  ;;  %v488_v4 = vpop.permute.xlu0 %487  ;;  %v13123_v35 = vld [vmem:[%s16614_s1 + $0x50] sm:$0xff]   ;;  %16879 = vst [vmem:[#allocation24_spill] sm:$0xff] %v13689_v61  ;;  %v363_v16 = vrot.slane %v13680_v58, 7 }
  0xd6   : > { %v622_v11 = vmul.f32 %v493_v3, %v13628_v0  ;;  %v621_v12 = vmul.f32 %v488_v4, %v13631_v1  ;;  %1715 = vperm.xlu1 %13112, %v1653_v55   ;;  %1710 = vperm.xlu0 %13111, %v1652_v56   ;;  %v357_v56 = vrot.slane %v13654_v30, 7 }
  0xd7   : > { %11721 = vmatprep.mubr.bf16.mxu0 %v681_v2  ;;  %11751 = vmatprep.subr.bf16.mxu0 %v13122_v57 }
  0xd8   : > { %v682_v21 = vpack.c.bf16 %v622_v11, %v621_v12  ;;  %v13692_v11 = vld [vmem:[%s13546_s23 + $0x80] sm:$0xff] }
  0xd9   : > { %v503_v25 = vpop.permute.xlu1 %502  ;;  %v498_v26 = vpop.permute.xlu0 %497  ;;  %11752 = vmatpush3.bf16.msra.mxu0 %v13122_v57  ;;  %v359_v57 = vrot.slane %v13661_v40, 7 }
  0xda   : > { %v624_v31 = vmul.f32 %v503_v25, %v13648_v19  ;;  %v623_v37 = vmul.f32 %v498_v26, %v13651_v20  ;;  %1725 = vperm.xlu1 %13112, %v1655_v5   ;;  %1720 = vperm.xlu0 %13111, %v1654_v6   ;;  %v1661_v5 = vld [vmem:[#allocation7 + $0x278] sm:$0xff]  ;;  %v1660_v6 = vld [vmem:[#allocation7 + $0x270] sm:$0xff]  ;;  %v13126_v25 = vld [vmem:[%s16614_s1 + $0x68] sm:$0xff]  }
  0xdb   : > { %11753 = vmatprep.subr.bf16.mxu0 %v13123_v35  ;;  %v13705_v26 = vsel %vm296_vm0, %v357_v56, %v359_v57 }
  0xdc   : > { %v683_v44 = vpack.c.bf16 %v624_v31, %v623_v37  ;;  %11722 = vmatmul.mubr.bf16.gmra.mrb[4].mxu0 %v682_v21  ;;  %v13699_v21 = vld [vmem:[%s13546_s23 + $0x88] sm:$0xff]  ;;  %16880 = vst [vmem:[#allocation25_spill] sm:$0xff] %v13705_v26 }
  0xdd   : > { %v513_v45 = vpop.permute.xlu1 %512  ;;  %v508_v46 = vpop.permute.xlu0 %507  ;;  %11754 = vmatpush3.bf16.msra.mxu0 %v13123_v35  ;;  %v361_v35 = vrot.slane %v13673_v53, 7 }
  0xde   : > { %v626_v54 = vmul.f32 %v513_v45, %v13667_v42  ;;  %v625_v55 = vmul.f32 %v508_v46, %v13670_v43  ;;  %1735 = vperm.xlu1 %13112, %v1657_v27   ;;  %1730 = vperm.xlu0 %13111, %v1656_v29   ;;  %v13708_v27 = vsel %vm296_vm0, %v355_v39, %v357_v56  ;;  %v365_v39 = vrot.slane %v13692_v11, 7 }
  0xdf   : > { %11725 = vmatprep.mubr.bf16.mxu0 %v683_v44  ;;  %11755 = vmatprep.subr.bf16.mxu0 %v13124_v41  ;;  %16881 = vst [vmem:[#allocation26_spill] sm:$0xff] %v13708_v27  ;;  %v13711_v44 = vld [vmem:[%s13546_s23 + $0x90] sm:$0xff]  ;;  %v13727_v56 = vsel %vm296_vm0, %v359_v57, %v361_v35 }
  0xe0   : > { %v684_v2 = vpack.c.bf16 %v626_v54, %v625_v55  ;;  %v13127_v54 = vld [vmem:[%s16614_s1 + $0x70] sm:$0xff]   ;;  %v13724_v55 = vsel %vm296_vm0, %v361_v35, %v363_v16  ;;  %16883 = vst [vmem:[#allocation28_spill] sm:$0xff] %v13727_v56  ;;  %v13737_v35 = vld [vmem:[%s13546_s23 + $0xa8] sm:$0xff] }
  0xe1   : > { %v523_v3 = vpop.permute.xlu1 %522  ;;  %v518_v4 = vpop.permute.xlu0 %517  ;;  %11756 = vmatpush3.bf16.msra.mxu0 %v13124_v41  ;;  %v1662_v41 = vld [vmem:[#allocation7 + $0x280] sm:$0xff]  ;;  %16882 = vst [vmem:[#allocation27_spill] sm:$0xff] %v13724_v55 }
  0xe2   : > { %v628_v12 = vmul.f32 %v523_v3, %v13686_v60  ;;  %v627_v13 = vmul.f32 %v518_v4, %v13689_v61  ;;  %1745 = vperm.xlu1 %13112, %v1659_v51   ;;  %1740 = vperm.xlu0 %13111, %v1658_v52   ;;  %v367_v51 = vrot.slane %v13699_v21, 7  ;;  %v13718_v52 = vld [vmem:[%s13546_s23 + $0x98] sm:$0xff] }
  0xe3   : > { %11757 = vmatprep.subr.bf16.mxu0 %v13125_v59  ;;  %v1665_v4 = vld [vmem:[#allocation7 + $0x298] sm:$0xff]  ;;  %v371_v57 = vrot.slane %v13718_v52, 7 }
  0xe4   : > { %v685_v29 = vpack.c.bf16 %v628_v12, %v627_v13  ;;  %11726 = vmatmul.mubr.bf16.gmra.mrb[8].mxu0 %v684_v2 }
  0xe5   : > { %v533_v31 = vpop.permute.xlu1 %532  ;;  %v528_v37 = vpop.permute.xlu0 %527  ;;  %11758 = vmatpush3.bf16.msra.mxu0 %v13125_v59 }
  0xe6   : > { %v630_v45 = vmul.f32 %v533_v31, %v13705_v26  ;;  %v629_v46 = vmul.f32 %v528_v37, %v13708_v27  ;;  %1755 = vperm.xlu1 %13112, %v1661_v5   ;;  %1750 = vperm.xlu0 %13111, %v1660_v6   ;;  %v1664_v5 = vld [vmem:[#allocation7 + $0x290] sm:$0xff]  ;;  %v13730_v6 = vld [vmem:[%s13546_s23 + $0xa0] sm:$0xff]  ;;  %v13743_v37 = vsel %vm296_vm0, %v365_v39, %v367_v51 }
  0xe7   : > { %11729 = vmatprep.mubr.bf16.mxu0 %v685_v29  ;;  %11759 = vmatprep.subr.bf16.mxu0 %v13126_v25  ;;  %v369_v29 = vrot.slane %v13711_v44, 7  ;;  %v13128_v31 = vld [vmem:[%s16614_s1 + $0x78] sm:$0xff]   ;;  %16884 = vst [vmem:[#allocation29_spill] sm:$0xff] %v13743_v37  ;;  %v373_v33 = vrot.slane %v13730_v6, 7  ;;  %v13813_v26 = vld [vmem:[%s13546_s23 + $0xe0] sm:$0xff] }
  0xe8   : > { %v686_v59 = vpack.c.bf16 %v630_v45, %v629_v46  ;;  %v1667_v46 = vld [vmem:[#allocation7 + $0x2a8] sm:$0xff] }
  0xe9   : > { %v543_v2 = vpop.permute.xlu1 %542  ;;  %v538_v3 = vpop.permute.xlu0 %537  ;;  %11760 = vmatpush3.bf16.msra.mxu0 %v13126_v25  ;;  %v13746_v25 = vsel %vm296_vm0, %v363_v16, %v365_v39  ;;  %v375_v16 = vrot.slane %v13737_v35, 7  ;;  %v13753_v39 = vld [vmem:[%s13546_s23 + $0xb0] sm:$0xff] }
  0xea   : > { %v632_v12 = vmul.f32 %v543_v2, %v13724_v55  ;;  %v631_v13 = vmul.f32 %v538_v3, %v13727_v56  ;;  %1765 = vperm.xlu1 %13112, %v1663_v38   ;;  %1760 = vperm.xlu0 %13111, %v1662_v41   ;;  %16885 = vst [vmem:[#allocation30_spill] sm:$0xff] %v13746_v25  ;;  %v1666_v2 = vld [vmem:[#allocation7 + $0x2a0] sm:$0xff]  ;;  %v13797_v55 = vld [vmem:[%s13546_s23 + $0xd0] sm:$0xff] }
  0xeb   : > { %11761 = vmatprep.subr.bf16.mxu0 %v13127_v54 }
  0xec   : > { %v687_v38 = vpack.c.bf16 %v632_v12, %v631_v13  ;;  %11730 = vmatmul.mubr.bf16.gmra.mrb[12].mxu0 %v686_v59  ;;  %v13758_v59 = vld [vmem:[%s16614_s1 + $0x80] sm:$0xff]   ;;  %v13764_v12 = vsel %vm296_vm0, %v367_v51, %v369_v29  ;;  %v13772_v51 = vsel %vm296_vm0, %v373_v33, %v375_v16 }
  0xed   : > { %v553_v41 = vpop.permute.xlu1 %552  ;;  %v548_v45 = vpop.permute.xlu0 %547  ;;  %11762 = vmatpush3.bf16.msra.mxu0 %v13127_v54  ;;  %v13761_v54 = vsel %vm296_vm0, %v369_v29, %v371_v57  ;;  %16887 = vst [vmem:[#allocation32_spill] sm:$0xff] %v13764_v12  ;;  %16888 = vst [vmem:[#allocation33_spill] sm:$0xff] %v13772_v51  ;;  %v377_v29 = vrot.slane %v13753_v39, 7 }
  0xee   : > { %v634_v3 = vmul.f32 %v553_v41, %v13743_v37  ;;  %v633_v17 = vmul.f32 %v548_v45, %v13746_v25  ;;  %1775 = vperm.xlu1 %13112, %v1665_v4   ;;  %1770 = vperm.xlu0 %13111, %v1664_v5   ;;  %16886 = vst [vmem:[#allocation31_spill] sm:$0xff] %v13761_v54  ;;  %v13767_v5 = vld [vmem:[%s13546_s23 + $0xb8] sm:$0xff] }
  0xef   : > { %11733 = vmatprep.mubr.bf16.mxu0 %v687_v38  ;;  %11763 = vmatprep.subr.bf16.mxu0 %v13128_v31  ;;  %v1669_v38 = vld [vmem:[#allocation7 + $0x2b8] sm:$0xff]  ;;  %v1668_v25 = vld [vmem:[#allocation7 + $0x2b0] sm:$0xff] }
  0xf0   : > { %v688_v4 = vpack.c.bf16 %v634_v3, %v633_v17  ;;  %v13775_v17 = vsel %vm296_vm0, %v371_v57, %v373_v33  ;;  %v379_v3 = vrot.slane %v13767_v5, 7 }
  0xf1   : > { %v563_v13 = vpop.permute.xlu1 %562  ;;  %v558_v41 = vpop.permute.xlu0 %557  ;;  %11764 = vmatpush3.bf16.msra.mxu0 %v13128_v31  ;;  %16889 = vst [vmem:[#allocation34_spill] sm:$0xff] %v13775_v17 }
  0xf2   : > { %v636_v45 = vmul.f32 %v563_v13, %v13761_v54  ;;  %v635_v36 = vmul.f32 %v558_v41, %v13764_v12  ;;  %1785 = vperm.xlu1 %13112, %v1667_v46   ;;  %1780 = vperm.xlu0 %13111, %v1666_v2   ;;  %v13781_v13 = vld [vmem:[%s13546_s23 + $0xc0] sm:$0xff]  ;;  %v13784_v46 = vld [vmem:[%s13546_s23 + $0xc8] sm:$0xff]  ;;  %v13789_v57 = vsel %vm296_vm0, %v377_v29, %v379_v3 }
  0xf3   : > { %11797 = vmatprep.subr.bf16.mxu0 %v13758_v59  ;;  %16890 = vst [vmem:[#allocation35_spill] sm:$0xff] %v13789_v57  ;;  %v381_v54 = vrot.slane %v13781_v13, 7  ;;  %v383_v37 = vrot.slane %v13784_v46, 7 }
  0xf4   : > { %v689_v31 = vpack.c.bf16 %v636_v45, %v635_v36  ;;  %11734 = vmatmul.mubr.bf16.gmra.mrb[16].mxu0 %v688_v4  ;;  %v13792_v36 = vsel %vm296_vm0, %v375_v16, %v377_v29  ;;  %v1671_v4 = vld [vmem:[#allocation7 + $0x2c8] sm:$0xff]  ;;  %v1670_v45 = vld [vmem:[#allocation7 + $0x2c0] sm:$0xff] }
  0xf5   : > { %v573_v2 = vpop.permute.xlu1 %572  ;;  %v568_v41 = vpop.permute.xlu0 %567  ;;  %16891 = vst [vmem:[#allocation36_spill] sm:$0xff] %v13792_v36  ;;  %v13805_v16 = vsel %vm296_vm0, %v381_v54, %v383_v37  ;;  %v13808_v29 = vsel %vm296_vm0, %v379_v3, %v381_v54 }
  0xf6   : > { %v638_v12 = vmul.f32 %v573_v2, %v13772_v51  ;;  %v637_v33 = vmul.f32 %v568_v41, %v13775_v17  ;;  %1795 = vperm.xlu1 %13112, %v1669_v38   ;;  %1790 = vperm.xlu0 %13111, %v1668_v25   ;;  %v13800_v2 = vld [vmem:[%s13546_s23 + $0xd8] sm:$0xff]  ;;  %16892 = vst [vmem:[#allocation37_spill] sm:$0xff] %v13805_v16  ;;  %16893 = vst [vmem:[#allocation38_spill] sm:$0xff] %v13808_v29  ;;  %v385_v17 = vrot.slane %v13797_v55, 7 }
  0xf7   : > { %11737 = vmatprep.mubr.bf16.mxu0 %v689_v31  ;;  %v387_v51 = vrot.slane %v13800_v2, 7 }
  0xf8   : > { %v690_v56 = vpack.c.bf16 %v638_v12, %v637_v33  ;;  %v1673_v12 = vld [vmem:[#allocation7 + $0x2d8] sm:$0xff]  ;;  %v1672_v33 = vld [vmem:[#allocation7 + $0x2d0] sm:$0xff]  ;;  %v13821_v3 = vsel %vm296_vm0, %v383_v37, %v385_v17 }
  0xf9   : > { %v583_v25 = vpop.permute.xlu1 %582  ;;  %v578_v38 = vpop.permute.xlu0 %577  ;;  %v13818_v54 = vsel %vm296_vm0, %v385_v17, %v387_v51  ;;  %16895 = vst [vmem:[#allocation40_spill] sm:$0xff] %v13821_v3  ;;  %v1677_v17 = vld [vmem:[#allocation7 + $0x2f8] sm:$0xff] }
  0xfa   : > { %v640_v31 = vmul.f32 %v583_v25, %v13789_v57  ;;  %v639_v41 = vmul.f32 %v578_v38, %v13792_v36  ;;  %1805 = vperm.xlu1 %13112, %v1671_v4   ;;  %1800 = vperm.xlu0 %13111, %v1670_v45   ;;  %16894 = vst [vmem:[#allocation39_spill] sm:$0xff] %v13818_v54  ;;  %v1675_v36 = vld [vmem:[#allocation7 + $0x2e8] sm:$0xff] }
  0xfc   : > { %v691_v27 = vpack.c.bf16 %v640_v31, %v639_v41  ;;  %11738 = vmatmul.mubr.bf16.gmra.mrb[20].mxu0 %v690_v56  ;;  %v1674_v31 = vld [vmem:[#allocation7 + $0x2e0] sm:$0xff]  ;;  %v389_v56 = vrot.slane %v13813_v26, 7 }
  0xfd   : > { %v593_v25 = vpop.permute.xlu1 %592  ;;  %v588_v38 = vpop.permute.xlu0 %587 }
  0xfe   : > { %v642_v4 = vmul.f32 %v593_v25, %v13805_v16  ;;  %v641_v45 = vmul.f32 %v588_v38, %v13808_v29  ;;  %1815 = vperm.xlu1 %13112, %v1673_v12   ;;  %1810 = vperm.xlu0 %13111, %v1672_v33   ;;  %v13832_v37 = vsel %vm296_vm0, %v387_v51, %v389_v56  ;;  %v1676_v33 = vld [vmem:[#allocation7 + $0x2f0] sm:$0xff] }
  0xff   : > { %11741 = vmatprep.mubr.bf16.mxu0 %v691_v27  ;;  %v16896_v27 = vrot.slane %v13555_v10, 7  ;;  %16898 = vst [vmem:[#allocation42_spill] sm:$0xff] %v13832_v37  ;;  %v2210_v10 = vld [vmem:[#allocation7 + $0x308] sm:$0xff] }
 0x100   : > { %v692_v41 = vpack.c.bf16 %v642_v4, %v641_v45 }
 0x101   : > { %v603_v57 = vpop.permute.xlu1 %602  ;;  %v598_v61 = vpop.permute.xlu0 %597  ;;  %v13829_v12 = vsel %vm296_vm0, %v389_v56, %v16896_v27 }
 0x102   : > { %v644_v25 = vmul.f32 %v603_v57, %v13818_v54  ;;  %v643_v38 = vmul.f32 %v598_v61, %v13821_v3  ;;  %1825 = vperm.xlu1 %13112, %v1675_v36   ;;  %1820 = vperm.xlu0 %13111, %v1674_v31   ;;  %16897 = vst [vmem:[#allocation41_spill] sm:$0xff] %v13829_v12  ;;  %v2209_v36 = vld [vmem:[#allocation7 + $0x300] sm:$0xff] }
 0x104   : > { %v693_v29 = vpack.c.bf16 %v644_v25, %v643_v38  ;;  %11742 = vmatmul.mubr.bf16.gmra.mrb[24].mxu0 %v692_v41  ;;  %v2212_v41 = vld [vmem:[#allocation7 + $0x318] sm:$0xff]  ;;  %v2211_v25 = vld [vmem:[#allocation7 + $0x310] sm:$0xff] }
 0x105   : > { %v613_v4 = vpop.permute.xlu1 %612  ;;  %v608_v45 = vpop.permute.xlu0 %607 }
 0x106   : > { %v646_v57 = vmul.f32 %v613_v4, %v13829_v12  ;;  %v645_v61 = vmul.f32 %v608_v45, %v13832_v37  ;;  %1835 = vperm.xlu1 %13112, %v1677_v17   ;;  %1830 = vperm.xlu0 %13111, %v1676_v33   ;;  %v2214_v33 = vld [vmem:[#allocation7 + $0x328] sm:$0xff] }
 0x107   : > { %11745 = vmatprep.mubr.bf16.mxu0 %v693_v29 }
 0x108   : > { %v694_v31 = vpack.c.bf16 %v646_v57, %v645_v61  ;;  %v2213_v57 = vld [vmem:[#allocation7 + $0x320] sm:$0xff] }
 0x109   : > { %v1025_v27 = vpop.permute.xlu1 %1024  ;;  %v1020_v3 = vpop.permute.xlu0 %1019 }
 0x10a   : > { %v1178_v51 = vmul.f32 %v1025_v27, %v13549_v8  ;;  %v1177_v56 = vmul.f32 %v1020_v3, %v13559_v14  ;;  %2248 = vperm.xlu1 %13112, %v2210_v10   ;;  %2243 = vperm.xlu0 %13111, %v2209_v36   ;;  %v2216_v36 = vld [vmem:[#allocation7 + $0x338] sm:$0xff] }
 0x10c   : > { %v1241_v38 = vpack.c.bf16 %v1178_v51, %v1177_v56  ;;  %11746 = vmatmul.mubr.bf16.gmra.mrb[28].mxu0 %v694_v31  ;;  %v2215_v31 = vld [vmem:[#allocation7 + $0x330] sm:$0xff] }
 0x10d   : > { %v1035_v4 = vpop.permute.xlu1 %1034  ;;  %v1030_v45 = vpop.permute.xlu0 %1029 }
 0x10e   : > { %v1180_v17 = vmul.f32 %v1035_v4, %v13562_v15  ;;  %v1179_v29 = vmul.f32 %v1030_v45, %v13552_v9  ;;  %2258 = vperm.xlu1 %13112, %v2212_v41   ;;  %2253 = vperm.xlu0 %13111, %v2211_v25   ;;  %v13130_v9 = vld [vmem:[%s16614_s1 + $0x88] sm:$0xff]   ;;  %v13131_v25 = vld [vmem:[%s16614_s1 + $0x90] sm:$0xff]  }
 0x10f   : > { %11765 = vmatprep.mubr.bf16.mxu0 %v1241_v38  ;;  %v2217_v41 = vld [vmem:[#allocation7 + $0x340] sm:$0xff] }
 0x110   : > { %v1242_v8 = vpack.c.bf16 %v1180_v17, %v1179_v29  ;;  %v2219_v17 = vld [vmem:[#allocation7 + $0x350] sm:$0xff] }
 0x111   : > { %v1045_v61 = vpop.permute.xlu1 %1044  ;;  %v1040_v14 = vpop.permute.xlu0 %1039  ;;  %v13132_v29 = vld [vmem:[%s16614_s1 + $0x98] sm:$0xff]  }
 0x112   : > { %v1182_v3 = vmul.f32 %v1045_v61, %v13572_v23  ;;  %v1181_v10 = vmul.f32 %v1040_v14, %v13569_v22  ;;  %2268 = vperm.xlu1 %13112, %v2214_v33   ;;  %2263 = vperm.xlu0 %13111, %v2213_v57   ;;  %v2218_v22 = vld [vmem:[#allocation7 + $0x348] sm:$0xff]  ;;  %v2221_v14 = vld [vmem:[#allocation7 + $0x360] sm:$0xff] }
 0x114   : > { %v1243_v15 = vpack.c.bf16 %v1182_v3, %v1181_v10  ;;  %11766 = vmatmul.mubr.bf16.vlgmr.msra.gmra.mrb[0].mxu0 %v1242_v8  ;;  %v13133_v3 = vld [vmem:[%s16614_s1 + $0xa0] sm:$0xff]  }
 0x115   : > { %11798 = vmatpush3.bf16.msra.mxu0 %v13758_v59  ;;  %v1055_v27 = vpop.permute.xlu1 %1054  ;;  %v1050_v51 = vpop.permute.xlu0 %1049 }
 0x116   : > { %v1184_v56 = vmul.f32 %v1055_v27, %v13583_v32  ;;  %v1183_v23 = vmul.f32 %v1050_v51, %v13575_v24  ;;  %2278 = vperm.xlu1 %13112, %v2216_v36   ;;  %2273 = vperm.xlu0 %13111, %v2215_v31   ;;  %v2220_v24 = vld [vmem:[#allocation7 + $0x358] sm:$0xff]  ;;  %v13134_v27 = vld [vmem:[%s16614_s1 + $0xa8] sm:$0xff]  }
 0x117   : > { %11769 = vmatprep.mubr.bf16.mxu0 %v1243_v15  ;;  %11799 = vmatprep.subr.bf16.mxu0 %v13130_v9  ;;  %v2223_v15 = vld [vmem:[#allocation7 + $0x370] sm:$0xff] }
 0x118   : > { %v1244_v38 = vpack.c.bf16 %v1184_v56, %v1183_v23 }
 0x119   : > { %v1065_v4 = vpop.permute.xlu1 %1064  ;;  %v1060_v45 = vpop.permute.xlu0 %1059  ;;  %11800 = vmatpush3.bf16.msra.mxu0 %v13130_v9 }
 0x11a   : > { %v1186_v59 = vmul.f32 %v1065_v4, %v13606_v48  ;;  %v1185_v32 = vmul.f32 %v1060_v45, %v13603_v47  ;;  %2288 = vperm.xlu1 %13112, %v2218_v22   ;;  %2283 = vperm.xlu0 %13111, %v2217_v41   ;;  %v2222_v47 = vld [vmem:[#allocation7 + $0x368] sm:$0xff]  ;;  %v2225_v41 = vld [vmem:[#allocation7 + $0x380] sm:$0xff] }
 0x11b   : > { %11801 = vmatprep.subr.bf16.mxu0 %v13131_v25 }
 0x11c   : > { %v1245_v33 = vpack.c.bf16 %v1186_v59, %v1185_v32  ;;  %11770 = vmatmul.mubr.bf16.gmra.mrb[4].mxu0 %v1244_v38  ;;  %v2227_v32 = vld [vmem:[#allocation7 + $0x390] sm:$0xff] }
 0x11d   : > { %v1075_v57 = vpop.permute.xlu1 %1074  ;;  %v1070_v8 = vpop.permute.xlu0 %1069  ;;  %11802 = vmatpush3.bf16.msra.mxu0 %v13131_v25  ;;  %v13135_v25 = vld [vmem:[%s16614_s1 + $0xb0] sm:$0xff]  }
 0x11e   : > { %v1188_v61 = vmul.f32 %v1075_v57, %v13625_v63  ;;  %v1187_v48 = vmul.f32 %v1070_v8, %v13622_v62  ;;  %2298 = vperm.xlu1 %13112, %v2220_v24   ;;  %2293 = vperm.xlu0 %13111, %v2219_v17   ;;  %v2224_v62 = vld [vmem:[#allocation7 + $0x378] sm:$0xff] }
 0x11f   : > { %11773 = vmatprep.mubr.bf16.mxu0 %v1245_v33  ;;  %11803 = vmatprep.subr.bf16.mxu0 %v13132_v29  ;;  %v13136_v24 = vld [vmem:[%s16614_s1 + $0xb8] sm:$0xff]  }
 0x120   : > { %v1246_v10 = vpack.c.bf16 %v1188_v61, %v1187_v48  ;;  %v2230_v61 = vld [vmem:[#allocation7 + $0x3a8] sm:$0xff]  ;;  %v2229_v48 = vld [vmem:[#allocation7 + $0x3a0] sm:$0xff] }
 0x121   : > { %v1085_v36 = vpop.permute.xlu1 %1084  ;;  %v1080_v31 = vpop.permute.xlu0 %1079  ;;  %11804 = vmatpush3.bf16.msra.mxu0 %v13132_v29 }
 0x122   : > { %v1190_v9 = vmul.f32 %v1085_v36, %v13642_v18  ;;  %v1189_v63 = vmul.f32 %v1080_v31, %v13635_v7  ;;  %2308 = vperm.xlu1 %13112, %v2222_v47   ;;  %2303 = vperm.xlu0 %13111, %v2221_v14   ;;  %v2226_v7 = vld [vmem:[#allocation7 + $0x388] sm:$0xff]  ;;  %v13881_v47 = vld [vmem:[%s16614_s1 + $0xc0] sm:$0xff]  }
 0x123   : > { %11805 = vmatprep.subr.bf16.mxu0 %v13133_v3 }
 0x124   : > { %v1247_v51 = vpack.c.bf16 %v1190_v9, %v1189_v63  ;;  %11774 = vmatmul.mubr.bf16.gmra.mrb[8].mxu0 %v1246_v10  ;;  %v2232_v9 = vld [vmem:[#allocation7 + $0x3b8] sm:$0xff]  ;;  %v2231_v63 = vld [vmem:[#allocation7 + $0x3b0] sm:$0xff] }
 0x125   : > { %v1095_v56 = vpop.permute.xlu1 %1094  ;;  %v1090_v23 = vpop.permute.xlu0 %1089  ;;  %11806 = vmatpush3.bf16.msra.mxu0 %v13133_v3 }
 0x126   : > { %v1192_v22 = vmul.f32 %v1095_v56, %v13661_v40  ;;  %v1191_v18 = vmul.f32 %v1090_v23, %v13654_v30  ;;  %2318 = vperm.xlu1 %13112, %v2224_v62   ;;  %2313 = vperm.xlu0 %13111, %v2223_v15   ;;  %v2228_v30 = vld [vmem:[#allocation7 + $0x398] sm:$0xff]  ;;  %v2234_v23 = vld [vmem:[#allocation7 + $0x3c8] sm:$0xff] }
 0x127   : > { %11777 = vmatprep.mubr.bf16.mxu0 %v1247_v51  ;;  %11807 = vmatprep.subr.bf16.mxu0 %v13134_v27 }
 0x128   : > { %v1248_v38 = vpack.c.bf16 %v1192_v22, %v1191_v18  ;;  %v2233_v22 = vld [vmem:[#allocation7 + $0x3c0] sm:$0xff] }
 0x129   : > { %v1105_v4 = vpop.permute.xlu1 %1104  ;;  %v1100_v45 = vpop.permute.xlu0 %1099  ;;  %11808 = vmatpush3.bf16.msra.mxu0 %v13134_v27 }
 0x12a   : > { %v1194_v59 = vmul.f32 %v1105_v4, %v13680_v58  ;;  %v1193_v40 = vmul.f32 %v1100_v45, %v13673_v53  ;;  %2328 = vperm.xlu1 %13112, %v2226_v7   ;;  %2323 = vperm.xlu0 %13111, %v2225_v41   ;;  %v2236_v4 = vld [vmem:[#allocation7 + $0x3d8] sm:$0xff]  ;;  %v2235_v45 = vld [vmem:[#allocation7 + $0x3d0] sm:$0xff] }
 0x12b   : > { %11809 = vmatprep.subr.bf16.mxu0 %v13135_v25 }
 0x12c   : > { %v1249_v17 = vpack.c.bf16 %v1194_v59, %v1193_v40  ;;  %11778 = vmatmul.mubr.bf16.gmra.mrb[12].mxu0 %v1248_v38 }
 0x12d   : > { %v1115_v29 = vpop.permute.xlu1 %1114  ;;  %v1110_v33 = vpop.permute.xlu0 %1109  ;;  %11810 = vmatpush3.bf16.msra.mxu0 %v13135_v25 }
 0x12e   : > { %v1196_v57 = vmul.f32 %v1115_v29, %v13699_v21  ;;  %v1195_v8 = vmul.f32 %v1110_v33, %v13692_v11  ;;  %2338 = vperm.xlu1 %13112, %v2228_v30   ;;  %2333 = vperm.xlu0 %13111, %v2227_v32   ;;  %v2237_v29 = vld [vmem:[#allocation7 + $0x3e0] sm:$0xff] }
 0x12f   : > { %11781 = vmatprep.mubr.bf16.mxu0 %v1249_v17  ;;  %11811 = vmatprep.subr.bf16.mxu0 %v13136_v24  ;;  %v2238_v17 = vld [vmem:[#allocation7 + $0x3e8] sm:$0xff] }
 0x130   : > { %v1250_v14 = vpack.c.bf16 %v1196_v57, %v1195_v8 }
 0x131   : > { %v1125_v3 = vpop.permute.xlu1 %1124  ;;  %v1120_v10 = vpop.permute.xlu0 %1119  ;;  %11812 = vmatpush3.bf16.msra.mxu0 %v13136_v24 }
 0x132   : > { %v1198_v36 = vmul.f32 %v1125_v3, %v13718_v52  ;;  %v1197_v31 = vmul.f32 %v1120_v10, %v13711_v44  ;;  %2348 = vperm.xlu1 %13112, %v2230_v61   ;;  %2343 = vperm.xlu0 %13111, %v2229_v48   ;;  %v2239_v3 = vld [vmem:[#allocation7 + $0x3f0] sm:$0xff] }
 0x133   : > { %11845 = vmatprep.subr.bf16.mxu0 %v13881_v47  ;;  %v13257_v10 = vld [vmem:[%s13546_s23 + $0xf8] sm:$0xff] }
 0x134   : > { %v1251_v62 = vpack.c.bf16 %v1198_v36, %v1197_v31  ;;  %11782 = vmatmul.mubr.bf16.gmra.mrb[16].mxu0 %v1250_v14  ;;  %v2240_v14 = vld [vmem:[#allocation7 + $0x3f8] sm:$0xff]  ;;  %v1549_v36 = vrot.slane %v13257_v10, 1 }
 0x135   : > { %v1135_v15 = vpop.permute.xlu1 %1134  ;;  %v1130_v27 = vpop.permute.xlu0 %1129  ;;  %v13896_v31 = vld [vmem:[%s13546_s23] sm:$0xff] }
 0x136   : > { %v1200_v51 = vmul.f32 %v1135_v15, %v13737_v35  ;;  %v1199_v56 = vmul.f32 %v1130_v27, %v13730_v6  ;;  %2358 = vperm.xlu1 %13112, %v2232_v9   ;;  %2353 = vperm.xlu0 %13111, %v2231_v63   ;;  %v1553_v9 = vrot.slane %v13896_v31, 1  ;;  %v13900_v63 = vld [vmem:[%s13546_s23 + $0xf0] sm:$0xff] }
 0x137   : > { %11785 = vmatprep.mubr.bf16.mxu0 %v1251_v62  ;;  %v16655_v62 = vrot.slane %v13900_v63, 1 }
 0x138   : > { %v1252_v18 = vpack.c.bf16 %v1200_v51, %v1199_v56  ;;  %v13904_v56 = vld [vmem:[%s13546_s23 + $0xe8] sm:$0xff] }
 0x139   : > { %v1145_v7 = vpop.permute.xlu1 %1144  ;;  %v1140_v41 = vpop.permute.xlu0 %1139 }
 0x13a   : > { %v1202_v25 = vmul.f32 %v1145_v7, %v13767_v5  ;;  %v1201_v38 = vmul.f32 %v1140_v41, %v13753_v39  ;;  %2368 = vperm.xlu1 %13112, %v2234_v23   ;;  %2363 = vperm.xlu0 %13111, %v2233_v22   ;;  %v13914_v7 = vsel %vm1547_vm1, %v16655_v62, %v1549_v36  ;;  %v3111_v41 = vld [vmem:[#allocation7 + $0x508] sm:$0xff] }
 0x13b   : > { %16900 = vst [vmem:[#allocation44_spill] sm:$0xff] %v13914_v7 }
 0x13c   : > { %v1253_v59 = vpack.c.bf16 %v1202_v25, %v1201_v38  ;;  %11786 = vmatmul.mubr.bf16.gmra.mrb[20].mxu0 %v1252_v18  ;;  %v13909_v18 = vsel %vm1547_vm1, %v1549_v36, %v1553_v9  ;;  %v3110_v25 = vld [vmem:[#allocation7 + $0x500] sm:$0xff] }
 0x13d   : > { %v1155_v40 = vpop.permute.xlu1 %1154  ;;  %v1150_v30 = vpop.permute.xlu0 %1149  ;;  %16899 = vst [vmem:[#allocation43_spill] sm:$0xff] %v13909_v18  ;;  %v13917_v38 = vld [vmem:[%s13546_s23 + $0x8] sm:$0xff] }
 0x13e   : > { %v1204_v32 = vmul.f32 %v1155_v40, %v13784_v46  ;;  %v1203_v24 = vmul.f32 %v1150_v30, %v13781_v13  ;;  %2378 = vperm.xlu1 %13112, %v2236_v4   ;;  %2373 = vperm.xlu0 %13111, %v2235_v45   ;;  %v1554_v4 = vrot.slane %v13917_v38, 1  ;;  %v13921_v45 = vld [vmem:[%s13546_s23 + $0x10] sm:$0xff] }
 0x13f   : > { %11789 = vmatprep.mubr.bf16.mxu0 %v1253_v59  ;;  %v1556_v59 = vrot.slane %v13921_v45, 1 }
 0x140   : > { %v1254_v33 = vpack.c.bf16 %v1204_v32, %v1203_v24 }
 0x141   : > { %v1165_v57 = vpop.permute.xlu1 %1164  ;;  %v1160_v8 = vpop.permute.xlu0 %1159 }
 0x142   : > { %v1206_v61 = vmul.f32 %v1165_v57, %v13800_v2  ;;  %v1205_v48 = vmul.f32 %v1160_v8, %v13797_v55  ;;  %2388 = vperm.xlu1 %13112, %v2238_v17   ;;  %2383 = vperm.xlu0 %13111, %v2237_v29   ;;  %v13927_v29 = vsel %vm1547_vm1, %v1554_v4, %v1556_v59  ;;  %v3113_v57 = vld [vmem:[#allocation7 + $0x518] sm:$0xff]  ;;  %v3112_v8 = vld [vmem:[#allocation7 + $0x510] sm:$0xff] }
 0x143   : > { %16901 = vst [vmem:[#allocation45_spill] sm:$0xff] %v13927_v29 }
 0x144   : > { %v1255_v15 = vpack.c.bf16 %v1206_v61, %v1205_v48  ;;  %11790 = vmatmul.mubr.bf16.gmra.mrb[24].mxu0 %v1254_v33  ;;  %v13930_v33 = vsel %vm1547_vm1, %v1553_v9, %v1554_v4  ;;  %v13933_v61 = vld [vmem:[%s13546_s23 + $0x18] sm:$0xff] }
 0x145   : > { %v1175_v27 = vpop.permute.xlu1 %1174  ;;  %v1170_v51 = vpop.permute.xlu0 %1169  ;;  %16902 = vst [vmem:[#allocation46_spill] sm:$0xff] %v13930_v33  ;;  %v1558_v48 = vrot.slane %v13933_v61, 1 }
 0x146   : > { %v1208_v23 = vmul.f32 %v13904_v56, %v1175_v27  ;;  %v1207_v22 = vmul.f32 %v1170_v51, %v13813_v26  ;;  %2398 = vperm.xlu1 %13112, %v2240_v14   ;;  %2393 = vperm.xlu0 %13111, %v2239_v3   ;;  %v13937_v14 = vld [vmem:[%s13546_s23 + $0x20] sm:$0xff] }
 0x147   : > { %11793 = vmatprep.mubr.bf16.mxu0 %v1255_v15  ;;  %v1560_v3 = vrot.slane %v13937_v14, 1 }
 0x148   : > { %v1256_v40 = vpack.c.bf16 %v1208_v23, %v1207_v22  ;;  %v13946_v23 = vsel %vm1547_vm1, %v1556_v59, %v1558_v48  ;;  %v3115_v22 = vld [vmem:[#allocation7 + $0x528] sm:$0xff] }
 0x149   : > { %v1686_v30 = vpop.permute.xlu1 %1685  ;;  %v1681_v32 = vpop.permute.xlu0 %1680  ;;  %v13943_v51 = vsel %vm1547_vm1, %v1558_v48, %v1560_v3  ;;  %16904 = vst [vmem:[#allocation48_spill] sm:$0xff] %v13946_v23 }
 0x14a   : > { %v1839_v24 = vmul.f32 %v1686_v30, %v13909_v18  ;;  %v1838_v17 = vmul.f32 %v1681_v32, %v13914_v7  ;;  %3149 = vperm.xlu1 %13112, %v3111_v41   ;;  %3144 = vperm.xlu0 %13111, %v3110_v25   ;;  %16903 = vst [vmem:[#allocation47_spill] sm:$0xff] %v13943_v51  ;;  %v3114_v41 = vld [vmem:[#allocation7 + $0x520] sm:$0xff] }
 0x14b   : > { %v13949_v25 = vld [vmem:[%s13546_s23 + $0x28] sm:$0xff] }
 0x14c   : > { %v1902_v10 = vpack.c.bf16 %v1839_v24, %v1838_v17  ;;  %11794 = vmatmul.mubr.bf16.gmra.mrb[28].mxu0 %v1256_v40  ;;  %v1562_v4 = vrot.slane %v13949_v25, 1  ;;  %v13953_v40 = vld [vmem:[%s13546_s23 + $0x30] sm:$0xff] }
 0x14d   : > { %v1696_v36 = vpop.permute.xlu1 %1695  ;;  %v1691_v15 = vpop.permute.xlu0 %1690  ;;  %v1564_v30 = vrot.slane %v13953_v40, 1 }
 0x14e   : > { %v1841_v27 = vmul.f32 %v1696_v36, %v13927_v29  ;;  %v1840_v9 = vmul.f32 %v1691_v15, %v13930_v33  ;;  %3159 = vperm.xlu1 %13112, %v3113_v57   ;;  %3154 = vperm.xlu0 %13111, %v3112_v8   ;;  %v13962_v48 = vsel %vm1547_vm1, %v1560_v3, %v1562_v4  ;;  %v3116_v36 = vld [vmem:[#allocation7 + $0x530] sm:$0xff] }
 0x14f   : > { %11813 = vmatprep.mubr.bf16.mxu0 %v1902_v10  ;;  %v13959_v8 = vsel %vm1547_vm1, %v1562_v4, %v1564_v30  ;;  %16906 = vst [vmem:[#allocation50_spill] sm:$0xff] %v13962_v48  ;;  %v3117_v10 = vld [vmem:[#allocation7 + $0x538] sm:$0xff]  ;;  %v3120_v33 = vld [vmem:[#allocation7 + $0x550] sm:$0xff] }
 0x150   : > { %v1903_v32 = vpack.c.bf16 %v1841_v27, %v1840_v9  ;;  %16905 = vst [vmem:[#allocation49_spill] sm:$0xff] %v13959_v8  ;;  %v13965_v15 = vld [vmem:[%s13546_s23 + $0x38] sm:$0xff]  ;;  %v13969_v9 = vld [vmem:[%s13546_s23 + $0x40] sm:$0xff] }
 0x151   : > { %v1706_v24 = vpop.permute.xlu1 %1705  ;;  %v1701_v17 = vpop.permute.xlu0 %1700  ;;  %v1566_v27 = vrot.slane %v13965_v15, 1  ;;  %v14004_v29 = vld [vmem:[%s13546_s23 + $0x58] sm:$0xff] }
 0x152   : > { %v1843_v57 = vmul.f32 %v1706_v24, %v13943_v51  ;;  %v1842_v59 = vmul.f32 %v1701_v17, %v13946_v23  ;;  %3169 = vperm.xlu1 %13112, %v3115_v22   ;;  %3164 = vperm.xlu0 %13111, %v3114_v41   ;;  %v1568_v24 = vrot.slane %v13969_v9, 1  ;;  %v13138_v22 = vld [vmem:[%s16614_s1 + $0xc8] sm:$0xff]   ;;  %v3121_v51 = vld [vmem:[#allocation7 + $0x558] sm:$0xff]  ;;  %16911 = vst [vmem:[#allocation55_spill] sm:$0xff] %v14004_v29 }
 0x153   : > { %v13982_v18 = vsel %vm1547_vm1, %v1564_v30, %v1566_v27 }
 0x154   : > { %v1904_v41 = vpack.c.bf16 %v1843_v57, %v1842_v59  ;;  %11814 = vmatmul.mubr.bf16.vlgmr.msra.gmra.mrb[0].mxu0 %v1903_v32  ;;  %v13979_v7 = vsel %vm1547_vm1, %v1566_v27, %v1568_v24  ;;  %16908 = vst [vmem:[#allocation52_spill] sm:$0xff] %v13982_v18  ;;  %v3119_v57 = vld [vmem:[#allocation7 + $0x548] sm:$0xff]  ;;  %v3118_v32 = vld [vmem:[#allocation7 + $0x540] sm:$0xff] }
 0x155   : > { %11846 = vmatpush3.bf16.msra.mxu0 %v13881_v47  ;;  %v1716_v3 = vpop.permute.xlu1 %1715  ;;  %v1711_v4 = vpop.permute.xlu0 %1710  ;;  %16907 = vst [vmem:[#allocation51_spill] sm:$0xff] %v13979_v7  ;;  %v13985_v59 = vld [vmem:[%s13546_s23 + $0x48] sm:$0xff] }
 0x156   : > { %v1845_v17 = vmul.f32 %v1716_v3, %v13959_v8  ;;  %v1844_v62 = vmul.f32 %v1711_v4, %v13962_v48  ;;  %3179 = vperm.xlu1 %13112, %v3117_v10   ;;  %3174 = vperm.xlu0 %13111, %v3116_v36   ;;  %v1570_v47 = vrot.slane %v13985_v59, 1  ;;  %v13989_v3 = vld [vmem:[%s13546_s23 + $0x50] sm:$0xff] }
 0x157   : > { %11817 = vmatprep.mubr.bf16.mxu0 %v1904_v41  ;;  %11847 = vmatprep.subr.bf16.mxu0 %v13138_v22  ;;  %v1572_v10 = vrot.slane %v13989_v3, 1  ;;  %v13139_v36 = vld [vmem:[%s16614_s1 + $0xd0] sm:$0xff]  }
 0x158   : > { %v1905_v41 = vpack.c.bf16 %v1845_v17, %v1844_v62  ;;  %v14001_v23 = vsel %vm1547_vm1, %v1568_v24, %v1570_v47  ;;  %v1574_v62 = vrot.slane %v14004_v29, 1  ;;  %v14008_v17 = vld [vmem:[%s13546_s23 + $0x60] sm:$0xff] }
 0x159   : > { %v1726_v30 = vpop.permute.xlu1 %1725  ;;  %v1721_v27 = vpop.permute.xlu0 %1720  ;;  %11848 = vmatpush3.bf16.msra.mxu0 %v13138_v22  ;;  %v13998_v8 = vsel %vm1547_vm1, %v1570_v47, %v1572_v10  ;;  %16910 = vst [vmem:[#allocation54_spill] sm:$0xff] %v14001_v23  ;;  %16912 = vst [vmem:[#allocation56_spill] sm:$0xff] %v14008_v17  ;;  %v1576_v22 = vrot.slane %v14008_v17, 1  ;;  %v3123_v17 = vld [vmem:[#allocation7 + $0x568] sm:$0xff]  ;;  %v3122_v29 = vld [vmem:[#allocation7 + $0x560] sm:$0xff] }
 0x15a   : > { %v1847_v4 = vmul.f32 %v1726_v30, %v13979_v7  ;;  %v1846_v48 = vmul.f32 %v1721_v27, %v13982_v18  ;;  %3189 = vperm.xlu1 %13112, %v3119_v57   ;;  %3184 = vperm.xlu0 %13111, %v3118_v32   ;;  %16909 = vst [vmem:[#allocation53_spill] sm:$0xff] %v13998_v8  ;;  %v13140_v57 = vld [vmem:[%s16614_s1 + $0xd8] sm:$0xff]  }
 0x15b   : > { %11849 = vmatprep.subr.bf16.mxu0 %v13139_v36  ;;  %v14017_v18 = vsel %vm1547_vm1, %v1574_v62, %v1576_v22  ;;  %v14020_v7 = vsel %vm1547_vm1, %v1572_v10, %v1574_v62 }
 0x15c   : > { %v1906_v32 = vpack.c.bf16 %v1847_v4, %v1846_v48  ;;  %11818 = vmatmul.mubr.bf16.gmra.mrb[4].mxu0 %v1905_v41  ;;  %v14023_v48 = vld [vmem:[%s13546_s23 + $0x68] sm:$0xff] }
 0x15d   : > { %v1736_v24 = vpop.permute.xlu1 %1735  ;;  %v1731_v47 = vpop.permute.xlu0 %1730  ;;  %11850 = vmatpush3.bf16.msra.mxu0 %v13139_v36  ;;  %v1578_v41 = vrot.slane %v14023_v48, 1  ;;  %v1580_v36 = vrot.slane %v13673_v53, 1 }
 0x15e   : > { %v1849_v30 = vmul.f32 %v1736_v24, %v13998_v8  ;;  %v1848_v27 = vmul.f32 %v1731_v47, %v14001_v23  ;;  %3199 = vperm.xlu1 %13112, %v3121_v51   ;;  %3194 = vperm.xlu0 %13111, %v3120_v33   ;;  %v13141_v33 = vld [vmem:[%s16614_s1 + $0xe0] sm:$0xff]   ;;  %v3124_v23 = vld [vmem:[#allocation7 + $0x570] sm:$0xff]  ;;  %v1582_v8 = vrot.slane %v13680_v58, 1 }
 0x15f   : > { %11821 = vmatprep.mubr.bf16.mxu0 %v1906_v32  ;;  %11851 = vmatprep.subr.bf16.mxu0 %v13140_v57  ;;  %v14033_v24 = vsel %vm1547_vm1, %v1578_v41, %v1580_v36  ;;  %v14036_v53 = vsel %vm1547_vm1, %v1576_v22, %v1578_v41  ;;  %v3125_v47 = vld [vmem:[#allocation7 + $0x578] sm:$0xff]  ;;  %v3127_v41 = vld [vmem:[#allocation7 + $0x588] sm:$0xff] }
 0x160   : > { %v1907_v51 = vpack.c.bf16 %v1849_v30, %v1848_v27  ;;  %v1584_v30 = vrot.slane %v13692_v11, 1  ;;  %v14049_v11 = vsel %vm1547_vm1, %v1580_v36, %v1582_v8 }
 0x161   : > { %v1746_v4 = vpop.permute.xlu1 %1745  ;;  %v1741_v32 = vpop.permute.xlu0 %1740  ;;  %11852 = vmatpush3.bf16.msra.mxu0 %v13140_v57  ;;  %v13142_v57 = vld [vmem:[%s16614_s1 + $0xe8] sm:$0xff]  }
 0x162   : > { %v1851_v10 = vmul.f32 %v1746_v4, %v14017_v18  ;;  %v1850_v62 = vmul.f32 %v1741_v32, %v14020_v7  ;;  %3209 = vperm.xlu1 %13112, %v3123_v17   ;;  %3204 = vperm.xlu0 %13111, %v3122_v29   ;;  %v14046_v58 = vsel %vm1547_vm1, %v1582_v8, %v1584_v30  ;;  %v3126_v32 = vld [vmem:[#allocation7 + $0x580] sm:$0xff] }
 0x163   : > { %11853 = vmatprep.subr.bf16.mxu0 %v13141_v33 }
 0x164   : > { %v1908_v27 = vpack.c.bf16 %v1851_v10, %v1850_v62  ;;  %11822 = vmatmul.mubr.bf16.gmra.mrb[8].mxu0 %v1907_v51  ;;  %v1586_v51 = vrot.slane %v13699_v21, 1  ;;  %v1588_v10 = vrot.slane %v13711_v44, 1  ;;  %v3129_v44 = vld [vmem:[#allocation7 + $0x598] sm:$0xff] }
 0x165   : > { %v1756_v29 = vpop.permute.xlu1 %1755  ;;  %v1751_v17 = vpop.permute.xlu0 %1750  ;;  %11854 = vmatpush3.bf16.msra.mxu0 %v13141_v33  ;;  %v13143_v33 = vld [vmem:[%s16614_s1 + $0xf0] sm:$0xff]  }
 0x166   : > { %v1853_v4 = vmul.f32 %v1756_v29, %v14033_v24  ;;  %v1852_v22 = vmul.f32 %v1751_v17, %v14036_v53  ;;  %3219 = vperm.xlu1 %13112, %v3125_v47   ;;  %3214 = vperm.xlu0 %13111, %v3124_v23   ;;  %v14059_v36 = vsel %vm1547_vm1, %v1586_v51, %v1588_v10  ;;  %v3128_v29 = vld [vmem:[#allocation7 + $0x590] sm:$0xff]  ;;  %v1590_v17 = vrot.slane %v13718_v52, 1 }
 0x167   : > { %11825 = vmatprep.mubr.bf16.mxu0 %v1908_v27  ;;  %11855 = vmatprep.subr.bf16.mxu0 %v13142_v57  ;;  %v14062_v21 = vsel %vm1547_vm1, %v1584_v30, %v1586_v51  ;;  %v3131_v51 = vld [vmem:[#allocation7 + $0x5a8] sm:$0xff] }
 0x168   : > { %v1909_v62 = vpack.c.bf16 %v1853_v4, %v1852_v22  ;;  %v1592_v4 = vrot.slane %v13730_v6, 1  ;;  %v14075_v6 = vsel %vm1547_vm1, %v1588_v10, %v1590_v17 }
 0x169   : > { %v1766_v23 = vpop.permute.xlu1 %1765  ;;  %v1761_v47 = vpop.permute.xlu0 %1760  ;;  %11856 = vmatpush3.bf16.msra.mxu0 %v13142_v57  ;;  %v13144_v57 = vld [vmem:[%s16614_s1 + $0xf8] sm:$0xff]  }
 0x16a   : > { %v1855_v27 = vmul.f32 %v1766_v23, %v14046_v58  ;;  %v1854_v8 = vmul.f32 %v1761_v47, %v14049_v11  ;;  %3229 = vperm.xlu1 %13112, %v3127_v41   ;;  %3224 = vperm.xlu0 %13111, %v3126_v32   ;;  %v14072_v52 = vsel %vm1547_vm1, %v1590_v17, %v1592_v4  ;;  %v3130_v47 = vld [vmem:[#allocation7 + $0x5a0] sm:$0xff]  ;;  %v3133_v17 = vld [vmem:[#allocation7 + $0x5b8] sm:$0xff] }
 0x16b   : > { %11857 = vmatprep.subr.bf16.mxu0 %v13143_v33 }
 0x16c   : > { %v1910_v22 = vpack.c.bf16 %v1855_v27, %v1854_v8  ;;  %11826 = vmatmul.mubr.bf16.gmra.mrb[12].mxu0 %v1909_v62  ;;  %v1594_v62 = vrot.slane %v13737_v35, 1  ;;  %v1596_v27 = vrot.slane %v13753_v39, 1 }
 0x16d   : > { %v1776_v41 = vpop.permute.xlu1 %1775  ;;  %v1771_v32 = vpop.permute.xlu0 %1770  ;;  %11858 = vmatpush3.bf16.msra.mxu0 %v13143_v33  ;;  %v14082_v33 = vld [vmem:[%s16614_s1 + $0x100] sm:$0xff]  }
 0x16e   : > { %v1857_v23 = vmul.f32 %v1776_v41, %v14059_v36  ;;  %v1856_v30 = vmul.f32 %v1771_v32, %v14062_v21  ;;  %3239 = vperm.xlu1 %13112, %v3129_v44   ;;  %3234 = vperm.xlu0 %13111, %v3128_v29   ;;  %v14087_v35 = vsel %vm1547_vm1, %v1594_v62, %v1596_v27  ;;  %v3132_v41 = vld [vmem:[#allocation7 + $0x5b0] sm:$0xff]  ;;  %v1598_v32 = vrot.slane %v13767_v5, 1 }
 0x16f   : > { %11829 = vmatprep.mubr.bf16.mxu0 %v1910_v22  ;;  %11859 = vmatprep.subr.bf16.mxu0 %v13144_v57  ;;  %v14090_v39 = vsel %vm1547_vm1, %v1592_v4, %v1594_v62  ;;  %v3134_v62 = vld [vmem:[#allocation7 + $0x5c0] sm:$0xff] }
 0x170   : > { %v1911_v8 = vpack.c.bf16 %v1857_v23, %v1856_v30  ;;  %16913 = vst [vmem:[#allocation57_spill] sm:$0xff] %v14090_v39  ;;  %v1600_v23 = vrot.slane %v13781_v13, 1  ;;  %v14101_v5 = vsel %vm1547_vm1, %v1596_v27, %v1598_v32  ;;  %v3135_v13 = vld [vmem:[#allocation7 + $0x5c8] sm:$0xff] }
 0x171   : > { %v1786_v44 = vpop.permute.xlu1 %1785  ;;  %v1781_v29 = vpop.permute.xlu0 %1780  ;;  %11860 = vmatpush3.bf16.msra.mxu0 %v13144_v57  ;;  %16915 = vst [vmem:[#allocation59_spill] sm:$0xff] %v14101_v5 }
 0x172   : > { %v1859_v22 = vmul.f32 %v1786_v44, %v14072_v52  ;;  %v1858_v10 = vmul.f32 %v1781_v29, %v14075_v6  ;;  %3249 = vperm.xlu1 %13112, %v3131_v51   ;;  %3244 = vperm.xlu0 %13111, %v3130_v47   ;;  %v14098_v4 = vsel %vm1547_vm1, %v1598_v32, %v1600_v23  ;;  %v1602_v29 = vrot.slane %v13784_v46, 1  ;;  %v3137_v32 = vld [vmem:[#allocation7 + $0x5d8] sm:$0xff] }
 0x173   : > { %11893 = vmatprep.subr.bf16.mxu0 %v14082_v33  ;;  %16914 = vst [vmem:[#allocation58_spill] sm:$0xff] %v14098_v4  ;;  %v1606_v46 = vrot.slane %v13800_v2, 1  ;;  %v3139_v2 = vld [vmem:[#allocation7 + $0x5e8] sm:$0xff] }
 0x174   : > { %v1912_v57 = vpack.c.bf16 %v1859_v22, %v1858_v10  ;;  %11830 = vmatmul.mubr.bf16.gmra.mrb[16].mxu0 %v1911_v8  ;;  %v1604_v8 = vrot.slane %v13797_v55, 1  ;;  %v14111_v27 = vsel %vm1547_vm1, %v1600_v23, %v1602_v29  ;;  %v1608_v55 = vrot.slane %v13813_v26, 1 }
 0x175   : > { %v1796_v30 = vpop.permute.xlu1 %1795  ;;  %v1791_v44 = vpop.permute.xlu0 %1790  ;;  %16917 = vst [vmem:[#allocation61_spill] sm:$0xff] %v14111_v27  ;;  %v1610_v26 = vrot.slane %v13904_v56, 1 }
 0x176   : > { %v1861_v51 = vmul.f32 %v1796_v30, %v14087_v35  ;;  %v1860_v47 = vmul.f32 %v1791_v44, %v14090_v39  ;;  %3259 = vperm.xlu1 %13112, %v3133_v17   ;;  %3254 = vperm.xlu0 %13111, %v3132_v41   ;;  %v14108_v41 = vsel %vm1547_vm1, %v1602_v29, %v1604_v8  ;;  %v3138_v29 = vld [vmem:[#allocation7 + $0x5e0] sm:$0xff] }
 0x177   : > { %11833 = vmatprep.mubr.bf16.mxu0 %v1912_v57  ;;  %16916 = vst [vmem:[#allocation60_spill] sm:$0xff] %v14108_v41  ;;  %v3136_v57 = vld [vmem:[#allocation7 + $0x5d0] sm:$0xff]  ;;  %v14118_v23 = vsel %vm1547_vm1, %v1606_v46, %v1608_v55 }
 0x178   : > { %v1913_v22 = vpack.c.bf16 %v1861_v51, %v1860_v47  ;;  %16918 = vst [vmem:[#allocation62_spill] sm:$0xff] %v14118_v23 }
 0x179   : > { %v1806_v10 = vpop.permute.xlu1 %1805  ;;  %v1801_v30 = vpop.permute.xlu0 %1800 }
 0x17a   : > { %v1863_v44 = vmul.f32 %v1806_v10, %v14098_v4  ;;  %v1862_v17 = vmul.f32 %v1801_v30, %v14101_v5  ;;  %3269 = vperm.xlu1 %13112, %v3135_v13   ;;  %3264 = vperm.xlu0 %13111, %v3134_v62   ;;  %v14121_v62 = vsel %vm1547_vm1, %v1604_v8, %v1606_v46  ;;  %v3141_v46 = vld [vmem:[#allocation7 + $0x5f8] sm:$0xff] }
 0x17b   : > { %16919 = vst [vmem:[#allocation63_spill] sm:$0xff] %v14121_v62  ;;  %v14132_v8 = vsel %vm1547_vm1, %v1608_v55, %v1610_v26 }
 0x17c   : > { %v1914_v51 = vpack.c.bf16 %v1863_v44, %v1862_v17  ;;  %11834 = vmatmul.mubr.bf16.gmra.mrb[20].mxu0 %v1913_v22  ;;  %16922 = vst [vmem:[#allocation65_spill] sm:$0xff] %v14132_v8 }
 0x17d   : > { %v1816_v47 = vpop.permute.xlu1 %1815  ;;  %v1811_v10 = vpop.permute.xlu0 %1810 }
 0x17e   : > { %v1865_v30 = vmul.f32 %v1816_v47, %v14108_v41  ;;  %v1864_v13 = vmul.f32 %v1811_v10, %v14111_v27  ;;  %3279 = vperm.xlu1 %13112, %v3137_v32   ;;  %3274 = vperm.xlu0 %13111, %v3136_v57   ;;  %v16920_v32 = vrot.slane %v13900_v63, 1  ;;  %v3674_v63 = vld [vmem:[#allocation7 + $0x608] sm:$0xff] }
 0x17f   : > { %11837 = vmatprep.mubr.bf16.mxu0 %v1914_v51  ;;  %v3140_v51 = vld [vmem:[#allocation7 + $0x5f0] sm:$0xff] }
 0x180   : > { %v1915_v22 = vpack.c.bf16 %v1865_v30, %v1864_v13  ;;  %v14129_v57 = vsel %vm1547_vm1, %v1610_v26, %v16920_v32 }
 0x181   : > { %v1826_v44 = vpop.permute.xlu1 %1825  ;;  %v1821_v17 = vpop.permute.xlu0 %1820  ;;  %16921 = vst [vmem:[#allocation64_spill] sm:$0xff] %v14129_v57 }
 0x182   : > { %v1867_v47 = vmul.f32 %v1826_v44, %v14118_v23  ;;  %v1866_v10 = vmul.f32 %v1821_v17, %v14121_v62  ;;  %3289 = vperm.xlu1 %13112, %v3139_v2   ;;  %3284 = vperm.xlu0 %13111, %v3138_v29   ;;  %v3673_v2 = vld [vmem:[#allocation7 + $0x600] sm:$0xff] }
 0x184   : > { %v1916_v56 = vpack.c.bf16 %v1867_v47, %v1866_v10  ;;  %11838 = vmatmul.mubr.bf16.gmra.mrb[24].mxu0 %v1915_v22  ;;  %v3676_v22 = vld [vmem:[#allocation7 + $0x618] sm:$0xff]  ;;  %v3675_v47 = vld [vmem:[#allocation7 + $0x610] sm:$0xff] }
 0x185   : > { %v1836_v30 = vpop.permute.xlu1 %1835  ;;  %v1831_v13 = vpop.permute.xlu0 %1830 }
 0x186   : > { %v1869_v44 = vmul.f32 %v1836_v30, %v14129_v57  ;;  %v1868_v17 = vmul.f32 %v1831_v13, %v14132_v8  ;;  %3299 = vperm.xlu1 %13112, %v3141_v46   ;;  %3294 = vperm.xlu0 %13111, %v3140_v51  }
 0x187   : > { %11841 = vmatprep.mubr.bf16.mxu0 %v1916_v56  ;;  %v3678_v56 = vld [vmem:[#allocation7 + $0x628] sm:$0xff] }
 0x188   : > { %v1917_v29 = vpack.c.bf16 %v1869_v44, %v1868_v17  ;;  %v3677_v44 = vld [vmem:[#allocation7 + $0x620] sm:$0xff] }
 0x189   : > { %v2249_v32 = vpop.permute.xlu1 %2248  ;;  %v2244_v62 = vpop.permute.xlu0 %2243 }
 0x18a   : > { %v2402_v55 = vmul.f32 %v2249_v32, %v13591_v34  ;;  %v2401_v26 = vmul.f32 %v2244_v62, %v13578_v28  ;;  %3712 = vperm.xlu1 %13112, %v3674_v63   ;;  %3707 = vperm.xlu0 %13111, %v3673_v2   ;;  %v16927_v34 = vld [vmem:[#allocation28_spill] sm:$0xff] }
 0x18c   : > { %v2465_v10 = vpack.c.bf16 %v2402_v55, %v2401_v26  ;;  %11842 = vmatmul.mubr.bf16.gmra.mrb[28].mxu0 %v1917_v29  ;;  %v3680_v29 = vld [vmem:[#allocation7 + $0x638] sm:$0xff]  ;;  %v3679_v55 = vld [vmem:[#allocation7 + $0x630] sm:$0xff]  ;;  %v13146_v26 = vld [vmem:[%s16614_s1 + $0x108] sm:$0xff]  }
 0x18d   : > { %v2259_v30 = vpop.permute.xlu1 %2258  ;;  %v2254_v13 = vpop.permute.xlu0 %2253 }
 0x18e   : > { %v2404_v46 = vmul.f32 %v2259_v30, %v13609_v49  ;;  %v2403_v51 = vmul.f32 %v2254_v13, %v13612_v50  ;;  %3722 = vperm.xlu1 %13112, %v3676_v22   ;;  %3717 = vperm.xlu0 %13111, %v3675_v47   ;;  %v16949_v50 = vld [vmem:[#allocation46_spill] sm:$0xff] }
 0x18f   : > { %11861 = vmatprep.mubr.bf16.mxu0 %v2465_v10 }
 0x190   : > { %v2466_v17 = vpack.c.bf16 %v2404_v46, %v2403_v51  ;;  %v3682_v46 = vld [vmem:[#allocation7 + $0x648] sm:$0xff]  ;;  %v3681_v51 = vld [vmem:[#allocation7 + $0x640] sm:$0xff] }
 0x191   : > { %v2269_v32 = vpop.permute.xlu1 %2268  ;;  %v2264_v62 = vpop.permute.xlu0 %2263 }
 0x192   : > { %v2406_v63 = vmul.f32 %v2269_v32, %v13628_v0  ;;  %v2405_v2 = vmul.f32 %v2264_v62, %v13631_v1  ;;  %3732 = vperm.xlu1 %13112, %v3678_v56   ;;  %3727 = vperm.xlu0 %13111, %v3677_v44   ;;  %v13147_v56 = vld [vmem:[%s16614_s1 + $0x110] sm:$0xff]   ;;  %v4267_v0 = vld [vmem:[#allocation7 + $0x7f8] sm:$0xff] }
 0x194   : > { %v2467_v22 = vpack.c.bf16 %v2406_v63, %v2405_v2  ;;  %11862 = vmatmul.mubr.bf16.vlgmr.msra.gmra.mrb[0].mxu0 %v2466_v17  ;;  %v3684_v63 = vld [vmem:[#allocation7 + $0x658] sm:$0xff]  ;;  %v3683_v2 = vld [vmem:[#allocation7 + $0x650] sm:$0xff] }
 0x195   : > { %11894 = vmatpush3.bf16.msra.mxu0 %v14082_v33  ;;  %v2279_v47 = vpop.permute.xlu1 %2278  ;;  %v2274_v10 = vpop.permute.xlu0 %2273 }
 0x196   : > { %v2408_v30 = vmul.f32 %v2279_v47, %v13648_v19  ;;  %v2407_v13 = vmul.f32 %v2274_v10, %v13651_v20  ;;  %3742 = vperm.xlu1 %13112, %v3680_v29   ;;  %3737 = vperm.xlu0 %13111, %v3679_v55   ;;  %v13148_v29 = vld [vmem:[%s16614_s1 + $0x118] sm:$0xff]   ;;  %v16923_v10 = vld [vmem:[#allocation24_spill] sm:$0xff] }
 0x197   : > { %11865 = vmatprep.mubr.bf16.mxu0 %v2467_v22  ;;  %11895 = vmatprep.subr.bf16.mxu0 %v13146_v26  ;;  %v13286_v20 = vld [vmem:[%s13546_s23 + $0xd0] sm:$0xff]  ;;  %v13287_v19 = vld [vmem:[%s13546_s23 + $0xd8] sm:$0xff] }
 0x198   : > { %v2468_v44 = vpack.c.bf16 %v2408_v30, %v2407_v13  ;;  %v3686_v13 = vld [vmem:[#allocation7 + $0x668] sm:$0xff]  ;;  %v2816_v1 = vpack.c.bf16 %v13287_v19, %v13286_v20  ;;  %v16948_v19 = vld [vmem:[#allocation45_spill] sm:$0xff] }
 0x199   : > { %v2289_v17 = vpop.permute.xlu1 %2288  ;;  %v2284_v32 = vpop.permute.xlu0 %2283  ;;  %11896 = vmatpush3.bf16.msra.mxu0 %v13146_v26 }
 0x19a   : > { %v2410_v33 = vmul.f32 %v2289_v17, %v13667_v42  ;;  %v2409_v62 = vmul.f32 %v2284_v32, %v13670_v43  ;;  %3752 = vperm.xlu1 %13112, %v3682_v46   ;;  %3747 = vperm.xlu0 %13111, %v3681_v51   ;;  %v3685_v46 = vld [vmem:[#allocation7 + $0x660] sm:$0xff] }
 0x19b   : > { %11897 = vmatprep.subr.bf16.mxu0 %v13147_v56  ;;  %v13149_v51 = vld [vmem:[%s16614_s1 + $0x120] sm:$0xff]  }
 0x19c   : > { %v2469_v55 = vpack.c.bf16 %v2410_v33, %v2409_v62  ;;  %11866 = vmatmul.mubr.bf16.gmra.mrb[4].mxu0 %v2468_v44  ;;  %v16924_v33 = vld [vmem:[#allocation25_spill] sm:$0xff]  ;;  %v16925_v62 = vld [vmem:[#allocation26_spill] sm:$0xff] }
 0x19d   : > { %v2299_v22 = vpop.permute.xlu1 %2298  ;;  %v2294_v47 = vpop.permute.xlu0 %2293  ;;  %11898 = vmatpush3.bf16.msra.mxu0 %v13147_v56 }
 0x19e   : > { %v2412_v26 = vmul.f32 %v2299_v22, %v13686_v60  ;;  %v2411_v30 = vmul.f32 %v2294_v47, %v16923_v10  ;;  %3762 = vperm.xlu1 %13112, %v3684_v63   ;;  %3757 = vperm.xlu0 %13111, %v3683_v2   ;;  %v3688_v63 = vld [vmem:[#allocation7 + $0x678] sm:$0xff]  ;;  %v3687_v2 = vld [vmem:[#allocation7 + $0x670] sm:$0xff] }
 0x19f   : > { %11869 = vmatprep.mubr.bf16.mxu0 %v2469_v55  ;;  %11899 = vmatprep.subr.bf16.mxu0 %v13148_v29  ;;  %v13150_v55 = vld [vmem:[%s16614_s1 + $0x128] sm:$0xff]  }
 0x1a0   : > { %v2470_v17 = vpack.c.bf16 %v2412_v26, %v2411_v30  ;;  %v16926_v30 = vld [vmem:[#allocation27_spill] sm:$0xff] }
 0x1a1   : > { %v2309_v32 = vpop.permute.xlu1 %2308  ;;  %v2304_v44 = vpop.permute.xlu0 %2303  ;;  %11900 = vmatpush3.bf16.msra.mxu0 %v13148_v29 }
 0x1a2   : > { %v2414_v56 = vmul.f32 %v2309_v32, %v16924_v33  ;;  %v2413_v22 = vmul.f32 %v2304_v44, %v16925_v62  ;;  %3772 = vperm.xlu1 %13112, %v3686_v13   ;;  %3767 = vperm.xlu0 %13111, %v3685_v46   ;;  %v3690_v13 = vld [vmem:[#allocation7 + $0x688] sm:$0xff]  ;;  %v3689_v46 = vld [vmem:[#allocation7 + $0x680] sm:$0xff]  ;;  %v16929_v33 = vld [vmem:[#allocation30_spill] sm:$0xff] }
 0x1a3   : > { %11901 = vmatprep.subr.bf16.mxu0 %v13149_v51  ;;  %v13151_v44 = vld [vmem:[%s16614_s1 + $0x130] sm:$0xff]  }
 0x1a4   : > { %v2471_v47 = vpack.c.bf16 %v2414_v56, %v2413_v22  ;;  %11870 = vmatmul.mubr.bf16.gmra.mrb[8].mxu0 %v2470_v17  ;;  %v16928_v22 = vld [vmem:[#allocation29_spill] sm:$0xff] }
 0x1a5   : > { %v2319_v28 = vpop.permute.xlu1 %2318  ;;  %v2314_v26 = vpop.permute.xlu0 %2313  ;;  %11902 = vmatpush3.bf16.msra.mxu0 %v13149_v51 }
 0x1a6   : > { %v2416_v29 = vmul.f32 %v2319_v28, %v16926_v30  ;;  %v2415_v32 = vmul.f32 %v2314_v26, %v16927_v34  ;;  %3782 = vperm.xlu1 %13112, %v3688_v63   ;;  %3777 = vperm.xlu0 %13111, %v3687_v2   ;;  %v3692_v63 = vld [vmem:[#allocation7 + $0x698] sm:$0xff]  ;;  %v3691_v2 = vld [vmem:[#allocation7 + $0x690] sm:$0xff]  ;;  %v16931_v30 = vld [vmem:[#allocation32_spill] sm:$0xff] }
 0x1a7   : > { %11873 = vmatprep.mubr.bf16.mxu0 %v2471_v47  ;;  %11903 = vmatprep.subr.bf16.mxu0 %v13150_v55  ;;  %v13152_v47 = vld [vmem:[%s16614_s1 + $0x138] sm:$0xff]  }
 0x1a8   : > { %v2472_v62 = vpack.c.bf16 %v2416_v29, %v2415_v32  ;;  %v16930_v32 = vld [vmem:[#allocation31_spill] sm:$0xff] }
 0x1a9   : > { %v2329_v56 = vpop.permute.xlu1 %2328  ;;  %v2324_v17 = vpop.permute.xlu0 %2323  ;;  %11904 = vmatpush3.bf16.msra.mxu0 %v13150_v55 }
 0x1aa   : > { %v2418_v51 = vmul.f32 %v2329_v56, %v16928_v22  ;;  %v2417_v28 = vmul.f32 %v2324_v17, %v16929_v33  ;;  %3792 = vperm.xlu1 %13112, %v3690_v13   ;;  %3787 = vperm.xlu0 %13111, %v3689_v46   ;;  %v3694_v13 = vld [vmem:[#allocation7 + $0x6a8] sm:$0xff]  ;;  %v3693_v46 = vld [vmem:[#allocation7 + $0x6a0] sm:$0xff] }
 0x1ab   : > { %11905 = vmatprep.subr.bf16.mxu0 %v13151_v44  ;;  %v14181_v17 = vld [vmem:[%s16614_s1 + $0x140] sm:$0xff]  }
 0x1ac   : > { %v2473_v26 = vpack.c.bf16 %v2418_v51, %v2417_v28  ;;  %11874 = vmatmul.mubr.bf16.gmra.mrb[12].mxu0 %v2472_v62  ;;  %v16934_v22 = vld [vmem:[#allocation35_spill] sm:$0xff] }
 0x1ad   : > { %v2339_v34 = vpop.permute.xlu1 %2338  ;;  %v2334_v29 = vpop.permute.xlu0 %2333  ;;  %11906 = vmatpush3.bf16.msra.mxu0 %v13151_v44  ;;  %v16932_v44 = vld [vmem:[#allocation33_spill] sm:$0xff] }
 0x1ae   : > { %v2420_v55 = vmul.f32 %v2339_v34, %v16930_v32  ;;  %v2419_v56 = vmul.f32 %v2334_v29, %v16931_v30  ;;  %3802 = vperm.xlu1 %13112, %v3692_v63   ;;  %3797 = vperm.xlu0 %13111, %v3691_v2   ;;  %v16933_v34 = vld [vmem:[#allocation34_spill] sm:$0xff]  ;;  %v3695_v2 = vld [vmem:[#allocation7 + $0x6b0] sm:$0xff] }
 0x1af   : > { %11877 = vmatprep.mubr.bf16.mxu0 %v2473_v26  ;;  %11907 = vmatprep.subr.bf16.mxu0 %v13152_v47  ;;  %v3696_v63 = vld [vmem:[#allocation7 + $0x6b8] sm:$0xff] }
 0x1b0   : > { %v2474_v51 = vpack.c.bf16 %v2420_v55, %v2419_v56  ;;  %v16935_v55 = vld [vmem:[#allocation36_spill] sm:$0xff] }
 0x1b1   : > { %v2349_v62 = vpop.permute.xlu1 %2348  ;;  %v2344_v28 = vpop.permute.xlu0 %2343  ;;  %11908 = vmatpush3.bf16.msra.mxu0 %v13152_v47  ;;  %v3698_v47 = vld [vmem:[#allocation7 + $0x6c8] sm:$0xff] }
 0x1b2   : > { %v2422_v33 = vmul.f32 %v2349_v62, %v16932_v44  ;;  %v2421_v32 = vmul.f32 %v2344_v28, %v16933_v34  ;;  %3812 = vperm.xlu1 %13112, %v3694_v13   ;;  %3807 = vperm.xlu0 %13111, %v3693_v46   ;;  %v3697_v62 = vld [vmem:[#allocation7 + $0x6c0] sm:$0xff]  ;;  %v16936_v44 = vld [vmem:[#allocation38_spill] sm:$0xff] }
 0x1b3   : > { %11941 = vmatprep.subr.bf16.mxu0 %v14181_v17 }
 0x1b4   : > { %v2475_v26 = vpack.c.bf16 %v2422_v33, %v2421_v32  ;;  %11878 = vmatmul.mubr.bf16.gmra.mrb[16].mxu0 %v2474_v51  ;;  %v3700_v33 = vld [vmem:[#allocation7 + $0x6d8] sm:$0xff]  ;;  %v3699_v32 = vld [vmem:[#allocation7 + $0x6d0] sm:$0xff] }
 0x1b5   : > { %v2359_v29 = vpop.permute.xlu1 %2358  ;;  %v2354_v30 = vpop.permute.xlu0 %2353 }
 0x1b6   : > { %v2424_v10 = vmul.f32 %v2359_v29, %v16934_v22  ;;  %v2423_v56 = vmul.f32 %v2354_v30, %v16935_v55  ;;  %3822 = vperm.xlu1 %13112, %v3696_v63   ;;  %3817 = vperm.xlu0 %13111, %v3695_v2   ;;  %v16937_v2 = vld [vmem:[#allocation40_spill] sm:$0xff]  ;;  %v13284_v22 = vld [vmem:[%s13546_s23 + $0xc0] sm:$0xff] }
 0x1b7   : > { %11881 = vmatprep.mubr.bf16.mxu0 %v2475_v26 }
 0x1b8   : > { %v2476_v28 = vpack.c.bf16 %v2424_v10, %v2423_v56  ;;  %v3702_v10 = vld [vmem:[#allocation7 + $0x6e8] sm:$0xff]  ;;  %v3701_v56 = vld [vmem:[#allocation7 + $0x6e0] sm:$0xff] }
 0x1b9   : > { %v2369_v13 = vpop.permute.xlu1 %2368  ;;  %v2364_v46 = vpop.permute.xlu0 %2363 }
 0x1ba   : > { %v2426_v34 = vmul.f32 %v2369_v13, %v13805_v16  ;;  %v2425_v60 = vmul.f32 %v2364_v46, %v16936_v44  ;;  %3832 = vperm.xlu1 %13112, %v3698_v47   ;;  %3827 = vperm.xlu0 %13111, %v3697_v62   ;;  %v4261_v44 = vld [vmem:[#allocation7 + $0x7c8] sm:$0xff] }
 0x1bc   : > { %v2477_v51 = vpack.c.bf16 %v2426_v34, %v2425_v60  ;;  %11882 = vmatmul.mubr.bf16.gmra.mrb[20].mxu0 %v2476_v28  ;;  %v3704_v60 = vld [vmem:[#allocation7 + $0x6f8] sm:$0xff]  ;;  %v3703_v34 = vld [vmem:[#allocation7 + $0x6f0] sm:$0xff] }
 0x1bd   : > { %v2379_v29 = vpop.permute.xlu1 %2378  ;;  %v2374_v30 = vpop.permute.xlu0 %2373 }
 0x1be   : > { %v2428_v63 = vmul.f32 %v2379_v29, %v13818_v54  ;;  %v2427_v26 = vmul.f32 %v2374_v30, %v16937_v2  ;;  %3842 = vperm.xlu1 %13112, %v3700_v33   ;;  %3837 = vperm.xlu0 %13111, %v3699_v32   ;;  %v16938_v33 = vld [vmem:[#allocation14_spill] sm:$0xff]  ;;  %v4258_v54 = vld [vmem:[#allocation7 + $0x7b0] sm:$0xff] }
 0x1bf   : > { %11885 = vmatprep.mubr.bf16.mxu0 %v2477_v51  ;;  %v16939_v51 = vld [vmem:[#allocation12_spill] sm:$0xff] }
 0x1c0   : > { %v2478_v13 = vpack.c.bf16 %v2428_v63, %v2427_v26  ;;  %v4237_v63 = vld [vmem:[#allocation7 + $0x708] sm:$0xff]  ;;  %v4236_v26 = vld [vmem:[#allocation7 + $0x700] sm:$0xff] }
 0x1c1   : > { %v2389_v16 = vpop.permute.xlu1 %2388  ;;  %v2384_v46 = vpop.permute.xlu0 %2383 }
 0x1c2   : > { %v2430_v47 = vmul.f32 %v2389_v16, %v13829_v12  ;;  %v2429_v62 = vmul.f32 %v2384_v46, %v13832_v37  ;;  %3852 = vperm.xlu1 %13112, %v3702_v10   ;;  %3847 = vperm.xlu0 %13111, %v3701_v56   ;;  %v2803_v56 = vpack.c.bf16 %v13917_v38, %v13896_v31  ;;  %v4238_v46 = vld [vmem:[#allocation7 + $0x710] sm:$0xff]  ;;  %v4259_v37 = vld [vmem:[#allocation7 + $0x7b8] sm:$0xff] }
 0x1c3   : > { %v2805_v38 = vpack.c.bf16 %v13949_v25, %v13937_v14  ;;  %v4244_v14 = vld [vmem:[#allocation7 + $0x740] sm:$0xff]  ;;  %v13155_v25 = vld [vmem:[%s16614_s1 + $0x150] sm:$0xff]  }
 0x1c4   : > { %v2479_v28 = vpack.c.bf16 %v2430_v47, %v2429_v62  ;;  %11886 = vmatmul.mubr.bf16.gmra.mrb[24].mxu0 %v2478_v13  ;;  %v4239_v13 = vld [vmem:[#allocation7 + $0x718] sm:$0xff] }
 0x1c5   : > { %v2399_v29 = vpop.permute.xlu1 %2398  ;;  %v2394_v30 = vpop.permute.xlu0 %2393 }
 0x1c6   : > { %v2432_v32 = vmul.f32 %v2399_v29, %v16938_v33  ;;  %v2431_v2 = vmul.f32 %v2394_v30, %v16939_v51  ;;  %3862 = vperm.xlu1 %13112, %v3704_v60   ;;  %3857 = vperm.xlu0 %13111, %v3703_v34   ;;  %v4240_v60 = vld [vmem:[#allocation7 + $0x720] sm:$0xff]  ;;  %v2804_v34 = vpack.c.bf16 %v13933_v61, %v13921_v45  ;;  %v4243_v29 = vld [vmem:[#allocation7 + $0x738] sm:$0xff]  ;;  %v4242_v30 = vld [vmem:[#allocation7 + $0x730] sm:$0xff] }
 0x1c7   : > { %11889 = vmatprep.mubr.bf16.mxu0 %v2479_v28  ;;  %v4245_v61 = vld [vmem:[#allocation7 + $0x748] sm:$0xff]  ;;  %v13160_v51 = vld [vmem:[%s16614_s1 + $0x178] sm:$0xff]  }
 0x1c8   : > { %v2480_v16 = vpack.c.bf16 %v2432_v32, %v2431_v2  ;;  %v4241_v2 = vld [vmem:[#allocation7 + $0x728] sm:$0xff] }
 0x1c9   : > { %v14196_v12 = vpop.permute.xlu1 %3149  ;;  %v14198_v10 = vpop.permute.xlu0 %3144  ;;  %v13154_v32 = vld [vmem:[%s16614_s1 + $0x148] sm:$0xff]  }
 0x1ca   : > { %4275 = vperm.xlu1 %13112, %v4237_v63   ;;  %4270 = vperm.xlu0 %13111, %v4236_v26   ;;  %v2806_v26 = vpack.c.bf16 %v13965_v15, %v13953_v40  ;;  %v4249_v15 = vld [vmem:[#allocation7 + $0x768] sm:$0xff]  ;;  %v3303_v20 = vmul.f32 %v14196_v12, %v16948_v19  ;;  %v3302_v49 = vmul.f32 %v14198_v10, %v16949_v50  ;;  %v16952_v10 = vld [vmem:[#allocation47_spill] sm:$0xff] }
 0x1cc   : > { %11890 = vmatmul.mubr.bf16.gmra.mrb[28].mxu0 %v2480_v16 }
 0x1cd   : > { %v14202_v47 = vpop.permute.xlu1 %3159  ;;  %v14204_v62 = vpop.permute.xlu0 %3154  ;;  %11909 = vmatprep.mubr.bf16.mxu0 %v2803_v56  ;;  %v2807_v56 = vpack.c.bf16 %v13985_v59, %v13969_v9  ;;  %v4248_v9 = vld [vmem:[#allocation7 + $0x760] sm:$0xff] }
 0x1ce   : > { %4285 = vperm.xlu1 %13112, %v4239_v13   ;;  %4280 = vperm.xlu0 %13111, %v4238_v46   ;;  %v4247_v13 = vld [vmem:[#allocation7 + $0x758] sm:$0xff]  ;;  %v4246_v46 = vld [vmem:[#allocation7 + $0x750] sm:$0xff]  ;;  %v3305_v50 = vmul.f32 %v14202_v47, %v16952_v10 }
 0x1cf   : > { %v13157_v59 = vld [vmem:[%s16614_s1 + $0x160] sm:$0xff]  }
 0x1d0   : > { %v4806_v10 = vld [vmem:[#allocation7 + $0x838] sm:$0xff] }
 0x1d1   : > { %v14208_v28 = vpop.permute.xlu1 %3169  ;;  %v14210_v31 = vpop.permute.xlu0 %3164 }
 0x1d2   : > { %4295 = vperm.xlu1 %13112, %v4241_v2   ;;  %4290 = vperm.xlu0 %13111, %v4240_v60   ;;  %v13156_v2 = vld [vmem:[%s16614_s1 + $0x158] sm:$0xff]  }
 0x1d4   : > { %11910 = vmatmul.mubr.bf16.vlgmr.msra.gmra.mrb[0].mxu0 %v2804_v34  ;;  %v16940_v34 = vld [vmem:[#allocation55_spill] sm:$0xff] }
 0x1d5   : > { %11942 = vmatpush3.bf16.msra.mxu0 %v14181_v17  ;;  %v14218_v63 = vpop.permute.xlu1 %3179  ;;  %v14220_v45 = vpop.permute.xlu0 %3174  ;;  %11913 = vmatprep.mubr.bf16.mxu0 %v2805_v38  ;;  %v2808_v38 = vpack.c.bf16 %v16940_v34, %v13989_v3 }
 0x1d6   : > { %4305 = vperm.xlu1 %13112, %v4243_v29   ;;  %4300 = vperm.xlu0 %13111, %v4242_v30  }
 0x1d7   : > { %11943 = vmatprep.subr.bf16.mxu0 %v13154_v32 }
 0x1d9   : > { %v14227_v16 = vpop.permute.xlu1 %3189  ;;  %v14229_v17 = vpop.permute.xlu0 %3184  ;;  %11944 = vmatpush3.bf16.msra.mxu0 %v13154_v32  ;;  %v16941_v32 = vld [vmem:[#allocation56_spill] sm:$0xff] }
 0x1da   : > { %4315 = vperm.xlu1 %13112, %v4245_v61   ;;  %4310 = vperm.xlu0 %13111, %v4244_v14   ;;  %v2809_v61 = vpack.c.bf16 %v14023_v48, %v16941_v32  ;;  %v4251_v14 = vld [vmem:[#allocation7 + $0x778] sm:$0xff]  ;;  %v4253_v48 = vld [vmem:[#allocation7 + $0x788] sm:$0xff] }
 0x1db   : > { %11945 = vmatprep.subr.bf16.mxu0 %v13155_v25  ;;  %v13277_v32 = vld [vmem:[%s13546_s23 + $0x88] sm:$0xff] }
 0x1dc   : > { %11914 = vmatmul.mubr.bf16.gmra.mrb[4].mxu0 %v2806_v26  ;;  %v13158_v26 = vld [vmem:[%s16614_s1 + $0x168] sm:$0xff]  }
 0x1dd   : > { %v14236_v60 = vpop.permute.xlu1 %3199  ;;  %v14238_v40 = vpop.permute.xlu0 %3194  ;;  %11917 = vmatprep.mubr.bf16.mxu0 %v2807_v56  ;;  %11946 = vmatpush3.bf16.msra.mxu0 %v13155_v25  ;;  %v4250_v25 = vld [vmem:[#allocation7 + $0x770] sm:$0xff] }
 0x1de   : > { %4325 = vperm.xlu1 %13112, %v4247_v13   ;;  %4320 = vperm.xlu0 %13111, %v4246_v46   ;;  %v4252_v13 = vld [vmem:[#allocation7 + $0x780] sm:$0xff]  ;;  %v13159_v46 = vld [vmem:[%s16614_s1 + $0x170] sm:$0xff]  }
 0x1df   : > { %11947 = vmatprep.subr.bf16.mxu0 %v13156_v2 }
 0x1e1   : > { %v14245_v29 = vpop.permute.xlu1 %3209  ;;  %v14247_v30 = vpop.permute.xlu0 %3204  ;;  %11948 = vmatpush3.bf16.msra.mxu0 %v13156_v2  ;;  %v14262_v2 = vld [vmem:[%s13546_s23 + $0x70] sm:$0xff] }
 0x1e2   : > { %4335 = vperm.xlu1 %13112, %v4249_v15   ;;  %4330 = vperm.xlu0 %13111, %v4248_v9   ;;  %16942 = vst [vmem:[#allocation55_spill] sm:$0xff] %v14262_v2  ;;  %v14265_v15 = vld [vmem:[%s13546_s23 + $0x78] sm:$0xff] }
 0x1e3   : > { %11949 = vmatprep.subr.bf16.mxu0 %v13157_v59  ;;  %16943 = vst [vmem:[#allocation56_spill] sm:$0xff] %v14265_v15  ;;  %v2810_v9 = vpack.c.bf16 %v14265_v15, %v14262_v2 }
 0x1e4   : > { %11918 = vmatmul.mubr.bf16.gmra.mrb[8].mxu0 %v2808_v38 }
 0x1e5   : > { %v14254_v3 = vpop.permute.xlu1 %3219  ;;  %v14256_v56 = vpop.permute.xlu0 %3214  ;;  %11921 = vmatprep.mubr.bf16.mxu0 %v2809_v61  ;;  %11950 = vmatpush3.bf16.msra.mxu0 %v13157_v59  ;;  %v13276_v59 = vld [vmem:[%s13546_s23 + $0x80] sm:$0xff] }
 0x1e6   : > { %4345 = vperm.xlu1 %13112, %v4251_v14   ;;  %4340 = vperm.xlu0 %13111, %v4250_v25   ;;  %v2811_v61 = vpack.c.bf16 %v13277_v32, %v13276_v59  ;;  %v4255_v14 = vld [vmem:[#allocation7 + $0x798] sm:$0xff]  ;;  %v4254_v25 = vld [vmem:[#allocation7 + $0x790] sm:$0xff] }
 0x1e7   : > { %11951 = vmatprep.subr.bf16.mxu0 %v13158_v26  ;;  %v14288_v59 = vld [vmem:[%s13546_s23 + $0x90] sm:$0xff] }
 0x1e8   : > { %16944 = vst [vmem:[#allocation66_spill] sm:$0xff] %v14288_v59 }
 0x1e9   : > { %v14269_v34 = vpop.permute.xlu1 %3229  ;;  %v14271_v38 = vpop.permute.xlu0 %3224  ;;  %11952 = vmatpush3.bf16.msra.mxu0 %v13158_v26  ;;  %v4257_v26 = vld [vmem:[#allocation7 + $0x7a8] sm:$0xff] }
 0x1ea   : > { %4355 = vperm.xlu1 %13112, %v4253_v48   ;;  %4350 = vperm.xlu0 %13111, %v4252_v13   ;;  %v4256_v48 = vld [vmem:[#allocation7 + $0x7a0] sm:$0xff] }
 0x1eb   : > { %11953 = vmatprep.subr.bf16.mxu0 %v13159_v46  ;;  %v14285_v13 = vld [vmem:[%s16614_s1 + $0x180] sm:$0xff]  }
 0x1ec   : > { %11922 = vmatmul.mubr.bf16.gmra.mrb[12].mxu0 %v2810_v9  ;;  %v14291_v9 = vld [vmem:[%s13546_s23 + $0x98] sm:$0xff] }
 0x1ed   : > { %v14278_v2 = vpop.permute.xlu1 %3239  ;;  %v14280_v15 = vpop.permute.xlu0 %3234  ;;  %11925 = vmatprep.mubr.bf16.mxu0 %v2811_v61  ;;  %11954 = vmatpush3.bf16.msra.mxu0 %v13159_v46  ;;  %16945 = vst [vmem:[#allocation67_spill] sm:$0xff] %v14291_v9  ;;  %v2812_v32 = vpack.c.bf16 %v14291_v9, %v14288_v59  ;;  %v13280_v61 = vld [vmem:[%s13546_s23 + $0xa0] sm:$0xff] }
 0x1ee   : > { %4365 = vperm.xlu1 %13112, %v4255_v14   ;;  %4360 = vperm.xlu0 %13111, %v4254_v25   ;;  %v13281_v14 = vld [vmem:[%s13546_s23 + $0xa8] sm:$0xff] }
 0x1ef   : > { %11955 = vmatprep.subr.bf16.mxu0 %v13160_v51  ;;  %v2813_v25 = vpack.c.bf16 %v13281_v14, %v13280_v61  ;;  %v4260_v61 = vld [vmem:[#allocation7 + $0x7c0] sm:$0xff]  ;;  %v13282_v14 = vld [vmem:[%s13546_s23 + $0xb0] sm:$0xff] }
 0x1f1   : > { %v14295_v33 = vpop.permute.xlu1 %3249  ;;  %v14297_v46 = vpop.permute.xlu0 %3244  ;;  %11956 = vmatpush3.bf16.msra.mxu0 %v13160_v51  ;;  %v13283_v51 = vld [vmem:[%s13546_s23 + $0xb8] sm:$0xff] }
 0x1f2   : > { %4375 = vperm.xlu1 %13112, %v4257_v26   ;;  %4370 = vperm.xlu0 %13111, %v4256_v48   ;;  %v2814_v26 = vpack.c.bf16 %v13283_v51, %v13282_v14  ;;  %v4265_v14 = vld [vmem:[#allocation7 + $0x7e8] sm:$0xff]  ;;  %v4264_v51 = vld [vmem:[#allocation7 + $0x7e0] sm:$0xff] }
 0x1f3   : > { %11989 = vmatprep.subr.bf16.mxu0 %v14285_v13 }
 0x1f4   : > { %11926 = vmatmul.mubr.bf16.gmra.mrb[16].mxu0 %v2812_v32  ;;  %v13285_v32 = vld [vmem:[%s13546_s23 + $0xc8] sm:$0xff] }
 0x1f5   : > { %v14302_v59 = vpop.permute.xlu1 %3259  ;;  %v14304_v9 = vpop.permute.xlu0 %3254  ;;  %11929 = vmatprep.mubr.bf16.mxu0 %v2813_v25  ;;  %v2815_v43 = vpack.c.bf16 %v13285_v32, %v13284_v22  ;;  %v4263_v25 = vld [vmem:[#allocation7 + $0x7d8] sm:$0xff] }
 0x1f6   : > { %4385 = vperm.xlu1 %13112, %v4259_v37   ;;  %4380 = vperm.xlu0 %13111, %v4258_v54   ;;  %v4262_v54 = vld [vmem:[#allocation7 + $0x7d0] sm:$0xff]  ;;  %v13289_v32 = vld [vmem:[%s13546_s23 + $0xe0] sm:$0xff] }
 0x1f9   : > { %v14308_v48 = vpop.permute.xlu1 %3269  ;;  %v14310_v55 = vpop.permute.xlu0 %3264 }
 0x1fa   : > { %4395 = vperm.xlu1 %13112, %v4261_v44   ;;  %4390 = vperm.xlu0 %13111, %v4260_v61   ;;  %v13288_v61 = vld [vmem:[%s13546_s23 + $0xe8] sm:$0xff] }
 0x1fc   : > { %11930 = vmatmul.mubr.bf16.gmra.mrb[20].mxu0 %v2814_v26  ;;  %v2817_v26 = vpack.c.bf16 %v13288_v61, %v13289_v32  ;;  %v4800_v61 = vld [vmem:[#allocation7 + $0x808] sm:$0xff]  ;;  %v4799_v32 = vld [vmem:[#allocation7 + $0x800] sm:$0xff] }
 0x1fd   : > { %v14314_v37 = vpop.permute.xlu1 %3279  ;;  %v14316_v42 = vpop.permute.xlu0 %3274  ;;  %11933 = vmatprep.mubr.bf16.mxu0 %v2815_v43  ;;  %v4266_v43 = vld [vmem:[#allocation7 + $0x7f0] sm:$0xff] }
 0x1fe   : > { %4405 = vperm.xlu1 %13112, %v4263_v25   ;;  %4400 = vperm.xlu0 %13111, %v4262_v54  }
 0x201   : > { %v14320_v22 = vpop.permute.xlu1 %3289  ;;  %v14322_v44 = vpop.permute.xlu0 %3284 }
 0x202   : > { %16946 = vst [vmem:[#allocation68_spill] sm:$0xff] %v14322_v44  ;;  %4415 = vperm.xlu1 %13112, %v4265_v14   ;;  %4410 = vperm.xlu0 %13111, %v4264_v51   ;;  %v13290_v14 = vld [vmem:[%s13546_s23 + $0xf8] sm:$0xff]  ;;  %v13291_v51 = vld [vmem:[%s13546_s23 + $0xf0] sm:$0xff] }
 0x203   : > { %v2818_v44 = vpack.c.bf16 %v13290_v14, %v13291_v51  ;;  %v16954_v51 = vld [vmem:[#allocation49_spill] sm:$0xff] }
 0x204   : > { %11934 = vmatmul.mubr.bf16.gmra.mrb[24].mxu0 %v2816_v1 }
 0x205   : > { %v14326_v25 = vpop.permute.xlu1 %3299  ;;  %v14328_v54 = vpop.permute.xlu0 %3294  ;;  %11937 = vmatprep.mubr.bf16.mxu0 %v2817_v26  ;;  %v3366_v26 = vpack.c.bf16 %v3303_v20, %v3302_v49  ;;  %v16955_v49 = vld [vmem:[#allocation50_spill] sm:$0xff] }
 0x206   : > { %16947 = vst [vmem:[#allocation69_spill] sm:$0xff] %v14328_v54  ;;  %4425 = vperm.xlu1 %13112, %v4267_v0   ;;  %4420 = vperm.xlu0 %13111, %v4266_v43   ;;  %v4802_v0 = vld [vmem:[#allocation7 + $0x818] sm:$0xff]  ;;  %v4801_v43 = vld [vmem:[#allocation7 + $0x810] sm:$0xff]  ;;  %v16953_v54 = vld [vmem:[#allocation48_spill] sm:$0xff]  ;;  %v3306_v20 = vmul.f32 %v14210_v31, %v16955_v49 }
 0x207   : > { %v3304_v14 = vmul.f32 %v14204_v62, %v16953_v54  ;;  %v4805_v62 = vld [vmem:[#allocation7 + $0x830] sm:$0xff] }
 0x208   : > { %v13163_v49 = vld [vmem:[%s16614_s1 + $0x190] sm:$0xff]  }
 0x209   : > { %v14336_v8 = vpop.permute.xlu1 %3712  ;;  %v14338_v1 = vpop.permute.xlu0 %3707 }
 0x20a   : > { %4838 = vperm.xlu1 %13112, %v4800_v61   ;;  %4833 = vperm.xlu0 %13111, %v4799_v32   ;;  %v3307_v61 = vmul.f32 %v14208_v28, %v16954_v51  ;;  %v4803_v32 = vld [vmem:[#allocation7 + $0x820] sm:$0xff] }
 0x20c   : > { %11938 = vmatmul.mubr.bf16.gmra.mrb[28].mxu0 %v2818_v44  ;;  %v4804_v44 = vld [vmem:[#allocation7 + $0x828] sm:$0xff]  ;;  %v3368_v47 = vpack.c.bf16 %v3307_v61, %v3306_v20  ;;  %v16958_v20 = vld [vmem:[#allocation53_spill] sm:$0xff] }
 0x20d   : > { %11957 = vmatprep.mubr.bf16.mxu0 %v3366_v26  ;;  %v14340_v12 = vpop.permute.xlu1 %3722  ;;  %v14342_v19 = vpop.permute.xlu0 %3717 }
 0x20e   : > { %16950 = vst [vmem:[#allocation70_spill] sm:$0xff] %v14340_v12  ;;  %16951 = vst [vmem:[#allocation71_spill] sm:$0xff] %v14342_v19  ;;  %4848 = vperm.xlu1 %13112, %v4802_v0   ;;  %4843 = vperm.xlu0 %13111, %v4801_v43   ;;  %v3367_v19 = vpack.c.bf16 %v3305_v50, %v3304_v14  ;;  %v13162_v0 = vld [vmem:[%s16614_s1 + $0x188] sm:$0xff]  }
 0x20f   : > { %v16956_v43 = vld [vmem:[#allocation51_spill] sm:$0xff]  ;;  %v16957_v14 = vld [vmem:[#allocation52_spill] sm:$0xff] }
 0x210   : > { %v3309_v50 = vmul.f32 %v14218_v63, %v16956_v43  ;;  %v3308_v61 = vmul.f32 %v14220_v45, %v16957_v14 }
 0x211   : > { %v14352_v26 = vpop.permute.xlu1 %3732  ;;  %v14354_v12 = vpop.permute.xlu0 %3727 }
 0x212   : > { %4858 = vperm.xlu1 %13112, %v4804_v44   ;;  %4853 = vperm.xlu0 %13111, %v4803_v32   ;;  %v3311_v44 = vmul.f32 %v14227_v16, %v16958_v20  ;;  %v16959_v32 = vld [vmem:[#allocation54_spill] sm:$0xff]  ;;  %v3369_v45 = vpack.c.bf16 %v3309_v50, %v3308_v61  ;;  %v3312_v50 = vmul.f32 %v14238_v40, %v14020_v7 }
 0x213   : > { %v4810_v16 = vld [vmem:[#allocation7 + $0x858] sm:$0xff]  ;;  %v3315_v61 = vmul.f32 %v14245_v29, %v14033_v24 }
 0x214   : > { %11958 = vmatmul.mubr.bf16.vlgmr.msra.gmra.mrb[0].mxu0 %v3367_v19  ;;  %v3310_v19 = vmul.f32 %v14229_v17, %v16959_v32  ;;  %v13164_v17 = vld [vmem:[%s16614_s1 + $0x198] sm:$0xff]  }
 0x215   : > { %11990 = vmatpush3.bf16.msra.mxu0 %v14285_v13  ;;  %11961 = vmatprep.mubr.bf16.mxu0 %v3368_v47  ;;  %v14360_v28 = vpop.permute.xlu1 %3742  ;;  %v14362_v31 = vpop.permute.xlu0 %3737  ;;  %v4808_v13 = vld [vmem:[#allocation7 + $0x848] sm:$0xff]  ;;  %v4807_v47 = vld [vmem:[#allocation7 + $0x840] sm:$0xff]  ;;  %v4814_v29 = vld [vmem:[#allocation7 + $0x878] sm:$0xff] }
 0x216   : > { %4868 = vperm.xlu1 %13112, %v4806_v10   ;;  %4863 = vperm.xlu0 %13111, %v4805_v62   ;;  %v3370_v10 = vpack.c.bf16 %v3311_v44, %v3310_v19  ;;  %v4809_v62 = vld [vmem:[#allocation7 + $0x850] sm:$0xff]  ;;  %v3314_v44 = vmul.f32 %v14247_v30, %v14036_v53  ;;  %v4812_v19 = vld [vmem:[#allocation7 + $0x868] sm:$0xff] }
 0x217   : > { %11991 = vmatprep.subr.bf16.mxu0 %v13162_v0  ;;  %v13166_v30 = vld [vmem:[%s16614_s1 + $0x1a8] sm:$0xff]  }
 0x219   : > { %v14375_v51 = vpop.permute.xlu1 %3752  ;;  %v14377_v63 = vpop.permute.xlu0 %3747  ;;  %11992 = vmatpush3.bf16.msra.mxu0 %v13162_v0  ;;  %v3313_v0 = vmul.f32 %v14236_v60, %v14017_v18 }
 0x21a   : > { %4878 = vperm.xlu1 %13112, %v4808_v13   ;;  %4873 = vperm.xlu0 %13111, %v4807_v47   ;;  %v4811_v13 = vld [vmem:[#allocation7 + $0x860] sm:$0xff] }
 0x21b   : > { %11993 = vmatprep.subr.bf16.mxu0 %v13163_v49  ;;  %v3371_v40 = vpack.c.bf16 %v3313_v0, %v3312_v50  ;;  %v3316_v0 = vmul.f32 %v14256_v56, %v14049_v11  ;;  %v3319_v50 = vmul.f32 %v14269_v34, %v14059_v36  ;;  %v4818_v34 = vld [vmem:[#allocation7 + $0x898] sm:$0xff] }
 0x21c   : > { %11962 = vmatmul.mubr.bf16.gmra.mrb[4].mxu0 %v3369_v45  ;;  %v3372_v45 = vpack.c.bf16 %v3315_v61, %v3314_v44  ;;  %v3318_v61 = vmul.f32 %v14271_v38, %v14062_v21  ;;  %v4816_v44 = vld [vmem:[#allocation7 + $0x888] sm:$0xff]  ;;  %v13168_v38 = vld [vmem:[%s16614_s1 + $0x1b8] sm:$0xff]  }
 0x21d   : > { %11965 = vmatprep.mubr.bf16.mxu0 %v3370_v10  ;;  %v14382_v32 = vpop.permute.xlu1 %3762  ;;  %v14384_v20 = vpop.permute.xlu0 %3757  ;;  %11994 = vmatpush3.bf16.msra.mxu0 %v13163_v49  ;;  %v13165_v49 = vld [vmem:[%s16614_s1 + $0x1a0] sm:$0xff]   ;;  %v4813_v10 = vld [vmem:[#allocation7 + $0x870] sm:$0xff] }
 0x21e   : > { %4888 = vperm.xlu1 %13112, %v4810_v16   ;;  %4883 = vperm.xlu0 %13111, %v4809_v62  }
 0x21f   : > { %11995 = vmatprep.subr.bf16.mxu0 %v13164_v17 }
 0x221   : > { %v14397_v47 = vpop.permute.xlu1 %3772  ;;  %v14399_v60 = vpop.permute.xlu0 %3767  ;;  %11996 = vmatpush3.bf16.msra.mxu0 %v13164_v17  ;;  %v3317_v17 = vmul.f32 %v14254_v3, %v14046_v58 }
 0x222   : > { %4898 = vperm.xlu1 %13112, %v4812_v19   ;;  %4893 = vperm.xlu0 %13111, %v4811_v13   ;;  %v4815_v19 = vld [vmem:[#allocation7 + $0x880] sm:$0xff]  ;;  %v13167_v13 = vld [vmem:[%s16614_s1 + $0x1b0] sm:$0xff]  }
 0x223   : > { %11997 = vmatprep.subr.bf16.mxu0 %v13165_v49  ;;  %v3373_v56 = vpack.c.bf16 %v3317_v17, %v3316_v0  ;;  %v3320_v17 = vmul.f32 %v14280_v15, %v14075_v6  ;;  %v3323_v0 = vmul.f32 %v14295_v33, %v14087_v35 }
 0x224   : > { %11966 = vmatmul.mubr.bf16.gmra.mrb[8].mxu0 %v3371_v40  ;;  %v3374_v40 = vpack.c.bf16 %v3319_v50, %v3318_v61  ;;  %v3322_v50 = vmul.f32 %v14297_v46, %v14090_v39  ;;  %v4820_v61 = vld [vmem:[#allocation7 + $0x8a8] sm:$0xff] }
 0x225   : > { %11969 = vmatprep.mubr.bf16.mxu0 %v3372_v45  ;;  %v14404_v16 = vpop.permute.xlu1 %3782  ;;  %v14406_v62 = vpop.permute.xlu0 %3777  ;;  %11998 = vmatpush3.bf16.msra.mxu0 %v13165_v49  ;;  %v4817_v45 = vld [vmem:[#allocation7 + $0x890] sm:$0xff] }
 0x226   : > { %4908 = vperm.xlu1 %13112, %v4814_v29   ;;  %4903 = vperm.xlu0 %13111, %v4813_v10   ;;  %v3376_v33 = vpack.c.bf16 %v3323_v0, %v3322_v50  ;;  %v4824_v0 = vld [vmem:[#allocation7 + $0x8c8] sm:$0xff]  ;;  %v4823_v50 = vld [vmem:[#allocation7 + $0x8c0] sm:$0xff] }
 0x227   : > { %11999 = vmatprep.subr.bf16.mxu0 %v13166_v30 }
 0x229   : > { %v14419_v49 = vpop.permute.xlu1 %3792  ;;  %v14421_v3 = vpop.permute.xlu0 %3787  ;;  %12000 = vmatpush3.bf16.msra.mxu0 %v13166_v30  ;;  %v3321_v30 = vmul.f32 %v14278_v2, %v14072_v52 }
 0x22a   : > { %4918 = vperm.xlu1 %13112, %v4816_v44   ;;  %4913 = vperm.xlu0 %13111, %v4815_v19   ;;  %v4819_v44 = vld [vmem:[#allocation7 + $0x8a0] sm:$0xff] }
 0x22b   : > { %12001 = vmatprep.subr.bf16.mxu0 %v13167_v13  ;;  %v14441_v19 = vld [vmem:[%s16614_s1 + $0x1c0] sm:$0xff]   ;;  %v3375_v15 = vpack.c.bf16 %v3321_v30, %v3320_v17  ;;  %v3327_v30 = vmul.f32 %v14308_v48, %v14108_v41  ;;  %v3326_v17 = vmul.f32 %v14310_v55, %v14111_v27  ;;  %v3329_v55 = vmul.f32 %v14314_v37, %v14118_v23 }
 0x22c   : > { %11970 = vmatmul.mubr.bf16.gmra.mrb[12].mxu0 %v3373_v56  ;;  %v4822_v56 = vld [vmem:[#allocation7 + $0x8b8] sm:$0xff] }
 0x22d   : > { %11973 = vmatprep.mubr.bf16.mxu0 %v3374_v40  ;;  %v14426_v29 = vpop.permute.xlu1 %3802  ;;  %v14428_v10 = vpop.permute.xlu0 %3797  ;;  %12002 = vmatpush3.bf16.msra.mxu0 %v13167_v13  ;;  %v4821_v40 = vld [vmem:[#allocation7 + $0x8b0] sm:$0xff]  ;;  %v4830_v23 = vld [vmem:[#allocation7 + $0x8f8] sm:$0xff] }
 0x22e   : > { %4928 = vperm.xlu1 %13112, %v4818_v34   ;;  %4923 = vperm.xlu0 %13111, %v4817_v45   ;;  %v3325_v45 = vmul.f32 %v14302_v59, %v14098_v4  ;;  %v3378_v59 = vpack.c.bf16 %v3327_v30, %v3326_v17  ;;  %v16962_v30 = vld [vmem:[#allocation68_spill] sm:$0xff] }
 0x22f   : > { %12003 = vmatprep.subr.bf16.mxu0 %v13168_v38 }
 0x231   : > { %v14443_v2 = vpop.permute.xlu1 %3812  ;;  %v14445_v13 = vpop.permute.xlu0 %3807  ;;  %12004 = vmatpush3.bf16.msra.mxu0 %v13168_v38  ;;  %v3324_v38 = vmul.f32 %v14304_v9, %v14101_v5  ;;  %v4825_v9 = vld [vmem:[#allocation7 + $0x8d0] sm:$0xff] }
 0x232   : > { %4938 = vperm.xlu1 %13112, %v4820_v61   ;;  %4933 = vperm.xlu0 %13111, %v4819_v44  }
 0x233   : > { %12037 = vmatprep.subr.bf16.mxu0 %v14441_v19 }
 0x234   : > { %11974 = vmatmul.mubr.bf16.gmra.mrb[16].mxu0 %v3375_v15  ;;  %v3377_v15 = vpack.c.bf16 %v3325_v45, %v3324_v38  ;;  %v3331_v45 = vmul.f32 %v14320_v22, %v14129_v57  ;;  %v16961_v38 = vld [vmem:[#allocation65_spill] sm:$0xff] }
 0x235   : > { %11977 = vmatprep.mubr.bf16.mxu0 %v3376_v33  ;;  %v14448_v46 = vpop.permute.xlu1 %3822  ;;  %v14450_v34 = vpop.permute.xlu0 %3817  ;;  %v4826_v33 = vld [vmem:[#allocation7 + $0x8d8] sm:$0xff]  ;;  %v3330_v17 = vmul.f32 %v16962_v30, %v16961_v38  ;;  %v16964_v38 = vld [vmem:[#allocation44_spill] sm:$0xff]  ;;  %v16965_v57 = vld [vmem:[#allocation69_spill] sm:$0xff] }
 0x236   : > { %4948 = vperm.xlu1 %13112, %v4822_v56   ;;  %4943 = vperm.xlu0 %13111, %v4821_v40   ;;  %v16960_v40 = vld [vmem:[#allocation63_spill] sm:$0xff] }
 0x237   : > { %v3328_v27 = vmul.f32 %v14316_v42, %v16960_v40  ;;  %v3380_v37 = vpack.c.bf16 %v3331_v45, %v3330_v17  ;;  %v4829_v42 = vld [vmem:[#allocation7 + $0x8f0] sm:$0xff]  ;;  %v3332_v40 = vmul.f32 %v16965_v57, %v16964_v38  ;;  %v16967_v45 = vld [vmem:[#allocation16_spill] sm:$0xff]  ;;  %v16971_v38 = vld [vmem:[#allocation71_spill] sm:$0xff] }
 0x238   : > { %v3865_v17 = vmul.f32 %v14338_v1, %v16967_v45  ;;  %v5691_v57 = vld [vmem:[#allocation7 + $0x10] sm:$0xff]  ;;  %v16969_v1 = vld [vmem:[#allocation70_spill] sm:$0xff] }
 0x239   : > { %v14460_v61 = vpop.permute.xlu1 %3832  ;;  %v14462_v44 = vpop.permute.xlu0 %3827  ;;  %v3379_v41 = vpack.c.bf16 %v3329_v55, %v3328_v27  ;;  %v16966_v27 = vld [vmem:[#allocation15_spill] sm:$0xff]  ;;  %v16970_v45 = vld [vmem:[#allocation18_spill] sm:$0xff] }
 0x23a   : > { %4958 = vperm.xlu1 %13112, %v4824_v0   ;;  %4953 = vperm.xlu0 %13111, %v4823_v50   ;;  %v4828_v0 = vld [vmem:[#allocation7 + $0x8e8] sm:$0xff]  ;;  %v4827_v50 = vld [vmem:[#allocation7 + $0x8e0] sm:$0xff]  ;;  %v3866_v55 = vmul.f32 %v14336_v8, %v16966_v27  ;;  %v3867_v4 = vmul.f32 %v16971_v38, %v16970_v45  ;;  %v5695_v38 = vld [vmem:[#allocation7 + $0x30] sm:$0xff] }
 0x23c   : > { %11978 = vmatmul.mubr.bf16.gmra.mrb[20].mxu0 %v3377_v15 }
 0x23d   : > { %11981 = vmatprep.mubr.bf16.mxu0 %v3378_v59  ;;  %v14464_v56 = vpop.permute.xlu1 %3842  ;;  %v14466_v48 = vpop.permute.xlu0 %3837 }
 0x23e   : > { %4968 = vperm.xlu1 %13112, %v4826_v33   ;;  %4963 = vperm.xlu0 %13111, %v4825_v9   ;;  %v16963_v9 = vld [vmem:[#allocation43_spill] sm:$0xff] }
 0x23f   : > { %v3333_v30 = vmul.f32 %v14326_v25, %v16963_v9  ;;  %v3929_v25 = vpack.c.bf16 %v3866_v55, %v3865_v17  ;;  %v5692_v9 = vld [vmem:[#allocation7 + $0x18] sm:$0xff]  ;;  %v16973_v55 = vld [vmem:[#allocation20_spill] sm:$0xff] }
 0x240   : > { %v3869_v17 = vmul.f32 %v14354_v12, %v16973_v55  ;;  %v16977_v55 = vld [vmem:[#allocation24_spill] sm:$0xff] }
 0x241   : > { %v14476_v15 = vpop.permute.xlu1 %3852  ;;  %v14478_v59 = vpop.permute.xlu0 %3847  ;;  %v3381_v5 = vpack.c.bf16 %v3333_v30, %v3332_v40  ;;  %v16972_v40 = vld [vmem:[#allocation19_spill] sm:$0xff] }
 0x242   : > { %4978 = vperm.xlu1 %13112, %v4828_v0   ;;  %4973 = vperm.xlu0 %13111, %v4827_v50   ;;  %v5689_v0 = vld [vmem:[#allocation7] sm:$0xff]  ;;  %v3870_v30 = vmul.f32 %v14352_v26, %v16972_v40 }
 0x243   : > { %v16976_v40 = vld [vmem:[#allocation23_spill] sm:$0xff] }
 0x244   : > { %11982 = vmatmul.mubr.bf16.gmra.mrb[24].mxu0 %v3379_v41  ;;  %v5690_v41 = vld [vmem:[#allocation7 + $0x8] sm:$0xff] }
 0x245   : > { %11985 = vmatprep.mubr.bf16.mxu0 %v3380_v37  ;;  %v14480_v33 = vpop.permute.xlu1 %3862  ;;  %v14482_v22 = vpop.permute.xlu0 %3857 }
 0x246   : > { %4988 = vperm.xlu1 %13112, %v4830_v23   ;;  %4983 = vperm.xlu0 %13111, %v4829_v42   ;;  %v16968_v42 = vld [vmem:[#allocation17_spill] sm:$0xff] }
 0x247   : > { %v3868_v27 = vmul.f32 %v16969_v1, %v16968_v42  ;;  %v3931_v42 = vpack.c.bf16 %v3870_v30, %v3869_v17  ;;  %v5696_v1 = vld [vmem:[#allocation7 + $0x38] sm:$0xff]  ;;  %v3874_v30 = vmul.f32 %v14375_v51, %v16976_v40  ;;  %v5697_v17 = vld [vmem:[#allocation7 + $0x40] sm:$0xff] }
 0x248   : > { %v5700_v51 = vld [vmem:[#allocation7 + $0x58] sm:$0xff]  ;;  %v16980_v40 = vld [vmem:[#allocation27_spill] sm:$0xff] }
 0x249   : > { %v14492_v50 = vpop.permute.xlu1 %4275  ;;  %v14494_v37 = vpop.permute.xlu0 %4270  ;;  %v3930_v39 = vpack.c.bf16 %v3868_v27, %v3867_v4  ;;  %v16975_v27 = vld [vmem:[#allocation22_spill] sm:$0xff] }
 0x24a   : > { %5728 = vperm.xlu1 %13112, %v5690_v41   ;;  %5723 = vperm.xlu0 %13111, %v5689_v0   ;;  %v5693_v41 = vld [vmem:[#allocation7 + $0x20] sm:$0xff]  ;;  %v3871_v45 = vmul.f32 %v14362_v31, %v16975_v27  ;;  %v16978_v27 = vld [vmem:[#allocation25_spill] sm:$0xff] }
 0x24c   : > { %11986 = vmatmul.mubr.bf16.gmra.mrb[28].mxu0 %v3381_v5  ;;  %v5694_v5 = vld [vmem:[#allocation7 + $0x28] sm:$0xff] }
 0x24d   : > { %12005 = vmatprep.mubr.bf16.mxu0 %v3929_v25  ;;  %v14496_v23 = vpop.permute.xlu1 %4285  ;;  %v14498_v8 = vpop.permute.xlu0 %4280 }
 0x24e   : > { %5738 = vperm.xlu1 %13112, %v5692_v9   ;;  %5733 = vperm.xlu0 %13111, %v5691_v57   ;;  %v13170_v9 = vld [vmem:[%s16614_s1 + $0x1c8] sm:$0xff]   ;;  %v16974_v57 = vld [vmem:[#allocation21_spill] sm:$0xff] }
 0x24f   : > { %v3872_v4 = vmul.f32 %v14360_v28, %v16974_v57 }
 0x251   : > { %v14508_v0 = vpop.permute.xlu1 %4295  ;;  %v14510_v25 = vpop.permute.xlu0 %4290  ;;  %v3932_v31 = vpack.c.bf16 %v3872_v4, %v3871_v45  ;;  %v16979_v4 = vld [vmem:[#allocation26_spill] sm:$0xff] }
 0x252   : > { %5748 = vperm.xlu1 %13112, %v5694_v5   ;;  %5743 = vperm.xlu0 %13111, %v5693_v41   ;;  %v13171_v5 = vld [vmem:[%s16614_s1 + $0x1d0] sm:$0xff]   ;;  %v3875_v45 = vmul.f32 %v14384_v20, %v16979_v4 }
 0x253   : > { %v16982_v4 = vld [vmem:[#allocation29_spill] sm:$0xff] }
 0x254   : > { %12006 = vmatmul.mubr.bf16.vlgmr.msra.gmra.mrb[0].mxu0 %v3930_v39  ;;  %v3873_v39 = vmul.f32 %v14377_v63, %v16977_v55  ;;  %v13172_v63 = vld [vmem:[%s16614_s1 + $0x1d8] sm:$0xff]   ;;  %v16981_v55 = vld [vmem:[#allocation28_spill] sm:$0xff] }
 0x255   : > { %12038 = vmatpush3.bf16.msra.mxu0 %v14441_v19  ;;  %12009 = vmatprep.mubr.bf16.mxu0 %v3931_v42  ;;  %v14516_v12 = vpop.permute.xlu1 %4305  ;;  %v14518_v26 = vpop.permute.xlu0 %4300  ;;  %v5698_v19 = vld [vmem:[#allocation7 + $0x48] sm:$0xff] }
 0x256   : > { %5758 = vperm.xlu1 %13112, %v5696_v1   ;;  %5753 = vperm.xlu0 %13111, %v5695_v38   ;;  %v3933_v42 = vpack.c.bf16 %v3874_v30, %v3873_v39  ;;  %v5699_v1 = vld [vmem:[#allocation7 + $0x50] sm:$0xff]  ;;  %v3878_v30 = vmul.f32 %v14397_v47, %v16980_v40  ;;  %v3877_v39 = vmul.f32 %v14399_v60, %v16981_v55  ;;  %v5704_v47 = vld [vmem:[#allocation7 + $0x78] sm:$0xff]  ;;  %v13174_v60 = vld [vmem:[%s16614_s1 + $0x1e8] sm:$0xff]  }
 0x257   : > { %12039 = vmatprep.subr.bf16.mxu0 %v13170_v9  ;;  %v16984_v40 = vld [vmem:[#allocation31_spill] sm:$0xff]  ;;  %v16985_v55 = vld [vmem:[#allocation32_spill] sm:$0xff] }
 0x259   : > { %v14531_v41 = vpop.permute.xlu1 %4315  ;;  %v14533_v28 = vpop.permute.xlu0 %4310  ;;  %12040 = vmatpush3.bf16.msra.mxu0 %v13170_v9  ;;  %v3876_v9 = vmul.f32 %v14382_v32, %v16978_v27 }
 0x25a   : > { %5768 = vperm.xlu1 %13112, %v5698_v19   ;;  %5763 = vperm.xlu0 %13111, %v5697_v17   ;;  %v5702_v19 = vld [vmem:[#allocation7 + $0x68] sm:$0xff]  ;;  %v5701_v17 = vld [vmem:[#allocation7 + $0x60] sm:$0xff] }
 0x25b   : > { %12041 = vmatprep.subr.bf16.mxu0 %v13171_v5  ;;  %v3934_v20 = vpack.c.bf16 %v3876_v9, %v3875_v45  ;;  %v16983_v9 = vld [vmem:[#allocation30_spill] sm:$0xff] }
 0x25c   : > { %12010 = vmatmul.mubr.bf16.gmra.mrb[4].mxu0 %v3932_v31  ;;  %v3879_v45 = vmul.f32 %v14406_v62, %v16983_v9  ;;  %v16986_v9 = vld [vmem:[#allocation33_spill] sm:$0xff] }
 0x25d   : > { %12013 = vmatprep.mubr.bf16.mxu0 %v3933_v42  ;;  %v14538_v38 = vpop.permute.xlu1 %4325  ;;  %v14540_v57 = vpop.permute.xlu0 %4320  ;;  %12042 = vmatpush3.bf16.msra.mxu0 %v13171_v5  ;;  %v13173_v5 = vld [vmem:[%s16614_s1 + $0x1e0] sm:$0xff]   ;;  %v3935_v42 = vpack.c.bf16 %v3878_v30, %v3877_v39  ;;  %v3882_v30 = vmul.f32 %v14419_v49, %v16984_v40  ;;  %v3881_v39 = vmul.f32 %v14421_v3, %v16985_v55  ;;  %v13176_v3 = vld [vmem:[%s16614_s1 + $0x1f8] sm:$0xff]   ;;  %v16989_v55 = vld [vmem:[#allocation36_spill] sm:$0xff] }
 0x25e   : > { %5778 = vperm.xlu1 %13112, %v5700_v51   ;;  %5773 = vperm.xlu0 %13111, %v5699_v1   ;;  %v5703_v51 = vld [vmem:[#allocation7 + $0x70] sm:$0xff]  ;;  %v5708_v49 = vld [vmem:[#allocation7 + $0x98] sm:$0xff]  ;;  %v16988_v40 = vld [vmem:[#allocation35_spill] sm:$0xff] }
 0x25f   : > { %12043 = vmatprep.subr.bf16.mxu0 %v13172_v63 }
 0x261   : > { %v14553_v31 = vpop.permute.xlu1 %4335  ;;  %v14555_v32 = vpop.permute.xlu0 %4330  ;;  %12044 = vmatpush3.bf16.msra.mxu0 %v13172_v63  ;;  %v3880_v63 = vmul.f32 %v14404_v16, %v16982_v4 }
 0x262   : > { %5788 = vperm.xlu1 %13112, %v5702_v19   ;;  %5783 = vperm.xlu0 %13111, %v5701_v17   ;;  %v5706_v19 = vld [vmem:[#allocation7 + $0x88] sm:$0xff]  ;;  %v5705_v17 = vld [vmem:[#allocation7 + $0x80] sm:$0xff] }
 0x263   : > { %12045 = vmatprep.subr.bf16.mxu0 %v13173_v5  ;;  %v3936_v62 = vpack.c.bf16 %v3880_v63, %v3879_v45  ;;  %v16987_v63 = vld [vmem:[#allocation34_spill] sm:$0xff] }
 0x264   : > { %12014 = vmatmul.mubr.bf16.gmra.mrb[8].mxu0 %v3934_v20  ;;  %v3883_v45 = vmul.f32 %v14428_v10, %v16987_v63 }
 0x265   : > { %12017 = vmatprep.mubr.bf16.mxu0 %v3935_v42  ;;  %v14560_v1 = vpop.permute.xlu1 %4345  ;;  %v14562_v27 = vpop.permute.xlu0 %4340  ;;  %12046 = vmatpush3.bf16.msra.mxu0 %v13173_v5  ;;  %v13175_v5 = vld [vmem:[%s16614_s1 + $0x1f0] sm:$0xff]   ;;  %v3937_v42 = vpack.c.bf16 %v3882_v30, %v3881_v39  ;;  %v3886_v30 = vmul.f32 %v14443_v2, %v16988_v40  ;;  %v3885_v39 = vmul.f32 %v14445_v13, %v16989_v55  ;;  %v16991_v40 = vld [vmem:[#allocation38_spill] sm:$0xff] }
 0x266   : > { %5798 = vperm.xlu1 %13112, %v5704_v47   ;;  %5793 = vperm.xlu0 %13111, %v5703_v51   ;;  %v5707_v47 = vld [vmem:[#allocation7 + $0x90] sm:$0xff] }
 0x267   : > { %12047 = vmatprep.subr.bf16.mxu0 %v13174_v60  ;;  %v3939_v2 = vpack.c.bf16 %v3886_v30, %v3885_v39  ;;  %v16993_v30 = vld [vmem:[#allocation40_spill] sm:$0xff] }
 0x268   : > { %v3889_v55 = vmul.f32 %v14462_v44, %v16993_v30  ;;  %v5714_v39 = vld [vmem:[#allocation7 + $0xc8] sm:$0xff] }
 0x269   : > { %v14575_v20 = vpop.permute.xlu1 %4355  ;;  %v14577_v16 = vpop.permute.xlu0 %4350  ;;  %12048 = vmatpush3.bf16.msra.mxu0 %v13174_v60  ;;  %v3884_v60 = vmul.f32 %v14426_v29, %v16986_v9  ;;  %v16990_v9 = vld [vmem:[#allocation37_spill] sm:$0xff] }
 0x26a   : > { %5808 = vperm.xlu1 %13112, %v5706_v19   ;;  %5803 = vperm.xlu0 %13111, %v5705_v17   ;;  %v5710_v19 = vld [vmem:[#allocation7 + $0xa8] sm:$0xff]  ;;  %v5709_v17 = vld [vmem:[#allocation7 + $0xa0] sm:$0xff]  ;;  %v3888_v63 = vmul.f32 %v14448_v46, %v16990_v9  ;;  %v5716_v9 = vld [vmem:[#allocation7 + $0xd8] sm:$0xff] }
 0x26b   : > { %12049 = vmatprep.subr.bf16.mxu0 %v13175_v5  ;;  %v3938_v10 = vpack.c.bf16 %v3884_v60, %v3883_v45  ;;  %v16992_v60 = vld [vmem:[#allocation39_spill] sm:$0xff] }
 0x26c   : > { %12018 = vmatmul.mubr.bf16.gmra.mrb[12].mxu0 %v3936_v62  ;;  %v3890_v45 = vmul.f32 %v14460_v61, %v16992_v60 }
 0x26d   : > { %12021 = vmatprep.mubr.bf16.mxu0 %v3937_v42  ;;  %v14582_v51 = vpop.permute.xlu1 %4365  ;;  %v14584_v4 = vpop.permute.xlu0 %4360  ;;  %12050 = vmatpush3.bf16.msra.mxu0 %v13175_v5  ;;  %v14597_v5 = vld [vmem:[%s16614_s1 + $0x200] sm:$0xff]  }
 0x26e   : > { %5818 = vperm.xlu1 %13112, %v5708_v49   ;;  %5813 = vperm.xlu0 %13111, %v5707_v47   ;;  %v5712_v42 = vld [vmem:[#allocation7 + $0xb8] sm:$0xff]  ;;  %v5711_v49 = vld [vmem:[#allocation7 + $0xb0] sm:$0xff]  ;;  %v3941_v46 = vpack.c.bf16 %v3890_v45, %v3889_v55  ;;  %v16997_v45 = vld [vmem:[#allocation12_spill] sm:$0xff] }
 0x26f   : > { %12051 = vmatprep.subr.bf16.mxu0 %v13176_v3  ;;  %v3893_v30 = vmul.f32 %v14478_v59, %v16997_v45  ;;  %v5718_v55 = vld [vmem:[#allocation7 + $0xe8] sm:$0xff]  ;;  %v16998_v59 = vld [vmem:[#allocation13_spill] sm:$0xff] }
 0x271   : > { %v14599_v29 = vpop.permute.xlu1 %4375  ;;  %v14601_v62 = vpop.permute.xlu0 %4370  ;;  %12052 = vmatpush3.bf16.msra.mxu0 %v13176_v3  ;;  %v3887_v3 = vmul.f32 %v14450_v34, %v16991_v40  ;;  %v5715_v34 = vld [vmem:[#allocation7 + $0xd0] sm:$0xff]  ;;  %v16995_v40 = vld [vmem:[#allocation42_spill] sm:$0xff] }
 0x272   : > { %5828 = vperm.xlu1 %13112, %v5710_v19   ;;  %5823 = vperm.xlu0 %13111, %v5709_v17   ;;  %v5713_v19 = vld [vmem:[#allocation7 + $0xc0] sm:$0xff]  ;;  %v3891_v60 = vmul.f32 %v14466_v48, %v16995_v40  ;;  %v5720_v48 = vld [vmem:[#allocation7 + $0xf8] sm:$0xff] }
 0x273   : > { %12085 = vmatprep.subr.bf16.mxu0 %v14597_v5  ;;  %v16999_v40 = vld [vmem:[#allocation11_spill] sm:$0xff] }
 0x274   : > { %12022 = vmatmul.mubr.bf16.gmra.mrb[16].mxu0 %v3938_v10 }
 0x275   : > { %12025 = vmatprep.mubr.bf16.mxu0 %v3939_v2  ;;  %v14604_v13 = vpop.permute.xlu1 %4385  ;;  %v14606_v47 = vpop.permute.xlu0 %4380  ;;  %v3940_v2 = vpack.c.bf16 %v3888_v63, %v3887_v3  ;;  %v16996_v63 = vld [vmem:[#allocation14_spill] sm:$0xff] }
 0x276   : > { %5838 = vperm.xlu1 %13112, %v5712_v42   ;;  %5833 = vperm.xlu0 %13111, %v5711_v49   ;;  %v16994_v49 = vld [vmem:[#allocation41_spill] sm:$0xff]  ;;  %v3894_v3 = vmul.f32 %v14476_v15, %v16996_v63  ;;  %v3895_v63 = vmul.f32 %v14482_v22, %v16999_v40  ;;  %v13295_v40 = vld [vmem:[%s13546_s23 + $0x20] sm:$0xff] }
 0x277   : > { %v3892_v44 = vmul.f32 %v14464_v56, %v16994_v49  ;;  %v3896_v49 = vmul.f32 %v14480_v33, %v16998_v59 }
 0x278   : > { %v3943_v56 = vpack.c.bf16 %v3894_v3, %v3893_v30  ;;  %v13293_v3 = vld [vmem:[%s13546_s23 + $0x10] sm:$0xff] }
 0x279   : > { %v14616_v17 = vpop.permute.xlu1 %4395  ;;  %v14618_v10 = vpop.permute.xlu0 %4390  ;;  %v4428_v45 = vmul.f32 %v13293_v3, %v14494_v37  ;;  %v6252_v30 = vld [vmem:[#allocation7 + $0x108] sm:$0xff]  ;;  %v3944_v33 = vpack.c.bf16 %v3896_v49, %v3895_v63  ;;  %v13296_v49 = vld [vmem:[%s13546_s23 + $0x38] sm:$0xff] }
 0x27a   : > { %5848 = vperm.xlu1 %13112, %v5714_v39   ;;  %5843 = vperm.xlu0 %13111, %v5713_v19   ;;  %v5717_v39 = vld [vmem:[#allocation7 + $0xe0] sm:$0xff]  ;;  %v4433_v63 = vmul.f32 %v13296_v49, %v14508_v0  ;;  %v13300_v49 = vld [vmem:[%s13546_s23 + $0x58] sm:$0xff] }
 0x27b   : > { %v13178_v0 = vld [vmem:[%s16614_s1 + $0x208] sm:$0xff]  }
 0x27c   : > { %12026 = vmatmul.mubr.bf16.gmra.mrb[20].mxu0 %v3940_v2 }
 0x27d   : > { %12029 = vmatprep.mubr.bf16.mxu0 %v3941_v46  ;;  %v14620_v42 = vpop.permute.xlu1 %4405  ;;  %v14622_v61 = vpop.permute.xlu0 %4400  ;;  %v3942_v46 = vpack.c.bf16 %v3892_v44, %v3891_v60  ;;  %v13292_v44 = vld [vmem:[%s13546_s23 + $0x18] sm:$0xff] }
 0x27e   : > { %5858 = vperm.xlu1 %13112, %v5716_v9   ;;  %5853 = vperm.xlu0 %13111, %v5715_v34   ;;  %v5719_v9 = vld [vmem:[#allocation7 + $0xf0] sm:$0xff]  ;;  %v4429_v60 = vmul.f32 %v13292_v44, %v14492_v50  ;;  %v4430_v44 = vmul.f32 %v13295_v40, %v14498_v8  ;;  %v13299_v40 = vld [vmem:[%s13546_s23 + $0x40] sm:$0xff] }
 0x280   : > { %v4492_v22 = vpack.c.bf16 %v4429_v60, %v4428_v45  ;;  %v13297_v60 = vld [vmem:[%s13546_s23 + $0x30] sm:$0xff] }
 0x281   : > { %v14632_v19 = vpop.permute.xlu1 %4415  ;;  %v14634_v2 = vpop.permute.xlu0 %4410  ;;  %v4432_v3 = vmul.f32 %v13297_v60, %v14510_v25  ;;  %v6256_v45 = vld [vmem:[#allocation7 + $0x128] sm:$0xff] }
 0x282   : > { %5868 = vperm.xlu1 %13112, %v5718_v55   ;;  %5863 = vperm.xlu0 %13111, %v5717_v39   ;;  %v6251_v55 = vld [vmem:[#allocation7 + $0x100] sm:$0xff]  ;;  %v13301_v60 = vld [vmem:[%s13546_s23 + $0x50] sm:$0xff] }
 0x283   : > { %v4494_v8 = vpack.c.bf16 %v4433_v63, %v4432_v3  ;;  %v4437_v63 = vmul.f32 %v13300_v49, %v14531_v41  ;;  %v4436_v3 = vmul.f32 %v13301_v60, %v14533_v28  ;;  %v6261_v28 = vld [vmem:[#allocation7 + $0x150] sm:$0xff]  ;;  %v17000_v49 = vld [vmem:[#allocation56_spill] sm:$0xff]  ;;  %v17001_v60 = vld [vmem:[#allocation55_spill] sm:$0xff] }
 0x284   : > { %12030 = vmatmul.mubr.bf16.gmra.mrb[24].mxu0 %v3942_v46 }
 0x285   : > { %12033 = vmatprep.mubr.bf16.mxu0 %v3943_v56  ;;  %v14636_v15 = vpop.permute.xlu1 %4425  ;;  %v14638_v34 = vpop.permute.xlu0 %4420  ;;  %v6254_v56 = vld [vmem:[#allocation7 + $0x118] sm:$0xff]  ;;  %v4496_v41 = vpack.c.bf16 %v4437_v63, %v4436_v3  ;;  %v4441_v63 = vmul.f32 %v17000_v49, %v14553_v31  ;;  %v4440_v3 = vmul.f32 %v17001_v60, %v14555_v32  ;;  %v6265_v32 = vld [vmem:[#allocation7 + $0x170] sm:$0xff]  ;;  %v17002_v49 = vld [vmem:[#allocation67_spill] sm:$0xff] }
 0x286   : > { %5878 = vperm.xlu1 %13112, %v5720_v48   ;;  %5873 = vperm.xlu0 %13111, %v5719_v9   ;;  %v6253_v48 = vld [vmem:[#allocation7 + $0x110] sm:$0xff]  ;;  %v13294_v9 = vld [vmem:[%s13546_s23 + $0x28] sm:$0xff]  ;;  %v17003_v60 = vld [vmem:[#allocation66_spill] sm:$0xff] }
 0x287   : > { %v4431_v59 = vmul.f32 %v13294_v9, %v14496_v23  ;;  %v13298_v9 = vld [vmem:[%s13546_s23 + $0x48] sm:$0xff]  ;;  %v4498_v31 = vpack.c.bf16 %v4441_v63, %v4440_v3  ;;  %v4445_v63 = vmul.f32 %v17002_v49, %v14575_v20  ;;  %v4444_v3 = vmul.f32 %v17003_v60, %v14577_v16  ;;  %v6270_v16 = vld [vmem:[#allocation7 + $0x198] sm:$0xff]  ;;  %v13309_v60 = vld [vmem:[%s13546_s23 + $0xb0] sm:$0xff] }
 0x288   : > { %v13308_v49 = vld [vmem:[%s13546_s23 + $0xb8] sm:$0xff] }
 0x289   : > { %v14648_v39 = vpop.permute.xlu1 %4838  ;;  %v14650_v46 = vpop.permute.xlu0 %4833  ;;  %v4493_v23 = vpack.c.bf16 %v4431_v59, %v4430_v44  ;;  %v4435_v59 = vmul.f32 %v13298_v9, %v14516_v12  ;;  %v4434_v44 = vmul.f32 %v13299_v40, %v14518_v26  ;;  %v13303_v40 = vld [vmem:[%s13546_s23 + $0x60] sm:$0xff]  ;;  %v4500_v20 = vpack.c.bf16 %v4445_v63, %v4444_v3 }
 0x28a   : > { %6290 = vperm.xlu1 %13112, %v6252_v30   ;;  %6285 = vperm.xlu0 %13111, %v6251_v55   ;;  %v6255_v30 = vld [vmem:[#allocation7 + $0x120] sm:$0xff]  ;;  %v4449_v63 = vmul.f32 %v13308_v49, %v14599_v29  ;;  %v4448_v3 = vmul.f32 %v13309_v60, %v14601_v62  ;;  %v6274_v29 = vld [vmem:[#allocation7 + $0x1b8] sm:$0xff]  ;;  %v13313_v49 = vld [vmem:[%s13546_s23 + $0xd0] sm:$0xff] }
 0x28b   : > { %v4495_v26 = vpack.c.bf16 %v4435_v59, %v4434_v44  ;;  %v4438_v44 = vmul.f32 %v13303_v40, %v14540_v57  ;;  %v13305_v40 = vld [vmem:[%s13546_s23 + $0x80] sm:$0xff]  ;;  %v6276_v60 = vld [vmem:[#allocation7 + $0x1c8] sm:$0xff] }
 0x28c   : > { %12034 = vmatmul.mubr.bf16.gmra.mrb[28].mxu0 %v3944_v33 }
 0x28d   : > { %12053 = vmatprep.mubr.bf16.mxu0 %v4492_v22  ;;  %v14652_v50 = vpop.permute.xlu1 %4848  ;;  %v14654_v37 = vpop.permute.xlu0 %4843  ;;  %v6258_v22 = vld [vmem:[#allocation7 + $0x138] sm:$0xff] }
 0x28e   : > { %6300 = vperm.xlu1 %13112, %v6254_v56   ;;  %6295 = vperm.xlu0 %13111, %v6253_v48   ;;  %v6257_v56 = vld [vmem:[#allocation7 + $0x130] sm:$0xff] }
 0x291   : > { %v14664_v55 = vpop.permute.xlu1 %4858  ;;  %v14666_v33 = vpop.permute.xlu0 %4853 }
 0x292   : > { %6310 = vperm.xlu1 %13112, %v6256_v45   ;;  %6305 = vperm.xlu0 %13111, %v6255_v30   ;;  %v6259_v45 = vld [vmem:[#allocation7 + $0x140] sm:$0xff]  ;;  %v13179_v30 = vld [vmem:[%s16614_s1 + $0x210] sm:$0xff]  }
 0x294   : > { %12054 = vmatmul.mubr.bf16.vlgmr.msra.gmra.mrb[0].mxu0 %v4493_v23 }
 0x295   : > { %12086 = vmatpush3.bf16.msra.mxu0 %v14597_v5  ;;  %12057 = vmatprep.mubr.bf16.mxu0 %v4494_v8  ;;  %v14672_v25 = vpop.permute.xlu1 %4868  ;;  %v14674_v48 = vpop.permute.xlu0 %4863  ;;  %v6260_v5 = vld [vmem:[#allocation7 + $0x148] sm:$0xff]  ;;  %v6262_v8 = vld [vmem:[#allocation7 + $0x158] sm:$0xff] }
 0x296   : > { %6320 = vperm.xlu1 %13112, %v6258_v22   ;;  %6315 = vperm.xlu0 %13111, %v6257_v56   ;;  %v13180_v22 = vld [vmem:[%s16614_s1 + $0x218] sm:$0xff]  }
 0x297   : > { %12087 = vmatprep.subr.bf16.mxu0 %v13178_v0 }
 0x299   : > { %v14687_v23 = vpop.permute.xlu1 %4878  ;;  %v14689_v12 = vpop.permute.xlu0 %4873  ;;  %12088 = vmatpush3.bf16.msra.mxu0 %v13178_v0  ;;  %v13302_v0 = vld [vmem:[%s13546_s23 + $0x68] sm:$0xff] }
 0x29a   : > { %6330 = vperm.xlu1 %13112, %v6260_v5   ;;  %6325 = vperm.xlu0 %13111, %v6259_v45   ;;  %v4439_v59 = vmul.f32 %v13302_v0, %v14538_v38  ;;  %v6264_v5 = vld [vmem:[#allocation7 + $0x168] sm:$0xff]  ;;  %v6263_v45 = vld [vmem:[#allocation7 + $0x160] sm:$0xff] }
 0x29b   : > { %12089 = vmatprep.subr.bf16.mxu0 %v13179_v30 }
 0x29c   : > { %12058 = vmatmul.mubr.bf16.gmra.mrb[4].mxu0 %v4495_v26  ;;  %v4497_v57 = vpack.c.bf16 %v4439_v59, %v4438_v44  ;;  %v4442_v44 = vmul.f32 %v13305_v40, %v14562_v27  ;;  %v13307_v40 = vld [vmem:[%s13546_s23 + $0xa0] sm:$0xff] }
 0x29d   : > { %12061 = vmatprep.mubr.bf16.mxu0 %v4496_v41  ;;  %v14694_v56 = vpop.permute.xlu1 %4888  ;;  %v14696_v9 = vpop.permute.xlu0 %4883  ;;  %12090 = vmatpush3.bf16.msra.mxu0 %v13179_v30  ;;  %v13181_v30 = vld [vmem:[%s16614_s1 + $0x220] sm:$0xff]  }
 0x29e   : > { %6340 = vperm.xlu1 %13112, %v6262_v8   ;;  %6335 = vperm.xlu0 %13111, %v6261_v28   ;;  %v6266_v41 = vld [vmem:[#allocation7 + $0x178] sm:$0xff]  ;;  %v13182_v8 = vld [vmem:[%s16614_s1 + $0x228] sm:$0xff]  }
 0x29f   : > { %12091 = vmatprep.subr.bf16.mxu0 %v13180_v22 }
 0x2a1   : > { %v14709_v26 = vpop.permute.xlu1 %4898  ;;  %v14711_v38 = vpop.permute.xlu0 %4893  ;;  %12092 = vmatpush3.bf16.msra.mxu0 %v13180_v22  ;;  %v13304_v22 = vld [vmem:[%s13546_s23 + $0x88] sm:$0xff] }
 0x2a2   : > { %6350 = vperm.xlu1 %13112, %v6264_v5   ;;  %6345 = vperm.xlu0 %13111, %v6263_v45   ;;  %v4443_v59 = vmul.f32 %v13304_v22, %v14560_v1  ;;  %v6268_v5 = vld [vmem:[#allocation7 + $0x188] sm:$0xff]  ;;  %v6267_v45 = vld [vmem:[#allocation7 + $0x180] sm:$0xff] }
 0x2a3   : > { %12093 = vmatprep.subr.bf16.mxu0 %v13181_v30 }
 0x2a4   : > { %12062 = vmatmul.mubr.bf16.gmra.mrb[8].mxu0 %v4497_v57  ;;  %v4499_v27 = vpack.c.bf16 %v4443_v59, %v4442_v44  ;;  %v4446_v44 = vmul.f32 %v13307_v40, %v14584_v4  ;;  %v4502_v4 = vpack.c.bf16 %v4449_v63, %v4448_v3  ;;  %v13311_v40 = vld [vmem:[%s13546_s23 + $0xc0] sm:$0xff]  ;;  %v4452_v63 = vmul.f32 %v13313_v49, %v14618_v10  ;;  %v6280_v49 = vld [vmem:[#allocation7 + $0x1e8] sm:$0xff] }
 0x2a5   : > { %12065 = vmatprep.mubr.bf16.mxu0 %v4498_v31  ;;  %v14716_v28 = vpop.permute.xlu1 %4908  ;;  %v14718_v0 = vpop.permute.xlu0 %4903  ;;  %12094 = vmatpush3.bf16.msra.mxu0 %v13181_v30  ;;  %v13183_v30 = vld [vmem:[%s16614_s1 + $0x230] sm:$0xff]   ;;  %v6275_v3 = vld [vmem:[#allocation7 + $0x1c0] sm:$0xff] }
 0x2a6   : > { %6360 = vperm.xlu1 %13112, %v6266_v41   ;;  %6355 = vperm.xlu0 %13111, %v6265_v32   ;;  %v6269_v31 = vld [vmem:[#allocation7 + $0x190] sm:$0xff] }
 0x2a7   : > { %12095 = vmatprep.subr.bf16.mxu0 %v13182_v8  ;;  %v13184_v41 = vld [vmem:[%s16614_s1 + $0x238] sm:$0xff]  }
 0x2a9   : > { %v14731_v57 = vpop.permute.xlu1 %4918  ;;  %v14733_v1 = vpop.permute.xlu0 %4913  ;;  %12096 = vmatpush3.bf16.msra.mxu0 %v13182_v8  ;;  %v13306_v8 = vld [vmem:[%s13546_s23 + $0xa8] sm:$0xff] }
 0x2aa   : > { %6370 = vperm.xlu1 %13112, %v6268_v5   ;;  %6365 = vperm.xlu0 %13111, %v6267_v45   ;;  %v4447_v59 = vmul.f32 %v13306_v8, %v14582_v51  ;;  %v6272_v5 = vld [vmem:[#allocation7 + $0x1a8] sm:$0xff]  ;;  %v6271_v45 = vld [vmem:[#allocation7 + $0x1a0] sm:$0xff] }
 0x2ab   : > { %12097 = vmatprep.subr.bf16.mxu0 %v13183_v30 }
 0x2ac   : > { %12066 = vmatmul.mubr.bf16.gmra.mrb[12].mxu0 %v4499_v27  ;;  %v4501_v51 = vpack.c.bf16 %v4447_v59, %v4446_v44  ;;  %v13312_v59 = vld [vmem:[%s13546_s23 + $0xd8] sm:$0xff] }
 0x2ad   : > { %12069 = vmatprep.mubr.bf16.mxu0 %v4500_v20  ;;  %v14738_v32 = vpop.permute.xlu1 %4928  ;;  %v14740_v22 = vpop.permute.xlu0 %4923  ;;  %12098 = vmatpush3.bf16.msra.mxu0 %v13183_v30  ;;  %v6273_v20 = vld [vmem:[#allocation7 + $0x1b0] sm:$0xff]  ;;  %v4453_v44 = vmul.f32 %v13312_v59, %v14616_v17 }
 0x2ae   : > { %6380 = vperm.xlu1 %13112, %v6270_v16   ;;  %6375 = vperm.xlu0 %13111, %v6269_v31   ;;  %v13310_v31 = vld [vmem:[%s13546_s23 + $0xc8] sm:$0xff]  ;;  %v13317_v59 = vld [vmem:[%s13546_s23 + $0xf0] sm:$0xff] }
 0x2af   : > { %12099 = vmatprep.subr.bf16.mxu0 %v13184_v41  ;;  %v4451_v8 = vmul.f32 %v13310_v31, %v14604_v13  ;;  %v13315_v31 = vld [vmem:[%s13546_s23 + $0xe0] sm:$0xff] }
 0x2b1   : > { %v14750_v30 = vpop.permute.xlu1 %4938  ;;  %v14752_v27 = vpop.permute.xlu0 %4933  ;;  %12100 = vmatpush3.bf16.msra.mxu0 %v13184_v41  ;;  %v4450_v41 = vmul.f32 %v13311_v40, %v14606_v47  ;;  %v4504_v47 = vpack.c.bf16 %v4453_v44, %v4452_v63  ;;  %v4454_v40 = vmul.f32 %v13315_v31, %v14622_v61  ;;  %v4456_v44 = vmul.f32 %v13317_v59, %v14634_v2  ;;  %v6279_v63 = vld [vmem:[#allocation7 + $0x1e0] sm:$0xff] }
 0x2b2   : > { %6390 = vperm.xlu1 %13112, %v6272_v5   ;;  %6385 = vperm.xlu0 %13111, %v6271_v45   ;;  %v13318_v2 = vld [vmem:[%s13546_s23 + $0x8] sm:$0xff] }
 0x2b3   : > { %v4503_v13 = vpack.c.bf16 %v4451_v8, %v4450_v41  ;;  %v13316_v8 = vld [vmem:[%s13546_s23 + $0xf8] sm:$0xff]  ;;  %v6910_v59 = vld [vmem:[#allocation7 + $0x200] sm:$0xff] }
 0x2b4   : > { %12070 = vmatmul.mubr.bf16.gmra.mrb[16].mxu0 %v4501_v51  ;;  %v6278_v51 = vld [vmem:[#allocation7 + $0x1d8] sm:$0xff]  ;;  %v4457_v41 = vmul.f32 %v13316_v8, %v14632_v19  ;;  %v4991_v8 = vmul.f32 %v14650_v46, %v16953_v54 }
 0x2b5   : > { %12073 = vmatprep.mubr.bf16.mxu0 %v4502_v4  ;;  %v14754_v62 = vpop.permute.xlu1 %4948  ;;  %v14756_v16 = vpop.permute.xlu0 %4943  ;;  %v6277_v4 = vld [vmem:[#allocation7 + $0x1d0] sm:$0xff]  ;;  %v17006_v46 = vld [vmem:[#allocation50_spill] sm:$0xff] }
 0x2b6   : > { %6400 = vperm.xlu1 %13112, %v6274_v29   ;;  %6395 = vperm.xlu0 %13111, %v6273_v20   ;;  %v13314_v29 = vld [vmem:[%s13546_s23 + $0xe8] sm:$0xff]  ;;  %v4506_v61 = vpack.c.bf16 %v4457_v41, %v4456_v44 }
 0x2b7   : > { %v4455_v20 = vmul.f32 %v13314_v29, %v14620_v42  ;;  %v13319_v29 = vld [vmem:[%s13546_s23] sm:$0xff]  ;;  %v6911_v41 = vld [vmem:[#allocation7 + $0x208] sm:$0xff] }
 0x2b8   : > { %v4458_v31 = vmul.f32 %v13319_v29, %v14638_v34  ;;  %v6912_v34 = vld [vmem:[#allocation7 + $0x210] sm:$0xff]  ;;  %v6915_v29 = vld [vmem:[#allocation7 + $0x228] sm:$0xff] }
 0x2b9   : > { %v14766_v5 = vpop.permute.xlu1 %4958  ;;  %v14768_v45 = vpop.permute.xlu0 %4953  ;;  %v4505_v42 = vpack.c.bf16 %v4455_v20, %v4454_v40  ;;  %v17004_v20 = vld [vmem:[#allocation47_spill] sm:$0xff] }
 0x2ba   : > { %6410 = vperm.xlu1 %13112, %v6276_v60   ;;  %6405 = vperm.xlu0 %13111, %v6275_v3   ;;  %v4992_v40 = vmul.f32 %v14648_v39, %v17004_v20 }
 0x2bc   : > { %12074 = vmatmul.mubr.bf16.gmra.mrb[20].mxu0 %v4503_v13  ;;  %v6282_v13 = vld [vmem:[#allocation7 + $0x1f8] sm:$0xff] }
 0x2bd   : > { %12077 = vmatprep.mubr.bf16.mxu0 %v4504_v47  ;;  %v14770_v17 = vpop.permute.xlu1 %4968  ;;  %v14772_v10 = vpop.permute.xlu0 %4963  ;;  %v6281_v47 = vld [vmem:[#allocation7 + $0x1f0] sm:$0xff] }
 0x2be   : > { %6420 = vperm.xlu1 %13112, %v6278_v51   ;;  %6415 = vperm.xlu0 %13111, %v6277_v4   ;;  %v4459_v4 = vmul.f32 %v13318_v2, %v14636_v15  ;;  %v5055_v15 = vpack.c.bf16 %v4992_v40, %v4991_v8  ;;  %v4996_v2 = vmul.f32 %v14664_v55, %v16956_v43  ;;  %v17007_v55 = vld [vmem:[#allocation53_spill] sm:$0xff] }
 0x2c1   : > { %v14782_v60 = vpop.permute.xlu1 %4978  ;;  %v14784_v3 = vpop.permute.xlu0 %4973 }
 0x2c2   : > { %6430 = vperm.xlu1 %13112, %v6280_v49   ;;  %6425 = vperm.xlu0 %13111, %v6279_v63   ;;  %v4507_v63 = vpack.c.bf16 %v4459_v4, %v4458_v31  ;;  %v4995_v4 = vmul.f32 %v14666_v33, %v16957_v14  ;;  %v6914_v31 = vld [vmem:[#allocation7 + $0x220] sm:$0xff]  ;;  %v4998_v14 = vmul.f32 %v14672_v25, %v17007_v55  ;;  %v17008_v33 = vld [vmem:[#allocation54_spill] sm:$0xff] }
 0x2c3   : > { %v5007_v55 = vmul.f32 %v14733_v1, %v14075_v6  ;;  %v5010_v6 = vmul.f32 %v14738_v32, %v14087_v35  ;;  %v6933_v32 = vld [vmem:[#allocation7 + $0x2b8] sm:$0xff] }
 0x2c4   : > { %12078 = vmatmul.mubr.bf16.gmra.mrb[24].mxu0 %v4505_v42  ;;  %v6913_v42 = vld [vmem:[#allocation7 + $0x218] sm:$0xff] }
 0x2c5   : > { %12081 = vmatprep.mubr.bf16.mxu0 %v4506_v61  ;;  %v14786_v19 = vpop.permute.xlu1 %4988  ;;  %v14788_v51 = vpop.permute.xlu0 %4983 }
 0x2c6   : > { %6440 = vperm.xlu1 %13112, %v6282_v13   ;;  %6435 = vperm.xlu0 %13111, %v6281_v47   ;;  %v17005_v13 = vld [vmem:[#allocation49_spill] sm:$0xff]  ;;  %v4993_v47 = vmul.f32 %v14654_v37, %v17006_v46 }
 0x2c7   : > { %v4994_v54 = vmul.f32 %v14652_v50, %v17005_v13  ;;  %v5057_v50 = vpack.c.bf16 %v4996_v2, %v4995_v4  ;;  %v6916_v37 = vld [vmem:[#allocation7 + $0x230] sm:$0xff]  ;;  %v6918_v13 = vld [vmem:[#allocation7 + $0x240] sm:$0xff]  ;;  %v6921_v2 = vld [vmem:[#allocation7 + $0x258] sm:$0xff] }
 0x2c9   : > { %v14798_v44 = vpop.permute.xlu1 %5728  ;;  %v14800_v49 = vpop.permute.xlu0 %5723  ;;  %v5056_v8 = vpack.c.bf16 %v4994_v54, %v4993_v47 }
 0x2ca   : > { %6949 = vperm.xlu1 %13112, %v6911_v41   ;;  %6944 = vperm.xlu0 %13111, %v6910_v59   ;;  %v6917_v41 = vld [vmem:[#allocation7 + $0x238] sm:$0xff] }
 0x2cc   : > { %12082 = vmatmul.mubr.bf16.gmra.mrb[28].mxu0 %v4507_v63  ;;  %v4997_v63 = vmul.f32 %v14674_v48, %v17008_v33  ;;  %v6920_v48 = vld [vmem:[#allocation7 + $0x250] sm:$0xff]  ;;  %v6926_v33 = vld [vmem:[#allocation7 + $0x280] sm:$0xff] }
 0x2cd   : > { %12101 = vmatprep.mubr.bf16.mxu0 %v5055_v15  ;;  %v14802_v61 = vpop.permute.xlu1 %5738  ;;  %v14804_v39 = vpop.permute.xlu0 %5733  ;;  %v5000_v15 = vmul.f32 %v14687_v23, %v14017_v18  ;;  %v5001_v23 = vmul.f32 %v14696_v9, %v14036_v53  ;;  %v6924_v53 = vld [vmem:[#allocation7 + $0x270] sm:$0xff] }
 0x2ce   : > { %6959 = vperm.xlu1 %13112, %v6913_v42   ;;  %6954 = vperm.xlu0 %13111, %v6912_v34   ;;  %v4999_v42 = vmul.f32 %v14689_v12, %v14020_v7  ;;  %v6919_v34 = vld [vmem:[#allocation7 + $0x248] sm:$0xff]  ;;  %v5058_v47 = vpack.c.bf16 %v4998_v14, %v4997_v63  ;;  %v5002_v7 = vmul.f32 %v14694_v56, %v14033_v24  ;;  %v6925_v56 = vld [vmem:[#allocation7 + $0x278] sm:$0xff] }
 0x2cf   : > { %v5004_v12 = vmul.f32 %v14709_v26, %v14046_v58  ;;  %v5005_v26 = vmul.f32 %v14718_v0, %v14062_v21  ;;  %v6927_v14 = vld [vmem:[#allocation7 + $0x288] sm:$0xff]  ;;  %v6928_v21 = vld [vmem:[#allocation7 + $0x290] sm:$0xff] }
 0x2d0   : > { %v5059_v25 = vpack.c.bf16 %v5000_v15, %v4999_v42 }
 0x2d1   : > { %v14814_v20 = vpop.permute.xlu1 %5748  ;;  %v14816_v40 = vpop.permute.xlu0 %5743 }
 0x2d2   : > { %6969 = vperm.xlu1 %13112, %v6915_v29   ;;  %6964 = vperm.xlu0 %13111, %v6914_v31   ;;  %v5003_v29 = vmul.f32 %v14711_v38, %v14049_v11  ;;  %v6923_v31 = vld [vmem:[#allocation7 + $0x268] sm:$0xff]  ;;  %v5006_v11 = vmul.f32 %v14716_v28, %v14059_v36  ;;  %v5008_v38 = vmul.f32 %v14731_v57, %v14072_v52  ;;  %v6929_v28 = vld [vmem:[#allocation7 + $0x298] sm:$0xff]  ;;  %v17010_v57 = vld [vmem:[#allocation57_spill] sm:$0xff] }
 0x2d3   : > { %v5009_v1 = vmul.f32 %v14740_v22, %v17010_v57  ;;  %v6932_v22 = vld [vmem:[#allocation7 + $0x2b0] sm:$0xff]  ;;  %v17025_v57 = vld [vmem:[#allocation43_spill] sm:$0xff] }
 0x2d4   : > { %12102 = vmatmul.mubr.bf16.vlgmr.msra.gmra.mrb[0].mxu0 %v5056_v8  ;;  %v6922_v8 = vld [vmem:[#allocation7 + $0x260] sm:$0xff]  ;;  %v5061_v24 = vpack.c.bf16 %v5004_v12, %v5003_v29  ;;  %v5062_v42 = vpack.c.bf16 %v5006_v11, %v5005_v26  ;;  %v5063_v36 = vpack.c.bf16 %v5008_v38, %v5007_v55  ;;  %v6935_v26 = vld [vmem:[#allocation7 + $0x2c8] sm:$0xff] }
 0x2d5   : > { %12105 = vmatprep.mubr.bf16.mxu0 %v5057_v50  ;;  %v14818_v59 = vpop.permute.xlu1 %5758  ;;  %v14820_v43 = vpop.permute.xlu0 %5753  ;;  %v5064_v12 = vpack.c.bf16 %v5010_v6, %v5009_v1  ;;  %v6934_v38 = vld [vmem:[#allocation7 + $0x2c0] sm:$0xff]  ;;  %v5020_v1 = vmul.f32 %v14782_v60, %v17025_v57 }
 0x2d6   : > { %6979 = vperm.xlu1 %13112, %v6917_v41   ;;  %6974 = vperm.xlu0 %13111, %v6916_v37   ;;  %v5060_v37 = vpack.c.bf16 %v5002_v7, %v5001_v23  ;;  %v7480_v57 = vld [vmem:[#allocation7 + $0x340] sm:$0xff] }
 0x2d9   : > { %v14830_v54 = vpop.permute.xlu1 %5768  ;;  %v14832_v46 = vpop.permute.xlu0 %5763 }
 0x2da   : > { %6989 = vperm.xlu1 %13112, %v6919_v34   ;;  %6984 = vperm.xlu0 %13111, %v6918_v13   ;;  %v17011_v34 = vld [vmem:[#allocation58_spill] sm:$0xff] }
 0x2db   : > { %v5012_v13 = vmul.f32 %v14750_v30, %v17011_v34  ;;  %v17026_v34 = vld [vmem:[#allocation44_spill] sm:$0xff] }
 0x2dc   : > { %12106 = vmatmul.mubr.bf16.gmra.mrb[4].mxu0 %v5058_v47  ;;  %v17012_v47 = vld [vmem:[#allocation59_spill] sm:$0xff] }
 0x2dd   : > { %12109 = vmatprep.mubr.bf16.mxu0 %v5059_v25  ;;  %v14834_v4 = vpop.permute.xlu1 %5778  ;;  %v14836_v18 = vpop.permute.xlu0 %5773  ;;  %v5011_v25 = vmul.f32 %v14752_v27, %v17012_v47  ;;  %v6939_v47 = vld [vmem:[#allocation7 + $0x2e8] sm:$0xff] }
 0x2de   : > { %6999 = vperm.xlu1 %13112, %v6921_v2   ;;  %6994 = vperm.xlu0 %13111, %v6920_v48   ;;  %v6931_v2 = vld [vmem:[#allocation7 + $0x2a8] sm:$0xff]  ;;  %v6930_v48 = vld [vmem:[#allocation7 + $0x2a0] sm:$0xff] }
 0x2df   : > { %v5065_v35 = vpack.c.bf16 %v5012_v13, %v5011_v25  ;;  %v5019_v13 = vmul.f32 %v14784_v3, %v17026_v34  ;;  %v6938_v25 = vld [vmem:[#allocation7 + $0x2e0] sm:$0xff] }
 0x2e1   : > { %v14846_v50 = vpop.permute.xlu1 %5788  ;;  %v14848_v41 = vpop.permute.xlu0 %5783 }
 0x2e2   : > { %7009 = vperm.xlu1 %13112, %v6923_v31   ;;  %7004 = vperm.xlu0 %13111, %v6922_v8   ;;  %v17015_v31 = vld [vmem:[#allocation60_spill] sm:$0xff]  ;;  %v17016_v8 = vld [vmem:[#allocation61_spill] sm:$0xff] }
 0x2e3   : > { %v5014_v27 = vmul.f32 %v14754_v62, %v17015_v31  ;;  %v17032_v31 = vld [vmem:[#allocation46_spill] sm:$0xff] }
 0x2e4   : > { %12110 = vmatmul.mubr.bf16.gmra.mrb[8].mxu0 %v5060_v37  ;;  %v5013_v37 = vmul.f32 %v14756_v16, %v17016_v8  ;;  %v6936_v16 = vld [vmem:[#allocation7 + $0x2d0] sm:$0xff]  ;;  %v7473_v8 = vld [vmem:[#allocation7 + $0x308] sm:$0xff] }
 0x2e5   : > { %12113 = vmatprep.mubr.bf16.mxu0 %v5061_v24  ;;  %v14850_v9 = vpop.permute.xlu1 %5798  ;;  %v14852_v58 = vpop.permute.xlu0 %5793  ;;  %v17017_v24 = vld [vmem:[#allocation62_spill] sm:$0xff] }
 0x2e6   : > { %7019 = vperm.xlu1 %13112, %v6925_v56   ;;  %7014 = vperm.xlu0 %13111, %v6924_v53   ;;  %v5016_v56 = vmul.f32 %v14766_v5, %v17017_v24  ;;  %v17018_v53 = vld [vmem:[#allocation63_spill] sm:$0xff] }
 0x2e7   : > { %v5015_v11 = vmul.f32 %v14768_v45, %v17018_v53 }
 0x2e9   : > { %v14862_v63 = vpop.permute.xlu1 %5808  ;;  %v14864_v15 = vpop.permute.xlu0 %5803  ;;  %v5067_v62 = vpack.c.bf16 %v5016_v56, %v5015_v11  ;;  %v7475_v11 = vld [vmem:[#allocation7 + $0x318] sm:$0xff] }
 0x2ea   : > { %7029 = vperm.xlu1 %13112, %v6927_v14   ;;  %7024 = vperm.xlu0 %13111, %v6926_v33   ;;  %v5066_v33 = vpack.c.bf16 %v5014_v27, %v5013_v37  ;;  %v5021_v27 = vmul.f32 %v14788_v51, %v17032_v31  ;;  %v7472_v37 = vld [vmem:[#allocation7 + $0x300] sm:$0xff]  ;;  %v7477_v51 = vld [vmem:[#allocation7 + $0x328] sm:$0xff]  ;;  %v7486_v31 = vld [vmem:[#allocation7 + $0x370] sm:$0xff] }
 0x2ec   : > { %12114 = vmatmul.mubr.bf16.gmra.mrb[12].mxu0 %v5062_v42  ;;  %v6937_v42 = vld [vmem:[#allocation7 + $0x2d8] sm:$0xff] }
 0x2ed   : > { %12117 = vmatprep.mubr.bf16.mxu0 %v5063_v36  ;;  %v14866_v0 = vpop.permute.xlu1 %5818  ;;  %v14868_v52 = vpop.permute.xlu0 %5813 }
 0x2ee   : > { %17009 = vst [vmem:[#allocation48_spill] sm:$0xff] %v14868_v52  ;;  %7039 = vperm.xlu1 %13112, %v6929_v28   ;;  %7034 = vperm.xlu0 %13111, %v6928_v21   ;;  %v17023_v28 = vld [vmem:[#allocation64_spill] sm:$0xff]  ;;  %v17024_v21 = vld [vmem:[#allocation65_spill] sm:$0xff]  ;;  %v9512_v52 = vld [vmem:[#allocation7 + $0x780] sm:$0xff] }
 0x2ef   : > { %v5018_v45 = vmul.f32 %v14770_v17, %v17023_v28  ;;  %v5017_v6 = vmul.f32 %v14772_v10, %v17024_v21  ;;  %v5069_v17 = vpack.c.bf16 %v5020_v1, %v5019_v13  ;;  %v6940_v10 = vld [vmem:[#allocation7 + $0x2f0] sm:$0xff]  ;;  %v7483_v13 = vld [vmem:[#allocation7 + $0x358] sm:$0xff] }
 0x2f0   : > { %v7478_v28 = vld [vmem:[#allocation7 + $0x330] sm:$0xff] }
 0x2f1   : > { %v14878_v7 = vpop.permute.xlu1 %5828  ;;  %v14880_v23 = vpop.permute.xlu0 %5823 }
 0x2f2   : > { %7049 = vperm.xlu1 %13112, %v6931_v2   ;;  %7044 = vperm.xlu0 %13111, %v6930_v48  }
 0x2f4   : > { %12118 = vmatmul.mubr.bf16.gmra.mrb[16].mxu0 %v5064_v12  ;;  %v5068_v12 = vpack.c.bf16 %v5018_v45, %v5017_v6  ;;  %v7481_v6 = vld [vmem:[#allocation7 + $0x348] sm:$0xff] }
 0x2f5   : > { %12121 = vmatprep.mubr.bf16.mxu0 %v5065_v35  ;;  %v14882_v29 = vpop.permute.xlu1 %5838  ;;  %v14884_v30 = vpop.permute.xlu0 %5833  ;;  %v6941_v35 = vld [vmem:[#allocation7 + $0x2f8] sm:$0xff] }
 0x2f6   : > { %17013 = vst [vmem:[#allocation51_spill] sm:$0xff] %v14882_v29  ;;  %17014 = vst [vmem:[#allocation52_spill] sm:$0xff] %v14884_v30  ;;  %7059 = vperm.xlu1 %13112, %v6933_v32   ;;  %7054 = vperm.xlu0 %13111, %v6932_v22   ;;  %v17031_v22 = vld [vmem:[#allocation45_spill] sm:$0xff] }
 0x2f7   : > { %v5022_v3 = vmul.f32 %v14786_v19, %v17031_v22 }
 0x2f9   : > { %v14894_v55 = vpop.permute.xlu1 %5848  ;;  %v14896_v14 = vpop.permute.xlu0 %5843  ;;  %v5070_v53 = vpack.c.bf16 %v5022_v3, %v5021_v27  ;;  %v7487_v3 = vld [vmem:[#allocation7 + $0x378] sm:$0xff] }
 0x2fa   : > { %17019 = vst [vmem:[#allocation68_spill] sm:$0xff] %v14894_v55  ;;  %17020 = vst [vmem:[#allocation69_spill] sm:$0xff] %v14896_v14  ;;  %7069 = vperm.xlu1 %13112, %v6935_v26   ;;  %7064 = vperm.xlu0 %13111, %v6934_v38   ;;  %v7474_v26 = vld [vmem:[#allocation7 + $0x310] sm:$0xff]  ;;  %v9508_v14 = vld [vmem:[#allocation7 + $0x760] sm:$0xff] }
 0x2fc   : > { %12122 = vmatmul.mubr.bf16.gmra.mrb[20].mxu0 %v5066_v33  ;;  %v7476_v33 = vld [vmem:[#allocation7 + $0x320] sm:$0xff] }
 0x2fd   : > { %12125 = vmatprep.mubr.bf16.mxu0 %v5067_v62  ;;  %v14898_v36 = vpop.permute.xlu1 %5858  ;;  %v14900_v5 = vpop.permute.xlu0 %5853 }
 0x2fe   : > { %17021 = vst [vmem:[#allocation15_spill] sm:$0xff] %v14898_v36  ;;  %17022 = vst [vmem:[#allocation16_spill] sm:$0xff] %v14900_v5  ;;  %7079 = vperm.xlu1 %13112, %v6937_v42   ;;  %7074 = vperm.xlu0 %13111, %v6936_v16   ;;  %v7479_v16 = vld [vmem:[#allocation7 + $0x338] sm:$0xff]  ;;  %v9506_v36 = vld [vmem:[#allocation7 + $0x750] sm:$0xff] }
 0x301   : > { %v14910_v2 = vpop.permute.xlu1 %5868  ;;  %v14912_v48 = vpop.permute.xlu0 %5863 }
 0x302   : > { %17027 = vst [vmem:[#allocation17_spill] sm:$0xff] %v14910_v2  ;;  %17028 = vst [vmem:[#allocation70_spill] sm:$0xff] %v14912_v48  ;;  %7089 = vperm.xlu1 %13112, %v6939_v47   ;;  %7084 = vperm.xlu0 %13111, %v6938_v25   ;;  %v7482_v47 = vld [vmem:[#allocation7 + $0x350] sm:$0xff]  ;;  %v15180_v2 = vld [vmem:[#allocation5] ss:$0 sm:$0xff] }
 0x304   : > { %12126 = vmatmul.mubr.bf16.gmra.mrb[24].mxu0 %v5068_v12 }
 0x305   : > { %12129 = vmatprep.mubr.bf16.mxu0 %v5069_v17  ;;  %v14914_v32 = vpop.permute.xlu1 %5878  ;;  %v14916_v60 = vpop.permute.xlu0 %5873  ;;  %v7485_v17 = vld [vmem:[#allocation7 + $0x368] sm:$0xff] }
 0x306   : > { %17029 = vst [vmem:[#allocation18_spill] sm:$0xff] %v14914_v32  ;;  %17030 = vst [vmem:[#allocation71_spill] sm:$0xff] %v14916_v60  ;;  %7099 = vperm.xlu1 %13112, %v6941_v35   ;;  %7094 = vperm.xlu0 %13111, %v6940_v10   ;;  %v7484_v35 = vld [vmem:[#allocation7 + $0x360] sm:$0xff] }
 0x309   : > { %v14922_v24 = vpop.permute.xlu1 %6290  ;;  %v14924_v56 = vpop.permute.xlu0 %6285 }
 0x30a   : > { %17033 = vst [vmem:[#allocation19_spill] sm:$0xff] %v14922_v24  ;;  %17034 = vst [vmem:[#allocation20_spill] sm:$0xff] %v14924_v56  ;;  %7511 = vperm.xlu1 %13112, %v7473_v8   ;;  %7506 = vperm.xlu0 %13111, %v7472_v37   ;;  %v7489_v37 = vld [vmem:[#allocation7 + $0x388] sm:$0xff]  ;;  %v9500_v56 = vld [vmem:[#allocation7 + $0x720] sm:$0xff] }
 0x30c   : > { %12130 = vmatmul.mubr.bf16.gmra.mrb[28].mxu0 %v5070_v53  ;;  %v7488_v53 = vld [vmem:[#allocation7 + $0x380] sm:$0xff] }
 0x30d   : > { %v14926_v38 = vpop.permute.xlu1 %6300  ;;  %v14928_v19 = vpop.permute.xlu0 %6295 }
 0x30e   : > { %17035 = vst [vmem:[#allocation21_spill] sm:$0xff] %v14926_v38  ;;  %17036 = vst [vmem:[#allocation22_spill] sm:$0xff] %v14928_v19  ;;  %7521 = vperm.xlu1 %13112, %v7475_v11   ;;  %7516 = vperm.xlu0 %13111, %v7474_v26  }
 0x311   : > { %v14930_v62 = vpop.permute.xlu1 %6310  ;;  %v14932_v42 = vpop.permute.xlu0 %6305 }
 0x312   : > { %17037 = vst [vmem:[#allocation23_spill] sm:$0xff] %v14930_v62  ;;  %17038 = vst [vmem:[#allocation24_spill] sm:$0xff] %v14932_v42  ;;  %7531 = vperm.xlu1 %13112, %v7477_v51   ;;  %7526 = vperm.xlu0 %13111, %v7476_v33   ;;  %v7491_v51 = vld [vmem:[#allocation7 + $0x398] sm:$0xff]  ;;  %v7490_v33 = vld [vmem:[#allocation7 + $0x390] sm:$0xff] }
 0x315   : > { %v14934_v45 = vpop.permute.xlu1 %6320  ;;  %v14936_v21 = vpop.permute.xlu0 %6315 }
 0x316   : > { %17039 = vst [vmem:[#allocation25_spill] sm:$0xff] %v14934_v45  ;;  %17040 = vst [vmem:[#allocation26_spill] sm:$0xff] %v14936_v21  ;;  %7541 = vperm.xlu1 %13112, %v7479_v16   ;;  %7536 = vperm.xlu0 %13111, %v7478_v28   ;;  %v9496_v45 = vld [vmem:[#allocation7 + $0x700] sm:$0xff] }
 0x319   : > { %v14938_v1 = vpop.permute.xlu1 %6330  ;;  %v14940_v34 = vpop.permute.xlu0 %6325 }
 0x31a   : > { %17041 = vst [vmem:[#allocation27_spill] sm:$0xff] %v14938_v1  ;;  %17042 = vst [vmem:[#allocation28_spill] sm:$0xff] %v14940_v34  ;;  %7551 = vperm.xlu1 %13112, %v7481_v6   ;;  %7546 = vperm.xlu0 %13111, %v7480_v57   ;;  %v7493_v6 = vld [vmem:[#allocation7 + $0x3a8] sm:$0xff]  ;;  %v7492_v57 = vld [vmem:[#allocation7 + $0x3a0] sm:$0xff] }
 0x31d   : > { %v14942_v25 = vpop.permute.xlu1 %6340  ;;  %v14944_v12 = vpop.permute.xlu0 %6335 }
 0x31e   : > { %17043 = vst [vmem:[#allocation29_spill] sm:$0xff] %v14942_v25  ;;  %17044 = vst [vmem:[#allocation30_spill] sm:$0xff] %v14944_v12  ;;  %7561 = vperm.xlu1 %13112, %v7483_v13   ;;  %7556 = vperm.xlu0 %13111, %v7482_v47  }
 0x321   : > { %v14946_v10 = vpop.permute.xlu1 %6350  ;;  %v14948_v22 = vpop.permute.xlu0 %6345 }
 0x322   : > { %17045 = vst [vmem:[#allocation31_spill] sm:$0xff] %v14946_v10  ;;  %17046 = vst [vmem:[#allocation32_spill] sm:$0xff] %v14948_v22  ;;  %7571 = vperm.xlu1 %13112, %v7485_v17   ;;  %7566 = vperm.xlu0 %13111, %v7484_v35   ;;  %v7495_v17 = vld [vmem:[#allocation7 + $0x3b8] sm:$0xff]  ;;  %v7494_v35 = vld [vmem:[#allocation7 + $0x3b0] sm:$0xff] }
 0x323   : > { %v8958_v22 = vld [vmem:[#allocation7 + $0x6c0] sm:$0xff] }
 0x325   : > { %v14950_v27 = vpop.permute.xlu1 %6360  ;;  %v14952_v8 = vpop.permute.xlu0 %6355 }
 0x326   : > { %17047 = vst [vmem:[#allocation33_spill] sm:$0xff] %v14950_v27  ;;  %17048 = vst [vmem:[#allocation34_spill] sm:$0xff] %v14952_v8  ;;  %7581 = vperm.xlu1 %13112, %v7487_v3   ;;  %7576 = vperm.xlu0 %13111, %v7486_v31  }
 0x329   : > { %v14954_v11 = vpop.permute.xlu1 %6370  ;;  %v14956_v26 = vpop.permute.xlu0 %6365 }
 0x32a   : > { %17049 = vst [vmem:[#allocation35_spill] sm:$0xff] %v14954_v11  ;;  %17050 = vst [vmem:[#allocation36_spill] sm:$0xff] %v14956_v26  ;;  %7591 = vperm.xlu1 %13112, %v7489_v37   ;;  %7586 = vperm.xlu0 %13111, %v7488_v53   ;;  %v7497_v37 = vld [vmem:[#allocation7 + $0x3c8] sm:$0xff]  ;;  %v7496_v53 = vld [vmem:[#allocation7 + $0x3c0] sm:$0xff] }
 0x32d   : > { %v14958_v16 = vpop.permute.xlu1 %6380  ;;  %v14960_v28 = vpop.permute.xlu0 %6375 }
 0x32e   : > { %17051 = vst [vmem:[#allocation37_spill] sm:$0xff] %v14958_v16  ;;  %17052 = vst [vmem:[#allocation38_spill] sm:$0xff] %v14960_v28  ;;  %7601 = vperm.xlu1 %13112, %v7491_v51   ;;  %7596 = vperm.xlu0 %13111, %v7490_v33   ;;  %v7499_v28 = vld [vmem:[#allocation7 + $0x3d8] sm:$0xff] }
 0x331   : > { %v14962_v13 = vpop.permute.xlu1 %6390  ;;  %v14964_v47 = vpop.permute.xlu0 %6385 }
 0x332   : > { %17053 = vst [vmem:[#allocation39_spill] sm:$0xff] %v14962_v13  ;;  %17054 = vst [vmem:[#allocation40_spill] sm:$0xff] %v14964_v47  ;;  %7611 = vperm.xlu1 %13112, %v7493_v6   ;;  %7606 = vperm.xlu0 %13111, %v7492_v57   ;;  %v7498_v47 = vld [vmem:[#allocation7 + $0x3d0] sm:$0xff] }
 0x335   : > { %v14966_v3 = vpop.permute.xlu1 %6400  ;;  %v14968_v31 = vpop.permute.xlu0 %6395 }
 0x336   : > { %17055 = vst [vmem:[#allocation41_spill] sm:$0xff] %v14966_v3  ;;  %17056 = vst [vmem:[#allocation42_spill] sm:$0xff] %v14968_v31  ;;  %7621 = vperm.xlu1 %13112, %v7495_v17   ;;  %7616 = vperm.xlu0 %13111, %v7494_v35   ;;  %v7501_v3 = vld [vmem:[#allocation7 + $0x3e8] sm:$0xff]  ;;  %v7500_v31 = vld [vmem:[#allocation7 + $0x3e0] sm:$0xff] }
 0x339   : > { %v14970_v51 = vpop.permute.xlu1 %6410  ;;  %v14972_v33 = vpop.permute.xlu0 %6405 }
 0x33a   : > { %17057 = vst [vmem:[#allocation14_spill] sm:$0xff] %v14970_v51  ;;  %17058 = vst [vmem:[#allocation12_spill] sm:$0xff] %v14972_v33  ;;  %7631 = vperm.xlu1 %13112, %v7497_v37   ;;  %7626 = vperm.xlu0 %13111, %v7496_v53   ;;  %v7503_v51 = vld [vmem:[#allocation7 + $0x3f8] sm:$0xff]  ;;  %v7502_v33 = vld [vmem:[#allocation7 + $0x3f0] sm:$0xff] }
 0x33d   : > { %v14974_v6 = vpop.permute.xlu1 %6420  ;;  %v14976_v57 = vpop.permute.xlu0 %6415 }
 0x33e   : > { %17059 = vst [vmem:[#allocation13_spill] sm:$0xff] %v14974_v6  ;;  %17060 = vst [vmem:[#allocation11_spill] sm:$0xff] %v14976_v57  ;;  %7641 = vperm.xlu1 %13112, %v7499_v28   ;;  %7636 = vperm.xlu0 %13111, %v7498_v47   ;;  %v8373_v6 = vld [vmem:[#allocation7 + $0x508] sm:$0xff]  ;;  %v8372_v57 = vld [vmem:[#allocation7 + $0x500] sm:$0xff] }
 0x341   : > { %v14978_v17 = vpop.permute.xlu1 %6430  ;;  %v14980_v35 = vpop.permute.xlu0 %6425 }
 0x342   : > { %17061 = vst [vmem:[#allocation56_spill] sm:$0xff] %v14978_v17  ;;  %17062 = vst [vmem:[#allocation55_spill] sm:$0xff] %v14980_v35  ;;  %7651 = vperm.xlu1 %13112, %v7501_v3   ;;  %7646 = vperm.xlu0 %13111, %v7500_v31   ;;  %v8375_v17 = vld [vmem:[#allocation7 + $0x518] sm:$0xff]  ;;  %v8374_v35 = vld [vmem:[#allocation7 + $0x510] sm:$0xff] }
 0x345   : > { %v14982_v37 = vpop.permute.xlu1 %6440  ;;  %v14984_v53 = vpop.permute.xlu0 %6435 }
 0x346   : > { %17063 = vst [vmem:[#allocation67_spill] sm:$0xff] %v14982_v37  ;;  %17064 = vst [vmem:[#allocation66_spill] sm:$0xff] %v14984_v53  ;;  %7661 = vperm.xlu1 %13112, %v7503_v51   ;;  %7656 = vperm.xlu0 %13111, %v7502_v33   ;;  %v13185_v53 = vld [vmem:[%s16614_s1 + $0x240] sm:$0xff]   ;;  %v8377_v51 = vld [vmem:[#allocation7 + $0x528] sm:$0xff] }
 0x347   : > { %v8376_v33 = vld [vmem:[#allocation7 + $0x520] sm:$0xff]  ;;  %12133 = vmatprep.subr.bf16.mxu1 %v13185_v53 }
 0x348   : > { %12134 = vmatpush3.bf16.msra.mxu1 %v13185_v53  ;;  %v13187_v53 = vld [vmem:[%s16614_s1 + $0x250] sm:$0xff]  }
 0x349   : > { %v14986_v28 = vpop.permute.xlu1 %6949  ;;  %v14988_v47 = vpop.permute.xlu0 %6944 }
 0x34a   : > { %17065 = vst [vmem:[#allocation47_spill] sm:$0xff] %v14986_v28  ;;  %17066 = vst [vmem:[#allocation49_spill] sm:$0xff] %v14988_v47  ;;  %8411 = vperm.xlu1 %13112, %v8373_v6   ;;  %8406 = vperm.xlu0 %13111, %v8372_v57   ;;  %v13186_v57 = vld [vmem:[%s16614_s1 + $0x248] sm:$0xff]  }
 0x34b   : > { %12135 = vmatprep.subr.bf16.mxu1 %v13186_v57 }
 0x34c   : > { %12136 = vmatpush3.bf16.msra.mxu1 %v13186_v57  ;;  %v13188_v57 = vld [vmem:[%s16614_s1 + $0x258] sm:$0xff]  }
 0x34d   : > { %v14990_v3 = vpop.permute.xlu1 %6959  ;;  %v14992_v31 = vpop.permute.xlu0 %6954  ;;  %12137 = vmatprep.subr.bf16.mxu1 %v13187_v53 }
 0x34e   : > { %17067 = vst [vmem:[#allocation50_spill] sm:$0xff] %v14990_v3  ;;  %17068 = vst [vmem:[#allocation53_spill] sm:$0xff] %v14992_v31  ;;  %8421 = vperm.xlu1 %13112, %v8375_v17   ;;  %8416 = vperm.xlu0 %13111, %v8374_v35   ;;  %v8379_v31 = vld [vmem:[#allocation7 + $0x538] sm:$0xff]  ;;  %v8378_v3 = vld [vmem:[#allocation7 + $0x530] sm:$0xff] }
 0x350   : > { %12138 = vmatpush3.bf16.msra.mxu1 %v13187_v53  ;;  %v13189_v53 = vld [vmem:[%s16614_s1 + $0x260] sm:$0xff]  }
 0x351   : > { %v14997_v28 = vpop.permute.xlu1 %6969  ;;  %v14999_v6 = vpop.permute.xlu0 %6964  ;;  %12139 = vmatprep.subr.bf16.mxu1 %v13188_v57 }
 0x352   : > { %17069 = vst [vmem:[#allocation54_spill] sm:$0xff] %v14997_v28  ;;  %17070 = vst [vmem:[#allocation57_spill] sm:$0xff] %v14999_v6  ;;  %8431 = vperm.xlu1 %13112, %v8377_v51   ;;  %8426 = vperm.xlu0 %13111, %v8376_v33   ;;  %v8381_v6 = vld [vmem:[#allocation7 + $0x548] sm:$0xff]  ;;  %v8380_v28 = vld [vmem:[#allocation7 + $0x540] sm:$0xff] }
 0x354   : > { %12140 = vmatpush3.bf16.msra.mxu1 %v13188_v57  ;;  %v13190_v57 = vld [vmem:[%s16614_s1 + $0x268] sm:$0xff]  }
 0x355   : > { %v15004_v17 = vpop.permute.xlu1 %6979  ;;  %v15006_v35 = vpop.permute.xlu0 %6974  ;;  %12141 = vmatprep.subr.bf16.mxu1 %v13189_v53 }
 0x356   : > { %17071 = vst [vmem:[#allocation58_spill] sm:$0xff] %v15004_v17  ;;  %17072 = vst [vmem:[#allocation59_spill] sm:$0xff] %v15006_v35  ;;  %8441 = vperm.xlu1 %13112, %v8379_v31   ;;  %8436 = vperm.xlu0 %13111, %v8378_v3   ;;  %v8383_v17 = vld [vmem:[#allocation7 + $0x558] sm:$0xff]  ;;  %v8382_v35 = vld [vmem:[#allocation7 + $0x550] sm:$0xff] }
 0x358   : > { %12142 = vmatpush3.bf16.msra.mxu1 %v13189_v53  ;;  %v13191_v53 = vld [vmem:[%s16614_s1 + $0x270] sm:$0xff]  }
 0x359   : > { %v15011_v51 = vpop.permute.xlu1 %6989  ;;  %v15013_v33 = vpop.permute.xlu0 %6984  ;;  %12143 = vmatprep.subr.bf16.mxu1 %v13190_v57 }
 0x35a   : > { %17073 = vst [vmem:[#allocation60_spill] sm:$0xff] %v15011_v51  ;;  %17074 = vst [vmem:[#allocation61_spill] sm:$0xff] %v15013_v33  ;;  %8451 = vperm.xlu1 %13112, %v8381_v6   ;;  %8446 = vperm.xlu0 %13111, %v8380_v28   ;;  %v8385_v33 = vld [vmem:[#allocation7 + $0x568] sm:$0xff]  ;;  %v8384_v51 = vld [vmem:[#allocation7 + $0x560] sm:$0xff] }
 0x35c   : > { %12144 = vmatpush3.bf16.msra.mxu1 %v13190_v57  ;;  %v13192_v57 = vld [vmem:[%s16614_s1 + $0x278] sm:$0xff]  }
 0x35d   : > { %v15018_v31 = vpop.permute.xlu1 %6999  ;;  %v15020_v3 = vpop.permute.xlu0 %6994  ;;  %12145 = vmatprep.subr.bf16.mxu1 %v13191_v53 }
 0x35e   : > { %17075 = vst [vmem:[#allocation62_spill] sm:$0xff] %v15018_v31  ;;  %17076 = vst [vmem:[#allocation63_spill] sm:$0xff] %v15020_v3  ;;  %8461 = vperm.xlu1 %13112, %v8383_v17   ;;  %8456 = vperm.xlu0 %13111, %v8382_v35   ;;  %v8387_v31 = vld [vmem:[#allocation7 + $0x578] sm:$0xff]  ;;  %v8386_v3 = vld [vmem:[#allocation7 + $0x570] sm:$0xff] }
 0x360   : > { %12146 = vmatpush3.bf16.msra.mxu1 %v13191_v53  ;;  %v15053_v53 = vld [vmem:[%s16614_s1 + $0x280] sm:$0xff]  }
 0x361   : > { %v15025_v6 = vpop.permute.xlu1 %7009  ;;  %v15027_v28 = vpop.permute.xlu0 %7004  ;;  %12147 = vmatprep.subr.bf16.mxu1 %v13192_v57 }
 0x362   : > { %17077 = vst [vmem:[#allocation64_spill] sm:$0xff] %v15025_v6  ;;  %17078 = vst [vmem:[#allocation65_spill] sm:$0xff] %v15027_v28  ;;  %8471 = vperm.xlu1 %13112, %v8385_v33   ;;  %8466 = vperm.xlu0 %13111, %v8384_v51   ;;  %v8389_v28 = vld [vmem:[#allocation7 + $0x588] sm:$0xff]  ;;  %v8388_v6 = vld [vmem:[#allocation7 + $0x580] sm:$0xff] }
 0x364   : > { %12148 = vmatpush3.bf16.msra.mxu1 %v13192_v57  ;;  %v8395_v57 = vld [vmem:[#allocation7 + $0x5b8] sm:$0xff] }
 0x365   : > { %v15032_v17 = vpop.permute.xlu1 %7019  ;;  %v15034_v35 = vpop.permute.xlu0 %7014  ;;  %12181 = vmatprep.subr.bf16.mxu1 %v15053_v53 }
 0x366   : > { %17079 = vst [vmem:[#allocation43_spill] sm:$0xff] %v15032_v17  ;;  %17080 = vst [vmem:[#allocation44_spill] sm:$0xff] %v15034_v35  ;;  %8481 = vperm.xlu1 %13112, %v8387_v31   ;;  %8476 = vperm.xlu0 %13111, %v8386_v3   ;;  %v8391_v17 = vld [vmem:[#allocation7 + $0x598] sm:$0xff]  ;;  %v8390_v35 = vld [vmem:[#allocation7 + $0x590] sm:$0xff] }
 0x369   : > { %v15039_v33 = vpop.permute.xlu1 %7029  ;;  %v15041_v51 = vpop.permute.xlu0 %7024 }
 0x36a   : > { %17081 = vst [vmem:[#allocation45_spill] sm:$0xff] %v15039_v33  ;;  %17082 = vst [vmem:[#allocation46_spill] sm:$0xff] %v15041_v51  ;;  %8491 = vperm.xlu1 %13112, %v8389_v28   ;;  %8486 = vperm.xlu0 %13111, %v8388_v6   ;;  %v8393_v51 = vld [vmem:[#allocation7 + $0x5a8] sm:$0xff]  ;;  %v8392_v33 = vld [vmem:[#allocation7 + $0x5a0] sm:$0xff] }
 0x36d   : > { %v15046_v31 = vpop.permute.xlu1 %7039  ;;  %v15048_v3 = vpop.permute.xlu0 %7034 }
 0x36e   : > { %17083 = vst [vmem:[#allocation72_spill] sm:$0xff] %v15046_v31  ;;  %17084 = vst [vmem:[#allocation73_spill] sm:$0xff] %v15048_v3  ;;  %8501 = vperm.xlu1 %13112, %v8391_v17   ;;  %8496 = vperm.xlu0 %13111, %v8390_v35   ;;  %v8394_v31 = vld [vmem:[#allocation7 + $0x5b0] sm:$0xff]  ;;  %v8397_v17 = vld [vmem:[#allocation7 + $0x5c8] sm:$0xff] }
 0x36f   : > { %v8396_v35 = vld [vmem:[#allocation7 + $0x5c0] sm:$0xff] }
 0x371   : > { %v15056_v6 = vpop.permute.xlu1 %7049  ;;  %v15058_v28 = vpop.permute.xlu0 %7044 }
 0x372   : > { %17085 = vst [vmem:[#allocation74_spill] sm:$0xff] %v15056_v6  ;;  %17086 = vst [vmem:[#allocation75_spill] sm:$0xff] %v15058_v28  ;;  %8511 = vperm.xlu1 %13112, %v8393_v51   ;;  %8506 = vperm.xlu0 %13111, %v8392_v33   ;;  %v8399_v6 = vld [vmem:[#allocation7 + $0x5d8] sm:$0xff]  ;;  %v8398_v28 = vld [vmem:[#allocation7 + $0x5d0] sm:$0xff] }
 0x373   : > { %v8401_v33 = vld [vmem:[#allocation7 + $0x5e8] sm:$0xff]  ;;  %v8400_v51 = vld [vmem:[#allocation7 + $0x5e0] sm:$0xff] }
 0x375   : > { %v15060_v3 = vpop.permute.xlu1 %7059  ;;  %v15062_v47 = vpop.permute.xlu0 %7054 }
 0x376   : > { %17087 = vst [vmem:[#allocation76_spill] sm:$0xff] %v15060_v3  ;;  %17088 = vst [vmem:[#allocation77_spill] sm:$0xff] %v15062_v47  ;;  %8521 = vperm.xlu1 %13112, %v8395_v57   ;;  %8516 = vperm.xlu0 %13111, %v8394_v31   ;;  %v8403_v31 = vld [vmem:[#allocation7 + $0x5f8] sm:$0xff]  ;;  %v8402_v57 = vld [vmem:[#allocation7 + $0x5f0] sm:$0xff] }
 0x379   : > { %v15064_v37 = vpop.permute.xlu1 %7069  ;;  %v15066_v13 = vpop.permute.xlu0 %7064 }
 0x37a   : > { %17089 = vst [vmem:[#allocation78_spill] sm:$0xff] %v15064_v37  ;;  %8531 = vperm.xlu1 %13112, %v8397_v17   ;;  %8526 = vperm.xlu0 %13111, %v8396_v35   ;;  %17090 = vst [vmem:[#allocation79_spill] sm:$0xff] %v15066_v13  ;;  %v8935_v35 = vld [vmem:[#allocation7 + $0x608] sm:$0xff]  ;;  %v8934_v13 = vld [vmem:[#allocation7 + $0x600] sm:$0xff] }
 0x37d   : > { %v15068_v16 = vpop.permute.xlu1 %7079  ;;  %v15070_v3 = vpop.permute.xlu0 %7074 }
 0x37e   : > { %8541 = vperm.xlu1 %13112, %v8399_v6   ;;  %8536 = vperm.xlu0 %13111, %v8398_v28   ;;  %17091 = vst [vmem:[#allocation80_spill] sm:$0xff] %v15068_v16  ;;  %17092 = vst [vmem:[#allocation81_spill] sm:$0xff] %v15070_v3  ;;  %v8937_v6 = vld [vmem:[#allocation7 + $0x618] sm:$0xff]  ;;  %v8936_v28 = vld [vmem:[#allocation7 + $0x610] sm:$0xff] }
 0x381   : > { %v15072_v47 = vpop.permute.xlu1 %7089  ;;  %v15074_v17 = vpop.permute.xlu0 %7084 }
 0x382   : > { %8551 = vperm.xlu1 %13112, %v8401_v33   ;;  %8546 = vperm.xlu0 %13111, %v8400_v51   ;;  %17093 = vst [vmem:[#allocation82_spill] sm:$0xff] %v15072_v47  ;;  %17094 = vst [vmem:[#allocation83_spill] sm:$0xff] %v15074_v17  ;;  %v8939_v33 = vld [vmem:[#allocation7 + $0x628] sm:$0xff]  ;;  %v8938_v51 = vld [vmem:[#allocation7 + $0x620] sm:$0xff] }
 0x383   : > { %v8940_v17 = vld [vmem:[#allocation7 + $0x630] sm:$0xff] }
 0x385   : > { %v15076_v37 = vpop.permute.xlu1 %7099  ;;  %v15078_v16 = vpop.permute.xlu0 %7094 }
 0x386   : > { %8561 = vperm.xlu1 %13112, %v8403_v31   ;;  %8556 = vperm.xlu0 %13111, %v8402_v57   ;;  %17095 = vst [vmem:[#allocation84_spill] sm:$0xff] %v15076_v37  ;;  %17096 = vst [vmem:[#allocation85_spill] sm:$0xff] %v15078_v16  ;;  %v8941_v57 = vld [vmem:[#allocation7 + $0x638] sm:$0xff] }
 0x389   : > { %v15080_v3 = vpop.permute.xlu1 %7511  ;;  %v15082_v31 = vpop.permute.xlu0 %7506 }
 0x38a   : > { %8973 = vperm.xlu1 %13112, %v8935_v35   ;;  %8968 = vperm.xlu0 %13111, %v8934_v13   ;;  %17097 = vst [vmem:[#allocation86_spill] sm:$0xff] %v15080_v3  ;;  %17098 = vst [vmem:[#allocation87_spill] sm:$0xff] %v15082_v31  ;;  %v8943_v13 = vld [vmem:[#allocation7 + $0x648] sm:$0xff]  ;;  %v8942_v35 = vld [vmem:[#allocation7 + $0x640] sm:$0xff] }
 0x38b   : > { %v8946_v3 = vld [vmem:[#allocation7 + $0x660] sm:$0xff] }
 0x38d   : > { %v15084_v47 = vpop.permute.xlu1 %7521  ;;  %v15086_v37 = vpop.permute.xlu0 %7516 }
 0x38e   : > { %8983 = vperm.xlu1 %13112, %v8937_v6   ;;  %8978 = vperm.xlu0 %13111, %v8936_v28   ;;  %17099 = vst [vmem:[#allocation88_spill] sm:$0xff] %v15084_v47  ;;  %17100 = vst [vmem:[#allocation89_spill] sm:$0xff] %v15086_v37  ;;  %v8945_v6 = vld [vmem:[#allocation7 + $0x658] sm:$0xff]  ;;  %v8944_v28 = vld [vmem:[#allocation7 + $0x650] sm:$0xff] }
 0x38f   : > { %v8954_v37 = vld [vmem:[#allocation7 + $0x6a0] sm:$0xff] }
 0x391   : > { %v15088_v16 = vpop.permute.xlu1 %7531 }
 0x392   : > { %8993 = vperm.xlu1 %13112, %v8939_v33   ;;  %8988 = vperm.xlu0 %13111, %v8938_v51   ;;  %17101 = vst [vmem:[#allocation90_spill] sm:$0xff] %v15088_v16  ;;  %v15090_v33 = vpop.permute.xlu0 %7526  ;;  %v8947_v51 = vld [vmem:[#allocation7 + $0x668] sm:$0xff]  ;;  %v8950_v16 = vld [vmem:[#allocation7 + $0x680] sm:$0xff] }
 0x393   : > { %17102 = vst [vmem:[#allocation91_spill] sm:$0xff] %v15090_v33 }
 0x395   : > { %v15092_v31 = vpop.permute.xlu1 %7541 }
 0x396   : > { %9003 = vperm.xlu1 %13112, %v8941_v57   ;;  %8998 = vperm.xlu0 %13111, %v8940_v17   ;;  %v8949_v17 = vld [vmem:[#allocation7 + $0x678] sm:$0xff]  ;;  %v8948_v57 = vld [vmem:[#allocation7 + $0x670] sm:$0xff]  ;;  %17103 = vst [vmem:[#allocation92_spill] sm:$0xff] %v15092_v31  ;;  %v15094_v47 = vpop.permute.xlu0 %7536 }
 0x397   : > { %17104 = vst [vmem:[#allocation93_spill] sm:$0xff] %v15094_v47  ;;  %v8953_v31 = vld [vmem:[#allocation7 + $0x698] sm:$0xff]  ;;  %v8952_v47 = vld [vmem:[#allocation7 + $0x690] sm:$0xff] }
 0x399   : > { %v15102_v33 = vpop.permute.xlu1 %7551 }
 0x39a   : > { %9013 = vperm.xlu1 %13112, %v8943_v13   ;;  %9008 = vperm.xlu0 %13111, %v8942_v35   ;;  %v8951_v35 = vld [vmem:[#allocation7 + $0x688] sm:$0xff]  ;;  %17105 = vst [vmem:[#allocation94_spill] sm:$0xff] %v15102_v33 }
 0x39d   : > { %v15110_v26 = vpop.permute.xlu1 %7561 }
 0x39e   : > { %9023 = vperm.xlu1 %13112, %v8945_v6   ;;  %9018 = vperm.xlu0 %13111, %v8944_v28   ;;  %17107 = vst [vmem:[#allocation96_spill] sm:$0xff] %v15110_v26  ;;  %v8959_v26 = vld [vmem:[#allocation7 + $0x6c8] sm:$0xff] }
 0x3a2   : > { %9033 = vperm.xlu1 %13112, %v8947_v51   ;;  %9028 = vperm.xlu0 %13111, %v8946_v3   ;;  %v15106_v3 = vpop.permute.xlu0 %7546 }
 0x3a3   : > { %17106 = vst [vmem:[#allocation95_spill] sm:$0xff] %v15106_v3  ;;  %v8956_v3 = vld [vmem:[#allocation7 + $0x6b0] sm:$0xff] }
 0x3a6   : > { %9043 = vperm.xlu1 %13112, %v8949_v17   ;;  %9038 = vperm.xlu0 %13111, %v8948_v57   ;;  %v8955_v57 = vld [vmem:[#allocation7 + $0x6a8] sm:$0xff]  ;;  %v15114_v11 = vpop.permute.xlu0 %7556 }
 0x3a7   : > { %v15096_v13 = vpop.f32.mrb[0].mxu0  ;;  %17108 = vst [vmem:[#allocation97_spill] sm:$0xff] %v15114_v11 }
 0x3a8   : > { %v15098_v6 = vpop.f32.mrb[1].mxu0  ;;  %v5402_v30 = vadd.f32 %v15096_v13, %v15180_v2 }
 0x3a9   : > { %v15100_v28 = vpop.f32.mrb[2].mxu0  ;;  %v5400_v55 = vadd.f32 %v15180_v2, %v15098_v6 }
 0x3aa   : > { %v15104_v51 = vpop.f32.mrb[3].mxu0  ;;  %9053 = vperm.xlu1 %13112, %v8951_v35   ;;  %9048 = vperm.xlu0 %13111, %v8950_v16   ;;  %v8957_v16 = vld [vmem:[#allocation7 + $0x6b8] sm:$0xff] }
 0x3ab   : > { %v15209_v13 = vmax.f32 %v5400_v55, 0.0 }
 0x3ad   : > { %17130 = vst [vmem:[#allocation119_spill] sm:$0xff] %v15209_v13 }
 0x3ae   : > { %9063 = vperm.xlu1 %13112, %v8953_v31   ;;  %9058 = vperm.xlu0 %13111, %v8952_v47   ;;  %v15120_v31 = vpop.permute.xlu1 %7571  ;;  %v15122_v47 = vpop.permute.xlu0 %7566 }
 0x3af   : > { %v15108_v17 = vpop.f32.mrb[4].mxu0  ;;  %17109 = vst [vmem:[#allocation98_spill] sm:$0xff] %v15120_v31  ;;  %17110 = vst [vmem:[#allocation99_spill] sm:$0xff] %v15122_v47  ;;  %v8963_v47 = vld [vmem:[#allocation7 + $0x6e8] sm:$0xff]  ;;  %v8962_v31 = vld [vmem:[#allocation7 + $0x6e0] sm:$0xff] }
 0x3b0   : > { %v15112_v8 = vpop.f32.mrb[5].mxu0 }
 0x3b1   : > { %v15116_v33 = vpop.f32.mrb[6].mxu0 }
 0x3b2   : > { %v15118_v35 = vpop.f32.mrb[7].mxu0  ;;  %9073 = vperm.xlu1 %13112, %v8955_v57   ;;  %9068 = vperm.xlu0 %13111, %v8954_v37   ;;  %v8961_v37 = vld [vmem:[#allocation7 + $0x6d8] sm:$0xff]  ;;  %v8960_v57 = vld [vmem:[#allocation7 + $0x6d0] sm:$0xff]  ;;  %v15132_v25 = vpop.permute.xlu1 %7581 }
 0x3b3   : > { %17111 = vst [vmem:[#allocation100_spill] sm:$0xff] %v15132_v25  ;;  %v8965_v25 = vld [vmem:[#allocation7 + $0x6f8] sm:$0xff] }
 0x3b6   : > { %9083 = vperm.xlu1 %13112, %v8957_v16   ;;  %9078 = vperm.xlu0 %13111, %v8956_v3   ;;  %v15134_v16 = vpop.permute.xlu0 %7576  ;;  %v15142_v1 = vpop.permute.xlu1 %7591 }
 0x3b7   : > { %v15124_v27 = vpop.f32.mrb[8].mxu0  ;;  %17112 = vst [vmem:[#allocation101_spill] sm:$0xff] %v15134_v16  ;;  %17113 = vst [vmem:[#allocation102_spill] sm:$0xff] %v15142_v1  ;;  %v8964_v16 = vld [vmem:[#allocation7 + $0x6f0] sm:$0xff] }
 0x3b8   : > { %v15126_v12 = vpop.f32.mrb[9].mxu0 }
 0x3b9   : > { %v15128_v11 = vpop.f32.mrb[10].mxu0 }
 0x3ba   : > { %v15130_v10 = vpop.f32.mrb[11].mxu0  ;;  %9093 = vperm.xlu1 %13112, %v8959_v26   ;;  %9088 = vperm.xlu0 %13111, %v8958_v22   ;;  %v15146_v22 = vpop.permute.xlu0 %7586 }
 0x3bb   : > { %17114 = vst [vmem:[#allocation103_spill] sm:$0xff] %v15146_v22  ;;  %v15150_v42 = vpop.permute.xlu1 %7601  ;;  %v9498_v22 = vld [vmem:[#allocation7 + $0x710] sm:$0xff] }
 0x3bc   : > { %17115 = vst [vmem:[#allocation104_spill] sm:$0xff] %v15150_v42  ;;  %v9501_v42 = vld [vmem:[#allocation7 + $0x728] sm:$0xff] }
 0x3be   : > { %9103 = vperm.xlu1 %13112, %v8961_v37   ;;  %9098 = vperm.xlu0 %13111, %v8960_v57   ;;  %v9497_v57 = vld [vmem:[#allocation7 + $0x708] sm:$0xff]  ;;  %v15154_v62 = vpop.permute.xlu0 %7596 }
 0x3bf   : > { %v15136_v3 = vpop.f32.mrb[12].mxu0  ;;  %17116 = vst [vmem:[#allocation105_spill] sm:$0xff] %v15154_v62 }
 0x3c0   : > { %v15138_v34 = vpop.f32.mrb[13].mxu0 }
 0x3c1   : > { %v15140_v21 = vpop.f32.mrb[14].mxu0 }
 0x3c2   : > { %v15144_v26 = vpop.f32.mrb[15].mxu0  ;;  %9113 = vperm.xlu1 %13112, %v8963_v47   ;;  %9108 = vperm.xlu0 %13111, %v8962_v31   ;;  %v9499_v31 = vld [vmem:[#allocation7 + $0x718] sm:$0xff] }
 0x3c6   : > { %9123 = vperm.xlu1 %13112, %v8965_v25   ;;  %9118 = vperm.xlu0 %13111, %v8964_v16   ;;  %v15160_v25 = vpop.permute.xlu1 %7611  ;;  %v15162_v16 = vpop.permute.xlu0 %7606 }
 0x3c7   : > { %v15148_v37 = vpop.f32.mrb[16].mxu0  ;;  %17117 = vst [vmem:[#allocation106_spill] sm:$0xff] %v15160_v25  ;;  %17118 = vst [vmem:[#allocation107_spill] sm:$0xff] %v15162_v16  ;;  %v9505_v16 = vld [vmem:[#allocation7 + $0x748] sm:$0xff]  ;;  %v9504_v25 = vld [vmem:[#allocation7 + $0x740] sm:$0xff] }
 0x3c8   : > { %v15152_v19 = vpop.f32.mrb[17].mxu0 }
 0x3c9   : > { %v15156_v1 = vpop.f32.mrb[18].mxu0 }
 0x3ca   : > { %v15158_v47 = vpop.f32.mrb[19].mxu0  ;;  %9535 = vperm.xlu1 %13112, %v9497_v57   ;;  %9530 = vperm.xlu0 %13111, %v9496_v45   ;;  %v9503_v45 = vld [vmem:[#allocation7 + $0x738] sm:$0xff]  ;;  %v9502_v57 = vld [vmem:[#allocation7 + $0x730] sm:$0xff]  ;;  %v15172_v32 = vpop.permute.xlu1 %7621 }
 0x3cb   : > { %17119 = vst [vmem:[#allocation108_spill] sm:$0xff] %v15172_v32 }
 0x3ce   : > { %9545 = vperm.xlu1 %13112, %v9499_v31   ;;  %9540 = vperm.xlu0 %13111, %v9498_v22   ;;  %v15174_v31 = vpop.permute.xlu0 %7616 }
 0x3cf   : > { %v15164_v38 = vpop.f32.mrb[20].mxu0  ;;  %17120 = vst [vmem:[#allocation109_spill] sm:$0xff] %v15174_v31  ;;  %v9507_v31 = vld [vmem:[#allocation7 + $0x758] sm:$0xff] }
 0x3d0   : > { %v15166_v60 = vpop.f32.mrb[21].mxu0 }
 0x3d1   : > { %v15168_v62 = vpop.f32.mrb[22].mxu0 }
 0x3d2   : > { %v15170_v24 = vpop.f32.mrb[23].mxu0  ;;  %9555 = vperm.xlu1 %13112, %v9501_v42   ;;  %9550 = vperm.xlu0 %13111, %v9500_v56   ;;  %v5401_v56 = vadd.f32 %v15180_v2, %v15104_v51  ;;  %v15186_v42 = vpop.permute.xlu1 %7631 }
 0x3d3   : > { %17123 = vst [vmem:[#allocation112_spill] sm:$0xff] %v15186_v42 }
 0x3d4   : > { %v15198_v51 = vmax.f32 %v5401_v56, 0.0 }
 0x3d6   : > { %9565 = vperm.xlu1 %13112, %v9503_v45   ;;  %9560 = vperm.xlu0 %13111, %v9502_v57   ;;  %v5403_v45 = vadd.f32 %v15100_v28, %v15180_v2  ;;  %v15192_v57 = vpop.permute.xlu0 %7626  ;;  %17125 = vst [vmem:[#allocation114_spill] sm:$0xff] %v15198_v51  ;;  %v15202_v28 = vmax.f32 %v5402_v30, 0.0 }
 0x3d7   : > { %v15176_v22 = vpop.f32.mrb[24].mxu0  ;;  %17124 = vst [vmem:[#allocation113_spill] sm:$0xff] %v15192_v57  ;;  %v15204_v57 = vpop.permute.xlu1 %7641 }
 0x3d8   : > { %17121 = vst [vmem:[#allocation110_spill] sm:$0xff] %v15176_v22  ;;  %v15178_v5 = vpop.f32.mrb[25].mxu0  ;;  %v15200_v42 = vmax.f32 %v5403_v45, 0.0  ;;  %17127 = vst [vmem:[#allocation116_spill] sm:$0xff] %v15202_v28 }
 0x3d9   : > { %17122 = vst [vmem:[#allocation111_spill] sm:$0xff] %v15178_v5  ;;  %v15182_v48 = vpop.f32.mrb[26].mxu0  ;;  %17128 = vst [vmem:[#allocation117_spill] sm:$0xff] %v15204_v57  ;;  %v5601_v57 = vrot.slane %v15198_v51, 7 }
 0x3da   : > { %v15188_v32 = vpop.f32.mrb[27].mxu0  ;;  %9575 = vperm.xlu1 %13112, %v9505_v16   ;;  %9570 = vperm.xlu0 %13111, %v9504_v25   ;;  %17126 = vst [vmem:[#allocation115_spill] sm:$0xff] %v15200_v42  ;;  %v9509_v16 = vld [vmem:[#allocation7 + $0x768] sm:$0xff]  ;;  %v15211_v6 = vpop.permute.xlu0 %7636 }
 0x3db   : > { %17131 = vst [vmem:[#allocation120_spill] sm:$0xff] %v15211_v6  ;;  %v9510_v6 = vld [vmem:[#allocation7 + $0x770] sm:$0xff] }
 0x3de   : > { %9585 = vperm.xlu1 %13112, %v9507_v31   ;;  %9580 = vperm.xlu0 %13111, %v9506_v36   ;;  %v5405_v36 = vadd.f32 %v15180_v2, %v15118_v35  ;;  %v5404_v35 = vadd.f32 %v15180_v2, %v15112_v8 }
 0x3df   : > { %v12131_v25 = vpop.f32.mrb[28].mxu0 }
 0x3e0   : > { %v5430_v29 = vadd.f32 %v12131_v25, %v15180_v2  ;;  %v15207_v22 = vpop.f32.mrb[29].mxu0  ;;  %v5407_v25 = vadd.f32 %v15116_v33, %v15180_v2  ;;  %v5600_v33 = vrot.slane %v15209_v13, 7  ;;  %v15233_v51 = vmax.f32 %v5405_v36, 0.0 }
 0x3e1   : > { %17129 = vst [vmem:[#allocation118_spill] sm:$0xff] %v15207_v22  ;;  %v12132_v56 = vpop.f32.mrb[30].mxu0  ;;  %v9511_v22 = vld [vmem:[#allocation7 + $0x778] sm:$0xff] }
 0x3e2   : > { %v15215_v31 = vmax.f32 %v5430_v29, 0.0  ;;  %v5431_v45 = vadd.f32 %v12132_v56, %v15180_v2  ;;  %v5285_v30 = vpop.f32.mrb[31].mxu0  ;;  %9595 = vperm.xlu1 %13112, %v9509_v16   ;;  %9590 = vperm.xlu0 %13111, %v9508_v14   ;;  %v5406_v29 = vadd.f32 %v15108_v17, %v15180_v2  ;;  %v5603_v14 = vrot.slane %v15202_v28, 7  ;;  %17135 = vst [vmem:[#allocation124_spill] sm:$0xff] %v15233_v51  ;;  %v15244_v28 = vpop.permute.xlu0 %7646 }
 0x3e3   : > { %v5429_v55 = vadd.f32 %v15180_v2, %v5285_v30  ;;  %v15235_v30 = vpop.permute.xlu1 %7651  ;;  %17138 = vst [vmem:[#allocation127_spill] sm:$0xff] %v15244_v28  ;;  %v15248_v13 = vsel %vm296_vm0, %v5600_v33, %v5601_v57 }
 0x3e4   : > { %17132 = vst [vmem:[#allocation121_spill] sm:$0xff] %v15215_v31  ;;  %v15227_v56 = vmax.f32 %v5431_v45, 0.0  ;;  %17136 = vst [vmem:[#allocation125_spill] sm:$0xff] %v15235_v30  ;;  %v5564_v5 = vrot.slane %v15215_v31, 7  ;;  %v15240_v8 = vsel %vm296_vm0, %v5601_v57, %v5603_v14  ;;  %v15242_v45 = vmax.f32 %v5407_v25, 0.0 }
 0x3e5   : > { %v15230_v16 = vmax.f32 %v5429_v55, 0.0  ;;  %v9513_v55 = vld [vmem:[#allocation7 + $0x788] sm:$0xff]  ;;  %17139 = vst [vmem:[#allocation128_spill] sm:$0xff] %v15248_v13  ;;  %v15255_v30 = vmax.f32 %v5406_v29, 0.0  ;;  %v15257_v31 = vmax.f32 %v5404_v35, 0.0  ;;  %v5885_v35 = vmul.f32 %v14816_v40, %v15240_v8 }
 0x3e6   : > { %17133 = vst [vmem:[#allocation122_spill] sm:$0xff] %v15227_v56  ;;  %9605 = vperm.xlu1 %13112, %v9511_v22   ;;  %9600 = vperm.xlu0 %13111, %v9510_v6   ;;  %v5566_v17 = vrot.slane %v15227_v56, 7  ;;  %17137 = vst [vmem:[#allocation126_spill] sm:$0xff] %v15242_v45  ;;  %v17140_v22 = vrot.slane %v15200_v42, 7  ;;  %v5884_v40 = vmul.f32 %v14802_v61, %v15248_v13  ;;  %v13194_v61 = vld [vmem:[%s16614_s1 + $0x288] sm:$0xff]  }
 0x3e7   : > { %17134 = vst [vmem:[#allocation123_spill] sm:$0xff] %v15230_v16  ;;  %v16722_v36 = vrot.slane %v15230_v16, 7  ;;  %17141 = vst [vmem:[#allocation129_spill] sm:$0xff] %v15255_v30 }
 0x3e8   : > { %v15253_v6 = vsel %vm296_vm0, %v5603_v14, %v17140_v22  ;;  %17142 = vst [vmem:[#allocation130_spill] sm:$0xff] %v15257_v31  ;;  %v15260_v25 = vsel %vm296_vm0, %v5564_v5, %v5566_v17  ;;  %v15263_v28 = vsel %vm296_vm0, %v5566_v17, %v5600_v33  ;;  %v5409_v14 = vadd.f32 %v15180_v2, %v15130_v10  ;;  %v15290_v10 = vpop.permute.xlu1 %7661 }
 0x3e9   : > { %17143 = vst [vmem:[#allocation131_spill] sm:$0xff] %v15260_v25  ;;  %17144 = vst [vmem:[#allocation132_spill] sm:$0xff] %v15263_v28  ;;  %v15268_v57 = vsel %vm296_vm0, %v16722_v36, %v5564_v5  ;;  %v5882_v56 = vmul.f32 %v14798_v44, %v15260_v25  ;;  %v5883_v29 = vmul.f32 %v14804_v39, %v15263_v28  ;;  %v5609_v17 = vrot.slane %v15233_v51, 7  ;;  %v9515_v39 = vld [vmem:[#allocation7 + $0x798] sm:$0xff]  ;;  %v15295_v25 = vpop.permute.xlu0 %7656 }
 0x3ea   : > { %17145 = vst [vmem:[#allocation133_spill] sm:$0xff] %v15268_v57  ;;  %9615 = vperm.xlu1 %13112, %v9513_v55   ;;  %9610 = vperm.xlu0 %13111, %v9512_v52   ;;  %v5881_v33 = vmul.f32 %v14800_v49, %v15268_v57  ;;  %v5886_v5 = vmul.f32 %v14814_v20, %v15253_v6  ;;  %17146 = vst [vmem:[#allocation134_spill] sm:$0xff] %v15290_v10  ;;  %v9514_v55 = vld [vmem:[#allocation7 + $0x790] sm:$0xff]  ;;  %v5607_v20 = vrot.slane %v15257_v31, 7 }
 0x3eb   : > { %v5411_v44 = vadd.f32 %v15128_v11, %v15180_v2  ;;  %v5408_v52 = vadd.f32 %v15180_v2, %v15126_v12  ;;  %v5410_v36 = vadd.f32 %v15124_v27, %v15180_v2  ;;  %17147 = vst [vmem:[#allocation135_spill] sm:$0xff] %v15295_v25  ;;  %v5946_v11 = vpack.c.bf16 %v5884_v40, %v5883_v29  ;;  %v9517_v27 = vld [vmem:[#allocation7 + $0x7a8] sm:$0xff] }
 0x3ec   : > { %v5945_v49 = vpack.c.bf16 %v5882_v56, %v5881_v33  ;;  %v5611_v22 = vrot.slane %v15255_v30, 7  ;;  %v15301_v57 = vmax.f32 %v5409_v14, 0.0  ;;  %v5947_v12 = vpack.c.bf16 %v5886_v5, %v5885_v35  ;;  %v9516_v35 = vld [vmem:[#allocation7 + $0x7a0] sm:$0xff] }
 0x3ed   : > { %v15304_v56 = vsel %vm296_vm0, %v5607_v20, %v5609_v17  ;;  %v15306_v33 = vmax.f32 %v5411_v44, 0.0  ;;  %v17150_v40 = vrot.slane %v15242_v45, 7  ;;  %v15316_v14 = vmax.f32 %v5408_v52, 0.0  ;;  %v15333_v52 = vpop.permute.xlu1 %8411 }
 0x3ee   : > { %17148 = vst [vmem:[#allocation136_spill] sm:$0xff] %v15301_v57  ;;  %12149 = vmatprep.mubr.bf16.mxu1 %v5945_v49  ;;  %9625 = vperm.xlu1 %13112, %v9515_v39   ;;  %v15309_v29 = vsel %vm296_vm0, %v5609_v17, %v5611_v22  ;;  %v17152_v5 = vrot.slane %v15200_v42, 7  ;;  %v15324_v39 = vmax.f32 %v5410_v36, 0.0  ;;  %v5888_v17 = vmul.f32 %v14818_v59, %v15304_v56 }
 0x3ef   : > { %17149 = vst [vmem:[#allocation137_spill] sm:$0xff] %v15306_v33  ;;  %9620 = vperm.xlu0 %13111, %v9514_v55   ;;  %12150 = vmatmul.mubr.bf16.vlgmr.msra.gmra.mrb[0].mxu1 %v5946_v11  ;;  %v15314_v10 = vsel %vm296_vm0, %v5611_v22, %v17150_v40  ;;  %17151 = vst [vmem:[#allocation138_spill] sm:$0xff] %v15316_v14  ;;  %v13195_v22 = vld [vmem:[%s16614_s1 + $0x290] sm:$0xff]   ;;  %v5889_v49 = vmul.f32 %v14832_v46, %v15309_v29  ;;  %v5617_v55 = vrot.slane %v15301_v57, 7  ;;  %v9519_v11 = vld [vmem:[#allocation7 + $0x7b8] sm:$0xff] }
 0x3f0   : > { %12182 = vmatpush3.bf16.msra.mxu1 %v15053_v53  ;;  %12153 = vmatprep.mubr.bf16.mxu1 %v5947_v12  ;;  %v15322_v44 = vsel %vm296_vm0, %v17152_v5, %v5607_v20  ;;  %17153 = vst [vmem:[#allocation139_spill] sm:$0xff] %v15324_v39  ;;  %v5413_v53 = vadd.f32 %v15180_v2, %v15144_v26  ;;  %17154 = vst [vmem:[#allocation140_spill] sm:$0xff] %v15333_v52  ;;  %v15342_v20 = vpop.permute.xlu0 %8406 }
 0x3f1   : > { %12183 = vmatprep.subr.bf16.mxu1 %v13194_v61  ;;  %v5890_v36 = vmul.f32 %v14830_v54, %v15314_v10  ;;  %v5415_v59 = vadd.f32 %v15140_v21, %v15180_v2  ;;  %17155 = vst [vmem:[#allocation141_spill] sm:$0xff] %v15342_v20  ;;  %v5887_v26 = vmul.f32 %v14820_v43, %v15322_v44  ;;  %v5615_v54 = vrot.slane %v15316_v14, 7  ;;  %v13196_v43 = vld [vmem:[%s16614_s1 + $0x298] sm:$0xff]  }
 0x3f2   : > { %9635 = vperm.xlu1 %13112, %v9517_v27   ;;  %v5412_v46 = vadd.f32 %v15180_v2, %v15138_v34  ;;  %v9518_v27 = vld [vmem:[#allocation7 + $0x7b0] sm:$0xff]  ;;  %v5414_v40 = vadd.f32 %v15136_v3, %v15180_v2  ;;  %v15356_v5 = vmax.f32 %v5413_v53, 0.0  ;;  %v9521_v3 = vld [vmem:[#allocation7 + $0x7c8] sm:$0xff] }
 0x3f3   : > { %9630 = vperm.xlu0 %13111, %v9516_v35   ;;  %v5948_v21 = vpack.c.bf16 %v5888_v17, %v5887_v26  ;;  %v5619_v35 = vrot.slane %v15324_v39, 7  ;;  %v5949_v12 = vpack.c.bf16 %v5890_v36, %v5889_v49  ;;  %v15359_v34 = vsel %vm296_vm0, %v5615_v54, %v5617_v55  ;;  %v9520_v49 = vld [vmem:[#allocation7 + $0x7c0] sm:$0xff] }
 0x3f4   : > { %12184 = vmatpush3.bf16.msra.mxu1 %v13194_v61  ;;  %17156 = vst [vmem:[#allocation142_spill] sm:$0xff] %v15356_v5  ;;  %v15361_v61 = vmax.f32 %v5415_v59, 0.0  ;;  %v17159_v26 = vrot.slane %v15306_v33, 7  ;;  %v15371_v53 = vmax.f32 %v5412_v46, 0.0  ;;  %v17163_v36 = vrot.slane %v15242_v45, 7  ;;  %v13197_v46 = vld [vmem:[%s16614_s1 + $0x2a0] sm:$0xff]  }
 0x3f5   : > { %12185 = vmatprep.subr.bf16.mxu1 %v13195_v22  ;;  %v15364_v17 = vsel %vm296_vm0, %v5617_v55, %v5619_v35  ;;  %v15382_v55 = vpop.permute.xlu0 %8416 }
 0x3f6   : > { %9645 = vperm.xlu1 %13112, %v9519_v11   ;;  %17157 = vst [vmem:[#allocation143_spill] sm:$0xff] %v15361_v61  ;;  %17158 = vst [vmem:[#allocation144_spill] sm:$0xff] %v15364_v17  ;;  %v15369_v20 = vsel %vm296_vm0, %v5619_v35, %v17159_v26  ;;  %v15373_v11 = vpop.permute.xlu1 %8421  ;;  %v15378_v59 = vsel %vm296_vm0, %v17163_v36, %v5615_v54  ;;  %v5893_v54 = vmul.f32 %v14848_v41, %v15364_v17  ;;  %v9523_v35 = vld [vmem:[#allocation7 + $0x7d8] sm:$0xff] }
 0x3f7   : > { %9640 = vperm.xlu0 %13111, %v9518_v27   ;;  %12154 = vmatmul.mubr.bf16.gmra.mrb[4].mxu1 %v5948_v21  ;;  %17160 = vst [vmem:[#allocation145_spill] sm:$0xff] %v15369_v20  ;;  %17161 = vst [vmem:[#allocation146_spill] sm:$0xff] %v15371_v53  ;;  %v15380_v27 = vmax.f32 %v5414_v40, 0.0  ;;  %v5892_v21 = vmul.f32 %v14834_v4, %v15359_v34  ;;  %v5625_v40 = vrot.slane %v15356_v5, 7  ;;  %v5623_v41 = vrot.slane %v15371_v53, 7 }
 0x3f8   : > { %17162 = vst [vmem:[#allocation147_spill] sm:$0xff] %v15373_v11  ;;  %12157 = vmatprep.mubr.bf16.mxu1 %v5949_v12  ;;  %12186 = vmatpush3.bf16.msra.mxu1 %v13195_v22  ;;  %17165 = vst [vmem:[#allocation149_spill] sm:$0xff] %v15382_v55  ;;  %v5417_v12 = vadd.f32 %v15180_v2, %v15158_v47  ;;  %v5894_v22 = vmul.f32 %v14846_v50, %v15369_v20 }
 0x3f9   : > { %17164 = vst [vmem:[#allocation148_spill] sm:$0xff] %v15380_v27  ;;  %12187 = vmatprep.subr.bf16.mxu1 %v13196_v43  ;;  %v5419_v4 = vadd.f32 %v15156_v1, %v15180_v2  ;;  %v5891_v26 = vmul.f32 %v14836_v18, %v15378_v59  ;;  %v5416_v47 = vadd.f32 %v15180_v2, %v15152_v19  ;;  %v5627_v1 = vrot.slane %v15380_v27, 7  ;;  %v13198_v18 = vld [vmem:[%s16614_s1 + $0x2a8] sm:$0xff]  }
 0x3fa   : > { %9655 = vperm.xlu1 %13112, %v9521_v3   ;;  %v9522_v3 = vld [vmem:[#allocation7 + $0x7d0] sm:$0xff]  ;;  %v5418_v50 = vadd.f32 %v15148_v37, %v15180_v2  ;;  %v15412_v36 = vpop.permute.xlu1 %8431  ;;  %v5951_v19 = vpack.c.bf16 %v5894_v22, %v5893_v54  ;;  %v15415_v11 = vsel %vm296_vm0, %v5623_v41, %v5625_v40  ;;  %v15419_v37 = vpop.permute.xlu0 %8426  ;;  %v9524_v54 = vld [vmem:[#allocation7 + $0x7e0] sm:$0xff]  ;;  %v17175_v22 = vrot.slane %v15306_v33, 7 }
 0x3fb   : > { %9650 = vperm.xlu0 %13111, %v9520_v49   ;;  %v5950_v55 = vpack.c.bf16 %v5892_v21, %v5891_v26  ;;  %v15410_v49 = vmax.f32 %v5417_v12, 0.0  ;;  %17167 = vst [vmem:[#allocation151_spill] sm:$0xff] %v15412_v36  ;;  %17168 = vst [vmem:[#allocation152_spill] sm:$0xff] %v15415_v11  ;;  %v9525_v21 = vld [vmem:[#allocation7 + $0x7e8] sm:$0xff]  ;;  %v15422_v26 = vsel %vm296_vm0, %v5625_v40, %v5627_v1  ;;  %v17172_v12 = vrot.slane %v15361_v61, 7  ;;  %v17194_v36 = vld [vmem:[#allocation110_spill] sm:$0xff] }
 0x3fc   : > { %12188 = vmatpush3.bf16.msra.mxu1 %v13196_v43  ;;  %v15417_v43 = vmax.f32 %v5419_v4, 0.0  ;;  %17170 = vst [vmem:[#allocation154_spill] sm:$0xff] %v15419_v37  ;;  %17171 = vst [vmem:[#allocation155_spill] sm:$0xff] %v15422_v26  ;;  %v15434_v4 = vsel %vm296_vm0, %v17175_v22, %v5623_v41  ;;  %v5896_v40 = vmul.f32 %v14850_v9, %v15415_v11 }
 0x3fd   : > { %12189 = vmatprep.subr.bf16.mxu1 %v13197_v46  ;;  %17166 = vst [vmem:[#allocation150_spill] sm:$0xff] %v15410_v49  ;;  %v15427_v52 = vsel %vm296_vm0, %v5627_v1, %v17172_v12  ;;  %17176 = vst [vmem:[#allocation158_spill] sm:$0xff] %v15434_v4  ;;  %v5897_v1 = vmul.f32 %v14864_v15, %v15422_v26  ;;  %v5633_v41 = vrot.slane %v15410_v49, 7  ;;  %v9526_v15 = vld [vmem:[#allocation7 + $0x7f0] sm:$0xff] }
 0x3fe   : > { %9665 = vperm.xlu1 %13112, %v9523_v35   ;;  %17169 = vst [vmem:[#allocation153_spill] sm:$0xff] %v15417_v43  ;;  %17173 = vst [vmem:[#allocation156_spill] sm:$0xff] %v15427_v52  ;;  %v15429_v35 = vmax.f32 %v5416_v47, 0.0  ;;  %v5421_v47 = vadd.f32 %v15180_v2, %v15170_v24  ;;  %v5423_v9 = vadd.f32 %v15168_v62, %v15180_v2  ;;  %v15462_v62 = vpop.permute.xlu0 %8436 }
 0x3ff   : > { %9660 = vperm.xlu0 %13111, %v9522_v3   ;;  %12158 = vmatmul.mubr.bf16.gmra.mrb[8].mxu1 %v5950_v55  ;;  %v15436_v55 = vmax.f32 %v5418_v50, 0.0  ;;  %v13199_v3 = vld [vmem:[%s16614_s1 + $0x2b0] sm:$0xff]   ;;  %v9527_v50 = vld [vmem:[#allocation7 + $0x7f8] sm:$0xff]  ;;  %v5420_v24 = vadd.f32 %v15180_v2, %v15166_v60  ;;  %v5422_v22 = vadd.f32 %v15164_v38, %v15180_v2  ;;  %17179 = vst [vmem:[#allocation161_spill] sm:$0xff] %v15462_v62 }
 0x400   : > { %17174 = vst [vmem:[#allocation157_spill] sm:$0xff] %v15429_v35  ;;  %12161 = vmatprep.mubr.bf16.mxu1 %v5951_v19  ;;  %12190 = vmatpush3.bf16.msra.mxu1 %v13197_v46  ;;  %v5898_v46 = vmul.f32 %v14862_v63, %v15427_v52  ;;  %v5895_v19 = vmul.f32 %v14852_v58, %v15434_v4  ;;  %v5631_v63 = vrot.slane %v15429_v35, 7  ;;  %v13200_v58 = vld [vmem:[%s16614_s1 + $0x2b8] sm:$0xff]   ;;  %v15468_v60 = vmax.f32 %v5421_v47, 0.0  ;;  %v10059_v38 = vld [vmem:[#allocation7 + $0x808] sm:$0xff] }
 0x401   : > { %17177 = vst [vmem:[#allocation159_spill] sm:$0xff] %v15436_v55  ;;  %12191 = vmatprep.subr.bf16.mxu1 %v13198_v18  ;;  %v5635_v37 = vrot.slane %v15436_v55, 7  ;;  %v15483_v47 = vmax.f32 %v5420_v24, 0.0  ;;  %v5426_v25 = vadd.f32 %v17194_v36, %v15180_v2 }
 0x402   : > { %9675 = vperm.xlu1 %13112, %v9525_v21   ;;  %v15457_v21 = vpop.permute.xlu1 %8441  ;;  %17180 = vst [vmem:[#allocation162_spill] sm:$0xff] %v15468_v60  ;;  %v5953_v12 = vpack.c.bf16 %v5898_v46, %v5897_v1  ;;  %v10058_v1 = vld [vmem:[#allocation7 + $0x800] sm:$0xff]  ;;  %v17187_v46 = vrot.slane %v15361_v61, 7 }
 0x403   : > { %9670 = vperm.xlu0 %13111, %v9524_v54   ;;  %17178 = vst [vmem:[#allocation160_spill] sm:$0xff] %v15457_v21  ;;  %v5952_v54 = vpack.c.bf16 %v5896_v40, %v5895_v19  ;;  %v15471_v21 = vsel %vm296_vm0, %v5631_v63, %v5633_v41  ;;  %v15476_v40 = vsel %vm296_vm0, %v5633_v41, %v5635_v37  ;;  %v17184_v19 = vrot.slane %v15417_v43, 7 }
 0x404   : > { %12192 = vmatpush3.bf16.msra.mxu1 %v13198_v18  ;;  %17181 = vst [vmem:[#allocation163_spill] sm:$0xff] %v15471_v21  ;;  %v15473_v18 = vmax.f32 %v5423_v9, 0.0  ;;  %17183 = vst [vmem:[#allocation165_spill] sm:$0xff] %v15476_v40  ;;  %v15488_v9 = vsel %vm296_vm0, %v17187_v46, %v5631_v63  ;;  %v5900_v41 = vmul.f32 %v14866_v0, %v15471_v21  ;;  %v5641_v0 = vrot.slane %v15468_v60, 7 }
 0x405   : > { %12193 = vmatprep.subr.bf16.mxu1 %v13199_v3  ;;  %v15481_v62 = vsel %vm296_vm0, %v5635_v37, %v17184_v19  ;;  %17186 = vst [vmem:[#allocation167_spill] sm:$0xff] %v15483_v47  ;;  %17188 = vst [vmem:[#allocation168_spill] sm:$0xff] %v15488_v9  ;;  %v15497_v37 = vld [vmem:[%s16614_s1 + $0x2c0] sm:$0xff]   ;;  %v5427_v63 = vadd.f32 %v15182_v48, %v15180_v2  ;;  %v17192_v19 = vld [vmem:[#allocation48_spill] sm:$0xff] }
 0x406   : > { %9685 = vperm.xlu1 %13112, %v9527_v50   ;;  %17182 = vst [vmem:[#allocation164_spill] sm:$0xff] %v15473_v18  ;;  %17185 = vst [vmem:[#allocation166_spill] sm:$0xff] %v15481_v62  ;;  %v15490_v50 = vmax.f32 %v5422_v22, 0.0  ;;  %v15499_v24 = vpop.permute.xlu1 %8451  ;;  %v15510_v22 = vpop.permute.xlu0 %8446  ;;  %v5899_v46 = vmul.f32 %v17192_v19, %v15488_v9  ;;  %v10065_v9 = vld [vmem:[#allocation7 + $0x838] sm:$0xff] }
 0x407   : > { %9680 = vperm.xlu0 %13111, %v9526_v15   ;;  %12162 = vmatmul.mubr.bf16.gmra.mrb[12].mxu1 %v5952_v54  ;;  %17190 = vst [vmem:[#allocation170_spill] sm:$0xff] %v15499_v24  ;;  %v5902_v15 = vmul.f32 %v14878_v7, %v15481_v62  ;;  %17191 = vst [vmem:[#allocation171_spill] sm:$0xff] %v15510_v22  ;;  %v10061_v54 = vld [vmem:[#allocation7 + $0x818] sm:$0xff]  ;;  %v10060_v24 = vld [vmem:[#allocation7 + $0x810] sm:$0xff]  ;;  %v5639_v7 = vrot.slane %v15483_v47, 7 }
 0x408   : > { %12165 = vmatprep.mubr.bf16.mxu1 %v5953_v12  ;;  %12194 = vmatpush3.bf16.msra.mxu1 %v13199_v3  ;;  %17189 = vst [vmem:[#allocation169_spill] sm:$0xff] %v15490_v50  ;;  %v5425_v12 = vadd.f32 %v15180_v2, %v15188_v32  ;;  %v5901_v3 = vmul.f32 %v14880_v23, %v15476_v40  ;;  %v5645_v32 = vrot.slane %v15473_v18, 7  ;;  %v5643_v22 = vrot.slane %v15490_v50, 7 }
 0x409   : > { %12195 = vmatprep.subr.bf16.mxu1 %v13200_v58  ;;  %v5954_v48 = vpack.c.bf16 %v5900_v41, %v5899_v46  ;;  %v15525_v62 = vsel %vm296_vm0, %v5639_v7, %v5641_v0 }
 0x40a   : > { %10097 = vperm.xlu1 %13112, %v10059_v38   ;;  %v17193_v38 = vld [vmem:[#allocation111_spill] sm:$0xff]  ;;  %v5955_v19 = vpack.c.bf16 %v5902_v15, %v5901_v3  ;;  %v15530_v40 = vsel %vm296_vm0, %v5641_v0, %v5643_v22  ;;  %v15533_v36 = vsel %vm296_vm0, %v5643_v22, %v5645_v32  ;;  %v17202_v15 = vrot.slane %v15417_v43, 7  ;;  %v17207_v22 = vld [vmem:[#allocation69_spill] sm:$0xff] }
 0x40b   : > { %10092 = vperm.xlu0 %13111, %v10058_v1   ;;  %v5424_v23 = vadd.f32 %v15180_v2, %v17193_v38  ;;  %v15522_v1 = vmax.f32 %v5425_v12, 0.0  ;;  %17196 = vst [vmem:[#allocation111_spill] sm:$0xff] %v15525_v62  ;;  %v15527_v38 = vmax.f32 %v5427_v63, 0.0  ;;  %17198 = vst [vmem:[#allocation172_spill] sm:$0xff] %v15530_v40  ;;  %v15537_v12 = vpop.permute.xlu1 %8461  ;;  %v10062_v3 = vld [vmem:[#allocation7 + $0x820] sm:$0xff] }
 0x40c   : > { %12196 = vmatpush3.bf16.msra.mxu1 %v13200_v58  ;;  %v10063_v58 = vld [vmem:[#allocation7 + $0x828] sm:$0xff]  ;;  %17199 = vst [vmem:[#allocation173_spill] sm:$0xff] %v15533_v36  ;;  %17201 = vst [vmem:[#allocation175_spill] sm:$0xff] %v15537_v12  ;;  %v15542_v63 = vsel %vm296_vm0, %v17202_v15, %v5639_v7  ;;  %v17206_v0 = vld [vmem:[#allocation51_spill] sm:$0xff] }
 0x40d   : > { %12229 = vmatprep.subr.bf16.mxu1 %v15497_v37  ;;  %17195 = vst [vmem:[#allocation48_spill] sm:$0xff] %v15522_v1  ;;  %17197 = vst [vmem:[#allocation110_spill] sm:$0xff] %v15527_v38  ;;  %v15535_v41 = vmax.f32 %v5424_v23, 0.0  ;;  %v5904_v46 = vmul.f32 %v17206_v0, %v15525_v62  ;;  %v5905_v23 = vmul.f32 %v17207_v22, %v15530_v40  ;;  %v5649_v12 = vrot.slane %v15522_v1, 7  ;;  %v17209_v7 = vld [vmem:[#allocation52_spill] sm:$0xff]  ;;  %v10064_v0 = vld [vmem:[#allocation7 + $0x830] sm:$0xff] }
 0x40e   : > { %10107 = vperm.xlu1 %13112, %v10061_v54   ;;  %17203 = vst [vmem:[#allocation176_spill] sm:$0xff] %v15542_v63  ;;  %v15546_v54 = vpop.permute.xlu0 %8456  ;;  %v5653_v15 = vrot.slane %v15527_v38, 7 }
 0x40f   : > { %10102 = vperm.xlu0 %13111, %v10060_v24   ;;  %12166 = vmatmul.mubr.bf16.gmra.mrb[16].mxu1 %v5954_v48  ;;  %17200 = vst [vmem:[#allocation174_spill] sm:$0xff] %v15535_v41  ;;  %v15544_v24 = vmax.f32 %v5426_v25, 0.0  ;;  %17205 = vst [vmem:[#allocation178_spill] sm:$0xff] %v15546_v54  ;;  %v17208_v48 = vld [vmem:[#allocation68_spill] sm:$0xff]  ;;  %v5903_v25 = vmul.f32 %v17209_v7, %v15542_v63  ;;  %v17210_v54 = vld [vmem:[#allocation118_spill] sm:$0xff]  ;;  %v15562_v40 = vpop.permute.xlu1 %8471 }
 0x410   : > { %12169 = vmatprep.mubr.bf16.mxu1 %v5955_v19  ;;  %v5906_v19 = vmul.f32 %v17208_v48, %v15533_v36  ;;  %v5428_v21 = vadd.f32 %v15180_v2, %v17210_v54  ;;  %17211 = vst [vmem:[#allocation51_spill] sm:$0xff] %v15562_v40  ;;  %v10067_v7 = vld [vmem:[#allocation7 + $0x848] sm:$0xff]  ;;  %v10068_v63 = vld [vmem:[#allocation7 + $0x850] sm:$0xff] }
 0x411   : > { %17204 = vst [vmem:[#allocation177_spill] sm:$0xff] %v15544_v24  ;;  %v5956_v62 = vpack.c.bf16 %v5904_v46, %v5903_v25  ;;  %v5651_v22 = vrot.slane %v15544_v24, 7  ;;  %v10066_v25 = vld [vmem:[#allocation7 + $0x840] sm:$0xff] }
 0x412   : > { %10117 = vperm.xlu1 %13112, %v10063_v58   ;;  %v5647_v58 = vrot.slane %v15535_v41, 7  ;;  %v5957_v48 = vpack.c.bf16 %v5906_v19, %v5905_v23  ;;  %v15567_v36 = vpop.permute.xlu0 %8466  ;;  %v15575_v46 = vmax.f32 %v5428_v21, 0.0  ;;  %v17218_v23 = vld [vmem:[#allocation15_spill] sm:$0xff]  ;;  %v17221_v21 = vld [vmem:[#allocation16_spill] sm:$0xff] }
 0x413   : > { %10112 = vperm.xlu0 %13111, %v10062_v3   ;;  %17213 = vst [vmem:[#allocation68_spill] sm:$0xff] %v15567_v36  ;;  %v15570_v2 = vsel %vm296_vm0, %v5649_v12, %v5651_v22  ;;  %v15573_v54 = vsel %vm296_vm0, %v5651_v22, %v5653_v15  ;;  %v10069_v22 = vld [vmem:[#allocation7 + $0x858] sm:$0xff] }
 0x414   : > { %v15565_v3 = vsel %vm296_vm0, %v5647_v58, %v5649_v12  ;;  %17214 = vst [vmem:[#allocation52_spill] sm:$0xff] %v15570_v2  ;;  %17215 = vst [vmem:[#allocation118_spill] sm:$0xff] %v15573_v54  ;;  %v17220_v12 = vld [vmem:[#allocation17_spill] sm:$0xff] }
 0x415   : > { %17212 = vst [vmem:[#allocation69_spill] sm:$0xff] %v15565_v3  ;;  %17216 = vst [vmem:[#allocation179_spill] sm:$0xff] %v15575_v46  ;;  %v5908_v19 = vmul.f32 %v17218_v23, %v15565_v3  ;;  %v5910_v36 = vmul.f32 %v17220_v12, %v15573_v54  ;;  %v10070_v12 = vld [vmem:[#allocation7 + $0x860] sm:$0xff] }
 0x416   : > { %10127 = vperm.xlu1 %13112, %v10065_v9   ;;  %v15578_v9 = vsel %vm296_vm0, %v5645_v32, %v5647_v58  ;;  %v5655_v32 = vrot.slane %v15575_v46, 7  ;;  %v15591_v58 = vpop.permute.xlu0 %8476 }
 0x417   : > { %10122 = vperm.xlu0 %13111, %v10064_v0   ;;  %12170 = vmatmul.mubr.bf16.gmra.mrb[20].mxu1 %v5956_v62  ;;  %17217 = vst [vmem:[#allocation180_spill] sm:$0xff] %v15578_v9  ;;  %v17219_v62 = vld [vmem:[#allocation70_spill] sm:$0xff]  ;;  %v5907_v40 = vmul.f32 %v17221_v21, %v15578_v9 }
 0x418   : > { %12173 = vmatprep.mubr.bf16.mxu1 %v5957_v48  ;;  %v5909_v0 = vmul.f32 %v17219_v62, %v15570_v2  ;;  %v15588_v48 = vpop.permute.xlu1 %8481  ;;  %17223 = vst [vmem:[#allocation70_spill] sm:$0xff] %v15591_v58  ;;  %v17224_v62 = vrot.slane %v15230_v16, 7  ;;  %v15599_v21 = vsel %vm296_vm0, %v5653_v15, %v5655_v32  ;;  %v17234_v15 = vld [vmem:[#allocation20_spill] sm:$0xff] }
 0x419   : > { %17222 = vst [vmem:[#allocation15_spill] sm:$0xff] %v15588_v48  ;;  %v5958_v23 = vpack.c.bf16 %v5908_v19, %v5907_v40  ;;  %17226 = vst [vmem:[#allocation16_spill] sm:$0xff] %v15599_v21  ;;  %v17227_v48 = vld [vmem:[#allocation18_spill] sm:$0xff] }
 0x41a   : > { %10137 = vperm.xlu1 %13112, %v10067_v7   ;;  %v5959_v7 = vpack.c.bf16 %v5910_v36, %v5909_v0  ;;  %v15596_v2 = vsel %vm296_vm0, %v5655_v32, %v17224_v62  ;;  %v17229_v40 = vld [vmem:[#allocation122_spill] sm:$0xff]  ;;  %v17230_v36 = vld [vmem:[#allocation19_spill] sm:$0xff]  ;;  %v15607_v0 = vpop.permute.xlu0 %8486  ;;  %v17233_v62 = vld [vmem:[#allocation121_spill] sm:$0xff] }
 0x41b   : > { %10132 = vperm.xlu0 %13111, %v10066_v25   ;;  %17225 = vst [vmem:[#allocation17_spill] sm:$0xff] %v15596_v2  ;;  %v10071_v25 = vld [vmem:[#allocation7 + $0x868] sm:$0xff]  ;;  %v5912_v54 = vmul.f32 %v17227_v48, %v15596_v2  ;;  %v6444_v19 = vmul.f32 %v17230_v36, %v17229_v40  ;;  %17231 = vst [vmem:[#allocation19_spill] sm:$0xff] %v15607_v0  ;;  %v6443_v32 = vmul.f32 %v17234_v15, %v17233_v62  ;;  %v10074_v36 = vld [vmem:[#allocation7 + $0x880] sm:$0xff] }
 0x41c   : > { %v15603_v58 = vpop.permute.xlu1 %8491  ;;  %v17236_v0 = vld [vmem:[#allocation114_spill] sm:$0xff]  ;;  %v17240_v15 = vld [vmem:[#allocation119_spill] sm:$0xff] }
 0x41d   : > { %17228 = vst [vmem:[#allocation18_spill] sm:$0xff] %v15603_v58  ;;  %v6507_v48 = vpack.c.bf16 %v6444_v19, %v6443_v32  ;;  %v10077_v19 = vld [vmem:[#allocation7 + $0x898] sm:$0xff] }
 0x41e   : > { %10147 = vperm.xlu1 %13112, %v10069_v22   ;;  %v17232_v22 = vld [vmem:[#allocation71_spill] sm:$0xff]  ;;  %v15617_v3 = vpop.permute.xlu0 %8496 }
 0x41f   : > { %10142 = vperm.xlu0 %13111, %v10068_v63   ;;  %12174 = vmatmul.mubr.bf16.gmra.mrb[24].mxu1 %v5958_v23  ;;  %v10073_v63 = vld [vmem:[#allocation7 + $0x878] sm:$0xff]  ;;  %v5911_v23 = vmul.f32 %v17232_v22, %v15599_v21  ;;  %17238 = vst [vmem:[#allocation20_spill] sm:$0xff] %v15617_v3  ;;  %v17239_v22 = vld [vmem:[#allocation23_spill] sm:$0xff] }
 0x420   : > { %12177 = vmatprep.mubr.bf16.mxu1 %v5959_v7  ;;  %v10072_v7 = vld [vmem:[#allocation7 + $0x870] sm:$0xff]  ;;  %v15613_v58 = vpop.permute.xlu1 %8501  ;;  %v6448_v21 = vmul.f32 %v17239_v22, %v15200_v42  ;;  %v10079_v22 = vld [vmem:[#allocation7 + $0x8a8] sm:$0xff] }
 0x421   : > { %v5960_v9 = vpack.c.bf16 %v5912_v54, %v5911_v23  ;;  %17235 = vst [vmem:[#allocation71_spill] sm:$0xff] %v15613_v58  ;;  %v17241_v54 = vld [vmem:[#allocation22_spill] sm:$0xff]  ;;  %v17242_v23 = vld [vmem:[#allocation116_spill] sm:$0xff] }
 0x422   : > { %10157 = vperm.xlu1 %13112, %v10071_v25   ;;  %v10075_v25 = vld [vmem:[#allocation7 + $0x888] sm:$0xff]  ;;  %v15630_v3 = vpop.permute.xlu0 %8506 }
 0x423   : > { %10152 = vperm.xlu0 %13111, %v10070_v12   ;;  %v17237_v12 = vld [vmem:[#allocation21_spill] sm:$0xff]  ;;  %17245 = vst [vmem:[#allocation23_spill] sm:$0xff] %v15630_v3 }
 0x424   : > { %v6446_v2 = vmul.f32 %v17237_v12, %v17236_v0  ;;  %v13202_v12 = vld [vmem:[%s16614_s1 + $0x2c8] sm:$0xff]   ;;  %v15628_v58 = vpop.permute.xlu1 %8511 }
 0x425   : > { %17244 = vst [vmem:[#allocation21_spill] sm:$0xff] %v15628_v58 }
 0x426   : > { %10167 = vperm.xlu1 %13112, %v10073_v63   ;;  %v6445_v63 = vmul.f32 %v17241_v54, %v17240_v15  ;;  %v15646_v3 = vpop.permute.xlu0 %8516 }
 0x427   : > { %10162 = vperm.xlu0 %13111, %v10072_v7   ;;  %12178 = vmatmul.mubr.bf16.gmra.mrb[28].mxu1 %v5960_v9  ;;  %v10076_v9 = vld [vmem:[#allocation7 + $0x890] sm:$0xff]  ;;  %v17243_v7 = vld [vmem:[#allocation24_spill] sm:$0xff] }
 0x428   : > { %12197 = vmatprep.mubr.bf16.mxu1 %v6507_v48  ;;  %v6447_v32 = vmul.f32 %v17243_v7, %v17242_v23  ;;  %v6508_v48 = vpack.c.bf16 %v6446_v2, %v6445_v63  ;;  %v17246_v2 = vld [vmem:[#allocation25_spill] sm:$0xff]  ;;  %v17248_v7 = vld [vmem:[#allocation26_spill] sm:$0xff]  ;;  %17251 = vst [vmem:[#allocation24_spill] sm:$0xff] %v15646_v3 }
 0x429   : > { %v6450_v54 = vmul.f32 %v17246_v2, %v15233_v51  ;;  %v13203_v63 = vld [vmem:[%s16614_s1 + $0x2d0] sm:$0xff]  }
 0x42a   : > { %10177 = vperm.xlu1 %13112, %v10075_v25   ;;  %v6509_v25 = vpack.c.bf16 %v6448_v21, %v6447_v32  ;;  %v17247_v21 = vld [vmem:[#allocation27_spill] sm:$0xff]  ;;  %v6449_v32 = vmul.f32 %v17248_v7, %v15257_v31 }
 0x42b   : > { %10172 = vperm.xlu0 %13111, %v10074_v36   ;;  %v10078_v36 = vld [vmem:[#allocation7 + $0x8a0] sm:$0xff] }
 0x42c   : > { %v6510_v58 = vpack.c.bf16 %v6450_v54, %v6449_v32  ;;  %v10082_v7 = vld [vmem:[#allocation7 + $0x8c0] sm:$0xff] }
 0x42d   : > { %v13205_v54 = vld [vmem:[%s16614_s1 + $0x2e0] sm:$0xff]  }
 0x42e   : > { %10187 = vperm.xlu1 %13112, %v10077_v19   ;;  %v6452_v19 = vmul.f32 %v17247_v21, %v15242_v45  ;;  %v10083_v21 = vld [vmem:[#allocation7 + $0x8c8] sm:$0xff] }
 0x42f   : > { %10182 = vperm.xlu0 %13111, %v10076_v9   ;;  %12198 = vmatmul.mubr.bf16.vlgmr.msra.gmra.mrb[0].mxu1 %v6508_v48  ;;  %v10081_v9 = vld [vmem:[#allocation7 + $0x8b8] sm:$0xff]  ;;  %v10080_v48 = vld [vmem:[#allocation7 + $0x8b0] sm:$0xff] }
 0x430   : > { %12230 = vmatpush3.bf16.msra.mxu1 %v15497_v37  ;;  %12201 = vmatprep.mubr.bf16.mxu1 %v6509_v25  ;;  %v15642_v37 = vpop.permute.xlu1 %8521  ;;  %v17250_v25 = vld [vmem:[#allocation28_spill] sm:$0xff] }
 0x431   : > { %12231 = vmatprep.subr.bf16.mxu1 %v13202_v12  ;;  %17249 = vst [vmem:[#allocation22_spill] sm:$0xff] %v15642_v37  ;;  %v6451_v2 = vmul.f32 %v17250_v25, %v15255_v30 }
 0x432   : > { %10197 = vperm.xlu1 %13112, %v10079_v22   ;;  %v13204_v22 = vld [vmem:[%s16614_s1 + $0x2d8] sm:$0xff]  }
 0x433   : > { %10192 = vperm.xlu0 %13111, %v10078_v36   ;;  %v6511_v36 = vpack.c.bf16 %v6452_v19, %v6451_v2  ;;  %v10084_v2 = vld [vmem:[#allocation7 + $0x8d0] sm:$0xff] }
 0x434   : > { %12232 = vmatpush3.bf16.msra.mxu1 %v13202_v12  ;;  %v17252_v12 = vld [vmem:[#allocation29_spill] sm:$0xff]  ;;  %v15656_v32 = vpop.permute.xlu1 %8531 }
 0x435   : > { %12233 = vmatprep.subr.bf16.mxu1 %v13203_v63  ;;  %v6454_v37 = vmul.f32 %v17252_v12, %v15301_v57  ;;  %17253 = vst [vmem:[#allocation25_spill] sm:$0xff] %v15656_v32 }
 0x436   : > { %10207 = vperm.xlu1 %13112, %v10081_v9   ;;  %v17254_v9 = vld [vmem:[#allocation31_spill] sm:$0xff] }
 0x437   : > { %10202 = vperm.xlu0 %13111, %v10080_v48   ;;  %12202 = vmatmul.mubr.bf16.gmra.mrb[4].mxu1 %v6510_v58  ;;  %v6456_v19 = vmul.f32 %v17254_v9, %v15306_v33  ;;  %v15660_v48 = vpop.permute.xlu0 %8526  ;;  %v10085_v58 = vld [vmem:[#allocation7 + $0x8d8] sm:$0xff] }
 0x438   : > { %12205 = vmatprep.mubr.bf16.mxu1 %v6511_v36  ;;  %12234 = vmatpush3.bf16.msra.mxu1 %v13203_v63  ;;  %17255 = vst [vmem:[#allocation27_spill] sm:$0xff] %v15660_v48  ;;  %v17256_v63 = vld [vmem:[#allocation30_spill] sm:$0xff]  ;;  %v17257_v36 = vld [vmem:[#allocation32_spill] sm:$0xff]  ;;  %v15669_v48 = vpop.permute.xlu1 %8541 }
 0x439   : > { %12235 = vmatprep.subr.bf16.mxu1 %v13204_v22  ;;  %v6453_v25 = vmul.f32 %v17256_v63, %v15316_v14  ;;  %v6455_v12 = vmul.f32 %v17257_v36, %v15324_v39  ;;  %17258 = vst [vmem:[#allocation26_spill] sm:$0xff] %v15669_v48  ;;  %v10086_v63 = vld [vmem:[#allocation7 + $0x8e0] sm:$0xff] }
 0x43a   : > { %10217 = vperm.xlu1 %13112, %v10083_v21   ;;  %v13206_v21 = vld [vmem:[%s16614_s1 + $0x2e8] sm:$0xff]  }
 0x43b   : > { %10212 = vperm.xlu0 %13111, %v10082_v7   ;;  %v6512_v3 = vpack.c.bf16 %v6454_v37, %v6453_v25  ;;  %v6513_v9 = vpack.c.bf16 %v6456_v19, %v6455_v12  ;;  %v10087_v7 = vld [vmem:[#allocation7 + $0x8e8] sm:$0xff]  ;;  %v15671_v32 = vpop.permute.xlu0 %8536  ;;  %v17261_v19 = vld [vmem:[#allocation35_spill] sm:$0xff] }
 0x43c   : > { %12236 = vmatpush3.bf16.msra.mxu1 %v13204_v22  ;;  %17259 = vst [vmem:[#allocation28_spill] sm:$0xff] %v15671_v32  ;;  %v17260_v22 = vld [vmem:[#allocation33_spill] sm:$0xff]  ;;  %v17263_v12 = vld [vmem:[#allocation36_spill] sm:$0xff] }
 0x43d   : > { %12237 = vmatprep.subr.bf16.mxu1 %v13205_v54  ;;  %v6458_v37 = vmul.f32 %v17260_v22, %v15356_v5  ;;  %v13207_v25 = vld [vmem:[%s16614_s1 + $0x2f0] sm:$0xff]   ;;  %v13208_v32 = vld [vmem:[%s16614_s1 + $0x2f8] sm:$0xff]  }
 0x43e   : > { %10227 = vperm.xlu1 %13112, %v10085_v58   ;;  %v10089_v58 = vld [vmem:[#allocation7 + $0x8f8] sm:$0xff] }
 0x43f   : > { %10222 = vperm.xlu0 %13111, %v10084_v2   ;;  %12206 = vmatmul.mubr.bf16.gmra.mrb[8].mxu1 %v6512_v3  ;;  %v6460_v3 = vmul.f32 %v17261_v19, %v15361_v61  ;;  %v17262_v2 = vld [vmem:[#allocation34_spill] sm:$0xff] }
 0x440   : > { %12209 = vmatprep.mubr.bf16.mxu1 %v6513_v9  ;;  %12238 = vmatpush3.bf16.msra.mxu1 %v13205_v54  ;;  %v6457_v36 = vmul.f32 %v17262_v2, %v15371_v53  ;;  %v10088_v54 = vld [vmem:[#allocation7 + $0x8f0] sm:$0xff]  ;;  %v6459_v9 = vmul.f32 %v17263_v12, %v15380_v27 }
 0x441   : > { %12239 = vmatprep.subr.bf16.mxu1 %v13206_v21  ;;  %v17266_v2 = vld [vmem:[#allocation37_spill] sm:$0xff] }
 0x442   : > { %10237 = vperm.xlu1 %13112, %v10087_v7   ;;  %v6514_v22 = vpack.c.bf16 %v6458_v37, %v6457_v36  ;;  %v15687_v7 = vpop.permute.xlu1 %8551  ;;  %v6515_v19 = vpack.c.bf16 %v6460_v3, %v6459_v9  ;;  %v6462_v12 = vmul.f32 %v17266_v2, %v15410_v49  ;;  %v17267_v37 = vld [vmem:[#allocation39_spill] sm:$0xff]  ;;  %v17269_v9 = vld [vmem:[#allocation40_spill] sm:$0xff] }
 0x443   : > { %10232 = vperm.xlu0 %13111, %v10086_v63   ;;  %17264 = vst [vmem:[#allocation29_spill] sm:$0xff] %v15687_v7  ;;  %v15689_v63 = vpop.permute.xlu0 %8546  ;;  %v6464_v36 = vmul.f32 %v17267_v37, %v15417_v43  ;;  %v17272_v37 = vld [vmem:[#allocation42_spill] sm:$0xff] }
 0x444   : > { %12240 = vmatpush3.bf16.msra.mxu1 %v13206_v21  ;;  %17265 = vst [vmem:[#allocation31_spill] sm:$0xff] %v15689_v63  ;;  %v13209_v21 = vld [vmem:[%s16614_s1 + $0x300] sm:$0xff]   ;;  %v6465_v48 = vmul.f32 %v17272_v37, %v15483_v47  ;;  %v6818_v37 = vrot.slane %v17240_v15, 1 }
 0x445   : > { %12241 = vmatprep.subr.bf16.mxu1 %v13207_v25  ;;  %v17271_v63 = vld [vmem:[#allocation14_spill] sm:$0xff] }
 0x446   : > { %10247 = vperm.xlu1 %13112, %v10089_v58   ;;  %v17268_v58 = vld [vmem:[#allocation38_spill] sm:$0xff]  ;;  %v6468_v7 = vmul.f32 %v17271_v63, %v15473_v18  ;;  %v17276_v63 = vld [vmem:[#allocation11_spill] sm:$0xff] }
 0x447   : > { %10242 = vperm.xlu0 %13111, %v10088_v54   ;;  %12210 = vmatmul.mubr.bf16.gmra.mrb[12].mxu1 %v6514_v22  ;;  %v6461_v3 = vmul.f32 %v17268_v58, %v15429_v35  ;;  %v6463_v54 = vmul.f32 %v17269_v9, %v15436_v55  ;;  %v17273_v58 = vld [vmem:[#allocation12_spill] sm:$0xff] }
 0x448   : > { %12213 = vmatprep.mubr.bf16.mxu1 %v6515_v19  ;;  %12242 = vmatpush3.bf16.msra.mxu1 %v13207_v25  ;;  %v17270_v19 = vld [vmem:[#allocation41_spill] sm:$0xff]  ;;  %v6467_v52 = vmul.f32 %v17273_v58, %v15490_v50  ;;  %v17280_v58 = vld [vmem:[#allocation67_spill] sm:$0xff] }
 0x449   : > { %12243 = vmatprep.subr.bf16.mxu1 %v13208_v32  ;;  %v6516_v22 = vpack.c.bf16 %v6462_v12, %v6461_v3  ;;  %v6517_v25 = vpack.c.bf16 %v6464_v36, %v6463_v54  ;;  %v6466_v2 = vmul.f32 %v17270_v19, %v15468_v60  ;;  %v17275_v36 = vld [vmem:[#allocation56_spill] sm:$0xff]  ;;  %v6814_v54 = vrot.slane %v17229_v40, 1 }
 0x44a   : > { %v6519_v9 = vpack.c.bf16 %v6468_v7, %v6467_v52  ;;  %v6472_v3 = vmul.f32 %v17275_v36, %v15527_v38  ;;  %v16759_v52 = vrot.slane %v17233_v62, 1  ;;  %v17281_v36 = vld [vmem:[#allocation47_spill] sm:$0xff] }
 0x44b   : > { %v6518_v26 = vpack.c.bf16 %v6466_v2, %v6465_v48  ;;  %v15722_v7 = vsel %vm1547_vm1, %v6814_v54, %v6818_v37 }
 0x44c   : > { %12244 = vmatpush3.bf16.msra.mxu1 %v13208_v32  ;;  %v17274_v32 = vld [vmem:[#allocation13_spill] sm:$0xff]  ;;  %17278 = vst [vmem:[#allocation30_spill] sm:$0xff] %v15722_v7  ;;  %v15727_v2 = vsel %vm1547_vm1, %v16759_v52, %v6814_v54  ;;  %v6821_v54 = vrot.slane %v17242_v23, 1 }
 0x44d   : > { %12277 = vmatprep.subr.bf16.mxu1 %v13209_v21  ;;  %v6470_v12 = vmul.f32 %v17274_v32, %v15522_v1  ;;  %17279 = vst [vmem:[#allocation32_spill] sm:$0xff] %v15727_v2  ;;  %v6819_v32 = vrot.slane %v17236_v0, 1 }
 0x44f   : > { %12214 = vmatmul.mubr.bf16.gmra.mrb[16].mxu1 %v6516_v22  ;;  %v6469_v22 = vmul.f32 %v17276_v63, %v15535_v41  ;;  %v7103_v63 = vmul.f32 %v17281_v36, %v15722_v7  ;;  %v15745_v52 = vsel %vm1547_vm1, %v6818_v37, %v6819_v32  ;;  %v17290_v37 = vld [vmem:[#allocation54_spill] sm:$0xff] }
 0x450   : > { %12217 = vmatprep.mubr.bf16.mxu1 %v6517_v25  ;;  %v17277_v25 = vld [vmem:[#allocation55_spill] sm:$0xff]  ;;  %17285 = vst [vmem:[#allocation35_spill] sm:$0xff] %v15745_v52 }
 0x451   : > { %v6471_v19 = vmul.f32 %v17277_v25, %v15544_v24  ;;  %v17283_v25 = vld [vmem:[#allocation66_spill] sm:$0xff] }
 0x453   : > { %v6521_v48 = vpack.c.bf16 %v6472_v3, %v6471_v19  ;;  %v6473_v19 = vmul.f32 %v17283_v25, %v15575_v46 }
 0x457   : > { %12218 = vmatmul.mubr.bf16.gmra.mrb[20].mxu1 %v6518_v26  ;;  %v6520_v26 = vpack.c.bf16 %v6470_v12, %v6469_v22  ;;  %v17282_v12 = vld [vmem:[#allocation49_spill] sm:$0xff]  ;;  %v6825_v22 = vrot.slane %v15257_v31, 1 }
 0x458   : > { %12221 = vmatprep.mubr.bf16.mxu1 %v6519_v9  ;;  %v6474_v9 = vmul.f32 %v17280_v58, %v15230_v16  ;;  %v7102_v3 = vmul.f32 %v17282_v12, %v15727_v2  ;;  %v15742_v58 = vsel %vm1547_vm1, %v6819_v32, %v6821_v54  ;;  %v17287_v12 = vld [vmem:[#allocation50_spill] sm:$0xff]  ;;  %v17288_v2 = vld [vmem:[#allocation53_spill] sm:$0xff] }
 0x459   : > { %17284 = vst [vmem:[#allocation33_spill] sm:$0xff] %v15742_v58  ;;  %v7105_v25 = vmul.f32 %v17287_v12, %v15742_v58  ;;  %v7104_v40 = vmul.f32 %v17288_v2, %v15745_v52  ;;  %v6831_v12 = vrot.slane %v15242_v45, 1  ;;  %v13210_v2 = vld [vmem:[%s16614_s1 + $0x308] sm:$0xff]  }
 0x45a   : > { %v7166_v36 = vpack.c.bf16 %v7103_v63, %v7102_v3  ;;  %v6833_v63 = vrot.slane %v15316_v14, 1  ;;  %v6829_v3 = vrot.slane %v15255_v30, 1 }
 0x45b   : > { %v7167_v31 = vpack.c.bf16 %v7105_v25, %v7104_v40  ;;  %v17296_v25 = vld [vmem:[#allocation59_spill] sm:$0xff] }
 0x45c   : > { %v15778_v40 = vsel %vm1547_vm1, %v6829_v3, %v6831_v12 }
 0x45d   : > { %17295 = vst [vmem:[#allocation40_spill] sm:$0xff] %v15778_v40 }
 0x45f   : > { %12222 = vmatmul.mubr.bf16.gmra.mrb[24].mxu1 %v6520_v26  ;;  %v6823_v26 = vrot.slane %v15200_v42, 1 }
 0x460   : > { %12225 = vmatprep.mubr.bf16.mxu1 %v6521_v48  ;;  %v6522_v48 = vpack.c.bf16 %v6474_v9, %v6473_v19  ;;  %v6827_v19 = vrot.slane %v15233_v51, 1 }
 0x461   : > { %v15748_v7 = vsel %vm1547_vm1, %v6823_v26, %v6825_v22  ;;  %v15755_v9 = vsel %vm1547_vm1, %v6821_v54, %v6823_v26 }
 0x462   : > { %17286 = vst [vmem:[#allocation34_spill] sm:$0xff] %v15748_v7  ;;  %17289 = vst [vmem:[#allocation36_spill] sm:$0xff] %v15755_v9  ;;  %v7107_v32 = vmul.f32 %v17290_v37, %v15748_v7  ;;  %v15769_v54 = vsel %vm1547_vm1, %v6827_v19, %v6829_v3  ;;  %v15772_v26 = vsel %vm1547_vm1, %v6825_v22, %v6827_v19  ;;  %v13211_v22 = vld [vmem:[%s16614_s1 + $0x310] sm:$0xff]   ;;  %v6835_v19 = vrot.slane %v15301_v57, 1 }
 0x463   : > { %17292 = vst [vmem:[#allocation37_spill] sm:$0xff] %v15769_v54  ;;  %17293 = vst [vmem:[#allocation39_spill] sm:$0xff] %v15772_v26  ;;  %v15775_v7 = vsel %vm1547_vm1, %v6831_v12, %v6833_v63  ;;  %v6837_v3 = vrot.slane %v15324_v39, 1 }
 0x464   : > { %17294 = vst [vmem:[#allocation38_spill] sm:$0xff] %v15775_v7 }
 0x467   : > { %12226 = vmatmul.mubr.bf16.gmra.mrb[28].mxu1 %v6522_v48  ;;  %v17291_v48 = vld [vmem:[#allocation57_spill] sm:$0xff] }
 0x468   : > { %12245 = vmatprep.mubr.bf16.mxu1 %v7166_v36  ;;  %v7106_v36 = vmul.f32 %v17291_v48, %v15755_v9  ;;  %v7108_v48 = vmul.f32 %v17296_v25, %v15772_v26  ;;  %v17297_v9 = vld [vmem:[#allocation58_spill] sm:$0xff]  ;;  %v15799_v26 = vsel %vm1547_vm1, %v6835_v19, %v6837_v3 }
 0x469   : > { %v7109_v52 = vmul.f32 %v17297_v9, %v15769_v54  ;;  %v13212_v25 = vld [vmem:[%s16614_s1 + $0x318] sm:$0xff]   ;;  %17300 = vst [vmem:[#allocation41_spill] sm:$0xff] %v15799_v26 }
 0x46a   : > { %v7168_v37 = vpack.c.bf16 %v7107_v32, %v7106_v36  ;;  %v6841_v32 = vrot.slane %v15371_v53, 1  ;;  %v17299_v36 = vld [vmem:[#allocation61_spill] sm:$0xff] }
 0x46b   : > { %v7110_v12 = vmul.f32 %v17299_v36, %v15778_v40  ;;  %v7169_v9 = vpack.c.bf16 %v7109_v52, %v7108_v48  ;;  %v17304_v48 = vld [vmem:[#allocation63_spill] sm:$0xff]  ;;  %v17305_v40 = vld [vmem:[#allocation62_spill] sm:$0xff] }
 0x46c   : > { %v7113_v54 = vmul.f32 %v17305_v40, %v15799_v26  ;;  %v6847_v40 = vrot.slane %v15361_v61, 1 }
 0x46f   : > { %12246 = vmatmul.mubr.bf16.vlgmr.msra.gmra.mrb[0].mxu1 %v7167_v31  ;;  %v17298_v31 = vld [vmem:[#allocation60_spill] sm:$0xff] }
 0x470   : > { %12278 = vmatpush3.bf16.msra.mxu1 %v13209_v21  ;;  %12249 = vmatprep.mubr.bf16.mxu1 %v7168_v37  ;;  %v7111_v21 = vmul.f32 %v17298_v31, %v15775_v7  ;;  %v6839_v37 = vrot.slane %v15306_v33, 1  ;;  %v15802_v31 = vsel %vm1547_vm1, %v6833_v63, %v6835_v19  ;;  %v13213_v63 = vld [vmem:[%s16614_s1 + $0x320] sm:$0xff]   ;;  %v6843_v19 = vrot.slane %v15356_v5, 1 }
 0x471   : > { %12279 = vmatprep.subr.bf16.mxu1 %v13210_v2  ;;  %17301 = vst [vmem:[#allocation14_spill] sm:$0xff] %v15802_v31  ;;  %v7112_v36 = vmul.f32 %v17304_v48, %v15802_v31  ;;  %v13214_v48 = vld [vmem:[%s16614_s1 + $0x328] sm:$0xff]  }
 0x472   : > { %v7170_v7 = vpack.c.bf16 %v7111_v21, %v7110_v12  ;;  %v15808_v52 = vsel %vm1547_vm1, %v6837_v3, %v6839_v37  ;;  %v17306_v21 = vld [vmem:[#allocation64_spill] sm:$0xff]  ;;  %v6845_v3 = vrot.slane %v15380_v27, 1  ;;  %v17307_v12 = vld [vmem:[#allocation65_spill] sm:$0xff] }
 0x473   : > { %17303 = vst [vmem:[#allocation12_spill] sm:$0xff] %v15808_v52 }
 0x474   : > { %12280 = vmatpush3.bf16.msra.mxu1 %v13210_v2  ;;  %v15805_v2 = vsel %vm1547_vm1, %v6839_v37, %v6841_v32  ;;  %v7114_v37 = vmul.f32 %v17307_v12, %v15808_v52  ;;  %v15829_v31 = vsel %vm1547_vm1, %v6843_v19, %v6845_v3  ;;  %v17313_v12 = vld [vmem:[#allocation43_spill] sm:$0xff] }
 0x475   : > { %12281 = vmatprep.subr.bf16.mxu1 %v13211_v22  ;;  %17302 = vst [vmem:[#allocation42_spill] sm:$0xff] %v15805_v2  ;;  %17308 = vst [vmem:[#allocation13_spill] sm:$0xff] %v15829_v31  ;;  %v7117_v52 = vmul.f32 %v17313_v12, %v15829_v31  ;;  %v13216_v12 = vld [vmem:[%s16614_s1 + $0x338] sm:$0xff]  }
 0x477   : > { %12250 = vmatmul.mubr.bf16.gmra.mrb[4].mxu1 %v7169_v9  ;;  %v7171_v9 = vpack.c.bf16 %v7113_v54, %v7112_v36  ;;  %v15838_v54 = vsel %vm1547_vm1, %v6845_v3, %v6847_v40  ;;  %v6853_v3 = vrot.slane %v15436_v55, 1 }
 0x478   : > { %12253 = vmatprep.mubr.bf16.mxu1 %v7170_v7  ;;  %12282 = vmatpush3.bf16.msra.mxu1 %v13211_v22  ;;  %v7115_v7 = vmul.f32 %v17306_v21, %v15805_v2  ;;  %v6849_v22 = vrot.slane %v15429_v35, 1  ;;  %v15832_v21 = vsel %vm1547_vm1, %v6841_v32, %v6843_v19  ;;  %17311 = vst [vmem:[#allocation55_spill] sm:$0xff] %v15838_v54  ;;  %v13215_v32 = vld [vmem:[%s16614_s1 + $0x330] sm:$0xff]   ;;  %v6851_v19 = vrot.slane %v15410_v49, 1 }
 0x479   : > { %12283 = vmatprep.subr.bf16.mxu1 %v13212_v25  ;;  %17309 = vst [vmem:[#allocation56_spill] sm:$0xff] %v15832_v21 }
 0x47a   : > { %v7172_v2 = vpack.c.bf16 %v7115_v7, %v7114_v37  ;;  %v15835_v26 = vsel %vm1547_vm1, %v6847_v40, %v6849_v22  ;;  %v17314_v7 = vld [vmem:[#allocation45_spill] sm:$0xff]  ;;  %v17315_v37 = vld [vmem:[#allocation46_spill] sm:$0xff] }
 0x47b   : > { %17310 = vst [vmem:[#allocation11_spill] sm:$0xff] %v15835_v26  ;;  %v7118_v40 = vmul.f32 %v17315_v37, %v15838_v54  ;;  %v17321_v37 = vld [vmem:[#allocation72_spill] sm:$0xff] }
 0x47c   : > { %12284 = vmatpush3.bf16.msra.mxu1 %v13212_v25  ;;  %v17312_v25 = vld [vmem:[#allocation44_spill] sm:$0xff] }
 0x47d   : > { %12285 = vmatprep.subr.bf16.mxu1 %v13213_v63  ;;  %v7116_v36 = vmul.f32 %v17312_v25, %v15832_v21  ;;  %v15859_v21 = vsel %vm1547_vm1, %v6851_v19, %v6853_v3 }
 0x47e   : > { %17316 = vst [vmem:[#allocation67_spill] sm:$0xff] %v15859_v21  ;;  %v7121_v54 = vmul.f32 %v17321_v37, %v15859_v21 }
 0x47f   : > { %12254 = vmatmul.mubr.bf16.gmra.mrb[8].mxu1 %v7171_v9  ;;  %v6855_v9 = vrot.slane %v15417_v43, 1  ;;  %v7173_v25 = vpack.c.bf16 %v7117_v52, %v7116_v36 }
 0x480   : > { %12257 = vmatprep.mubr.bf16.mxu1 %v7172_v2  ;;  %12286 = vmatpush3.bf16.msra.mxu1 %v13213_v63  ;;  %v7119_v2 = vmul.f32 %v17314_v7, %v15835_v26  ;;  %v6857_v63 = vrot.slane %v15483_v47, 1  ;;  %v15862_v7 = vsel %vm1547_vm1, %v6849_v22, %v6851_v19  ;;  %v13217_v22 = vld [vmem:[%s16614_s1 + $0x340] sm:$0xff]   ;;  %v6859_v19 = vrot.slane %v15468_v60, 1 }
 0x481   : > { %12287 = vmatprep.subr.bf16.mxu1 %v13214_v48  ;;  %17317 = vst [vmem:[#allocation47_spill] sm:$0xff] %v15862_v7  ;;  %v15868_v52 = vsel %vm1547_vm1, %v6853_v3, %v6855_v9  ;;  %v6861_v3 = vrot.slane %v15490_v50, 1 }
 0x482   : > { %v7174_v26 = vpack.c.bf16 %v7119_v2, %v7118_v40  ;;  %v15865_v31 = vsel %vm1547_vm1, %v6855_v9, %v6857_v63  ;;  %17319 = vst [vmem:[#allocation66_spill] sm:$0xff] %v15868_v52  ;;  %v17322_v2 = vld [vmem:[#allocation74_spill] sm:$0xff]  ;;  %v17323_v40 = vld [vmem:[#allocation75_spill] sm:$0xff] }
 0x483   : > { %17318 = vst [vmem:[#allocation49_spill] sm:$0xff] %v15865_v31  ;;  %v7122_v9 = vmul.f32 %v17323_v40, %v15868_v52  ;;  %v15886_v37 = vsel %vm1547_vm1, %v6859_v19, %v6861_v3  ;;  %v6867_v52 = vrot.slane %v15522_v1, 1 }
 0x484   : > { %12288 = vmatpush3.bf16.msra.mxu1 %v13214_v48  ;;  %v17320_v48 = vld [vmem:[#allocation73_spill] sm:$0xff]  ;;  %17324 = vst [vmem:[#allocation50_spill] sm:$0xff] %v15886_v37 }
 0x485   : > { %12289 = vmatprep.subr.bf16.mxu1 %v13215_v32  ;;  %v7120_v36 = vmul.f32 %v17320_v48, %v15862_v7  ;;  %v15889_v7 = vsel %vm1547_vm1, %v6857_v63, %v6859_v19  ;;  %v17330_v63 = vld [vmem:[#allocation78_spill] sm:$0xff] }
 0x486   : > { %17325 = vst [vmem:[#allocation53_spill] sm:$0xff] %v15889_v7 }
 0x487   : > { %12258 = vmatmul.mubr.bf16.gmra.mrb[12].mxu1 %v7173_v25  ;;  %v6863_v25 = vrot.slane %v15473_v18, 1  ;;  %v7175_v48 = vpack.c.bf16 %v7121_v54, %v7120_v36  ;;  %v17329_v54 = vld [vmem:[#allocation76_spill] sm:$0xff] }
 0x488   : > { %12261 = vmatprep.mubr.bf16.mxu1 %v7174_v26  ;;  %12290 = vmatpush3.bf16.msra.mxu1 %v13215_v32  ;;  %v7123_v26 = vmul.f32 %v17322_v2, %v15865_v31  ;;  %v6865_v32 = vrot.slane %v15535_v41, 1  ;;  %v7125_v36 = vmul.f32 %v17329_v54, %v15886_v37 }
 0x489   : > { %12291 = vmatprep.subr.bf16.mxu1 %v13216_v12  ;;  %v15895_v31 = vsel %vm1547_vm1, %v6861_v3, %v6863_v25  ;;  %v6871_v3 = vrot.slane %v15527_v38, 1 }
 0x48a   : > { %v7176_v21 = vpack.c.bf16 %v7123_v26, %v7122_v9  ;;  %v15892_v2 = vsel %vm1547_vm1, %v6863_v25, %v6865_v32  ;;  %17327 = vst [vmem:[#allocation57_spill] sm:$0xff] %v15895_v31  ;;  %v6873_v26 = vrot.slane %v15575_v46, 1  ;;  %v6869_v9 = vrot.slane %v15544_v24, 1 }
 0x48b   : > { %17326 = vst [vmem:[#allocation54_spill] sm:$0xff] %v15892_v2  ;;  %v7127_v19 = vmul.f32 %v17330_v63, %v15892_v2  ;;  %v15913_v54 = vsel %vm1547_vm1, %v6865_v32, %v6867_v52  ;;  %v6875_v2 = vrot.slane %v15230_v16, 1 }
 0x48c   : > { %12292 = vmatpush3.bf16.msra.mxu1 %v13216_v12  ;;  %v17328_v12 = vld [vmem:[#allocation77_spill] sm:$0xff]  ;;  %17333 = vst [vmem:[#allocation58_spill] sm:$0xff] %v15913_v54  ;;  %v15916_v37 = vsel %vm1547_vm1, %v6871_v3, %v6873_v26  ;;  %v15919_v63 = vsel %vm1547_vm1, %v6869_v9, %v6871_v3 }
 0x48d   : > { %12325 = vmatprep.subr.bf16.mxu1 %v13217_v22  ;;  %v7124_v40 = vmul.f32 %v17328_v12, %v15889_v7  ;;  %v15910_v12 = vsel %vm1547_vm1, %v6867_v52, %v6869_v9  ;;  %17334 = vst [vmem:[#allocation60_spill] sm:$0xff] %v15916_v37  ;;  %17335 = vst [vmem:[#allocation61_spill] sm:$0xff] %v15919_v63  ;;  %v17338_v52 = vld [vmem:[#allocation82_spill] sm:$0xff]  ;;  %v15936_v3 = vsel %vm1547_vm1, %v6873_v26, %v6875_v2  ;;  %v17347_v26 = vld [vmem:[#allocation88_spill] sm:$0xff] }
 0x48e   : > { %17332 = vst [vmem:[#allocation59_spill] sm:$0xff] %v15910_v12  ;;  %v7131_v32 = vmul.f32 %v17338_v52, %v15916_v37  ;;  %17341 = vst [vmem:[#allocation63_spill] sm:$0xff] %v15936_v3  ;;  %v17343_v52 = vld [vmem:[#allocation84_spill] sm:$0xff] }
 0x48f   : > { %12262 = vmatmul.mubr.bf16.gmra.mrb[16].mxu1 %v7175_v48  ;;  %v7177_v25 = vpack.c.bf16 %v7125_v36, %v7124_v40  ;;  %v17337_v40 = vld [vmem:[#allocation80_spill] sm:$0xff] }
 0x490   : > { %12265 = vmatprep.mubr.bf16.mxu1 %v7176_v21  ;;  %v17331_v21 = vld [vmem:[#allocation79_spill] sm:$0xff]  ;;  %v7129_v36 = vmul.f32 %v17337_v40, %v15910_v12 }
 0x491   : > { %v7126_v48 = vmul.f32 %v17331_v21, %v15895_v31  ;;  %v17336_v21 = vld [vmem:[#allocation81_spill] sm:$0xff] }
 0x492   : > { %v7128_v31 = vmul.f32 %v17336_v21, %v15913_v54  ;;  %v17342_v21 = vld [vmem:[#allocation85_spill] sm:$0xff] }
 0x493   : > { %v7178_v7 = vpack.c.bf16 %v7127_v19, %v7126_v48  ;;  %v17339_v19 = vld [vmem:[#allocation83_spill] sm:$0xff]  ;;  %v7132_v40 = vmul.f32 %v17342_v21, %v15936_v3 }
 0x494   : > { %v7130_v48 = vmul.f32 %v17339_v19, %v15919_v63  ;;  %v7179_v58 = vpack.c.bf16 %v7129_v36, %v7128_v31  ;;  %v17344_v19 = vld [vmem:[#allocation87_spill] sm:$0xff]  ;;  %v17345_v36 = vld [vmem:[#allocation86_spill] sm:$0xff] }
 0x495   : > { %v7664_v31 = vmul.f32 %v17344_v19, %v15263_v28  ;;  %v7665_v63 = vmul.f32 %v17345_v36, %v15248_v13  ;;  %v17349_v21 = vld [vmem:[#allocation91_spill] sm:$0xff]  ;;  %v17368_v13 = vld [vmem:[#allocation166_spill] sm:$0xff] }
 0x496   : > { %v17365_v28 = vld [vmem:[#allocation103_spill] sm:$0xff] }
 0x497   : > { %12266 = vmatmul.mubr.bf16.gmra.mrb[20].mxu1 %v7177_v25  ;;  %v7180_v25 = vpack.c.bf16 %v7131_v32, %v7130_v48  ;;  %v7728_v54 = vpack.c.bf16 %v7665_v63, %v7664_v31  ;;  %v7667_v32 = vmul.f32 %v17347_v26, %v15253_v6  ;;  %v17348_v48 = vld [vmem:[#allocation90_spill] sm:$0xff]  ;;  %v17351_v31 = vld [vmem:[#allocation92_spill] sm:$0xff]  ;;  %v17353_v26 = vld [vmem:[#allocation95_spill] sm:$0xff] }
 0x498   : > { %12269 = vmatprep.mubr.bf16.mxu1 %v7178_v7  ;;  %v17340_v7 = vrot.slane %v17233_v62, 1  ;;  %v7671_v36 = vmul.f32 %v17351_v31, %v15314_v10  ;;  %v17357_v31 = vld [vmem:[#allocation99_spill] sm:$0xff] }
 0x49a   : > { %v15933_v9 = vsel %vm1547_vm1, %v6875_v2, %v17340_v7  ;;  %v17346_v2 = vld [vmem:[#allocation89_spill] sm:$0xff] }
 0x49b   : > { %v7133_v37 = vmul.f32 %v17343_v52, %v15933_v9  ;;  %v7668_v52 = vmul.f32 %v17349_v21, %v15322_v44  ;;  %v17354_v21 = vld [vmem:[#allocation97_spill] sm:$0xff] }
 0x49d   : > { %v7181_v7 = vpack.c.bf16 %v7133_v37, %v7132_v40  ;;  %v13218_v37 = vld [vmem:[%s16614_s1 + $0x348] sm:$0xff]  }
 0x49f   : > { %12270 = vmatmul.mubr.bf16.gmra.mrb[24].mxu1 %v7179_v58  ;;  %v7666_v58 = vmul.f32 %v17346_v2, %v15240_v8  ;;  %v17352_v2 = vld [vmem:[#allocation94_spill] sm:$0xff] }
 0x4a0   : > { %12273 = vmatprep.mubr.bf16.mxu1 %v7180_v25  ;;  %v7669_v25 = vmul.f32 %v17348_v48, %v15304_v56  ;;  %v13220_v48 = vld [vmem:[%s16614_s1 + $0x358] sm:$0xff]  }
 0x4a1   : > { %v7729_v19 = vpack.c.bf16 %v7667_v32, %v7666_v58  ;;  %v7673_v58 = vmul.f32 %v17352_v2, %v15359_v34  ;;  %v7672_v32 = vmul.f32 %v17353_v26, %v15378_v59  ;;  %v17358_v26 = vld [vmem:[#allocation155_spill] sm:$0xff] }
 0x4a2   : > { %v7730_v63 = vpack.c.bf16 %v7669_v25, %v7668_v52  ;;  %v7674_v52 = vmul.f32 %v17354_v21, %v15364_v17  ;;  %v17361_v21 = vld [vmem:[#allocation100_spill] sm:$0xff] }
 0x4a3   : > { %v7732_v25 = vpack.c.bf16 %v7673_v58, %v7672_v32  ;;  %v17359_v32 = vld [vmem:[#allocation101_spill] sm:$0xff]  ;;  %v17380_v17 = vld [vmem:[#allocation180_spill] sm:$0xff] }
 0x4a7   : > { %12274 = vmatmul.mubr.bf16.gmra.mrb[28].mxu1 %v7181_v7  ;;  %v13219_v7 = vld [vmem:[%s16614_s1 + $0x350] sm:$0xff]  }
 0x4a8   : > { %12293 = vmatprep.mubr.bf16.mxu1 %v7728_v54  ;;  %v17350_v54 = vld [vmem:[#allocation93_spill] sm:$0xff] }
 0x4a9   : > { %v7670_v40 = vmul.f32 %v17350_v54, %v15309_v29  ;;  %v17356_v54 = vld [vmem:[#allocation98_spill] sm:$0xff] }
 0x4af   : > { %12294 = vmatmul.mubr.bf16.vlgmr.msra.gmra.mrb[0].mxu1 %v7729_v19  ;;  %v17355_v19 = vld [vmem:[#allocation96_spill] sm:$0xff] }
 0x4b0   : > { %12326 = vmatpush3.bf16.msra.mxu1 %v13217_v22  ;;  %12297 = vmatprep.mubr.bf16.mxu1 %v7730_v63  ;;  %v7731_v22 = vpack.c.bf16 %v7671_v36, %v7670_v40  ;;  %v7675_v63 = vmul.f32 %v17355_v19, %v15369_v20  ;;  %v7677_v40 = vmul.f32 %v17356_v54, %v15415_v11 }
 0x4b1   : > { %12327 = vmatprep.subr.bf16.mxu1 %v13218_v37  ;;  %v7676_v36 = vmul.f32 %v17357_v31, %v15434_v4  ;;  %v17364_v31 = vld [vmem:[#allocation168_spill] sm:$0xff] }
 0x4b2   : > { %v7733_v2 = vpack.c.bf16 %v7675_v63, %v7674_v52  ;;  %v17362_v52 = vld [vmem:[#allocation163_spill] sm:$0xff]  ;;  %v17363_v63 = vld [vmem:[#allocation102_spill] sm:$0xff]  ;;  %v17379_v4 = vld [vmem:[#allocation112_spill] sm:$0xff] }
 0x4b3   : > { %v7734_v58 = vpack.c.bf16 %v7677_v40, %v7676_v36  ;;  %v7681_v54 = vmul.f32 %v17363_v63, %v17362_v52  ;;  %v7680_v40 = vmul.f32 %v17365_v28, %v17364_v31  ;;  %v13225_v28 = vld [vmem:[%s16614_s1 + $0x380] sm:$0xff]   ;;  %v17372_v31 = vld [vmem:[#allocation176_spill] sm:$0xff] }
 0x4b4   : > { %12328 = vmatpush3.bf16.msra.mxu1 %v13218_v37  ;;  %v13221_v37 = vld [vmem:[%s16614_s1 + $0x360] sm:$0xff]  }
 0x4b5   : > { %12329 = vmatprep.subr.bf16.mxu1 %v13219_v7  ;;  %v17373_v52 = vld [vmem:[#allocation107_spill] sm:$0xff] }
 0x4b7   : > { %12298 = vmatmul.mubr.bf16.gmra.mrb[4].mxu1 %v7731_v22  ;;  %v7678_v22 = vmul.f32 %v17359_v32, %v17358_v26  ;;  %v17367_v32 = vld [vmem:[#allocation105_spill] sm:$0xff]  ;;  %v17369_v26 = vld [vmem:[#allocation104_spill] sm:$0xff] }
 0x4b8   : > { %12301 = vmatprep.mubr.bf16.mxu1 %v7732_v25  ;;  %12330 = vmatpush3.bf16.msra.mxu1 %v13219_v7  ;;  %v13222_v7 = vld [vmem:[%s16614_s1 + $0x368] sm:$0xff]   ;;  %v7683_v63 = vmul.f32 %v17369_v26, %v17368_v13 }
 0x4b9   : > { %12331 = vmatprep.subr.bf16.mxu1 %v13220_v48  ;;  %v17360_v25 = vld [vmem:[#allocation156_spill] sm:$0xff] }
 0x4ba   : > { %v7679_v19 = vmul.f32 %v17361_v21, %v17360_v25  ;;  %v17378_v25 = vld [vmem:[#allocation69_spill] sm:$0xff] }
 0x4bb   : > { %v7689_v11 = vmul.f32 %v17379_v4, %v17378_v25 }
 0x4bc   : > { %12332 = vmatpush3.bf16.msra.mxu1 %v13220_v48  ;;  %v13223_v48 = vld [vmem:[%s16614_s1 + $0x370] sm:$0xff]   ;;  %v7735_v36 = vpack.c.bf16 %v7679_v19, %v7678_v22  ;;  %v17371_v22 = vld [vmem:[#allocation106_spill] sm:$0xff] }
 0x4bd   : > { %12333 = vmatprep.subr.bf16.mxu1 %v13221_v37 }
 0x4bf   : > { %12302 = vmatmul.mubr.bf16.gmra.mrb[8].mxu1 %v7733_v2  ;;  %v7736_v2 = vpack.c.bf16 %v7681_v54, %v7680_v40  ;;  %v7684_v54 = vmul.f32 %v17373_v52, %v17372_v31 }
 0x4c0   : > { %12305 = vmatprep.mubr.bf16.mxu1 %v7734_v58  ;;  %12334 = vmatpush3.bf16.msra.mxu1 %v13221_v37  ;;  %v13224_v37 = vld [vmem:[%s16614_s1 + $0x378] sm:$0xff]  }
 0x4c1   : > { %12335 = vmatprep.subr.bf16.mxu1 %v13222_v7  ;;  %v17366_v58 = vld [vmem:[#allocation165_spill] sm:$0xff] }
 0x4c2   : > { %v7682_v21 = vmul.f32 %v17367_v32, %v17366_v58  ;;  %v17376_v32 = vld [vmem:[#allocation173_spill] sm:$0xff]  ;;  %v17377_v58 = vld [vmem:[#allocation108_spill] sm:$0xff] }
 0x4c3   : > { %v7687_v13 = vmul.f32 %v17377_v58, %v17376_v32  ;;  %v17388_v58 = vld [vmem:[#allocation16_spill] sm:$0xff]  ;;  %v17389_v32 = vld [vmem:[#allocation127_spill] sm:$0xff] }
 0x4c4   : > { %12336 = vmatpush3.bf16.msra.mxu1 %v13222_v7  ;;  %v17370_v7 = vld [vmem:[#allocation111_spill] sm:$0xff]  ;;  %v7737_v40 = vpack.c.bf16 %v7683_v63, %v7682_v21  ;;  %v17383_v21 = vld [vmem:[#allocation120_spill] sm:$0xff]  ;;  %v7692_v31 = vmul.f32 %v17389_v32, %v17388_v58 }
 0x4c5   : > { %12337 = vmatprep.subr.bf16.mxu1 %v13223_v48  ;;  %v7685_v19 = vmul.f32 %v17371_v22, %v17370_v7  ;;  %v17381_v22 = vld [vmem:[#allocation113_spill] sm:$0xff] }
 0x4c6   : > { %v7688_v7 = vmul.f32 %v17381_v22, %v17380_v17  ;;  %v13227_v32 = vld [vmem:[%s16614_s1 + $0x390] sm:$0xff]  }
 0x4c7   : > { %12306 = vmatmul.mubr.bf16.gmra.mrb[12].mxu1 %v7735_v36  ;;  %v17374_v36 = vld [vmem:[#allocation172_spill] sm:$0xff] }
 0x4c8   : > { %12309 = vmatprep.mubr.bf16.mxu1 %v7736_v2  ;;  %12338 = vmatpush3.bf16.msra.mxu1 %v13223_v48  ;;  %v7738_v48 = vpack.c.bf16 %v7685_v19, %v7684_v54  ;;  %v17375_v2 = vld [vmem:[#allocation109_spill] sm:$0xff]  ;;  %v7740_v52 = vpack.c.bf16 %v7689_v11, %v7688_v7  ;;  %v17384_v19 = vld [vmem:[#allocation118_spill] sm:$0xff]  ;;  %v17391_v11 = vld [vmem:[#allocation135_spill] sm:$0xff] }
 0x4c9   : > { %12339 = vmatprep.subr.bf16.mxu1 %v13224_v37  ;;  %v7686_v26 = vmul.f32 %v17375_v2, %v17374_v36  ;;  %v17385_v54 = vld [vmem:[#allocation117_spill] sm:$0xff]  ;;  %v17392_v7 = vld [vmem:[#allocation131_spill] sm:$0xff] }
 0x4ca   : > { %v17387_v2 = vld [vmem:[#allocation125_spill] sm:$0xff] }
 0x4cb   : > { %v7739_v20 = vpack.c.bf16 %v7687_v13, %v7686_v26  ;;  %v17390_v13 = vld [vmem:[#allocation133_spill] sm:$0xff]  ;;  %v17393_v26 = vld [vmem:[#allocation134_spill] sm:$0xff] }
 0x4cc   : > { %12340 = vmatpush3.bf16.msra.mxu1 %v13224_v37  ;;  %v17382_v37 = vld [vmem:[#allocation52_spill] sm:$0xff]  ;;  %v7695_v22 = vmul.f32 %v17393_v26, %v17392_v7 }
 0x4cd   : > { %12373 = vmatprep.subr.bf16.mxu1 %v13225_v28  ;;  %v7690_v63 = vmul.f32 %v17383_v21, %v17382_v37  ;;  %v8066_v21 = vpack.c.bf16 %v17236_v0, %v17240_v15  ;;  %v13230_v26 = vld [vmem:[%s16614_s1 + $0x3a8] sm:$0xff]  }
 0x4cf   : > { %12310 = vmatmul.mubr.bf16.gmra.mrb[16].mxu1 %v7737_v40  ;;  %v7691_v40 = vmul.f32 %v17385_v54, %v17384_v19  ;;  %v8067_v54 = vpack.c.bf16 %v15200_v42, %v17242_v23  ;;  %v17443_v23 = vld [vmem:[#allocation24_spill] sm:$0xff] }
 0x4d0   : > { %12313 = vmatprep.mubr.bf16.mxu1 %v7738_v48  ;;  %v17386_v48 = vld [vmem:[#allocation17_spill] sm:$0xff] }
 0x4d1   : > { %v7693_v36 = vmul.f32 %v17387_v2, %v17386_v48  ;;  %v7741_v4 = vpack.c.bf16 %v7691_v40, %v7690_v63  ;;  %v8069_v63 = vpack.c.bf16 %v15242_v45, %v15255_v30  ;;  %v13228_v40 = vld [vmem:[%s16614_s1 + $0x398] sm:$0xff]   ;;  %v8070_v2 = vpack.c.bf16 %v15301_v57, %v15316_v14  ;;  %v17426_v14 = vld [vmem:[#allocation55_spill] sm:$0xff] }
 0x4d2   : > { %v17431_v57 = vld [vmem:[#allocation19_spill] sm:$0xff] }
 0x4d3   : > { %v7742_v25 = vpack.c.bf16 %v7693_v36, %v7692_v31  ;;  %v13226_v31 = vld [vmem:[%s16614_s1 + $0x388] sm:$0xff]  }
 0x4d7   : > { %12314 = vmatmul.mubr.bf16.gmra.mrb[20].mxu1 %v7739_v20  ;;  %v7694_v20 = vmul.f32 %v17391_v11, %v17390_v13  ;;  %v16054_v11 = vpop.permute.xlu0 %8556  ;;  %v17446_v13 = vld [vmem:[#allocation58_spill] sm:$0xff] }
 0x4d8   : > { %12317 = vmatprep.mubr.bf16.mxu1 %v7740_v52 }
 0x4d9   : > { %v7743_v52 = vpack.c.bf16 %v7695_v22, %v7694_v20  ;;  %v8071_v20 = vpack.c.bf16 %v15306_v33, %v15324_v39  ;;  %v8072_v22 = vpack.c.bf16 %v15356_v5, %v15371_v53  ;;  %v17415_v5 = vld [vmem:[#allocation171_spill] sm:$0xff] }
 0x4da   : > { %v17424_v33 = vld [vmem:[#allocation11_spill] sm:$0xff] }
 0x4df   : > { %12318 = vmatmul.mubr.bf16.gmra.mrb[24].mxu1 %v7741_v4  ;;  %v16052_v4 = vpop.permute.xlu1 %8561 }
 0x4e0   : > { %12321 = vmatprep.mubr.bf16.mxu1 %v7742_v25  ;;  %v17394_v25 = vld [vmem:[#allocation130_spill] sm:$0xff] }
 0x4e1   : > { %v8068_v36 = vpack.c.bf16 %v15233_v51, %v17394_v25  ;;  %v17438_v25 = vld [vmem:[#allocation53_spill] sm:$0xff]  ;;  %v17439_v51 = vld [vmem:[#allocation23_spill] sm:$0xff] }
 0x4e7   : > { %12322 = vmatmul.mubr.bf16.gmra.mrb[28].mxu1 %v7743_v52  ;;  %v13231_v52 = vld [vmem:[%s16614_s1 + $0x3b0] sm:$0xff]  }
 0x4e8   : > { %12341 = vmatprep.mubr.bf16.mxu1 %v8066_v21  ;;  %v16066_v21 = vpop.permute.xlu1 %8973 }
 0x4ef   : > { %12342 = vmatmul.mubr.bf16.vlgmr.msra.gmra.mrb[0].mxu1 %v8067_v54  ;;  %v16068_v54 = vpop.permute.xlu0 %8968 }
 0x4f0   : > { %12374 = vmatpush3.bf16.msra.mxu1 %v13225_v28  ;;  %12345 = vmatprep.mubr.bf16.mxu1 %v8068_v36  ;;  %v13229_v28 = vld [vmem:[%s16614_s1 + $0x3a0] sm:$0xff]   ;;  %v13232_v36 = vld [vmem:[%s16614_s1 + $0x3b8] sm:$0xff]  }
 0x4f1   : > { %12375 = vmatprep.subr.bf16.mxu1 %v13226_v31 }
 0x4f4   : > { %12376 = vmatpush3.bf16.msra.mxu1 %v13226_v31  ;;  %v8073_v31 = vpack.c.bf16 %v15361_v61, %v15380_v27 }
 0x4f5   : > { %12377 = vmatprep.subr.bf16.mxu1 %v13227_v32 }
 0x4f7   : > { %12346 = vmatmul.mubr.bf16.gmra.mrb[4].mxu1 %v8069_v63  ;;  %v16077_v63 = vpop.permute.xlu1 %8983 }
 0x4f8   : > { %12349 = vmatprep.mubr.bf16.mxu1 %v8070_v2  ;;  %12378 = vmatpush3.bf16.msra.mxu1 %v13227_v32  ;;  %v8074_v32 = vpack.c.bf16 %v15410_v49, %v15429_v35  ;;  %v13233_v2 = vld [vmem:[%s16614_s1 + $0x3c0] sm:$0xff]   ;;  %v17403_v49 = vld [vmem:[#allocation149_spill] sm:$0xff] }
 0x4f9   : > { %12379 = vmatprep.subr.bf16.mxu1 %v13228_v40 }
 0x4fc   : > { %12380 = vmatpush3.bf16.msra.mxu1 %v13228_v40  ;;  %v16079_v40 = vpop.permute.xlu0 %8978 }
 0x4fd   : > { %12381 = vmatprep.subr.bf16.mxu1 %v13229_v28 }
 0x4ff   : > { %12350 = vmatmul.mubr.bf16.gmra.mrb[8].mxu1 %v8071_v20  ;;  %v8076_v20 = vpack.c.bf16 %v15468_v60, %v15483_v47 }
 0x500   : > { %12353 = vmatprep.mubr.bf16.mxu1 %v8072_v22  ;;  %12382 = vmatpush3.bf16.msra.mxu1 %v13229_v28  ;;  %v8075_v28 = vpack.c.bf16 %v15417_v43, %v15436_v55  ;;  %v16090_v22 = vpop.permute.xlu0 %8988  ;;  %v17399_v55 = vld [vmem:[#allocation122_spill] sm:$0xff] }
 0x501   : > { %12383 = vmatprep.subr.bf16.mxu1 %v13230_v26  ;;  %v8081_v43 = vpack.c.bf16 %v17399_v55, %v17233_v62  ;;  %v17414_v55 = vld [vmem:[#allocation14_spill] sm:$0xff] }
 0x504   : > { %12384 = vmatpush3.bf16.msra.mxu1 %v13230_v26  ;;  %v16088_v26 = vpop.permute.xlu1 %8993 }
 0x505   : > { %12385 = vmatprep.subr.bf16.mxu1 %v13231_v52 }
 0x507   : > { %12354 = vmatmul.mubr.bf16.gmra.mrb[12].mxu1 %v8073_v31  ;;  %v16094_v31 = vpop.permute.xlu0 %8998 }
 0x508   : > { %12357 = vmatprep.mubr.bf16.mxu1 %v8074_v32  ;;  %12386 = vmatpush3.bf16.msra.mxu1 %v13231_v52  ;;  %v16092_v52 = vpop.permute.xlu1 %9003  ;;  %v8078_v32 = vpack.c.bf16 %v15522_v1, %v15535_v41  ;;  %v17396_v41 = vld [vmem:[#allocation140_spill] sm:$0xff]  ;;  %v17398_v1 = vld [vmem:[#allocation141_spill] sm:$0xff] }
 0x509   : > { %12387 = vmatprep.subr.bf16.mxu1 %v13232_v36 }
 0x50b   : > { %v16102_v0 = vpop.permute.xlu0 %9008 }
 0x50c   : > { %12388 = vmatpush3.bf16.msra.mxu1 %v13232_v36  ;;  %v8077_v36 = vpack.c.bf16 %v15473_v18, %v15490_v50  ;;  %v16100_v15 = vpop.permute.xlu1 %9013  ;;  %v17395_v18 = vld [vmem:[#allocation33_spill] sm:$0xff] }
 0x50d   : > { %12421 = vmatprep.subr.bf16.mxu1 %v13233_v2 }
 0x50f   : > { %12358 = vmatmul.mubr.bf16.gmra.mrb[16].mxu1 %v8075_v28  ;;  %v8079_v28 = vpack.c.bf16 %v15527_v38, %v15544_v24  ;;  %v16110_v50 = vpop.permute.xlu0 %9018 }
 0x510   : > { %12361 = vmatprep.mubr.bf16.mxu1 %v8076_v20  ;;  %v8080_v20 = vpack.c.bf16 %v15230_v16, %v15575_v46  ;;  %v16108_v47 = vpop.permute.xlu1 %9023  ;;  %v17402_v16 = vld [vmem:[#allocation36_spill] sm:$0xff] }
 0x511   : > { %v8566_v27 = vmul.f32 %v17403_v49, %v17402_v16  ;;  %v17408_v49 = vld [vmem:[#allocation38_spill] sm:$0xff] }
 0x513   : > { %v16120_v38 = vpop.permute.xlu0 %9028 }
 0x514   : > { %v16118_v24 = vpop.permute.xlu1 %9033 }
 0x517   : > { %12362 = vmatmul.mubr.bf16.gmra.mrb[20].mxu1 %v8077_v36  ;;  %v8565_v36 = vmul.f32 %v17396_v41, %v17395_v18  ;;  %v17404_v41 = vld [vmem:[#allocation37_spill] sm:$0xff]  ;;  %v17405_v18 = vld [vmem:[#allocation151_spill] sm:$0xff] }
 0x518   : > { %12365 = vmatprep.mubr.bf16.mxu1 %v8078_v32  ;;  %v17397_v32 = vld [vmem:[#allocation35_spill] sm:$0xff]  ;;  %v8569_v61 = vmul.f32 %v17405_v18, %v17404_v41  ;;  %v17410_v18 = vld [vmem:[#allocation40_spill] sm:$0xff]  ;;  %v17411_v41 = vld [vmem:[#allocation161_spill] sm:$0xff] }
 0x519   : > { %v8564_v60 = vmul.f32 %v17398_v1, %v17397_v32  ;;  %v17406_v1 = vld [vmem:[#allocation39_spill] sm:$0xff]  ;;  %v17407_v32 = vld [vmem:[#allocation154_spill] sm:$0xff] }
 0x51a   : > { %v8568_v53 = vmul.f32 %v17407_v32, %v17406_v1  ;;  %v17413_v32 = vld [vmem:[#allocation170_spill] sm:$0xff] }
 0x51b   : > { %v8628_v35 = vpack.c.bf16 %v8565_v36, %v8564_v60  ;;  %v16130_v60 = vpop.permute.xlu1 %9043  ;;  %v16132_v36 = vpop.permute.xlu0 %9038 }
 0x51f   : > { %12366 = vmatmul.mubr.bf16.gmra.mrb[24].mxu1 %v8079_v28  ;;  %v17400_v28 = vld [vmem:[#allocation34_spill] sm:$0xff] }
 0x520   : > { %12369 = vmatprep.mubr.bf16.mxu1 %v8080_v20  ;;  %v17401_v20 = vld [vmem:[#allocation147_spill] sm:$0xff] }
 0x521   : > { %v8567_v46 = vmul.f32 %v17401_v20, %v17400_v28  ;;  %v17409_v20 = vld [vmem:[#allocation160_spill] sm:$0xff]  ;;  %v8570_v28 = vmul.f32 %v17411_v41, %v17410_v18  ;;  %v13236_v41 = vld [vmem:[%s16614_s1 + $0x3d8] sm:$0xff]  }
 0x522   : > { %v8571_v16 = vmul.f32 %v17409_v20, %v17408_v49  ;;  %v17416_v20 = vld [vmem:[#allocation42_spill] sm:$0xff]  ;;  %v17418_v18 = vld [vmem:[#allocation12_spill] sm:$0xff] }
 0x523   : > { %v8629_v62 = vpack.c.bf16 %v8567_v46, %v8566_v27  ;;  %v13235_v27 = vld [vmem:[%s16614_s1 + $0x3d0] sm:$0xff]  }
 0x524   : > { %v17412_v46 = vld [vmem:[#allocation41_spill] sm:$0xff] }
 0x525   : > { %v8573_v1 = vmul.f32 %v17413_v32, %v17412_v46  ;;  %v17417_v32 = vld [vmem:[#allocation175_spill] sm:$0xff] }
 0x526   : > { %v8575_v46 = vmul.f32 %v17417_v32, %v17416_v20  ;;  %v13238_v32 = vld [vmem:[%s16614_s1 + $0x3e8] sm:$0xff]  }
 0x527   : > { %12370 = vmatmul.mubr.bf16.gmra.mrb[28].mxu1 %v8081_v43  ;;  %v13234_v43 = vld [vmem:[%s16614_s1 + $0x3c8] sm:$0xff]  }
 0x528   : > { %12389 = vmatprep.mubr.bf16.mxu1 %v8628_v35  ;;  %v8630_v35 = vpack.c.bf16 %v8569_v61, %v8568_v53  ;;  %v8572_v61 = vmul.f32 %v17415_v5, %v17414_v55  ;;  %v16148_v53 = vpop.permute.xlu1 %9053  ;;  %v17419_v5 = vld [vmem:[#allocation178_spill] sm:$0xff] }
 0x529   : > { %v8574_v55 = vmul.f32 %v17419_v5, %v17418_v18 }
 0x52c   : > { %v16159_v49 = vpop.permute.xlu1 %9063 }
 0x52f   : > { %12390 = vmatmul.mubr.bf16.vlgmr.msra.gmra.mrb[0].mxu1 %v8629_v62  ;;  %v16150_v62 = vpop.permute.xlu0 %9048 }
 0x530   : > { %12422 = vmatpush3.bf16.msra.mxu1 %v13233_v2  ;;  %12393 = vmatprep.mubr.bf16.mxu1 %v8630_v35  ;;  %v8631_v2 = vpack.c.bf16 %v8571_v16, %v8570_v28  ;;  %v8632_v35 = vpack.c.bf16 %v8573_v1, %v8572_v61  ;;  %v13237_v16 = vld [vmem:[%s16614_s1 + $0x3e0] sm:$0xff]   ;;  %v17420_v28 = vld [vmem:[#allocation13_spill] sm:$0xff]  ;;  %v17422_v61 = vld [vmem:[#allocation56_spill] sm:$0xff]  ;;  %v16173_v18 = vpop.permute.xlu1 %9073 }
 0x531   : > { %12423 = vmatprep.subr.bf16.mxu1 %v13234_v43  ;;  %v17421_v1 = vld [vmem:[#allocation51_spill] sm:$0xff] }
 0x533   : > { %v16161_v39 = vpop.permute.xlu0 %9058 }
 0x534   : > { %12424 = vmatpush3.bf16.msra.mxu1 %v13234_v43  ;;  %v8577_v43 = vmul.f32 %v17421_v1, %v17420_v28  ;;  %v17425_v1 = vld [vmem:[#allocation15_spill] sm:$0xff] }
 0x535   : > { %12425 = vmatprep.subr.bf16.mxu1 %v13235_v27  ;;  %v8579_v28 = vmul.f32 %v17425_v1, %v17424_v33  ;;  %v13240_v1 = vld [vmem:[%s16614_s1 + $0x3f8] sm:$0xff]  }
 0x536   : > { %v17434_v33 = vld [vmem:[#allocation66_spill] sm:$0xff] }
 0x537   : > { %12394 = vmatmul.mubr.bf16.gmra.mrb[4].mxu1 %v8631_v2  ;;  %v16175_v20 = vpop.permute.xlu0 %9068 }
 0x538   : > { %12397 = vmatprep.mubr.bf16.mxu1 %v8632_v35  ;;  %12426 = vmatpush3.bf16.msra.mxu1 %v13235_v27  ;;  %v17423_v27 = vld [vmem:[#allocation68_spill] sm:$0xff]  ;;  %v8633_v35 = vpack.c.bf16 %v8575_v46, %v8574_v55  ;;  %v17428_v46 = vld [vmem:[#allocation67_spill] sm:$0xff] }
 0x539   : > { %12427 = vmatprep.subr.bf16.mxu1 %v13236_v41  ;;  %v8576_v2 = vmul.f32 %v17423_v27, %v17422_v61  ;;  %v17427_v27 = vld [vmem:[#allocation70_spill] sm:$0xff]  ;;  %v13239_v55 = vld [vmem:[%s16614_s1 + $0x3f0] sm:$0xff]   ;;  %v17430_v61 = vld [vmem:[#allocation47_spill] sm:$0xff] }
 0x53a   : > { %v8580_v30 = vmul.f32 %v17431_v57, %v17430_v61  ;;  %v17435_v57 = vld [vmem:[#allocation20_spill] sm:$0xff]  ;;  %v17437_v61 = vld [vmem:[#allocation21_spill] sm:$0xff] }
 0x53b   : > { %v8634_v5 = vpack.c.bf16 %v8577_v43, %v8576_v2  ;;  %v17429_v43 = vld [vmem:[#allocation18_spill] sm:$0xff] }
 0x53c   : > { %12428 = vmatpush3.bf16.msra.mxu1 %v13236_v41  ;;  %v8578_v41 = vmul.f32 %v17427_v27, %v17426_v14  ;;  %v8581_v2 = vmul.f32 %v17429_v43, %v17428_v46  ;;  %v17432_v14 = vld [vmem:[#allocation49_spill] sm:$0xff]  ;;  %v17433_v43 = vld [vmem:[#allocation71_spill] sm:$0xff] }
 0x53d   : > { %12429 = vmatprep.subr.bf16.mxu1 %v13237_v16  ;;  %v8583_v46 = vmul.f32 %v17433_v43, %v17432_v14  ;;  %v17440_v43 = vld [vmem:[#allocation54_spill] sm:$0xff]  ;;  %v17442_v14 = vld [vmem:[#allocation57_spill] sm:$0xff] }
 0x53e   : > { %v8636_v27 = vpack.c.bf16 %v8581_v2, %v8580_v30  ;;  %v8584_v30 = vmul.f32 %v17439_v51, %v17438_v25  ;;  %v8586_v42 = vmul.f32 %v17443_v23, %v17442_v14  ;;  %v17445_v51 = vld [vmem:[#allocation25_spill] sm:$0xff]  ;;  %v17449_v23 = vld [vmem:[#allocation26_spill] sm:$0xff] }
 0x53f   : > { %12398 = vmatmul.mubr.bf16.gmra.mrb[8].mxu1 %v8633_v35  ;;  %v8635_v35 = vpack.c.bf16 %v8579_v28, %v8578_v41  ;;  %v13241_v28 = vld [vmem:[%s16614_s1 + $0x400] sm:$0xff]   ;;  %v8589_v25 = vmul.f32 %v17445_v51, %v15910_v12  ;;  %v17450_v14 = vld [vmem:[#allocation61_spill] sm:$0xff] }
 0x540   : > { %12401 = vmatprep.mubr.bf16.mxu1 %v8634_v5  ;;  %12430 = vmatpush3.bf16.msra.mxu1 %v13237_v16  ;;  %v16188_v16 = vpop.permute.xlu1 %9083  ;;  %v16190_v5 = vpop.permute.xlu0 %9078  ;;  %v17436_v41 = vld [vmem:[#allocation50_spill] sm:$0xff]  ;;  %v17453_v12 = vld [vmem:[#allocation31_spill] sm:$0xff] }
 0x541   : > { %12431 = vmatprep.subr.bf16.mxu1 %v13238_v32  ;;  %v8585_v45 = vmul.f32 %v17437_v61, %v17436_v41 }
 0x544   : > { %12432 = vmatpush3.bf16.msra.mxu1 %v13238_v32  ;;  %v8582_v32 = vmul.f32 %v17435_v57, %v17434_v33  ;;  %v16206_v2 = vpop.permute.xlu1 %9093  ;;  %v17441_v57 = vld [vmem:[#allocation22_spill] sm:$0xff] }
 0x545   : > { %12433 = vmatprep.subr.bf16.mxu1 %v13239_v55  ;;  %v8587_v33 = vmul.f32 %v17441_v57, %v17440_v43  ;;  %v17451_v43 = vld [vmem:[#allocation28_spill] sm:$0xff] }
 0x546   : > { %v8590_v7 = vmul.f32 %v17451_v43, %v17450_v14 }
 0x547   : > { %12402 = vmatmul.mubr.bf16.gmra.mrb[12].mxu1 %v8635_v35  ;;  %v8637_v35 = vpack.c.bf16 %v8583_v46, %v8582_v32  ;;  %v8639_v32 = vpack.c.bf16 %v8587_v33, %v8586_v42 }
 0x548   : > { %12405 = vmatprep.mubr.bf16.mxu1 %v8636_v27  ;;  %12434 = vmatpush3.bf16.msra.mxu1 %v13239_v55  ;;  %v16208_v55 = vpop.permute.xlu0 %9088  ;;  %v8638_v27 = vpack.c.bf16 %v8585_v45, %v8584_v30  ;;  %v16214_v61 = vpop.permute.xlu1 %9103 }
 0x549   : > { %12435 = vmatprep.subr.bf16.mxu1 %v13240_v1 }
 0x54c   : > { %12436 = vmatpush3.bf16.msra.mxu1 %v13240_v1  ;;  %v16216_v41 = vpop.permute.xlu0 %9098  ;;  %v17447_v1 = vld [vmem:[#allocation27_spill] sm:$0xff]  ;;  %v16222_v30 = vpop.permute.xlu1 %9113 }
 0x54d   : > { %12469 = vmatprep.subr.bf16.mxu1 %v13241_v28  ;;  %17444 = vst [vmem:[#allocation62_spill] sm:$0xff] %v16216_v41  ;;  %v8588_v46 = vmul.f32 %v17447_v1, %v17446_v13  ;;  %v17452_v41 = vld [vmem:[#allocation29_spill] sm:$0xff]  ;;  %v8592_v1 = vmul.f32 %v17453_v12, %v15936_v3  ;;  %v9126_v12 = vmul.f32 %v16068_v54, %v15240_v8 }
 0x54e   : > { %v8593_v51 = vmul.f32 %v17452_v41, %v15933_v9  ;;  %v9127_v41 = vmul.f32 %v16066_v21, %v15253_v6  ;;  %v9131_v8 = vmul.f32 %v16088_v26, %v15314_v10  ;;  %v9130_v21 = vmul.f32 %v16090_v22, %v15309_v29  ;;  %v13243_v29 = vld [vmem:[%s16614_s1 + $0x410] sm:$0xff]  }
 0x54f   : > { %12406 = vmatmul.mubr.bf16.gmra.mrb[16].mxu1 %v8637_v35  ;;  %v8640_v45 = vpack.c.bf16 %v8589_v25, %v8588_v46  ;;  %v9132_v10 = vmul.f32 %v16094_v31, %v15378_v59  ;;  %v17457_v22 = vld [vmem:[#allocation144_spill] sm:$0xff]  ;;  %v17459_v31 = vld [vmem:[#allocation158_spill] sm:$0xff] }
 0x550   : > { %12409 = vmatprep.mubr.bf16.mxu1 %v8638_v27  ;;  %v16224_v35 = vpop.permute.xlu0 %9108  ;;  %v17448_v27 = vld [vmem:[#allocation60_spill] sm:$0xff]  ;;  %v16234_v33 = vpop.permute.xlu1 %9123  ;;  %v8642_v46 = vpack.c.bf16 %v8593_v51, %v8592_v1  ;;  %v9190_v51 = vpack.c.bf16 %v9127_v41, %v9126_v12  ;;  %v13245_v41 = vld [vmem:[%s16614_s1 + $0x420] sm:$0xff]  }
 0x551   : > { %v8591_v57 = vmul.f32 %v17449_v23, %v17448_v27  ;;  %v17455_v23 = vld [vmem:[#allocation32_spill] sm:$0xff] }
 0x552   : > { %v8594_v43 = vmul.f32 %v16054_v11, %v17455_v23  ;;  %v9128_v11 = vmul.f32 %v16079_v40, %v15322_v44  ;;  %v9133_v44 = vmul.f32 %v16092_v52, %v15359_v34  ;;  %v17456_v40 = vld [vmem:[#allocation145_spill] sm:$0xff]  ;;  %v17458_v52 = vld [vmem:[#allocation152_spill] sm:$0xff] }
 0x553   : > { %v8641_v42 = vpack.c.bf16 %v8591_v57, %v8590_v7  ;;  %v9135_v26 = vmul.f32 %v16100_v15, %v17456_v40  ;;  %v13244_v34 = vld [vmem:[%s16614_s1 + $0x418] sm:$0xff]   ;;  %v9137_v15 = vmul.f32 %v16108_v47, %v17458_v52  ;;  %v17460_v12 = vld [vmem:[#allocation156_spill] sm:$0xff]  ;;  %v17466_v52 = vld [vmem:[#allocation111_spill] sm:$0xff] }
 0x554   : > { %v16236_v25 = vpop.permute.xlu0 %9118  ;;  %v16246_v7 = vpop.permute.xlu1 %9535  ;;  %v17464_v40 = vld [vmem:[#allocation166_spill] sm:$0xff] }
 0x557   : > { %12410 = vmatmul.mubr.bf16.gmra.mrb[20].mxu1 %v8639_v32  ;;  %v17454_v32 = vld [vmem:[#allocation30_spill] sm:$0xff] }
 0x558   : > { %12413 = vmatprep.mubr.bf16.mxu1 %v8640_v45  ;;  %v8595_v45 = vmul.f32 %v16052_v4, %v17454_v32  ;;  %v16248_v57 = vpop.permute.xlu0 %9530  ;;  %v9129_v4 = vmul.f32 %v16077_v63, %v15304_v56  ;;  %v16254_v1 = vpop.permute.xlu1 %9545 }
 0x55a   : > { %v8643_v3 = vpack.c.bf16 %v8595_v45, %v8594_v43  ;;  %v9191_v54 = vpack.c.bf16 %v9129_v4, %v9128_v11  ;;  %v17461_v4 = vld [vmem:[#allocation155_spill] sm:$0xff] }
 0x55b   : > { %v9138_v11 = vmul.f32 %v16120_v38, %v17461_v4 }
 0x55c   : > { %v16256_v6 = vpop.permute.xlu0 %9540  ;;  %v16265_v56 = vpop.permute.xlu1 %9555 }
 0x55f   : > { %12414 = vmatmul.mubr.bf16.gmra.mrb[24].mxu1 %v8641_v42  ;;  %v9192_v42 = vpack.c.bf16 %v9131_v8, %v9130_v21 }
 0x560   : > { %12417 = vmatprep.mubr.bf16.mxu1 %v8642_v46  ;;  %v16267_v63 = vpop.permute.xlu0 %9550  ;;  %v9134_v46 = vmul.f32 %v16102_v0, %v17457_v22  ;;  %v16280_v45 = vpop.permute.xlu1 %9565  ;;  %v9136_v0 = vmul.f32 %v16110_v50, %v17459_v31  ;;  %v13246_v50 = vld [vmem:[%s16614_s1 + $0x428] sm:$0xff]   ;;  %v17465_v22 = vld [vmem:[#allocation165_spill] sm:$0xff]  ;;  %v13249_v31 = vld [vmem:[%s16614_s1 + $0x440] sm:$0xff]  }
 0x562   : > { %v9194_v59 = vpack.c.bf16 %v9135_v26, %v9134_v46  ;;  %v9195_v47 = vpack.c.bf16 %v9137_v15, %v9136_v0  ;;  %v9143_v26 = vmul.f32 %v16148_v53, %v17464_v40  ;;  %v9142_v46 = vmul.f32 %v16150_v62, %v17465_v22  ;;  %v17467_v15 = vld [vmem:[#allocation176_spill] sm:$0xff]  ;;  %v17468_v0 = vld [vmem:[#allocation173_spill] sm:$0xff] }
 0x563   : > { %v9145_v53 = vmul.f32 %v16159_v49, %v17466_v52  ;;  %v9144_v62 = vmul.f32 %v16161_v39, %v17467_v15  ;;  %v17470_v39 = vld [vmem:[#allocation69_spill] sm:$0xff]  ;;  %v17477_v52 = vld [vmem:[#allocation116_spill] sm:$0xff] }
 0x564   : > { %v16282_v43 = vpop.permute.xlu0 %9560  ;;  %v16298_v8 = vpop.permute.xlu1 %9575 }
 0x565   : > { %v9199_v4 = vpack.c.bf16 %v9145_v53, %v9144_v62 }
 0x567   : > { %12418 = vmatmul.mubr.bf16.gmra.mrb[28].mxu1 %v8643_v3  ;;  %v13242_v3 = vld [vmem:[%s16614_s1 + $0x408] sm:$0xff]  }
 0x568   : > { %12437 = vmatprep.mubr.bf16.mxu1 %v9190_v51  ;;  %v9139_v51 = vmul.f32 %v16118_v24, %v17460_v12  ;;  %v16300_v21 = vpop.permute.xlu0 %9570  ;;  %v17469_v12 = vld [vmem:[#allocation172_spill] sm:$0xff] }
 0x56f   : > { %12438 = vmatmul.mubr.bf16.vlgmr.msra.gmra.mrb[0].mxu1 %v9191_v54  ;;  %v9196_v54 = vpack.c.bf16 %v9139_v51, %v9138_v11  ;;  %v9146_v51 = vmul.f32 %v16175_v20, %v17469_v12  ;;  %v9150_v20 = vmul.f32 %v16208_v55, %v17382_v37  ;;  %v17473_v55 = vld [vmem:[#allocation133_spill] sm:$0xff]  ;;  %v17479_v12 = vld [vmem:[#allocation130_spill] sm:$0xff] }
 0x570   : > { %12470 = vmatpush3.bf16.msra.mxu1 %v13241_v28  ;;  %12441 = vmatprep.mubr.bf16.mxu1 %v9192_v42  ;;  %v9193_v28 = vpack.c.bf16 %v9133_v44, %v9132_v10  ;;  %v17463_v42 = vld [vmem:[#allocation168_spill] sm:$0xff]  ;;  %v16309_v44 = vpop.permute.xlu1 %9585  ;;  %v16311_v10 = vpop.permute.xlu0 %9580  ;;  %v9154_v40 = vmul.f32 %v16224_v35, %v17473_v55  ;;  %v9688_v35 = vmul.f32 %v16248_v57, %v17477_v52 }
 0x571   : > { %12471 = vmatprep.subr.bf16.mxu1 %v13242_v3  ;;  %v9140_v38 = vmul.f32 %v16132_v36, %v17463_v42  ;;  %v13248_v36 = vld [vmem:[%s16614_s1 + $0x438] sm:$0xff]  }
 0x574   : > { %12472 = vmatpush3.bf16.msra.mxu1 %v13242_v3  ;;  %v17462_v3 = vld [vmem:[#allocation163_spill] sm:$0xff] }
 0x575   : > { %12473 = vmatprep.subr.bf16.mxu1 %v13243_v29  ;;  %v9141_v24 = vmul.f32 %v16130_v60, %v17462_v3 }
 0x577   : > { %12442 = vmatmul.mubr.bf16.gmra.mrb[4].mxu1 %v9193_v28  ;;  %v9197_v60 = vpack.c.bf16 %v9141_v24, %v9140_v38  ;;  %v9198_v28 = vpack.c.bf16 %v9143_v26, %v9142_v46 }
 0x578   : > { %12445 = vmatprep.mubr.bf16.mxu1 %v9194_v59  ;;  %12474 = vmatpush3.bf16.msra.mxu1 %v13243_v29  ;;  %v13247_v29 = vld [vmem:[%s16614_s1 + $0x430] sm:$0xff]   ;;  %v16325_v59 = vpop.permute.xlu0 %9590 }
 0x579   : > { %12475 = vmatprep.subr.bf16.mxu1 %v13244_v34 }
 0x57c   : > { %12476 = vmatpush3.bf16.msra.mxu1 %v13244_v34  ;;  %v16323_v34 = vpop.permute.xlu1 %9595 }
 0x57d   : > { %12477 = vmatprep.subr.bf16.mxu1 %v13245_v41 }
 0x57f   : > { %12446 = vmatmul.mubr.bf16.gmra.mrb[8].mxu1 %v9195_v47  ;;  %v16340_v47 = vpop.permute.xlu0 %9600 }
 0x580   : > { %12449 = vmatprep.mubr.bf16.mxu1 %v9196_v54  ;;  %12478 = vmatpush3.bf16.msra.mxu1 %v13245_v41  ;;  %v9147_v41 = vmul.f32 %v16173_v18, %v17468_v0  ;;  %v16338_v11 = vpop.permute.xlu1 %9605  ;;  %v9148_v54 = vmul.f32 %v16190_v5, %v17380_v17  ;;  %v9151_v18 = vmul.f32 %v16206_v2, %v17384_v19  ;;  %v17472_v2 = vld [vmem:[#allocation131_spill] sm:$0xff] }
 0x581   : > { %12479 = vmatprep.subr.bf16.mxu1 %v13246_v50  ;;  %v9155_v37 = vmul.f32 %v16222_v30, %v17472_v2 }
 0x582   : > { %v9200_v49 = vpack.c.bf16 %v9147_v41, %v9146_v51  ;;  %v9202_v38 = vpack.c.bf16 %v9151_v18, %v9150_v20  ;;  %v17478_v41 = vld [vmem:[#allocation124_spill] sm:$0xff]  ;;  %v17480_v51 = vld [vmem:[#allocation126_spill] sm:$0xff] }
 0x583   : > { %v16352_v24 = vpop.permute.xlu0 %9610  ;;  %v9204_v22 = vpack.c.bf16 %v9155_v37, %v9154_v40  ;;  %v17486_v40 = vld [vmem:[#allocation142_spill] sm:$0xff] }
 0x584   : > { %12480 = vmatpush3.bf16.msra.mxu1 %v13246_v50  ;;  %v9149_v50 = vmul.f32 %v16188_v16, %v17470_v39  ;;  %v16350_v3 = vpop.permute.xlu1 %9615  ;;  %v9153_v16 = vmul.f32 %v16214_v61, %v17386_v48  ;;  %v17474_v48 = vld [vmem:[#allocation128_spill] sm:$0xff] }
 0x585   : > { %12481 = vmatprep.subr.bf16.mxu1 %v13247_v29  ;;  %v17475_v61 = vld [vmem:[#allocation132_spill] sm:$0xff] }
 0x586   : > { %v9201_v42 = vpack.c.bf16 %v9149_v50, %v9148_v54  ;;  %v13250_v54 = vld [vmem:[%s16614_s1 + $0x448] sm:$0xff]  }
 0x587   : > { %12450 = vmatmul.mubr.bf16.gmra.mrb[12].mxu1 %v9197_v60  ;;  %v16360_v19 = vpop.permute.xlu0 %9620 }
 0x588   : > { %12453 = vmatprep.mubr.bf16.mxu1 %v9198_v28  ;;  %12482 = vmatpush3.bf16.msra.mxu1 %v13247_v29  ;;  %v17471_v29 = vld [vmem:[#allocation62_spill] sm:$0xff]  ;;  %v16358_v5 = vpop.permute.xlu1 %9625  ;;  %v17476_v28 = vld [vmem:[#allocation115_spill] sm:$0xff] }
 0x589   : > { %12483 = vmatprep.subr.bf16.mxu1 %v13248_v36  ;;  %v9152_v17 = vmul.f32 %v17471_v29, %v17388_v58  ;;  %v9157_v58 = vmul.f32 %v16234_v33, %v17474_v48  ;;  %v9689_v30 = vmul.f32 %v16246_v7, %v17476_v28  ;;  %v9691_v33 = vmul.f32 %v16254_v1, %v17478_v41  ;;  %v17482_v1 = vld [vmem:[#allocation136_spill] sm:$0xff]  ;;  %v17488_v48 = vld [vmem:[#allocation143_spill] sm:$0xff]  ;;  %v17492_v41 = vld [vmem:[#allocation153_spill] sm:$0xff] }
 0x58a   : > { %v9693_v7 = vmul.f32 %v16265_v56, %v17480_v51  ;;  %v17483_v56 = vld [vmem:[#allocation138_spill] sm:$0xff] }
 0x58b   : > { %v9203_v26 = vpack.c.bf16 %v9153_v16, %v9152_v17  ;;  %v16368_v60 = vpop.permute.xlu0 %9630  ;;  %v9752_v0 = vpack.c.bf16 %v9689_v30, %v9688_v35  ;;  %v9694_v20 = vmul.f32 %v16282_v43, %v17483_v56  ;;  %v17484_v16 = vld [vmem:[#allocation137_spill] sm:$0xff]  ;;  %v17490_v35 = vld [vmem:[#allocation150_spill] sm:$0xff] }
 0x58c   : > { %12484 = vmatpush3.bf16.msra.mxu1 %v13248_v36  ;;  %v16366_v46 = vpop.permute.xlu1 %9635  ;;  %v9156_v36 = vmul.f32 %v16236_v25, %v17475_v61  ;;  %v9690_v25 = vmul.f32 %v16256_v6, %v17479_v12  ;;  %v9695_v6 = vmul.f32 %v16280_v45, %v17482_v1  ;;  %v9697_v29 = vmul.f32 %v16298_v8, %v17484_v16  ;;  %v13252_v43 = vld [vmem:[%s16614_s1 + $0x458] sm:$0xff]   ;;  %v17489_v61 = vld [vmem:[#allocation148_spill] sm:$0xff]  ;;  %v17493_v12 = vld [vmem:[#allocation159_spill] sm:$0xff] }
 0x58d   : > { %12517 = vmatprep.subr.bf16.mxu1 %v13249_v31  ;;  %v9699_v8 = vmul.f32 %v16309_v44, %v17486_v40  ;;  %v13254_v44 = vld [vmem:[%s16614_s1 + $0x468] sm:$0xff]   ;;  %v17497_v56 = vld [vmem:[#allocation169_spill] sm:$0xff] }
 0x58e   : > { %v9205_v53 = vpack.c.bf16 %v9157_v58, %v9156_v36  ;;  %v9753_v50 = vpack.c.bf16 %v9691_v33, %v9690_v25  ;;  %v9755_v45 = vpack.c.bf16 %v9695_v6, %v9694_v20  ;;  %v9701_v58 = vmul.f32 %v16323_v34, %v17488_v48  ;;  %v17491_v34 = vld [vmem:[#allocation157_spill] sm:$0xff]  ;;  %v17496_v1 = vld [vmem:[#allocation164_spill] sm:$0xff] }
 0x58f   : > { %12454 = vmatmul.mubr.bf16.gmra.mrb[16].mxu1 %v9199_v4  ;;  %v16380_v62 = vpop.permute.xlu0 %9640  ;;  %v17481_v4 = vld [vmem:[#allocation129_spill] sm:$0xff]  ;;  %v9700_v36 = vmul.f32 %v16325_v59, %v17489_v61  ;;  %v9705_v33 = vmul.f32 %v16350_v3, %v17492_v41  ;;  %v9704_v25 = vmul.f32 %v16352_v24, %v17493_v12  ;;  %v17495_v3 = vld [vmem:[#allocation167_spill] sm:$0xff]  ;;  %v9709_v6 = vmul.f32 %v16366_v46, %v17496_v1  ;;  %v17504_v61 = vld [vmem:[#allocation122_spill] sm:$0xff] }
 0x590   : > { %12457 = vmatprep.mubr.bf16.mxu1 %v9200_v49  ;;  %v16378_v15 = vpop.permute.xlu1 %9645  ;;  %v9692_v57 = vmul.f32 %v16267_v63, %v17481_v4  ;;  %v13255_v59 = vld [vmem:[%s16614_s1 + $0x470] sm:$0xff]   ;;  %v9708_v20 = vmul.f32 %v16368_v60, %v17497_v56  ;;  %v17508_v41 = vld [vmem:[#allocation34_spill] sm:$0xff] }
 0x591   : > { %v17501_v46 = vld [vmem:[#allocation177_spill] sm:$0xff] }
 0x592   : > { %v9754_v18 = vpack.c.bf16 %v9693_v7, %v9692_v57  ;;  %v17494_v57 = vld [vmem:[#allocation162_spill] sm:$0xff]  ;;  %v9762_v16 = vpack.c.bf16 %v9709_v6, %v9708_v20 }
 0x593   : > { %v16392_v39 = vpop.permute.xlu0 %9650 }
 0x594   : > { %v16390_v49 = vpop.permute.xlu1 %9655  ;;  %v9712_v40 = vmul.f32 %v16392_v39, %v17501_v46  ;;  %v17519_v46 = vld [vmem:[#allocation56_spill] sm:$0xff] }
 0x597   : > { %12458 = vmatmul.mubr.bf16.gmra.mrb[20].mxu1 %v9201_v42  ;;  %v16403_v42 = vpop.permute.xlu0 %9660 }
 0x598   : > { %12461 = vmatprep.mubr.bf16.mxu1 %v9202_v38  ;;  %v16401_v63 = vpop.permute.xlu1 %9665  ;;  %v13251_v38 = vld [vmem:[%s16614_s1 + $0x450] sm:$0xff]  }
 0x59b   : > { %v16417_v55 = vpop.permute.xlu0 %9670 }
 0x59c   : > { %v16415_v37 = vpop.permute.xlu1 %9675 }
 0x59f   : > { %12462 = vmatmul.mubr.bf16.gmra.mrb[24].mxu1 %v9203_v26  ;;  %v17487_v26 = vld [vmem:[#allocation146_spill] sm:$0xff]  ;;  %v9681_v52 = vpop.permute.xlu0 %9680 }
 0x5a0   : > { %12465 = vmatprep.mubr.bf16.mxu1 %v9204_v22  ;;  %v13253_v22 = vld [vmem:[%s16614_s1 + $0x460] sm:$0xff]   ;;  %v9686_v30 = vpop.permute.xlu1 %9685 }
 0x5a3   : > { %v10093_v7 = vpop.permute.xlu0 %10092 }
 0x5a4   : > { %v10098_v51 = vpop.permute.xlu1 %10097 }
 0x5a7   : > { %12466 = vmatmul.mubr.bf16.gmra.mrb[28].mxu1 %v9205_v53  ;;  %v9703_v53 = vmul.f32 %v16338_v11, %v17490_v35  ;;  %v13256_v11 = vld [vmem:[%s16614_s1 + $0x478] sm:$0xff]  }
 0x5a8   : > { %12485 = vmatprep.mubr.bf16.mxu1 %v9752_v0  ;;  %v9702_v0 = vmul.f32 %v16340_v47, %v17491_v34  ;;  %v9760_v47 = vpack.c.bf16 %v9705_v33, %v9704_v25  ;;  %v10108_v24 = vpop.permute.xlu1 %10107  ;;  %v17506_v35 = vld [vmem:[#allocation114_spill] sm:$0xff]  ;;  %v17507_v34 = vld [vmem:[#allocation119_spill] sm:$0xff]  ;;  %v17509_v33 = vld [vmem:[#allocation36_spill] sm:$0xff] }
 0x5a9   : > { %v10250_v12 = vmul.f32 %v10093_v7, %v17509_v33  ;;  %v17514_v7 = vld [vmem:[#allocation41_spill] sm:$0xff] }
 0x5aa   : > { %v9759_v4 = vpack.c.bf16 %v9703_v53, %v9702_v0  ;;  %v9719_v53 = vmul.f32 %v9686_v30, %v17506_v35  ;;  %v9718_v0 = vmul.f32 %v9681_v52, %v17507_v34  ;;  %v17525_v35 = vld [vmem:[#allocation66_spill] sm:$0xff]  ;;  %v17527_v33 = vld [vmem:[#allocation53_spill] sm:$0xff] }
 0x5af   : > { %12486 = vmatmul.mubr.bf16.vlgmr.msra.gmra.mrb[0].mxu1 %v9753_v50  ;;  %v9707_v50 = vmul.f32 %v16358_v5, %v17494_v57  ;;  %v17498_v5 = vld [vmem:[#allocation48_spill] sm:$0xff]  ;;  %v17511_v57 = vld [vmem:[#allocation39_spill] sm:$0xff] }
 0x5b0   : > { %12518 = vmatpush3.bf16.msra.mxu1 %v13249_v31  ;;  %12489 = vmatprep.mubr.bf16.mxu1 %v9754_v18  ;;  %v17485_v31 = vld [vmem:[#allocation139_spill] sm:$0xff]  ;;  %v10103_v18 = vpop.permute.xlu0 %10102 }
 0x5b1   : > { %12519 = vmatprep.subr.bf16.mxu1 %v13250_v54  ;;  %v9696_v17 = vmul.f32 %v16300_v21, %v17485_v31  ;;  %v9698_v21 = vmul.f32 %v16311_v10, %v17487_v26  ;;  %v9758_v10 = vpack.c.bf16 %v9701_v58, %v9700_v36  ;;  %v17503_v58 = vld [vmem:[#allocation179_spill] sm:$0xff]  ;;  %v17505_v36 = vld [vmem:[#allocation121_spill] sm:$0xff] }
 0x5b3   : > { %v9756_v2 = vpack.c.bf16 %v9697_v29, %v9696_v17  ;;  %v9757_v28 = vpack.c.bf16 %v9699_v8, %v9698_v21  ;;  %v10118_v29 = vpop.permute.xlu1 %10117  ;;  %v9711_v17 = vmul.f32 %v16378_v15, %v17498_v5  ;;  %v9714_v15 = vmul.f32 %v16403_v42, %v17503_v58  ;;  %v17516_v5 = vld [vmem:[#allocation42_spill] sm:$0xff] }
 0x5b4   : > { %12520 = vmatpush3.bf16.msra.mxu1 %v13250_v54  ;;  %v9706_v54 = vmul.f32 %v16360_v19, %v17495_v3  ;;  %v10113_v31 = vpop.permute.xlu0 %10112  ;;  %v17499_v19 = vld [vmem:[#allocation174_spill] sm:$0xff]  ;;  %v10251_v42 = vmul.f32 %v10098_v51, %v17508_v41 }
 0x5b5   : > { %12521 = vmatprep.subr.bf16.mxu1 %v13251_v38  ;;  %v17512_v3 = vld [vmem:[#allocation38_spill] sm:$0xff] }
 0x5b6   : > { %v10314_v25 = vpack.c.bf16 %v10251_v42, %v10250_v12  ;;  %v10255_v30 = vmul.f32 %v10118_v29, %v17512_v3  ;;  %v17526_v41 = vld [vmem:[#allocation50_spill] sm:$0xff]  ;;  %v17530_v3 = vld [vmem:[#allocation59_spill] sm:$0xff] }
 0x5b7   : > { %12490 = vmatmul.mubr.bf16.gmra.mrb[4].mxu1 %v9755_v45  ;;  %v9710_v45 = vmul.f32 %v16380_v62, %v17499_v19  ;;  %v10128_v8 = vpop.permute.xlu1 %10127  ;;  %v9717_v62 = vmul.f32 %v16415_v37, %v17504_v61  ;;  %v9767_v37 = vpack.c.bf16 %v9719_v53, %v9718_v0  ;;  %v17517_v19 = vld [vmem:[#allocation12_spill] sm:$0xff] }
 0x5b8   : > { %12493 = vmatprep.mubr.bf16.mxu1 %v9756_v2  ;;  %12522 = vmatpush3.bf16.msra.mxu1 %v13251_v38  ;;  %v9761_v38 = vpack.c.bf16 %v9707_v50, %v9706_v54  ;;  %v10123_v26 = vpop.permute.xlu0 %10122  ;;  %v10252_v50 = vmul.f32 %v10103_v18, %v17511_v57  ;;  %v17513_v54 = vld [vmem:[#allocation40_spill] sm:$0xff]  ;;  %v10257_v20 = vmul.f32 %v10128_v8, %v17514_v7 }
 0x5b9   : > { %12523 = vmatprep.subr.bf16.mxu1 %v13252_v43  ;;  %v9763_v60 = vpack.c.bf16 %v9711_v17, %v9710_v45  ;;  %v10254_v52 = vmul.f32 %v10113_v31, %v17513_v54  ;;  %v17518_v31 = vld [vmem:[#allocation13_spill] sm:$0xff] }
 0x5bb   : > { %v10316_v51 = vpack.c.bf16 %v10255_v30, %v10254_v52 }
 0x5bc   : > { %12524 = vmatpush3.bf16.msra.mxu1 %v13252_v43  ;;  %v17500_v43 = vld [vmem:[#allocation110_spill] sm:$0xff]  ;;  %v10133_v39 = vpop.permute.xlu0 %10132 }
 0x5bd   : > { %12525 = vmatprep.subr.bf16.mxu1 %v13253_v22  ;;  %v9713_v2 = vmul.f32 %v16390_v49, %v17500_v43  ;;  %v9716_v49 = vmul.f32 %v16417_v55, %v17505_v36  ;;  %v17522_v36 = vld [vmem:[#allocation67_spill] sm:$0xff] }
 0x5bf   : > { %12494 = vmatmul.mubr.bf16.gmra.mrb[8].mxu1 %v9757_v28  ;;  %v9764_v21 = vpack.c.bf16 %v9713_v2, %v9712_v40  ;;  %v10138_v28 = vpop.permute.xlu1 %10137 }
 0x5c0   : > { %12497 = vmatprep.mubr.bf16.mxu1 %v9758_v10  ;;  %12526 = vmatpush3.bf16.msra.mxu1 %v13253_v22  ;;  %v17502_v22 = vld [vmem:[#allocation123_spill] sm:$0xff]  ;;  %v9766_v10 = vpack.c.bf16 %v9717_v62, %v9716_v49  ;;  %v10259_v17 = vmul.f32 %v10138_v28, %v17516_v5 }
 0x5c1   : > { %12527 = vmatprep.subr.bf16.mxu1 %v13254_v44  ;;  %v9715_v48 = vmul.f32 %v16401_v63, %v17502_v22  ;;  %v17520_v22 = vld [vmem:[#allocation11_spill] sm:$0xff] }
 0x5c2   : > { %v17523_v28 = vld [vmem:[#allocation47_spill] sm:$0xff] }
 0x5c3   : > { %v10148_v63 = vpop.permute.xlu1 %10147  ;;  %v17531_v5 = vld [vmem:[#allocation63_spill] sm:$0xff] }
 0x5c4   : > { %12528 = vmatpush3.bf16.msra.mxu1 %v13254_v44  ;;  %v9765_v44 = vpack.c.bf16 %v9715_v48, %v9714_v15  ;;  %v10261_v2 = vmul.f32 %v10148_v63, %v17518_v31  ;;  %v17521_v48 = vld [vmem:[#allocation55_spill] sm:$0xff] }
 0x5c5   : > { %12529 = vmatprep.subr.bf16.mxu1 %v13255_v59 }
 0x5c7   : > { %12498 = vmatmul.mubr.bf16.gmra.mrb[12].mxu1 %v9759_v4  ;;  %v10158_v4 = vpop.permute.xlu1 %10157 }
 0x5c8   : > { %12501 = vmatprep.mubr.bf16.mxu1 %v9760_v47  ;;  %12530 = vmatpush3.bf16.msra.mxu1 %v13255_v59  ;;  %v10143_v59 = vpop.permute.xlu0 %10142  ;;  %v10263_v8 = vmul.f32 %v10158_v4, %v17520_v22  ;;  %v17529_v4 = vld [vmem:[#allocation57_spill] sm:$0xff] }
 0x5c9   : > { %12531 = vmatprep.subr.bf16.mxu1 %v13256_v11  ;;  %v10260_v40 = vmul.f32 %v10143_v59, %v17519_v46 }
 0x5cb   : > { %v10168_v6 = vpop.permute.xlu1 %10167  ;;  %v10319_v58 = vpack.c.bf16 %v10261_v2, %v10260_v40 }
 0x5cc   : > { %12532 = vmatpush3.bf16.msra.mxu1 %v13256_v11  ;;  %v10153_v55 = vpop.permute.xlu0 %10152  ;;  %v17510_v11 = vld [vmem:[#allocation37_spill] sm:$0xff]  ;;  %v10265_v49 = vmul.f32 %v10168_v6, %v17522_v36 }
 0x5cd   : > { %v10253_v47 = vmul.f32 %v10108_v24, %v17510_v11  ;;  %v10258_v24 = vmul.f32 %v10133_v39, %v17517_v19 }
 0x5cf   : > { %12502 = vmatmul.mubr.bf16.gmra.mrb[16].mxu1 %v9761_v38  ;;  %v10315_v1 = vpack.c.bf16 %v10253_v47, %v10252_v50  ;;  %v17515_v38 = vld [vmem:[#allocation14_spill] sm:$0xff]  ;;  %v10178_v45 = vpop.permute.xlu1 %10177  ;;  %v10318_v29 = vpack.c.bf16 %v10259_v17, %v10258_v24 }
 0x5d0   : > { %12505 = vmatprep.mubr.bf16.mxu1 %v9762_v16  ;;  %v10163_v56 = vpop.permute.xlu0 %10162  ;;  %v10256_v16 = vmul.f32 %v10123_v26, %v17515_v38  ;;  %v10262_v26 = vmul.f32 %v10153_v55, %v17521_v48 }
 0x5d1   : > { %v10264_v39 = vmul.f32 %v10163_v56, %v17523_v28 }
 0x5d2   : > { %v10317_v43 = vpack.c.bf16 %v10257_v20, %v10256_v16  ;;  %v10320_v15 = vpack.c.bf16 %v10263_v8, %v10262_v26 }
 0x5d3   : > { %v10321_v34 = vpack.c.bf16 %v10265_v49, %v10264_v39 }
 0x5d4   : > { %v10173_v18 = vpop.permute.xlu0 %10172 }
 0x5d5   : > { %v10266_v53 = vmul.f32 %v10173_v18, %v17525_v35 }
 0x5d7   : > { %12506 = vmatmul.mubr.bf16.gmra.mrb[20].mxu1 %v9763_v60  ;;  %v10188_v60 = vpop.permute.xlu1 %10187 }
 0x5d8   : > { %12509 = vmatprep.mubr.bf16.mxu1 %v9764_v21  ;;  %v10183_v21 = vpop.permute.xlu0 %10182  ;;  %v10269_v42 = vmul.f32 %v10188_v60, %v17526_v41 }
 0x5d9   : > { %v10268_v12 = vmul.f32 %v10183_v21, %v17527_v33 }
 0x5db   : > { %v10198_v61 = vpop.permute.xlu1 %10197  ;;  %v10323_v57 = vpack.c.bf16 %v10269_v42, %v10268_v12 }
 0x5dc   : > { %v10193_v62 = vpop.permute.xlu0 %10192 }
 0x5dd   : > { %v10270_v55 = vmul.f32 %v10193_v62, %v17529_v4 }
 0x5df   : > { %12510 = vmatmul.mubr.bf16.gmra.mrb[24].mxu1 %v9765_v44  ;;  %v17524_v44 = vld [vmem:[#allocation49_spill] sm:$0xff]  ;;  %v10208_v0 = vpop.permute.xlu1 %10207 }
 0x5e0   : > { %12513 = vmatprep.mubr.bf16.mxu1 %v9766_v10  ;;  %v10267_v10 = vmul.f32 %v10178_v45, %v17524_v44  ;;  %v10203_v63 = vpop.permute.xlu0 %10202  ;;  %v10273_v30 = vmul.f32 %v10208_v0, %v17530_v3 }
 0x5e1   : > { %v10272_v54 = vmul.f32 %v10203_v63, %v17446_v13 }
 0x5e2   : > { %v10322_v59 = vpack.c.bf16 %v10267_v10, %v10266_v53 }
 0x5e3   : > { %v10218_v11 = vpop.permute.xlu1 %10217 }
 0x5e4   : > { %v10213_v47 = vpop.permute.xlu0 %10212  ;;  %v10275_v6 = vmul.f32 %v10218_v11, %v17448_v27 }
 0x5e5   : > { %v10274_v56 = vmul.f32 %v10213_v47, %v17450_v14  ;;  %v17532_v14 = vld [vmem:[#allocation33_spill] sm:$0xff] }
 0x5e7   : > { %12514 = vmatmul.mubr.bf16.gmra.mrb[28].mxu1 %v9767_v37  ;;  %v17528_v37 = vld [vmem:[#allocation54_spill] sm:$0xff]  ;;  %v10228_v52 = vpop.permute.xlu1 %10227  ;;  %v10326_v7 = vpack.c.bf16 %v10275_v6, %v10274_v56 }
 0x5e8   : > { %12533 = vmatprep.mubr.bf16.mxu1 %v10314_v25  ;;  %v10271_v25 = vmul.f32 %v10198_v61, %v17528_v37  ;;  %v10277_v16 = vmul.f32 %v10228_v52, %v15933_v9  ;;  %v16505_v9 = vld [vmem:[#allocation5 + $0x1] ss:$0 sm:$0xff] }
 0x5ea   : > { %v10324_v50 = vpack.c.bf16 %v10271_v25, %v10270_v55 }
 0x5eb   : > { %v10238_v20 = vpop.permute.xlu1 %10237 }
 0x5ec   : > { %v10279_v19 = vmul.f32 %v10238_v20, %v17454_v32 }
 0x5ef   : > { %12534 = vmatmul.mubr.bf16.vlgmr.msra.gmra.mrb[0].mxu1 %v10315_v1  ;;  %v10223_v1 = vpop.permute.xlu0 %10222  ;;  %v10248_v27 = vpop.permute.xlu1 %10247 }
 0x5f0   : > { %12537 = vmatprep.mubr.bf16.mxu1 %v10316_v51  ;;  %v10325_v51 = vpack.c.bf16 %v10273_v30, %v10272_v54  ;;  %v10276_v17 = vmul.f32 %v10223_v1, %v17531_v5 }
 0x5f2   : > { %v10327_v24 = vpack.c.bf16 %v10277_v16, %v10276_v17 }
 0x5f3   : > { %v10233_v38 = vpop.permute.xlu0 %10232 }
 0x5f4   : > { %v10278_v13 = vmul.f32 %v10233_v38, %v17455_v23 }
 0x5f6   : > { %v10328_v45 = vpack.c.bf16 %v10279_v19, %v10278_v13 }
 0x5f7   : > { %12538 = vmatmul.mubr.bf16.gmra.mrb[4].mxu1 %v10317_v43  ;;  %v10243_v18 = vpop.permute.xlu0 %10242  ;;  %v10281_v43 = vmul.f32 %v10248_v27, %v17532_v14 }
 0x5f8   : > { %12541 = vmatprep.mubr.bf16.mxu1 %v10318_v29  ;;  %v17533_v29 = vld [vmem:[#allocation35_spill] sm:$0xff] }
 0x5f9   : > { %v10280_v31 = vmul.f32 %v10243_v18, %v17533_v29 }
 0x5fb   : > { %v10329_v2 = vpack.c.bf16 %v10281_v43, %v10280_v31 }
 0x5ff   : > { %12542 = vmatmul.mubr.bf16.gmra.mrb[8].mxu1 %v10319_v58 }
 0x600   : > { %12545 = vmatprep.mubr.bf16.mxu1 %v10320_v15 }
 0x607   : > { %12546 = vmatmul.mubr.bf16.gmra.mrb[12].mxu1 %v10321_v34 }
 0x608   : > { %12549 = vmatprep.mubr.bf16.mxu1 %v10322_v59 }
 0x60f   : > { %12550 = vmatmul.mubr.bf16.gmra.mrb[16].mxu1 %v10323_v57 }
 0x610   : > { %12553 = vmatprep.mubr.bf16.mxu1 %v10324_v50 }
 0x617   : > { %12554 = vmatmul.mubr.bf16.gmra.mrb[20].mxu1 %v10325_v51 }
 0x618   : > { %12557 = vmatprep.mubr.bf16.mxu1 %v10326_v7 }
 0x61f   : > { %12558 = vmatmul.mubr.bf16.gmra.mrb[24].mxu1 %v10327_v24 }
 0x620   : > { %12561 = vmatprep.mubr.bf16.mxu1 %v10328_v45 }
 0x627   : > { %12562 = vmatmul.mubr.bf16.gmra.mrb[28].mxu1 %v10329_v2 }
 0x6c2   : > { %v12535_v46 = vpop.f32.mrb[0].mxu1 }
 0x6c3   : > { %v10662_v32 = vadd.f32 %v12535_v46, %v16505_v9  ;;  %v10429_v40 = vpop.f32.mrb[1].mxu1 }
 0x6c4   : > { %v10660_v23 = vadd.f32 %v16505_v9, %v10429_v40  ;;  %v12536_v60 = vpop.f32.mrb[2].mxu1 }
 0x6c5   : > { %v10694_v21 = vmax.f32 %v10662_v32, 0.0  ;;  %v10663_v22 = vadd.f32 %v12536_v60, %v16505_v9  ;;  %v10432_v8 = vpop.f32.mrb[3].mxu1 }
 0x6c6   : > { %v10692_v48 = vmax.f32 %v10660_v23, 0.0  ;;  %v10661_v26 = vadd.f32 %v16505_v9, %v10432_v8 }
 0x6c7   : > { %10727 = vst.msk [vmem:[%s16513_s25 + $0x10] sm:$0xff] %vm10724_vm2, %v10694_v21  ;;  %v10695_v58 = vmax.f32 %v10663_v22, 0.0 }
 0x6c8   : > { %10725 = vst.msk [vmem:[%s16513_s25] sm:$0xff] %vm10724_vm2, %v10692_v48  ;;  %v10693_v15 = vmax.f32 %v10661_v26, 0.0 }
 0x6c9   : > { %10728 = vst.msk [vmem:[%s16513_s25 + $0x18] sm:$0xff] %vm10724_vm2, %v10695_v58 }
 0x6ca   : > { %10726 = vst.msk [vmem:[%s16513_s25 + $0x8] sm:$0xff] %vm10724_vm2, %v10693_v15  ;;  %v12539_v61 = vpop.f32.mrb[4].mxu1 }
 0x6cb   : > { %v10666_v62 = vadd.f32 %v12539_v61, %v16505_v9  ;;  %v10445_v36 = vpop.f32.mrb[5].mxu1 }
 0x6cc   : > { %v10664_v49 = vadd.f32 %v16505_v9, %v10445_v36  ;;  %v12540_v28 = vpop.f32.mrb[6].mxu1 }
 0x6cd   : > { %v10698_v39 = vmax.f32 %v10666_v62, 0.0  ;;  %v10667_v44 = vadd.f32 %v12540_v28, %v16505_v9  ;;  %v10448_v10 = vpop.f32.mrb[7].mxu1 }
 0x6ce   : > { %v10696_v35 = vmax.f32 %v10664_v49, 0.0  ;;  %v10665_v53 = vadd.f32 %v16505_v9, %v10448_v10 }
 0x6cf   : > { %10731 = vst.msk [vmem:[%s16513_s25 + $0x30] sm:$0xff] %vm10724_vm2, %v10698_v39  ;;  %v10699_v34 = vmax.f32 %v10667_v44, 0.0 }
 0x6d0   : > { %10729 = vst.msk [vmem:[%s16513_s25 + $0x20] sm:$0xff] %vm10724_vm2, %v10696_v35  ;;  %v10697_v0 = vmax.f32 %v10665_v53, 0.0 }
 0x6d1   : > { %10732 = vst.msk [vmem:[%s16513_s25 + $0x38] sm:$0xff] %vm10724_vm2, %v10699_v34 }
 0x6d2   : > { %10730 = vst.msk [vmem:[%s16513_s25 + $0x28] sm:$0xff] %vm10724_vm2, %v10697_v0  ;;  %v12543_v63 = vpop.f32.mrb[8].mxu1 }
 0x6d3   : > { %v10670_v59 = vadd.f32 %v12543_v63, %v16505_v9  ;;  %v10461_v41 = vpop.f32.mrb[9].mxu1 }
 0x6d4   : > { %v10668_v42 = vadd.f32 %v16505_v9, %v10461_v41  ;;  %v12544_v33 = vpop.f32.mrb[10].mxu1 }
 0x6d5   : > { %v10702_v12 = vmax.f32 %v10670_v59, 0.0  ;;  %v10671_v37 = vadd.f32 %v12544_v33, %v16505_v9  ;;  %v10464_v25 = vpop.f32.mrb[11].mxu1 }
 0x6d6   : > { %v10700_v4 = vmax.f32 %v10668_v42, 0.0  ;;  %v10669_v55 = vadd.f32 %v16505_v9, %v10464_v25 }
 0x6d7   : > { %10735 = vst.msk [vmem:[%s16513_s25 + $0x50] sm:$0xff] %vm10724_vm2, %v10702_v12  ;;  %v10703_v11 = vmax.f32 %v10671_v37, 0.0 }
 0x6d8   : > { %10733 = vst.msk [vmem:[%s16513_s25 + $0x40] sm:$0xff] %vm10724_vm2, %v10700_v4  ;;  %v10701_v47 = vmax.f32 %v10669_v55, 0.0 }
 0x6d9   : > { %10736 = vst.msk [vmem:[%s16513_s25 + $0x58] sm:$0xff] %vm10724_vm2, %v10703_v11 }
 0x6da   : > { %10734 = vst.msk [vmem:[%s16513_s25 + $0x48] sm:$0xff] %vm10724_vm2, %v10701_v47  ;;  %v12547_v57 = vpop.f32.mrb[12].mxu1 }
 0x6db   : > { %v10674_v50 = vadd.f32 %v12547_v57, %v16505_v9  ;;  %v10477_v3 = vpop.f32.mrb[13].mxu1 }
 0x6dc   : > { %v10672_v30 = vadd.f32 %v16505_v9, %v10477_v3  ;;  %v12548_v54 = vpop.f32.mrb[14].mxu1 }
 0x6dd   : > { %v10706_v52 = vmax.f32 %v10674_v50, 0.0  ;;  %v10675_v1 = vadd.f32 %v12548_v54, %v16505_v9  ;;  %v10480_v6 = vpop.f32.mrb[15].mxu1 }
 0x6de   : > { %v10704_v56 = vmax.f32 %v10672_v30, 0.0  ;;  %v10673_v51 = vadd.f32 %v16505_v9, %v10480_v6 }
 0x6df   : > { %10739 = vst.msk [vmem:[%s16513_s25 + $0x70] sm:$0xff] %vm10724_vm2, %v10706_v52  ;;  %v10707_v7 = vmax.f32 %v10675_v1, 0.0 }
 0x6e0   : > { %10737 = vst.msk [vmem:[%s16513_s25 + $0x60] sm:$0xff] %vm10724_vm2, %v10704_v56  ;;  %v10705_v20 = vmax.f32 %v10673_v51, 0.0 }
 0x6e1   : > { %10740 = vst.msk [vmem:[%s16513_s25 + $0x78] sm:$0xff] %vm10724_vm2, %v10707_v7 }
 0x6e2   : > { %10738 = vst.msk [vmem:[%s16513_s25 + $0x68] sm:$0xff] %vm10724_vm2, %v10705_v20  ;;  %v12551_v38 = vpop.f32.mrb[16].mxu1 }
 0x6e3   : > { %v10678_v16 = vadd.f32 %v12551_v38, %v16505_v9  ;;  %v10493_v5 = vpop.f32.mrb[17].mxu1 }
 0x6e4   : > { %v10676_v17 = vadd.f32 %v16505_v9, %v10493_v5  ;;  %v12552_v19 = vpop.f32.mrb[18].mxu1 }
 0x6e5   : > { %v10710_v13 = vmax.f32 %v10678_v16, 0.0  ;;  %v10679_v24 = vadd.f32 %v12552_v19, %v16505_v9  ;;  %v10496_v45 = vpop.f32.mrb[19].mxu1 }
 0x6e6   : > { %v10708_v27 = vmax.f32 %v10676_v17, 0.0  ;;  %v10677_v18 = vadd.f32 %v16505_v9, %v10496_v45 }
 0x6e7   : > { %10743 = vst.msk [vmem:[%s16513_s25 + $0x90] sm:$0xff] %vm10724_vm2, %v10710_v13  ;;  %v10711_v14 = vmax.f32 %v10679_v24, 0.0 }
 0x6e8   : > { %10741 = vst.msk [vmem:[%s16513_s25 + $0x80] sm:$0xff] %vm10724_vm2, %v10708_v27  ;;  %v10709_v43 = vmax.f32 %v10677_v18, 0.0 }
 0x6e9   : > { %10744 = vst.msk [vmem:[%s16513_s25 + $0x98] sm:$0xff] %vm10724_vm2, %v10711_v14 }
 0x6ea   : > { %10742 = vst.msk [vmem:[%s16513_s25 + $0x88] sm:$0xff] %vm10724_vm2, %v10709_v43  ;;  %v12555_v29 = vpop.f32.mrb[20].mxu1 }
 0x6eb   : > { %v10682_v31 = vadd.f32 %v12555_v29, %v16505_v9  ;;  %v10509_v2 = vpop.f32.mrb[21].mxu1 }
 0x6ec   : > { %v10680_v46 = vadd.f32 %v16505_v9, %v10509_v2  ;;  %v12556_v32 = vpop.f32.mrb[22].mxu1 }
 0x6ed   : > { %v10714_v40 = vmax.f32 %v10682_v31, 0.0  ;;  %v10683_v23 = vadd.f32 %v12556_v32, %v16505_v9  ;;  %v10512_v60 = vpop.f32.mrb[23].mxu1 }
 0x6ee   : > { %v10712_v21 = vmax.f32 %v10680_v46, 0.0  ;;  %v10681_v22 = vadd.f32 %v16505_v9, %v10512_v60 }
 0x6ef   : > { %10747 = vst.msk [vmem:[%s16513_s25 + $0xb0] sm:$0xff] %vm10724_vm2, %v10714_v40  ;;  %v10715_v8 = vmax.f32 %v10683_v23, 0.0 }
 0x6f0   : > { %10745 = vst.msk [vmem:[%s16513_s25 + $0xa0] sm:$0xff] %vm10724_vm2, %v10712_v21  ;;  %v10713_v48 = vmax.f32 %v10681_v22, 0.0 }
 0x6f1   : > { %10748 = vst.msk [vmem:[%s16513_s25 + $0xb8] sm:$0xff] %vm10724_vm2, %v10715_v8 }
 0x6f2   : > { %10746 = vst.msk [vmem:[%s16513_s25 + $0xa8] sm:$0xff] %vm10724_vm2, %v10713_v48  ;;  %v12559_v26 = vpop.f32.mrb[24].mxu1 }
 0x6f3   : > { %v10686_v58 = vadd.f32 %v12559_v26, %v16505_v9  ;;  %v10525_v15 = vpop.f32.mrb[25].mxu1 }
 0x6f4   : > { %v10684_v61 = vadd.f32 %v16505_v9, %v10525_v15  ;;  %v12560_v62 = vpop.f32.mrb[26].mxu1 }
 0x6f5   : > { %v10718_v36 = vmax.f32 %v10686_v58, 0.0  ;;  %v10687_v49 = vadd.f32 %v12560_v62, %v16505_v9  ;;  %v10528_v28 = vpop.f32.mrb[27].mxu1 }
 0x6f6   : > { %v10716_v39 = vmax.f32 %v10684_v61, 0.0  ;;  %v10685_v44 = vadd.f32 %v16505_v9, %v10528_v28 }
 0x6f7   : > { %10751 = vst.msk [vmem:[%s16513_s25 + $0xd0] sm:$0xff] %vm10724_vm2, %v10718_v36  ;;  %v10719_v10 = vmax.f32 %v10687_v49, 0.0 }
 0x6f8   : > { %10749 = vst.msk [vmem:[%s16513_s25 + $0xc0] sm:$0xff] %vm10724_vm2, %v10716_v39  ;;  %v10717_v35 = vmax.f32 %v10685_v44, 0.0 }
 0x6f9   : > { %10752 = vst.msk [vmem:[%s16513_s25 + $0xd8] sm:$0xff] %vm10724_vm2, %v10719_v10 }
 0x6fa   : > { %10750 = vst.msk [vmem:[%s16513_s25 + $0xc8] sm:$0xff] %vm10724_vm2, %v10717_v35  ;;  %v12563_v53 = vpop.f32.mrb[28].mxu1 }
 0x6fb   : > { %v10690_v34 = vadd.f32 %v12563_v53, %v16505_v9  ;;  %v10541_v0 = vpop.f32.mrb[29].mxu1 }
 0x6fc   : > { %v10688_v63 = vadd.f32 %v16505_v9, %v10541_v0  ;;  %v12564_v59 = vpop.f32.mrb[30].mxu1 }
 0x6fd   : > { %v10722_v41 = vmax.f32 %v10690_v34, 0.0  ;;  %v10691_v42 = vadd.f32 %v12564_v59, %v16505_v9  ;;  %v10544_v33 = vpop.f32.mrb[31].mxu1 }
 0x6fe   : > { %v10720_v12 = vmax.f32 %v10688_v63, 0.0  ;;  %v10689_v37 = vadd.f32 %v16505_v9, %v10544_v33 }
 0x6ff   : > { %10755 = vst.msk [vmem:[%s16513_s25 + $0xf0] sm:$0xff] %vm10724_vm2, %v10722_v41  ;;  %v10723_v25 = vmax.f32 %v10691_v42, 0.0 }
 0x700   : > { %10753 = vst.msk [vmem:[%s16513_s25 + $0xe0] sm:$0xff] %vm10724_vm2, %v10720_v12  ;;  %v10721_v4 = vmax.f32 %v10689_v37, 0.0 }
 0x701   : > { %10756 = vst.msk [vmem:[%s16513_s25 + $0xf8] sm:$0xff] %vm10724_vm2, %v10723_v25 }
 0x702   : > { %10754 = vst.msk [vmem:[%s16513_s25 + $0xe8] sm:$0xff] %vm10724_vm2, %v10721_v4 }
 0x703 PF: > { %s16_s15 = sadd.s32 1, %s13390_s15  }
 0x704   : > { %p13_p9 = scmp.ge.s32.totalorder %s16_s15, 4  }
 0x706   :  { %15 = sbr.rel (!%p13_p9) target bundleno = 2 (0x2), region = 100 }
 0x70d   :  { %10778 = vsyncpa [#allocation6], 1 }
 0x70e   :  { %10780 = vsyncpa [#allocation6 + $0x1], 1 }
 0x70f   :  { %10781 = vsyncpa [#allocation8], 1 }

</bundles_post_ra>
